<compile_context>
chip_gen: v5e
topology: v5e:2x2
jax: 0.10.0
libtpu: 0.0.40
codegen_flags: <defaults>
</compile_context>

<pallas_src>
import functools

import jax
import jax.numpy as jnp
from jax.experimental import pallas as pl
from jax.experimental.pallas import tpu as pltpu


def _encoder_kernel(x_ref,
                    w1_ref, b1_ref, g1_ref,
                    w2_ref, b2_ref, g2_ref,
                    w3_ref, b3_ref, g3_ref,
                    w4_ref, b4_ref, g4_ref,
                    w5_ref, b5_ref,
                    o_ref,
                    xp_ref, p1_ref, p2_ref, c3_ref, p3_ref, c4_ref, p4_ref,
                    *, B, H, W):
    H2, W2, H4, W4 = H // 2, W // 2, H // 4, W // 4
    f32 = jnp.float32

    def zero_border(pref):
        """Zero only the 1-pixel border of a padded (B, hp, wp, C) buffer."""
        b, hp, wp, c = pref.shape
        row = jnp.zeros((b, 1, wp, c), f32)
        col = jnp.zeros((b, hp, 1, c), f32)
        pref[:, 0:1, :, :] = row
        pref[:, hp - 1:hp, :, :] = row
        pref[:, :, 0:1, :] = col
        pref[:, :, wp - 1:wp, :] = col

    def conv3x3(pref, w_ref, b_ref, h, w, cin, cout, shift_ref=None):
        """3x3 'same' conv from a zero-padded (B, h+2, w+2, cin) VMEM ref as 9
        accumulated shift-and-matmul MXU passes (no im2col buffer).
        Returns relu(conv + bias) [+ BN shift] as a (B*h*w, cout) value."""
        m = B * h * w
        acc = None
        for t in range(9):
            dy, dx = divmod(t, 3)
            win = pref[:, dy:dy + h, dx:dx + w, :].reshape(m, cin)
            d = jnp.dot(win, w_ref[t], preferred_element_type=f32)
            acc = d if acc is None else acc + d
        y = jnp.maximum(acc + b_ref[...], 0.0)
        if shift_ref is not None:
            y = y + shift_ref[...]
        return y

    def pool2x2_into(cref, pref, h, w, c):
        """2x2 / stride-2 max-pool of cref (B, h, w, c), written into the
        interior of the padded ref pref (B, h//2+2, w//2+2, c) in ONE store."""
        h2, w2 = h // 2, w // 2
        cols = jnp.maximum(cref[:, :, pl.ds(0, w2, 2), :],       # even columns
                           cref[:, :, pl.ds(1, w2, 2), :])       # odd  columns
        rows = cols.reshape(B, h2, 2, w2, c)                     # split row pairs
        pooled = jnp.maximum(rows[:, :, 0, :, :], rows[:, :, 1, :, :])
        pref[:, 1:h2 + 1, 1:w2 + 1, :] = pooled

    # Per-step border zeroing (cheap: border slabs only).  A pl.program_id==0
    # guard would be unsafe under v7x megacore ("parallel" splits the grid
    # across TensorCores, each with its own scratch), so borders are re-zeroed
    # every step; interiors are fully rewritten below.
    for ref in (xp_ref, p1_ref, p2_ref, p3_ref, p4_ref):
        zero_border(ref)

    # ---- layer1 / block1: Conv2d(1, 16) + ReLU + BN(16) --------------------
    # Cin == 1: 9 broadcast FMAs on the VPU.  BN scale is folded into w1/b1.
    xp_ref[:, 1:H + 1, 1:W + 1, :] = x_ref[...]
    acc = jnp.zeros((B, H, W, 16), f32)
    for t in range(9):
        dy, dx = divmod(t, 3)
        acc = acc + xp_ref[:, dy:dy + H, dx:dx + W, :] * w1_ref[t:t + 1, :]
    y1 = jnp.maximum(acc + b1_ref[...], 0.0) + g1_ref[...]
    p1_ref[:, 1:H + 1, 1:W + 1, :] = y1

    # ---- layer1 / block2: Conv2d(16, 32) + ReLU + BN(32) -------------------
    y2 = conv3x3(p1_ref, w2_ref, b2_ref, H, W, 16, 32, g2_ref)
    p2_ref[:, 1:H + 1, 1:W + 1, :] = y2.reshape(B, H, W, 32)

    # ---- layer1 / block3: Conv2d(32, 64) + ReLU + BN(64) + MaxPool(2,2) ----
    y3 = conv3x3(p2_ref, w3_ref, b3_ref, H, W, 32, 64, g3_ref)
    c3_ref[...] = y3.reshape(B, H, W, 64)
    pool2x2_into(c3_ref, p3_ref, H, W, 64)

    # ---- layer2 / block4: Conv2d(64, 128) + ReLU + BN(128) + MaxPool(2,2) --
    y4 = conv3x3(p3_ref, w4_ref, b4_ref, H2, W2, 64, 128, g4_ref)
    c4_ref[...] = y4.reshape(B, H2, W2, 128)
    pool2x2_into(c4_ref, p4_ref, H2, W2, 128)

    # ---- layer2 / block5: Conv2d(128, 256) + ReLU (no BN) ------------------
    y5 = conv3x3(p4_ref, w5_ref, b5_ref, H4, W4, 128, 256)       # (B*H4*W4, 256)

    # Channels-last output block: last dim = 256 lanes -> unmasked full-lane
    # stores and no in-kernel transpose.  NCHW permute happens in the wrapper.
    o_ref[...] = y5.reshape(B, H4 * W4, 256)


def encoder_forward(x_nchw, params, block_b=None):
    N, C, H, W = x_nchw.shape
    assert C == 1 and H % 4 == 0 and W % 4 == 0
    H2, W2, H4, W4 = H // 2, W // 2, H // 4, W // 4

    # Batch blocking: biggest block that keeps >= 2 grid steps (v7x megacore).
    if block_b is None:
        block_b = 1
        for cand in (16, 8, 4, 2):
            if N % cand == 0 and N // cand >= 2:
                block_b = cand
                break
    assert N % block_b == 0
    B = block_b

    # NCHW with C==1 -> NHWC is a pure (free) reshape, no transpose needed.
    x = x_nchw.reshape(N, H, W, 1).astype(jnp.float32)

    (w1, b1, g1), (w2, b2, g2), (w3, b3, g3), (w4, b4, g4), (w5, b5) = params
    flat = (w1, b1, g1, w2, b2, g2, w3, b3, g3, w4, b4, g4, w5, b5)

    def const_spec(a):
        # Full-array block, same block every grid step -> DMA'd once.
        z = (0,) * a.ndim
        return pl.BlockSpec(a.shape, lambda n, _z=z: _z)

    kernel = functools.partial(_encoder_kernel, B=B, H=H, W=W)
    out = pl.pallas_call(
        kernel,
        out_shape=jax.ShapeDtypeStruct((N, H4 * W4, 256), jnp.float32),
        grid_spec=pltpu.PrefetchScalarGridSpec(
            num_scalar_prefetch=0,
            grid=(N // B,),
            in_specs=[pl.BlockSpec((B, H, W, 1), lambda n: (n, 0, 0, 0))]
                     + [const_spec(a) for a in flat],
            out_specs=pl.BlockSpec((B, H4 * W4, 256), lambda n: (n, 0, 0)),
            scratch_shapes=[
                pltpu.VMEM((B, H + 2, W + 2, 1), jnp.float32),      # padded input
                pltpu.VMEM((B, H + 2, W + 2, 16), jnp.float32),     # padded act 1
                pltpu.VMEM((B, H + 2, W + 2, 32), jnp.float32),     # padded act 2
                pltpu.VMEM((B, H, W, 64), jnp.float32),             # conv3 out (pre-pool)
                pltpu.VMEM((B, H2 + 2, W2 + 2, 64), jnp.float32),   # padded pooled act 3
                pltpu.VMEM((B, H2, W2, 128), jnp.float32),          # conv4 out (pre-pool)
                pltpu.VMEM((B, H4 + 2, W4 + 2, 128), jnp.float32),  # padded pooled act 4
            ],
        ),
        compiler_params=pltpu.CompilerParams(
            dimension_semantics=("parallel",),      # batch blocks -> v7x megacore
            vmem_limit_bytes=32 * 1024 * 1024,      # fits v5e/v6e/v7x (< 64 MiB)
        ),
    )(x, *flat)

    # (N, H4*W4, 256) channels-last -> NCHW flatten order: this matches
    # PyTorch's `out.view(N, -1)` on the (N, 256, H/4, W/4) tensor exactly.
    return jnp.transpose(out, (0, 2, 1)).reshape(N, -1)


def init_params(key):
    """Deterministic parameter init matching the module's __init__ shapes.

    Conv weights are stored tap-major for shift-and-matmul: (9, Cin, Cout)
    with tap index t = dy*3 + dx (i.e. HWIO (3,3,Cin,Cout) reshaped).
    NOTE: real PyTorch Conv2d weights are (Cout, Cin, 3, 3); port them with
    w.transpose(2, 3, 1, 0).reshape(9, Cin, Cout).
    BatchNorm (eval mode) is folded: scale into the conv weight/bias (valid
    because ReLU(x)*s == ReLU(x*s) for s > 0), shift kept as a separate add."""
    eps = 1e-5

    def conv_block(k, cin, cout, with_bn=True):
        kw, kb = jax.random.split(k)
        bound = 1.0 / float((cin * 9) ** 0.5)                 # PyTorch-style fan-in
        w = jax.random.uniform(kw, (3, 3, cin, cout), jnp.float32, -bound, bound)
        w = w.reshape(9, cin, cout)
        b = jax.random.uniform(kb, (1, cout), jnp.float32, -bound, bound)
        if not with_bn:
            return (w, b)
        gamma = jnp.ones((cout,), jnp.float32)                # PyTorch BN defaults
        beta = jnp.zeros((cout,), jnp.float32)
        running_mean = jnp.zeros((cout,), jnp.float32)
        running_var = jnp.ones((cout,), jnp.float32)
        scale = gamma / jnp.sqrt(running_var + eps)
        shift = beta - running_mean * scale
        assert bool(jnp.all(scale > 0.0)), "BN scale fold requires scale > 0"
        w = w * scale                                          # fold scale into conv
        b = b * scale
        return (w, b, shift.reshape(1, cout))

    keys = jax.random.split(key, 5)
    blk1 = conv_block(keys[0], 1, 16)                  # layer1: conv + ReLU + BN(16)
    blk2 = conv_block(keys[1], 16, 32)                 # layer1: conv + ReLU + BN(32)
    blk3 = conv_block(keys[2], 32, 64)                 # layer1: conv + ReLU + BN(64)
    blk4 = conv_block(keys[3], 64, 128)                # layer2: conv + ReLU + BN(128)
    blk5 = conv_block(keys[4], 128, 256, with_bn=False)  # layer2: conv + ReLU

    # conv1 (Cin=1) uses the tap-major 2-D weight (9, 16) on the VPU path.
    w1, b1, g1 = blk1
    blk1 = (w1.reshape(9, 16), b1, g1)
    return [blk1, blk2, blk3, blk4, blk5]


if __name__ == "__main__":
    key = jax.random.PRNGKey(0)
    k_params, k_x = jax.random.split(key)
    params = init_params(k_params)

    # Input matches Conv2d(1, 16, ...): batch=2, channels=1, spatial=16x16 (NCHW).
    x = jax.random.normal(k_x, (2, 1, 16, 16), jnp.float32)

    fwd = jax.jit(lambda xx: encoder_forward(xx, params))
    out = fwd(x)
    jax.block_until_ready(out)
    assert out.shape == (2, 256 * 4 * 4), out.shape
    assert bool(jnp.all(jnp.isfinite(out)))
    print("KERNEL_OK")
</pallas_src>

<mosaic_0001>
module attributes {stable_mosaic.version = 11 : i64} {
  func.func @_encoder_kernel(%arg0: i32, %arg1: memref<1x16x16x1xf32, #tpu.memory_space<vmem>>, %arg2: memref<9x16xf32, #tpu.memory_space<vmem>>, %arg3: memref<1x16xf32, #tpu.memory_space<vmem>>, %arg4: memref<1x16xf32, #tpu.memory_space<vmem>>, %arg5: memref<9x16x32xf32, #tpu.memory_space<vmem>>, %arg6: memref<1x32xf32, #tpu.memory_space<vmem>>, %arg7: memref<1x32xf32, #tpu.memory_space<vmem>>, %arg8: memref<9x32x64xf32, #tpu.memory_space<vmem>>, %arg9: memref<1x64xf32, #tpu.memory_space<vmem>>, %arg10: memref<1x64xf32, #tpu.memory_space<vmem>>, %arg11: memref<9x64x128xf32, #tpu.memory_space<vmem>>, %arg12: memref<1x128xf32, #tpu.memory_space<vmem>>, %arg13: memref<1x128xf32, #tpu.memory_space<vmem>>, %arg14: memref<9x128x256xf32, #tpu.memory_space<vmem>>, %arg15: memref<1x256xf32, #tpu.memory_space<vmem>>, %arg16: memref<1x16x256xf32, #tpu.memory_space<vmem>>, %arg17: memref<1x18x18x1xf32, #tpu.memory_space<vmem>>, %arg18: memref<1x18x18x16xf32, #tpu.memory_space<vmem>>, %arg19: memref<1x18x18x32xf32, #tpu.memory_space<vmem>>, %arg20: memref<1x16x16x64xf32, #tpu.memory_space<vmem>>, %arg21: memref<1x10x10x64xf32, #tpu.memory_space<vmem>>, %arg22: memref<1x8x8x128xf32, #tpu.memory_space<vmem>>, %arg23: memref<1x6x6x128xf32, #tpu.memory_space<vmem>>) attributes {dimension_semantics = [#tpu.dimension_semantics<parallel>], iteration_bounds = array<i64: 2>, scalar_prefetch = 0 : i64, scratch_operands = 7 : i64, tpu.core_type = #tpu.core_type<tc>, window_params = [{transform_indices = @transform_0, window_bounds = array<i64: 1, 16, 16, 1>}, {pipeline_mode = #tpu.pipeline_mode<synchronous>, transform_indices = @transform_1, window_bounds = array<i64: 9, 16>}, {pipeline_mode = #tpu.pipeline_mode<synchronous>, transform_indices = @transform_2, window_bounds = array<i64: 1, 16>}, {pipeline_mode = #tpu.pipeline_mode<synchronous>, transform_indices = @transform_3, window_bounds = array<i64: 1, 16>}, {pipeline_mode = #tpu.pipeline_mode<synchronous>, transform_indices = @transform_4, window_bounds = array<i64: 9, 16, 32>}, {pipeline_mode = #tpu.pipeline_mode<synchronous>, transform_indices = @transform_5, window_bounds = array<i64: 1, 32>}, {pipeline_mode = #tpu.pipeline_mode<synchronous>, transform_indices = @transform_6, window_bounds = array<i64: 1, 32>}, {pipeline_mode = #tpu.pipeline_mode<synchronous>, transform_indices = @transform_7, window_bounds = array<i64: 9, 32, 64>}, {pipeline_mode = #tpu.pipeline_mode<synchronous>, transform_indices = @transform_8, window_bounds = array<i64: 1, 64>}, {pipeline_mode = #tpu.pipeline_mode<synchronous>, transform_indices = @transform_9, window_bounds = array<i64: 1, 64>}, {pipeline_mode = #tpu.pipeline_mode<synchronous>, transform_indices = @transform_10, window_bounds = array<i64: 9, 64, 128>}, {pipeline_mode = #tpu.pipeline_mode<synchronous>, transform_indices = @transform_11, window_bounds = array<i64: 1, 128>}, {pipeline_mode = #tpu.pipeline_mode<synchronous>, transform_indices = @transform_12, window_bounds = array<i64: 1, 128>}, {pipeline_mode = #tpu.pipeline_mode<synchronous>, transform_indices = @transform_13, window_bounds = array<i64: 9, 128, 256>}, {pipeline_mode = #tpu.pipeline_mode<synchronous>, transform_indices = @transform_14, window_bounds = array<i64: 1, 256>}, {transform_indices = @transform_15, window_bounds = array<i64: 1, 16, 256>}]} {
    %cst = arith.constant 0.000000e+00 : f32
    %0 = vector.broadcast %cst : f32 to vector<1x1x18x1xf32>
    %cst_0 = arith.constant 0.000000e+00 : f32
    %1 = vector.broadcast %cst_0 : f32 to vector<1x18x1x1xf32>
    %c0 = arith.constant 0 : index
    %c0_1 = arith.constant 0 : index
    %c0_2 = arith.constant 0 : index
    %c0_3 = arith.constant 0 : index
    %2 = vector.load %arg17[%c0, %c0_1, %c0_2, %c0_3] : memref<1x18x18x1xf32, #tpu.memory_space<vmem>>, vector<1x1x18x1xf32>
    tpu.vector_store %arg17[%c0, %c0_1, %c0_2, %c0_3], %0 {strides = array<i32>} : memref<1x18x18x1xf32, #tpu.memory_space<vmem>>, vector<1x1x18x1xf32>,
    %c0_4 = arith.constant 0 : index
    %c17 = arith.constant 17 : index
    %c0_5 = arith.constant 0 : index
    %c0_6 = arith.constant 0 : index
    %3 = vector.load %arg17[%c0_4, %c17, %c0_5, %c0_6] : memref<1x18x18x1xf32, #tpu.memory_space<vmem>>, vector<1x1x18x1xf32>
    tpu.vector_store %arg17[%c0_4, %c17, %c0_5, %c0_6], %0 {strides = array<i32>} : memref<1x18x18x1xf32, #tpu.memory_space<vmem>>, vector<1x1x18x1xf32>,
    %c0_7 = arith.constant 0 : index
    %c0_8 = arith.constant 0 : index
    %c0_9 = arith.constant 0 : index
    %c0_10 = arith.constant 0 : index
    %4 = vector.load %arg17[%c0_7, %c0_8, %c0_9, %c0_10] : memref<1x18x18x1xf32, #tpu.memory_space<vmem>>, vector<1x18x1x1xf32>
    tpu.vector_store %arg17[%c0_7, %c0_8, %c0_9, %c0_10], %1 {strides = array<i32>} : memref<1x18x18x1xf32, #tpu.memory_space<vmem>>, vector<1x18x1x1xf32>,
    %c0_11 = arith.constant 0 : index
    %c0_12 = arith.constant 0 : index
    %c17_13 = arith.constant 17 : index
    %c0_14 = arith.constant 0 : index
    %5 = vector.load %arg17[%c0_11, %c0_12, %c17_13, %c0_14] : memref<1x18x18x1xf32, #tpu.memory_space<vmem>>, vector<1x18x1x1xf32>
    tpu.vector_store %arg17[%c0_11, %c0_12, %c17_13, %c0_14], %1 {strides = array<i32>} : memref<1x18x18x1xf32, #tpu.memory_space<vmem>>, vector<1x18x1x1xf32>,
    %cst_15 = arith.constant 0.000000e+00 : f32
    %6 = vector.broadcast %cst_15 : f32 to vector<1x1x18x16xf32>
    %cst_16 = arith.constant 0.000000e+00 : f32
    %7 = vector.broadcast %cst_16 : f32 to vector<1x18x1x16xf32>
    %c0_17 = arith.constant 0 : index
    %c0_18 = arith.constant 0 : index
    %c0_19 = arith.constant 0 : index
    %c0_20 = arith.constant 0 : index
    %8 = vector.load %arg18[%c0_17, %c0_18, %c0_19, %c0_20] : memref<1x18x18x16xf32, #tpu.memory_space<vmem>>, vector<1x1x18x16xf32>
    tpu.vector_store %arg18[%c0_17, %c0_18, %c0_19, %c0_20], %6 {strides = array<i32>} : memref<1x18x18x16xf32, #tpu.memory_space<vmem>>, vector<1x1x18x16xf32>,
    %c0_21 = arith.constant 0 : index
    %c17_22 = arith.constant 17 : index
    %c0_23 = arith.constant 0 : index
    %c0_24 = arith.constant 0 : index
    %9 = vector.load %arg18[%c0_21, %c17_22, %c0_23, %c0_24] : memref<1x18x18x16xf32, #tpu.memory_space<vmem>>, vector<1x1x18x16xf32>
    tpu.vector_store %arg18[%c0_21, %c17_22, %c0_23, %c0_24], %6 {strides = array<i32>} : memref<1x18x18x16xf32, #tpu.memory_space<vmem>>, vector<1x1x18x16xf32>,
    %c0_25 = arith.constant 0 : index
    %c0_26 = arith.constant 0 : index
    %c0_27 = arith.constant 0 : index
    %c0_28 = arith.constant 0 : index
    %10 = vector.load %arg18[%c0_25, %c0_26, %c0_27, %c0_28] : memref<1x18x18x16xf32, #tpu.memory_space<vmem>>, vector<1x18x1x16xf32>
    tpu.vector_store %arg18[%c0_25, %c0_26, %c0_27, %c0_28], %7 {strides = array<i32>} : memref<1x18x18x16xf32, #tpu.memory_space<vmem>>, vector<1x18x1x16xf32>,
    %c0_29 = arith.constant 0 : index
    %c0_30 = arith.constant 0 : index
    %c17_31 = arith.constant 17 : index
    %c0_32 = arith.constant 0 : index
    %11 = vector.load %arg18[%c0_29, %c0_30, %c17_31, %c0_32] : memref<1x18x18x16xf32, #tpu.memory_space<vmem>>, vector<1x18x1x16xf32>
    tpu.vector_store %arg18[%c0_29, %c0_30, %c17_31, %c0_32], %7 {strides = array<i32>} : memref<1x18x18x16xf32, #tpu.memory_space<vmem>>, vector<1x18x1x16xf32>,
    %cst_33 = arith.constant 0.000000e+00 : f32
    %12 = vector.broadcast %cst_33 : f32 to vector<1x1x18x32xf32>
    %cst_34 = arith.constant 0.000000e+00 : f32
    %13 = vector.broadcast %cst_34 : f32 to vector<1x18x1x32xf32>
    %c0_35 = arith.constant 0 : index
    %c0_36 = arith.constant 0 : index
    %c0_37 = arith.constant 0 : index
    %c0_38 = arith.constant 0 : index
    %14 = vector.load %arg19[%c0_35, %c0_36, %c0_37, %c0_38] : memref<1x18x18x32xf32, #tpu.memory_space<vmem>>, vector<1x1x18x32xf32>
    tpu.vector_store %arg19[%c0_35, %c0_36, %c0_37, %c0_38], %12 {strides = array<i32>} : memref<1x18x18x32xf32, #tpu.memory_space<vmem>>, vector<1x1x18x32xf32>,
    %c0_39 = arith.constant 0 : index
    %c17_40 = arith.constant 17 : index
    %c0_41 = arith.constant 0 : index
    %c0_42 = arith.constant 0 : index
    %15 = vector.load %arg19[%c0_39, %c17_40, %c0_41, %c0_42] : memref<1x18x18x32xf32, #tpu.memory_space<vmem>>, vector<1x1x18x32xf32>
    tpu.vector_store %arg19[%c0_39, %c17_40, %c0_41, %c0_42], %12 {strides = array<i32>} : memref<1x18x18x32xf32, #tpu.memory_space<vmem>>, vector<1x1x18x32xf32>,
    %c0_43 = arith.constant 0 : index
    %c0_44 = arith.constant 0 : index
    %c0_45 = arith.constant 0 : index
    %c0_46 = arith.constant 0 : index
    %16 = vector.load %arg19[%c0_43, %c0_44, %c0_45, %c0_46] : memref<1x18x18x32xf32, #tpu.memory_space<vmem>>, vector<1x18x1x32xf32>
    tpu.vector_store %arg19[%c0_43, %c0_44, %c0_45, %c0_46], %13 {strides = array<i32>} : memref<1x18x18x32xf32, #tpu.memory_space<vmem>>, vector<1x18x1x32xf32>,
    %c0_47 = arith.constant 0 : index
    %c0_48 = arith.constant 0 : index
    %c17_49 = arith.constant 17 : index
    %c0_50 = arith.constant 0 : index
    %17 = vector.load %arg19[%c0_47, %c0_48, %c17_49, %c0_50] : memref<1x18x18x32xf32, #tpu.memory_space<vmem>>, vector<1x18x1x32xf32>
    tpu.vector_store %arg19[%c0_47, %c0_48, %c17_49, %c0_50], %13 {strides = array<i32>} : memref<1x18x18x32xf32, #tpu.memory_space<vmem>>, vector<1x18x1x32xf32>,
    %cst_51 = arith.constant 0.000000e+00 : f32
    %18 = vector.broadcast %cst_51 : f32 to vector<1x1x10x64xf32>
    %cst_52 = arith.constant 0.000000e+00 : f32
    %19 = vector.broadcast %cst_52 : f32 to vector<1x10x1x64xf32>
    %c0_53 = arith.constant 0 : index
    %c0_54 = arith.constant 0 : index
    %c0_55 = arith.constant 0 : index
    %c0_56 = arith.constant 0 : index
    %20 = vector.load %arg21[%c0_53, %c0_54, %c0_55, %c0_56] : memref<1x10x10x64xf32, #tpu.memory_space<vmem>>, vector<1x1x10x64xf32>
    tpu.vector_store %arg21[%c0_53, %c0_54, %c0_55, %c0_56], %18 {strides = array<i32>} : memref<1x10x10x64xf32, #tpu.memory_space<vmem>>, vector<1x1x10x64xf32>,
    %c0_57 = arith.constant 0 : index
    %c9 = arith.constant 9 : index
    %c0_58 = arith.constant 0 : index
    %c0_59 = arith.constant 0 : index
    %21 = vector.load %arg21[%c0_57, %c9, %c0_58, %c0_59] : memref<1x10x10x64xf32, #tpu.memory_space<vmem>>, vector<1x1x10x64xf32>
    tpu.vector_store %arg21[%c0_57, %c9, %c0_58, %c0_59], %18 {strides = array<i32>} : memref<1x10x10x64xf32, #tpu.memory_space<vmem>>, vector<1x1x10x64xf32>,
    %c0_60 = arith.constant 0 : index
    %c0_61 = arith.constant 0 : index
    %c0_62 = arith.constant 0 : index
    %c0_63 = arith.constant 0 : index
    %22 = vector.load %arg21[%c0_60, %c0_61, %c0_62, %c0_63] : memref<1x10x10x64xf32, #tpu.memory_space<vmem>>, vector<1x10x1x64xf32>
    tpu.vector_store %arg21[%c0_60, %c0_61, %c0_62, %c0_63], %19 {strides = array<i32>} : memref<1x10x10x64xf32, #tpu.memory_space<vmem>>, vector<1x10x1x64xf32>,
    %c0_64 = arith.constant 0 : index
    %c0_65 = arith.constant 0 : index
    %c9_66 = arith.constant 9 : index
    %c0_67 = arith.constant 0 : index
    %23 = vector.load %arg21[%c0_64, %c0_65, %c9_66, %c0_67] : memref<1x10x10x64xf32, #tpu.memory_space<vmem>>, vector<1x10x1x64xf32>
    tpu.vector_store %arg21[%c0_64, %c0_65, %c9_66, %c0_67], %19 {strides = array<i32>} : memref<1x10x10x64xf32, #tpu.memory_space<vmem>>, vector<1x10x1x64xf32>,
    %cst_68 = arith.constant 0.000000e+00 : f32
    %24 = vector.broadcast %cst_68 : f32 to vector<1x1x6x128xf32>
    %cst_69 = arith.constant 0.000000e+00 : f32
    %25 = vector.broadcast %cst_69 : f32 to vector<1x6x1x128xf32>
    %c0_70 = arith.constant 0 : index
    %c0_71 = arith.constant 0 : index
    %c0_72 = arith.constant 0 : index
    %c0_73 = arith.constant 0 : index
    %26 = vector.load %arg23[%c0_70, %c0_71, %c0_72, %c0_73] : memref<1x6x6x128xf32, #tpu.memory_space<vmem>>, vector<1x1x6x128xf32>
    tpu.vector_store %arg23[%c0_70, %c0_71, %c0_72, %c0_73], %24 {strides = array<i32>} : memref<1x6x6x128xf32, #tpu.memory_space<vmem>>, vector<1x1x6x128xf32>,
    %c0_74 = arith.constant 0 : index
    %c5 = arith.constant 5 : index
    %c0_75 = arith.constant 0 : index
    %c0_76 = arith.constant 0 : index
    %27 = vector.load %arg23[%c0_74, %c5, %c0_75, %c0_76] : memref<1x6x6x128xf32, #tpu.memory_space<vmem>>, vector<1x1x6x128xf32>
    tpu.vector_store %arg23[%c0_74, %c5, %c0_75, %c0_76], %24 {strides = array<i32>} : memref<1x6x6x128xf32, #tpu.memory_space<vmem>>, vector<1x1x6x128xf32>,
    %c0_77 = arith.constant 0 : index
    %c0_78 = arith.constant 0 : index
    %c0_79 = arith.constant 0 : index
    %c0_80 = arith.constant 0 : index
    %28 = vector.load %arg23[%c0_77, %c0_78, %c0_79, %c0_80] : memref<1x6x6x128xf32, #tpu.memory_space<vmem>>, vector<1x6x1x128xf32>
    tpu.vector_store %arg23[%c0_77, %c0_78, %c0_79, %c0_80], %25 {strides = array<i32>} : memref<1x6x6x128xf32, #tpu.memory_space<vmem>>, vector<1x6x1x128xf32>,
    %c0_81 = arith.constant 0 : index
    %c0_82 = arith.constant 0 : index
    %c5_83 = arith.constant 5 : index
    %c0_84 = arith.constant 0 : index
    %29 = vector.load %arg23[%c0_81, %c0_82, %c5_83, %c0_84] : memref<1x6x6x128xf32, #tpu.memory_space<vmem>>, vector<1x6x1x128xf32>
    tpu.vector_store %arg23[%c0_81, %c0_82, %c5_83, %c0_84], %25 {strides = array<i32>} : memref<1x6x6x128xf32, #tpu.memory_space<vmem>>, vector<1x6x1x128xf32>,
    %c0_85 = arith.constant 0 : index
    %c0_86 = arith.constant 0 : index
    %c0_87 = arith.constant 0 : index
    %c0_88 = arith.constant 0 : index
    %30 = vector.load %arg1[%c0_85, %c0_86, %c0_87, %c0_88] : memref<1x16x16x1xf32, #tpu.memory_space<vmem>>, vector<1x16x16x1xf32>
    %c0_89 = arith.constant 0 : index
    %c1 = arith.constant 1 : index
    %c1_90 = arith.constant 1 : index
    %c0_91 = arith.constant 0 : index
    %31 = vector.load %arg17[%c0_89, %c1, %c1_90, %c0_91] : memref<1x18x18x1xf32, #tpu.memory_space<vmem>>, vector<1x16x16x1xf32>
    tpu.vector_store %arg17[%c0_89, %c1, %c1_90, %c0_91], %30 {strides = array<i32>} : memref<1x18x18x1xf32, #tpu.memory_space<vmem>>, vector<1x16x16x1xf32>,
    %cst_92 = arith.constant 0.000000e+00 : f32
    %32 = vector.broadcast %cst_92 : f32 to vector<1x16x16x16xf32>
    %c0_93 = arith.constant 0 : index
    %c0_94 = arith.constant 0 : index
    %c0_95 = arith.constant 0 : index
    %c0_96 = arith.constant 0 : index
    %33 = vector.load %arg17[%c0_93, %c0_94, %c0_95, %c0_96] : memref<1x18x18x1xf32, #tpu.memory_space<vmem>>, vector<1x16x16x1xf32>
    %c0_97 = arith.constant 0 : index
    %c0_98 = arith.constant 0 : index
    %34 = vector.load %arg2[%c0_97, %c0_98] : memref<9x16xf32, #tpu.memory_space<vmem>>, vector<1x16xf32>
    %35 = vector.shape_cast %34 : vector<1x16xf32> to vector<1x1x1x16xf32>
    %36 = vector.broadcast %33 : vector<1x16x16x1xf32> to vector<1x16x16x16xf32>
    %37 = vector.broadcast %35 : vector<1x1x1x16xf32> to vector<1x16x16x16xf32>
    %38 = arith.mulf %36, %37 : vector<1x16x16x16xf32>
    %39 = arith.addf %32, %38 : vector<1x16x16x16xf32>
    %c0_99 = arith.constant 0 : index
    %c0_100 = arith.constant 0 : index
    %c1_101 = arith.constant 1 : index
    %c0_102 = arith.constant 0 : index
    %40 = vector.load %arg17[%c0_99, %c0_100, %c1_101, %c0_102] : memref<1x18x18x1xf32, #tpu.memory_space<vmem>>, vector<1x16x16x1xf32>
    %c1_103 = arith.constant 1 : index
    %c0_104 = arith.constant 0 : index
    %41 = vector.load %arg2[%c1_103, %c0_104] : memref<9x16xf32, #tpu.memory_space<vmem>>, vector<1x16xf32>
    %42 = vector.shape_cast %41 : vector<1x16xf32> to vector<1x1x1x16xf32>
    %43 = vector.broadcast %40 : vector<1x16x16x1xf32> to vector<1x16x16x16xf32>
    %44 = vector.broadcast %42 : vector<1x1x1x16xf32> to vector<1x16x16x16xf32>
    %45 = arith.mulf %43, %44 : vector<1x16x16x16xf32>
    %46 = arith.addf %39, %45 : vector<1x16x16x16xf32>
    %c0_105 = arith.constant 0 : index
    %c0_106 = arith.constant 0 : index
    %c2 = arith.constant 2 : index
    %c0_107 = arith.constant 0 : index
    %47 = vector.load %arg17[%c0_105, %c0_106, %c2, %c0_107] : memref<1x18x18x1xf32, #tpu.memory_space<vmem>>, vector<1x16x16x1xf32>
    %c2_108 = arith.constant 2 : index
    %c0_109 = arith.constant 0 : index
    %48 = vector.load %arg2[%c2_108, %c0_109] : memref<9x16xf32, #tpu.memory_space<vmem>>, vector<1x16xf32>
    %49 = vector.shape_cast %48 : vector<1x16xf32> to vector<1x1x1x16xf32>
    %50 = vector.broadcast %47 : vector<1x16x16x1xf32> to vector<1x16x16x16xf32>
    %51 = vector.broadcast %49 : vector<1x1x1x16xf32> to vector<1x16x16x16xf32>
    %52 = arith.mulf %50, %51 : vector<1x16x16x16xf32>
    %53 = arith.addf %46, %52 : vector<1x16x16x16xf32>
    %c0_110 = arith.constant 0 : index
    %c1_111 = arith.constant 1 : index
    %c0_112 = arith.constant 0 : index
    %c0_113 = arith.constant 0 : index
    %54 = vector.load %arg17[%c0_110, %c1_111, %c0_112, %c0_113] : memref<1x18x18x1xf32, #tpu.memory_space<vmem>>, vector<1x16x16x1xf32>
    %c3 = arith.constant 3 : index
    %c0_114 = arith.constant 0 : index
    %55 = vector.load %arg2[%c3, %c0_114] : memref<9x16xf32, #tpu.memory_space<vmem>>, vector<1x16xf32>
    %56 = vector.shape_cast %55 : vector<1x16xf32> to vector<1x1x1x16xf32>
    %57 = vector.broadcast %54 : vector<1x16x16x1xf32> to vector<1x16x16x16xf32>
    %58 = vector.broadcast %56 : vector<1x1x1x16xf32> to vector<1x16x16x16xf32>
    %59 = arith.mulf %57, %58 : vector<1x16x16x16xf32>
    %60 = arith.addf %53, %59 : vector<1x16x16x16xf32>
    %c0_115 = arith.constant 0 : index
    %c1_116 = arith.constant 1 : index
    %c1_117 = arith.constant 1 : index
    %c0_118 = arith.constant 0 : index
    %61 = vector.load %arg17[%c0_115, %c1_116, %c1_117, %c0_118] : memref<1x18x18x1xf32, #tpu.memory_space<vmem>>, vector<1x16x16x1xf32>
    %c4 = arith.constant 4 : index
    %c0_119 = arith.constant 0 : index
    %62 = vector.load %arg2[%c4, %c0_119] : memref<9x16xf32, #tpu.memory_space<vmem>>, vector<1x16xf32>
    %63 = vector.shape_cast %62 : vector<1x16xf32> to vector<1x1x1x16xf32>
    %64 = vector.broadcast %61 : vector<1x16x16x1xf32> to vector<1x16x16x16xf32>
    %65 = vector.broadcast %63 : vector<1x1x1x16xf32> to vector<1x16x16x16xf32>
    %66 = arith.mulf %64, %65 : vector<1x16x16x16xf32>
    %67 = arith.addf %60, %66 : vector<1x16x16x16xf32>
    %c0_120 = arith.constant 0 : index
    %c1_121 = arith.constant 1 : index
    %c2_122 = arith.constant 2 : index
    %c0_123 = arith.constant 0 : index
    %68 = vector.load %arg17[%c0_120, %c1_121, %c2_122, %c0_123] : memref<1x18x18x1xf32, #tpu.memory_space<vmem>>, vector<1x16x16x1xf32>
    %c5_124 = arith.constant 5 : index
    %c0_125 = arith.constant 0 : index
    %69 = vector.load %arg2[%c5_124, %c0_125] : memref<9x16xf32, #tpu.memory_space<vmem>>, vector<1x16xf32>
    %70 = vector.shape_cast %69 : vector<1x16xf32> to vector<1x1x1x16xf32>
    %71 = vector.broadcast %68 : vector<1x16x16x1xf32> to vector<1x16x16x16xf32>
    %72 = vector.broadcast %70 : vector<1x1x1x16xf32> to vector<1x16x16x16xf32>
    %73 = arith.mulf %71, %72 : vector<1x16x16x16xf32>
    %74 = arith.addf %67, %73 : vector<1x16x16x16xf32>
    %c0_126 = arith.constant 0 : index
    %c2_127 = arith.constant 2 : index
    %c0_128 = arith.constant 0 : index
    %c0_129 = arith.constant 0 : index
    %75 = vector.load %arg17[%c0_126, %c2_127, %c0_128, %c0_129] : memref<1x18x18x1xf32, #tpu.memory_space<vmem>>, vector<1x16x16x1xf32>
    %c6 = arith.constant 6 : index
    %c0_130 = arith.constant 0 : index
    %76 = vector.load %arg2[%c6, %c0_130] : memref<9x16xf32, #tpu.memory_space<vmem>>, vector<1x16xf32>
    %77 = vector.shape_cast %76 : vector<1x16xf32> to vector<1x1x1x16xf32>
    %78 = vector.broadcast %75 : vector<1x16x16x1xf32> to vector<1x16x16x16xf32>
    %79 = vector.broadcast %77 : vector<1x1x1x16xf32> to vector<1x16x16x16xf32>
    %80 = arith.mulf %78, %79 : vector<1x16x16x16xf32>
    %81 = arith.addf %74, %80 : vector<1x16x16x16xf32>
    %c0_131 = arith.constant 0 : index
    %c2_132 = arith.constant 2 : index
    %c1_133 = arith.constant 1 : index
    %c0_134 = arith.constant 0 : index
    %82 = vector.load %arg17[%c0_131, %c2_132, %c1_133, %c0_134] : memref<1x18x18x1xf32, #tpu.memory_space<vmem>>, vector<1x16x16x1xf32>
    %c7 = arith.constant 7 : index
    %c0_135 = arith.constant 0 : index
    %83 = vector.load %arg2[%c7, %c0_135] : memref<9x16xf32, #tpu.memory_space<vmem>>, vector<1x16xf32>
    %84 = vector.shape_cast %83 : vector<1x16xf32> to vector<1x1x1x16xf32>
    %85 = vector.broadcast %82 : vector<1x16x16x1xf32> to vector<1x16x16x16xf32>
    %86 = vector.broadcast %84 : vector<1x1x1x16xf32> to vector<1x16x16x16xf32>
    %87 = arith.mulf %85, %86 : vector<1x16x16x16xf32>
    %88 = arith.addf %81, %87 : vector<1x16x16x16xf32>
    %c0_136 = arith.constant 0 : index
    %c2_137 = arith.constant 2 : index
    %c2_138 = arith.constant 2 : index
    %c0_139 = arith.constant 0 : index
    %89 = vector.load %arg17[%c0_136, %c2_137, %c2_138, %c0_139] : memref<1x18x18x1xf32, #tpu.memory_space<vmem>>, vector<1x16x16x1xf32>
    %c8 = arith.constant 8 : index
    %c0_140 = arith.constant 0 : index
    %90 = vector.load %arg2[%c8, %c0_140] : memref<9x16xf32, #tpu.memory_space<vmem>>, vector<1x16xf32>
    %91 = vector.shape_cast %90 : vector<1x16xf32> to vector<1x1x1x16xf32>
    %92 = vector.broadcast %89 : vector<1x16x16x1xf32> to vector<1x16x16x16xf32>
    %93 = vector.broadcast %91 : vector<1x1x1x16xf32> to vector<1x16x16x16xf32>
    %94 = arith.mulf %92, %93 : vector<1x16x16x16xf32>
    %95 = arith.addf %88, %94 : vector<1x16x16x16xf32>
    %c0_141 = arith.constant 0 : index
    %c0_142 = arith.constant 0 : index
    %96 = vector.load %arg3[%c0_141, %c0_142] : memref<1x16xf32, #tpu.memory_space<vmem>>, vector<1x16xf32>
    %97 = vector.shape_cast %96 : vector<1x16xf32> to vector<1x1x1x16xf32>
    %98 = vector.broadcast %97 : vector<1x1x1x16xf32> to vector<1x16x16x16xf32>
    %99 = arith.addf %95, %98 : vector<1x16x16x16xf32>
    %cst_143 = arith.constant 0.000000e+00 : f32
    %100 = vector.broadcast %cst_143 : f32 to vector<1x16x16x16xf32>
    %101 = arith.maximumf %99, %100 : vector<1x16x16x16xf32>
    %c0_144 = arith.constant 0 : index
    %c0_145 = arith.constant 0 : index
    %102 = vector.load %arg4[%c0_144, %c0_145] : memref<1x16xf32, #tpu.memory_space<vmem>>, vector<1x16xf32>
    %103 = vector.shape_cast %102 : vector<1x16xf32> to vector<1x1x1x16xf32>
    %104 = vector.broadcast %103 : vector<1x1x1x16xf32> to vector<1x16x16x16xf32>
    %105 = arith.addf %101, %104 : vector<1x16x16x16xf32>
    %c0_146 = arith.constant 0 : index
    %c1_147 = arith.constant 1 : index
    %c1_148 = arith.constant 1 : index
    %c0_149 = arith.constant 0 : index
    %106 = vector.load %arg18[%c0_146, %c1_147, %c1_148, %c0_149] : memref<1x18x18x16xf32, #tpu.memory_space<vmem>>, vector<1x16x16x16xf32>
    tpu.vector_store %arg18[%c0_146, %c1_147, %c1_148, %c0_149], %105 {strides = array<i32>} : memref<1x18x18x16xf32, #tpu.memory_space<vmem>>, vector<1x16x16x16xf32>,
    %c0_150 = arith.constant 0 : index
    %c0_151 = arith.constant 0 : index
    %c0_152 = arith.constant 0 : index
    %c0_153 = arith.constant 0 : index
    %107 = vector.load %arg18[%c0_150, %c0_151, %c0_152, %c0_153] : memref<1x18x18x16xf32, #tpu.memory_space<vmem>>, vector<1x16x16x16xf32>
    %108 = vector.shape_cast %107 : vector<1x16x16x16xf32> to vector<256x16xf32>
    %c0_154 = arith.constant 0 : index
    %c0_155 = arith.constant 0 : index
    %c0_156 = arith.constant 0 : index
    %109 = vector.load %arg5[%c0_154, %c0_155, %c0_156] : memref<9x16x32xf32, #tpu.memory_space<vmem>>, vector<1x16x32xf32>
    %110 = vector.shape_cast %109 : vector<1x16x32xf32> to vector<16x32xf32>
    %cst_157 = arith.constant dense<0.000000e+00> : vector<256x32xf32>
    %111 = tpu.matmul %108, %110, %cst_157 {dimension_numbers = #tpu.dot_dimension_numbers<[1], [0], [0], [1], [0, 0, 1, 1], [], []>} : vector<256x16xf32>, vector<16x32xf32>, vector<256x32xf32> -> vector<256x32xf32>
    %c0_158 = arith.constant 0 : index
    %c0_159 = arith.constant 0 : index
    %c1_160 = arith.constant 1 : index
    %c0_161 = arith.constant 0 : index
    %112 = vector.load %arg18[%c0_158, %c0_159, %c1_160, %c0_161] : memref<1x18x18x16xf32, #tpu.memory_space<vmem>>, vector<1x16x16x16xf32>
    %113 = vector.shape_cast %112 : vector<1x16x16x16xf32> to vector<256x16xf32>
    %c1_162 = arith.constant 1 : index
    %c0_163 = arith.constant 0 : index
    %c0_164 = arith.constant 0 : index
    %114 = vector.load %arg5[%c1_162, %c0_163, %c0_164] : memref<9x16x32xf32, #tpu.memory_space<vmem>>, vector<1x16x32xf32>
    %115 = vector.shape_cast %114 : vector<1x16x32xf32> to vector<16x32xf32>
    %cst_165 = arith.constant dense<0.000000e+00> : vector<256x32xf32>
    %116 = tpu.matmul %113, %115, %cst_165 {dimension_numbers = #tpu.dot_dimension_numbers<[1], [0], [0], [1], [0, 0, 1, 1], [], []>} : vector<256x16xf32>, vector<16x32xf32>, vector<256x32xf32> -> vector<256x32xf32>
    %117 = arith.addf %111, %116 : vector<256x32xf32>
    %c0_166 = arith.constant 0 : index
    %c0_167 = arith.constant 0 : index
    %c2_168 = arith.constant 2 : index
    %c0_169 = arith.constant 0 : index
    %118 = vector.load %arg18[%c0_166, %c0_167, %c2_168, %c0_169] : memref<1x18x18x16xf32, #tpu.memory_space<vmem>>, vector<1x16x16x16xf32>
    %119 = vector.shape_cast %118 : vector<1x16x16x16xf32> to vector<256x16xf32>
    %c2_170 = arith.constant 2 : index
    %c0_171 = arith.constant 0 : index
    %c0_172 = arith.constant 0 : index
    %120 = vector.load %arg5[%c2_170, %c0_171, %c0_172] : memref<9x16x32xf32, #tpu.memory_space<vmem>>, vector<1x16x32xf32>
    %121 = vector.shape_cast %120 : vector<1x16x32xf32> to vector<16x32xf32>
    %cst_173 = arith.constant dense<0.000000e+00> : vector<256x32xf32>
    %122 = tpu.matmul %119, %121, %cst_173 {dimension_numbers = #tpu.dot_dimension_numbers<[1], [0], [0], [1], [0, 0, 1, 1], [], []>} : vector<256x16xf32>, vector<16x32xf32>, vector<256x32xf32> -> vector<256x32xf32>
    %123 = arith.addf %117, %122 : vector<256x32xf32>
    %c0_174 = arith.constant 0 : index
    %c1_175 = arith.constant 1 : index
    %c0_176 = arith.constant 0 : index
    %c0_177 = arith.constant 0 : index
    %124 = vector.load %arg18[%c0_174, %c1_175, %c0_176, %c0_177] : memref<1x18x18x16xf32, #tpu.memory_space<vmem>>, vector<1x16x16x16xf32>
    %125 = vector.shape_cast %124 : vector<1x16x16x16xf32> to vector<256x16xf32>
    %c3_178 = arith.constant 3 : index
    %c0_179 = arith.constant 0 : index
    %c0_180 = arith.constant 0 : index
    %126 = vector.load %arg5[%c3_178, %c0_179, %c0_180] : memref<9x16x32xf32, #tpu.memory_space<vmem>>, vector<1x16x32xf32>
    %127 = vector.shape_cast %126 : vector<1x16x32xf32> to vector<16x32xf32>
    %cst_181 = arith.constant dense<0.000000e+00> : vector<256x32xf32>
    %128 = tpu.matmul %125, %127, %cst_181 {dimension_numbers = #tpu.dot_dimension_numbers<[1], [0], [0], [1], [0, 0, 1, 1], [], []>} : vector<256x16xf32>, vector<16x32xf32>, vector<256x32xf32> -> vector<256x32xf32>
    %129 = arith.addf %123, %128 : vector<256x32xf32>
    %c0_182 = arith.constant 0 : index
    %c1_183 = arith.constant 1 : index
    %c1_184 = arith.constant 1 : index
    %c0_185 = arith.constant 0 : index
    %130 = vector.load %arg18[%c0_182, %c1_183, %c1_184, %c0_185] : memref<1x18x18x16xf32, #tpu.memory_space<vmem>>, vector<1x16x16x16xf32>
    %131 = vector.shape_cast %130 : vector<1x16x16x16xf32> to vector<256x16xf32>
    %c4_186 = arith.constant 4 : index
    %c0_187 = arith.constant 0 : index
    %c0_188 = arith.constant 0 : index
    %132 = vector.load %arg5[%c4_186, %c0_187, %c0_188] : memref<9x16x32xf32, #tpu.memory_space<vmem>>, vector<1x16x32xf32>
    %133 = vector.shape_cast %132 : vector<1x16x32xf32> to vector<16x32xf32>
    %cst_189 = arith.constant dense<0.000000e+00> : vector<256x32xf32>
    %134 = tpu.matmul %131, %133, %cst_189 {dimension_numbers = #tpu.dot_dimension_numbers<[1], [0], [0], [1], [0, 0, 1, 1], [], []>} : vector<256x16xf32>, vector<16x32xf32>, vector<256x32xf32> -> vector<256x32xf32>
    %135 = arith.addf %129, %134 : vector<256x32xf32>
    %c0_190 = arith.constant 0 : index
    %c1_191 = arith.constant 1 : index
    %c2_192 = arith.constant 2 : index
    %c0_193 = arith.constant 0 : index
    %136 = vector.load %arg18[%c0_190, %c1_191, %c2_192, %c0_193] : memref<1x18x18x16xf32, #tpu.memory_space<vmem>>, vector<1x16x16x16xf32>
    %137 = vector.shape_cast %136 : vector<1x16x16x16xf32> to vector<256x16xf32>
    %c5_194 = arith.constant 5 : index
    %c0_195 = arith.constant 0 : index
    %c0_196 = arith.constant 0 : index
    %138 = vector.load %arg5[%c5_194, %c0_195, %c0_196] : memref<9x16x32xf32, #tpu.memory_space<vmem>>, vector<1x16x32xf32>
    %139 = vector.shape_cast %138 : vector<1x16x32xf32> to vector<16x32xf32>
    %cst_197 = arith.constant dense<0.000000e+00> : vector<256x32xf32>
    %140 = tpu.matmul %137, %139, %cst_197 {dimension_numbers = #tpu.dot_dimension_numbers<[1], [0], [0], [1], [0, 0, 1, 1], [], []>} : vector<256x16xf32>, vector<16x32xf32>, vector<256x32xf32> -> vector<256x32xf32>
    %141 = arith.addf %135, %140 : vector<256x32xf32>
    %c0_198 = arith.constant 0 : index
    %c2_199 = arith.constant 2 : index
    %c0_200 = arith.constant 0 : index
    %c0_201 = arith.constant 0 : index
    %142 = vector.load %arg18[%c0_198, %c2_199, %c0_200, %c0_201] : memref<1x18x18x16xf32, #tpu.memory_space<vmem>>, vector<1x16x16x16xf32>
    %143 = vector.shape_cast %142 : vector<1x16x16x16xf32> to vector<256x16xf32>
    %c6_202 = arith.constant 6 : index
    %c0_203 = arith.constant 0 : index
    %c0_204 = arith.constant 0 : index
    %144 = vector.load %arg5[%c6_202, %c0_203, %c0_204] : memref<9x16x32xf32, #tpu.memory_space<vmem>>, vector<1x16x32xf32>
    %145 = vector.shape_cast %144 : vector<1x16x32xf32> to vector<16x32xf32>
    %cst_205 = arith.constant dense<0.000000e+00> : vector<256x32xf32>
    %146 = tpu.matmul %143, %145, %cst_205 {dimension_numbers = #tpu.dot_dimension_numbers<[1], [0], [0], [1], [0, 0, 1, 1], [], []>} : vector<256x16xf32>, vector<16x32xf32>, vector<256x32xf32> -> vector<256x32xf32>
    %147 = arith.addf %141, %146 : vector<256x32xf32>
    %c0_206 = arith.constant 0 : index
    %c2_207 = arith.constant 2 : index
    %c1_208 = arith.constant 1 : index
    %c0_209 = arith.constant 0 : index
    %148 = vector.load %arg18[%c0_206, %c2_207, %c1_208, %c0_209] : memref<1x18x18x16xf32, #tpu.memory_space<vmem>>, vector<1x16x16x16xf32>
    %149 = vector.shape_cast %148 : vector<1x16x16x16xf32> to vector<256x16xf32>
    %c7_210 = arith.constant 7 : index
    %c0_211 = arith.constant 0 : index
    %c0_212 = arith.constant 0 : index
    %150 = vector.load %arg5[%c7_210, %c0_211, %c0_212] : memref<9x16x32xf32, #tpu.memory_space<vmem>>, vector<1x16x32xf32>
    %151 = vector.shape_cast %150 : vector<1x16x32xf32> to vector<16x32xf32>
    %cst_213 = arith.constant dense<0.000000e+00> : vector<256x32xf32>
    %152 = tpu.matmul %149, %151, %cst_213 {dimension_numbers = #tpu.dot_dimension_numbers<[1], [0], [0], [1], [0, 0, 1, 1], [], []>} : vector<256x16xf32>, vector<16x32xf32>, vector<256x32xf32> -> vector<256x32xf32>
    %153 = arith.addf %147, %152 : vector<256x32xf32>
    %c0_214 = arith.constant 0 : index
    %c2_215 = arith.constant 2 : index
    %c2_216 = arith.constant 2 : index
    %c0_217 = arith.constant 0 : index
    %154 = vector.load %arg18[%c0_214, %c2_215, %c2_216, %c0_217] : memref<1x18x18x16xf32, #tpu.memory_space<vmem>>, vector<1x16x16x16xf32>
    %155 = vector.shape_cast %154 : vector<1x16x16x16xf32> to vector<256x16xf32>
    %c8_218 = arith.constant 8 : index
    %c0_219 = arith.constant 0 : index
    %c0_220 = arith.constant 0 : index
    %156 = vector.load %arg5[%c8_218, %c0_219, %c0_220] : memref<9x16x32xf32, #tpu.memory_space<vmem>>, vector<1x16x32xf32>
    %157 = vector.shape_cast %156 : vector<1x16x32xf32> to vector<16x32xf32>
    %cst_221 = arith.constant dense<0.000000e+00> : vector<256x32xf32>
    %158 = tpu.matmul %155, %157, %cst_221 {dimension_numbers = #tpu.dot_dimension_numbers<[1], [0], [0], [1], [0, 0, 1, 1], [], []>} : vector<256x16xf32>, vector<16x32xf32>, vector<256x32xf32> -> vector<256x32xf32>
    %159 = arith.addf %153, %158 : vector<256x32xf32>
    %c0_222 = arith.constant 0 : index
    %c0_223 = arith.constant 0 : index
    %160 = vector.load %arg6[%c0_222, %c0_223] : memref<1x32xf32, #tpu.memory_space<vmem>>, vector<1x32xf32>
    %161 = vector.broadcast %160 : vector<1x32xf32> to vector<256x32xf32>
    %162 = arith.addf %159, %161 : vector<256x32xf32>
    %cst_224 = arith.constant 0.000000e+00 : f32
    %163 = vector.broadcast %cst_224 : f32 to vector<256x32xf32>
    %164 = arith.maximumf %162, %163 : vector<256x32xf32>
    %c0_225 = arith.constant 0 : index
    %c0_226 = arith.constant 0 : index
    %165 = vector.load %arg7[%c0_225, %c0_226] : memref<1x32xf32, #tpu.memory_space<vmem>>, vector<1x32xf32>
    %166 = vector.broadcast %165 : vector<1x32xf32> to vector<256x32xf32>
    %167 = arith.addf %164, %166 : vector<256x32xf32>
    %168 = vector.shape_cast %167 : vector<256x32xf32> to vector<1x16x16x32xf32>
    %c0_227 = arith.constant 0 : index
    %c1_228 = arith.constant 1 : index
    %c1_229 = arith.constant 1 : index
    %c0_230 = arith.constant 0 : index
    %169 = vector.load %arg19[%c0_227, %c1_228, %c1_229, %c0_230] : memref<1x18x18x32xf32, #tpu.memory_space<vmem>>, vector<1x16x16x32xf32>
    tpu.vector_store %arg19[%c0_227, %c1_228, %c1_229, %c0_230], %168 {strides = array<i32>} : memref<1x18x18x32xf32, #tpu.memory_space<vmem>>, vector<1x16x16x32xf32>,
    %c0_231 = arith.constant 0 : index
    %c0_232 = arith.constant 0 : index
    %c0_233 = arith.constant 0 : index
    %c0_234 = arith.constant 0 : index
    %170 = vector.load %arg19[%c0_231, %c0_232, %c0_233, %c0_234] : memref<1x18x18x32xf32, #tpu.memory_space<vmem>>, vector<1x16x16x32xf32>
    %171 = vector.shape_cast %170 : vector<1x16x16x32xf32> to vector<256x32xf32>
    %c0_235 = arith.constant 0 : index
    %c0_236 = arith.constant 0 : index
    %c0_237 = arith.constant 0 : index
    %172 = vector.load %arg8[%c0_235, %c0_236, %c0_237] : memref<9x32x64xf32, #tpu.memory_space<vmem>>, vector<1x32x64xf32>
    %173 = vector.shape_cast %172 : vector<1x32x64xf32> to vector<32x64xf32>
    %cst_238 = arith.constant dense<0.000000e+00> : vector<256x64xf32>
    %174 = tpu.matmul %171, %173, %cst_238 {dimension_numbers = #tpu.dot_dimension_numbers<[1], [0], [0], [1], [0, 0, 1, 1], [], []>} : vector<256x32xf32>, vector<32x64xf32>, vector<256x64xf32> -> vector<256x64xf32>
    %c0_239 = arith.constant 0 : index
    %c0_240 = arith.constant 0 : index
    %c1_241 = arith.constant 1 : index
    %c0_242 = arith.constant 0 : index
    %175 = vector.load %arg19[%c0_239, %c0_240, %c1_241, %c0_242] : memref<1x18x18x32xf32, #tpu.memory_space<vmem>>, vector<1x16x16x32xf32>
    %176 = vector.shape_cast %175 : vector<1x16x16x32xf32> to vector<256x32xf32>
    %c1_243 = arith.constant 1 : index
    %c0_244 = arith.constant 0 : index
    %c0_245 = arith.constant 0 : index
    %177 = vector.load %arg8[%c1_243, %c0_244, %c0_245] : memref<9x32x64xf32, #tpu.memory_space<vmem>>, vector<1x32x64xf32>
    %178 = vector.shape_cast %177 : vector<1x32x64xf32> to vector<32x64xf32>
    %cst_246 = arith.constant dense<0.000000e+00> : vector<256x64xf32>
    %179 = tpu.matmul %176, %178, %cst_246 {dimension_numbers = #tpu.dot_dimension_numbers<[1], [0], [0], [1], [0, 0, 1, 1], [], []>} : vector<256x32xf32>, vector<32x64xf32>, vector<256x64xf32> -> vector<256x64xf32>
    %180 = arith.addf %174, %179 : vector<256x64xf32>
    %c0_247 = arith.constant 0 : index
    %c0_248 = arith.constant 0 : index
    %c2_249 = arith.constant 2 : index
    %c0_250 = arith.constant 0 : index
    %181 = vector.load %arg19[%c0_247, %c0_248, %c2_249, %c0_250] : memref<1x18x18x32xf32, #tpu.memory_space<vmem>>, vector<1x16x16x32xf32>
    %182 = vector.shape_cast %181 : vector<1x16x16x32xf32> to vector<256x32xf32>
    %c2_251 = arith.constant 2 : index
    %c0_252 = arith.constant 0 : index
    %c0_253 = arith.constant 0 : index
    %183 = vector.load %arg8[%c2_251, %c0_252, %c0_253] : memref<9x32x64xf32, #tpu.memory_space<vmem>>, vector<1x32x64xf32>
    %184 = vector.shape_cast %183 : vector<1x32x64xf32> to vector<32x64xf32>
    %cst_254 = arith.constant dense<0.000000e+00> : vector<256x64xf32>
    %185 = tpu.matmul %182, %184, %cst_254 {dimension_numbers = #tpu.dot_dimension_numbers<[1], [0], [0], [1], [0, 0, 1, 1], [], []>} : vector<256x32xf32>, vector<32x64xf32>, vector<256x64xf32> -> vector<256x64xf32>
    %186 = arith.addf %180, %185 : vector<256x64xf32>
    %c0_255 = arith.constant 0 : index
    %c1_256 = arith.constant 1 : index
    %c0_257 = arith.constant 0 : index
    %c0_258 = arith.constant 0 : index
    %187 = vector.load %arg19[%c0_255, %c1_256, %c0_257, %c0_258] : memref<1x18x18x32xf32, #tpu.memory_space<vmem>>, vector<1x16x16x32xf32>
    %188 = vector.shape_cast %187 : vector<1x16x16x32xf32> to vector<256x32xf32>
    %c3_259 = arith.constant 3 : index
    %c0_260 = arith.constant 0 : index
    %c0_261 = arith.constant 0 : index
    %189 = vector.load %arg8[%c3_259, %c0_260, %c0_261] : memref<9x32x64xf32, #tpu.memory_space<vmem>>, vector<1x32x64xf32>
    %190 = vector.shape_cast %189 : vector<1x32x64xf32> to vector<32x64xf32>
    %cst_262 = arith.constant dense<0.000000e+00> : vector<256x64xf32>
    %191 = tpu.matmul %188, %190, %cst_262 {dimension_numbers = #tpu.dot_dimension_numbers<[1], [0], [0], [1], [0, 0, 1, 1], [], []>} : vector<256x32xf32>, vector<32x64xf32>, vector<256x64xf32> -> vector<256x64xf32>
    %192 = arith.addf %186, %191 : vector<256x64xf32>
    %c0_263 = arith.constant 0 : index
    %c1_264 = arith.constant 1 : index
    %c1_265 = arith.constant 1 : index
    %c0_266 = arith.constant 0 : index
    %193 = vector.load %arg19[%c0_263, %c1_264, %c1_265, %c0_266] : memref<1x18x18x32xf32, #tpu.memory_space<vmem>>, vector<1x16x16x32xf32>
    %194 = vector.shape_cast %193 : vector<1x16x16x32xf32> to vector<256x32xf32>
    %c4_267 = arith.constant 4 : index
    %c0_268 = arith.constant 0 : index
    %c0_269 = arith.constant 0 : index
    %195 = vector.load %arg8[%c4_267, %c0_268, %c0_269] : memref<9x32x64xf32, #tpu.memory_space<vmem>>, vector<1x32x64xf32>
    %196 = vector.shape_cast %195 : vector<1x32x64xf32> to vector<32x64xf32>
    %cst_270 = arith.constant dense<0.000000e+00> : vector<256x64xf32>
    %197 = tpu.matmul %194, %196, %cst_270 {dimension_numbers = #tpu.dot_dimension_numbers<[1], [0], [0], [1], [0, 0, 1, 1], [], []>} : vector<256x32xf32>, vector<32x64xf32>, vector<256x64xf32> -> vector<256x64xf32>
    %198 = arith.addf %192, %197 : vector<256x64xf32>
    %c0_271 = arith.constant 0 : index
    %c1_272 = arith.constant 1 : index
    %c2_273 = arith.constant 2 : index
    %c0_274 = arith.constant 0 : index
    %199 = vector.load %arg19[%c0_271, %c1_272, %c2_273, %c0_274] : memref<1x18x18x32xf32, #tpu.memory_space<vmem>>, vector<1x16x16x32xf32>
    %200 = vector.shape_cast %199 : vector<1x16x16x32xf32> to vector<256x32xf32>
    %c5_275 = arith.constant 5 : index
    %c0_276 = arith.constant 0 : index
    %c0_277 = arith.constant 0 : index
    %201 = vector.load %arg8[%c5_275, %c0_276, %c0_277] : memref<9x32x64xf32, #tpu.memory_space<vmem>>, vector<1x32x64xf32>
    %202 = vector.shape_cast %201 : vector<1x32x64xf32> to vector<32x64xf32>
    %cst_278 = arith.constant dense<0.000000e+00> : vector<256x64xf32>
    %203 = tpu.matmul %200, %202, %cst_278 {dimension_numbers = #tpu.dot_dimension_numbers<[1], [0], [0], [1], [0, 0, 1, 1], [], []>} : vector<256x32xf32>, vector<32x64xf32>, vector<256x64xf32> -> vector<256x64xf32>
    %204 = arith.addf %198, %203 : vector<256x64xf32>
    %c0_279 = arith.constant 0 : index
    %c2_280 = arith.constant 2 : index
    %c0_281 = arith.constant 0 : index
    %c0_282 = arith.constant 0 : index
    %205 = vector.load %arg19[%c0_279, %c2_280, %c0_281, %c0_282] : memref<1x18x18x32xf32, #tpu.memory_space<vmem>>, vector<1x16x16x32xf32>
    %206 = vector.shape_cast %205 : vector<1x16x16x32xf32> to vector<256x32xf32>
    %c6_283 = arith.constant 6 : index
    %c0_284 = arith.constant 0 : index
    %c0_285 = arith.constant 0 : index
    %207 = vector.load %arg8[%c6_283, %c0_284, %c0_285] : memref<9x32x64xf32, #tpu.memory_space<vmem>>, vector<1x32x64xf32>
    %208 = vector.shape_cast %207 : vector<1x32x64xf32> to vector<32x64xf32>
    %cst_286 = arith.constant dense<0.000000e+00> : vector<256x64xf32>
    %209 = tpu.matmul %206, %208, %cst_286 {dimension_numbers = #tpu.dot_dimension_numbers<[1], [0], [0], [1], [0, 0, 1, 1], [], []>} : vector<256x32xf32>, vector<32x64xf32>, vector<256x64xf32> -> vector<256x64xf32>
    %210 = arith.addf %204, %209 : vector<256x64xf32>
    %c0_287 = arith.constant 0 : index
    %c2_288 = arith.constant 2 : index
    %c1_289 = arith.constant 1 : index
    %c0_290 = arith.constant 0 : index
    %211 = vector.load %arg19[%c0_287, %c2_288, %c1_289, %c0_290] : memref<1x18x18x32xf32, #tpu.memory_space<vmem>>, vector<1x16x16x32xf32>
    %212 = vector.shape_cast %211 : vector<1x16x16x32xf32> to vector<256x32xf32>
    %c7_291 = arith.constant 7 : index
    %c0_292 = arith.constant 0 : index
    %c0_293 = arith.constant 0 : index
    %213 = vector.load %arg8[%c7_291, %c0_292, %c0_293] : memref<9x32x64xf32, #tpu.memory_space<vmem>>, vector<1x32x64xf32>
    %214 = vector.shape_cast %213 : vector<1x32x64xf32> to vector<32x64xf32>
    %cst_294 = arith.constant dense<0.000000e+00> : vector<256x64xf32>
    %215 = tpu.matmul %212, %214, %cst_294 {dimension_numbers = #tpu.dot_dimension_numbers<[1], [0], [0], [1], [0, 0, 1, 1], [], []>} : vector<256x32xf32>, vector<32x64xf32>, vector<256x64xf32> -> vector<256x64xf32>
    %216 = arith.addf %210, %215 : vector<256x64xf32>
    %c0_295 = arith.constant 0 : index
    %c2_296 = arith.constant 2 : index
    %c2_297 = arith.constant 2 : index
    %c0_298 = arith.constant 0 : index
    %217 = vector.load %arg19[%c0_295, %c2_296, %c2_297, %c0_298] : memref<1x18x18x32xf32, #tpu.memory_space<vmem>>, vector<1x16x16x32xf32>
    %218 = vector.shape_cast %217 : vector<1x16x16x32xf32> to vector<256x32xf32>
    %c8_299 = arith.constant 8 : index
    %c0_300 = arith.constant 0 : index
    %c0_301 = arith.constant 0 : index
    %219 = vector.load %arg8[%c8_299, %c0_300, %c0_301] : memref<9x32x64xf32, #tpu.memory_space<vmem>>, vector<1x32x64xf32>
    %220 = vector.shape_cast %219 : vector<1x32x64xf32> to vector<32x64xf32>
    %cst_302 = arith.constant dense<0.000000e+00> : vector<256x64xf32>
    %221 = tpu.matmul %218, %220, %cst_302 {dimension_numbers = #tpu.dot_dimension_numbers<[1], [0], [0], [1], [0, 0, 1, 1], [], []>} : vector<256x32xf32>, vector<32x64xf32>, vector<256x64xf32> -> vector<256x64xf32>
    %222 = arith.addf %216, %221 : vector<256x64xf32>
    %c0_303 = arith.constant 0 : index
    %c0_304 = arith.constant 0 : index
    %223 = vector.load %arg9[%c0_303, %c0_304] : memref<1x64xf32, #tpu.memory_space<vmem>>, vector<1x64xf32>
    %224 = vector.broadcast %223 : vector<1x64xf32> to vector<256x64xf32>
    %225 = arith.addf %222, %224 : vector<256x64xf32>
    %cst_305 = arith.constant 0.000000e+00 : f32
    %226 = vector.broadcast %cst_305 : f32 to vector<256x64xf32>
    %227 = arith.maximumf %225, %226 : vector<256x64xf32>
    %c0_306 = arith.constant 0 : index
    %c0_307 = arith.constant 0 : index
    %228 = vector.load %arg10[%c0_306, %c0_307] : memref<1x64xf32, #tpu.memory_space<vmem>>, vector<1x64xf32>
    %229 = vector.broadcast %228 : vector<1x64xf32> to vector<256x64xf32>
    %230 = arith.addf %227, %229 : vector<256x64xf32>
    %231 = vector.shape_cast %230 : vector<256x64xf32> to vector<1x16x16x64xf32>
    %c0_308 = arith.constant 0 : index
    %c0_309 = arith.constant 0 : index
    %c0_310 = arith.constant 0 : index
    %c0_311 = arith.constant 0 : index
    %232 = vector.load %arg20[%c0_308, %c0_309, %c0_310, %c0_311] : memref<1x16x16x64xf32, #tpu.memory_space<vmem>>, vector<1x16x16x64xf32>
    tpu.vector_store %arg20[%c0_308, %c0_309, %c0_310, %c0_311], %231 {strides = array<i32>} : memref<1x16x16x64xf32, #tpu.memory_space<vmem>>, vector<1x16x16x64xf32>,
    %c0_312 = arith.constant 0 : index
    %c0_313 = arith.constant 0 : index
    %c0_314 = arith.constant 0 : index
    %c0_315 = arith.constant 0 : index
    %233 = tpu.strided_load %arg20[%c0_312, %c0_313, %c0_314, %c0_315] {strides = array<i32: 1, 1, 2, 1>} : memref<1x16x16x64xf32, #tpu.memory_space<vmem>>, vector<1x16x8x64xf32>
    %c0_316 = arith.constant 0 : index
    %c0_317 = arith.constant 0 : index
    %c1_318 = arith.constant 1 : index
    %c0_319 = arith.constant 0 : index
    %234 = tpu.strided_load %arg20[%c0_316, %c0_317, %c1_318, %c0_319] {strides = array<i32: 1, 1, 2, 1>} : memref<1x16x16x64xf32, #tpu.memory_space<vmem>>, vector<1x16x8x64xf32>
    %235 = arith.maximumf %233, %234 : vector<1x16x8x64xf32>
    %236 = vector.shape_cast %235 : vector<1x16x8x64xf32> to vector<1x8x2x8x64xf32>
    %237 = vector.extract_strided_slice %236 {offsets = [0, 0, 0, 0, 0], sizes = [1, 8, 1, 8, 64], strides = [1, 1, 1, 1, 1]} : vector<1x8x2x8x64xf32> to vector<1x8x1x8x64xf32>
    %238 = vector.shape_cast %237 : vector<1x8x1x8x64xf32> to vector<1x8x8x64xf32>
    %239 = vector.extract_strided_slice %236 {offsets = [0, 0, 1, 0, 0], sizes = [1, 8, 1, 8, 64], strides = [1, 1, 1, 1, 1]} : vector<1x8x2x8x64xf32> to vector<1x8x1x8x64xf32>
    %240 = vector.shape_cast %239 : vector<1x8x1x8x64xf32> to vector<1x8x8x64xf32>
    %241 = arith.maximumf %238, %240 : vector<1x8x8x64xf32>
    %c0_320 = arith.constant 0 : index
    %c1_321 = arith.constant 1 : index
    %c1_322 = arith.constant 1 : index
    %c0_323 = arith.constant 0 : index
    %242 = vector.load %arg21[%c0_320, %c1_321, %c1_322, %c0_323] : memref<1x10x10x64xf32, #tpu.memory_space<vmem>>, vector<1x8x8x64xf32>
    tpu.vector_store %arg21[%c0_320, %c1_321, %c1_322, %c0_323], %241 {strides = array<i32>} : memref<1x10x10x64xf32, #tpu.memory_space<vmem>>, vector<1x8x8x64xf32>,
    %c0_324 = arith.constant 0 : index
    %c0_325 = arith.constant 0 : index
    %c0_326 = arith.constant 0 : index
    %c0_327 = arith.constant 0 : index
    %243 = vector.load %arg21[%c0_324, %c0_325, %c0_326, %c0_327] : memref<1x10x10x64xf32, #tpu.memory_space<vmem>>, vector<1x8x8x64xf32>
    %244 = vector.shape_cast %243 : vector<1x8x8x64xf32> to vector<64x64xf32>
    %c0_328 = arith.constant 0 : index
    %c0_329 = arith.constant 0 : index
    %c0_330 = arith.constant 0 : index
    %245 = vector.load %arg11[%c0_328, %c0_329, %c0_330] : memref<9x64x128xf32, #tpu.memory_space<vmem>>, vector<1x64x128xf32>
    %246 = vector.shape_cast %245 : vector<1x64x128xf32> to vector<64x128xf32>
    %cst_331 = arith.constant dense<0.000000e+00> : vector<64x128xf32>
    %247 = tpu.matmul %244, %246, %cst_331 {dimension_numbers = #tpu.dot_dimension_numbers<[1], [0], [0], [1], [0, 0, 1, 1], [], []>} : vector<64x64xf32>, vector<64x128xf32>, vector<64x128xf32> -> vector<64x128xf32>
    %c0_332 = arith.constant 0 : index
    %c0_333 = arith.constant 0 : index
    %c1_334 = arith.constant 1 : index
    %c0_335 = arith.constant 0 : index
    %248 = vector.load %arg21[%c0_332, %c0_333, %c1_334, %c0_335] : memref<1x10x10x64xf32, #tpu.memory_space<vmem>>, vector<1x8x8x64xf32>
    %249 = vector.shape_cast %248 : vector<1x8x8x64xf32> to vector<64x64xf32>
    %c1_336 = arith.constant 1 : index
    %c0_337 = arith.constant 0 : index
    %c0_338 = arith.constant 0 : index
    %250 = vector.load %arg11[%c1_336, %c0_337, %c0_338] : memref<9x64x128xf32, #tpu.memory_space<vmem>>, vector<1x64x128xf32>
    %251 = vector.shape_cast %250 : vector<1x64x128xf32> to vector<64x128xf32>
    %cst_339 = arith.constant dense<0.000000e+00> : vector<64x128xf32>
    %252 = tpu.matmul %249, %251, %cst_339 {dimension_numbers = #tpu.dot_dimension_numbers<[1], [0], [0], [1], [0, 0, 1, 1], [], []>} : vector<64x64xf32>, vector<64x128xf32>, vector<64x128xf32> -> vector<64x128xf32>
    %253 = arith.addf %247, %252 : vector<64x128xf32>
    %c0_340 = arith.constant 0 : index
    %c0_341 = arith.constant 0 : index
    %c2_342 = arith.constant 2 : index
    %c0_343 = arith.constant 0 : index
    %254 = vector.load %arg21[%c0_340, %c0_341, %c2_342, %c0_343] : memref<1x10x10x64xf32, #tpu.memory_space<vmem>>, vector<1x8x8x64xf32>
    %255 = vector.shape_cast %254 : vector<1x8x8x64xf32> to vector<64x64xf32>
    %c2_344 = arith.constant 2 : index
    %c0_345 = arith.constant 0 : index
    %c0_346 = arith.constant 0 : index
    %256 = vector.load %arg11[%c2_344, %c0_345, %c0_346] : memref<9x64x128xf32, #tpu.memory_space<vmem>>, vector<1x64x128xf32>
    %257 = vector.shape_cast %256 : vector<1x64x128xf32> to vector<64x128xf32>
    %cst_347 = arith.constant dense<0.000000e+00> : vector<64x128xf32>
    %258 = tpu.matmul %255, %257, %cst_347 {dimension_numbers = #tpu.dot_dimension_numbers<[1], [0], [0], [1], [0, 0, 1, 1], [], []>} : vector<64x64xf32>, vector<64x128xf32>, vector<64x128xf32> -> vector<64x128xf32>
    %259 = arith.addf %253, %258 : vector<64x128xf32>
    %c0_348 = arith.constant 0 : index
    %c1_349 = arith.constant 1 : index
    %c0_350 = arith.constant 0 : index
    %c0_351 = arith.constant 0 : index
    %260 = vector.load %arg21[%c0_348, %c1_349, %c0_350, %c0_351] : memref<1x10x10x64xf32, #tpu.memory_space<vmem>>, vector<1x8x8x64xf32>
    %261 = vector.shape_cast %260 : vector<1x8x8x64xf32> to vector<64x64xf32>
    %c3_352 = arith.constant 3 : index
    %c0_353 = arith.constant 0 : index
    %c0_354 = arith.constant 0 : index
    %262 = vector.load %arg11[%c3_352, %c0_353, %c0_354] : memref<9x64x128xf32, #tpu.memory_space<vmem>>, vector<1x64x128xf32>
    %263 = vector.shape_cast %262 : vector<1x64x128xf32> to vector<64x128xf32>
    %cst_355 = arith.constant dense<0.000000e+00> : vector<64x128xf32>
    %264 = tpu.matmul %261, %263, %cst_355 {dimension_numbers = #tpu.dot_dimension_numbers<[1], [0], [0], [1], [0, 0, 1, 1], [], []>} : vector<64x64xf32>, vector<64x128xf32>, vector<64x128xf32> -> vector<64x128xf32>
    %265 = arith.addf %259, %264 : vector<64x128xf32>
    %c0_356 = arith.constant 0 : index
    %c1_357 = arith.constant 1 : index
    %c1_358 = arith.constant 1 : index
    %c0_359 = arith.constant 0 : index
    %266 = vector.load %arg21[%c0_356, %c1_357, %c1_358, %c0_359] : memref<1x10x10x64xf32, #tpu.memory_space<vmem>>, vector<1x8x8x64xf32>
    %267 = vector.shape_cast %266 : vector<1x8x8x64xf32> to vector<64x64xf32>
    %c4_360 = arith.constant 4 : index
    %c0_361 = arith.constant 0 : index
    %c0_362 = arith.constant 0 : index
    %268 = vector.load %arg11[%c4_360, %c0_361, %c0_362] : memref<9x64x128xf32, #tpu.memory_space<vmem>>, vector<1x64x128xf32>
    %269 = vector.shape_cast %268 : vector<1x64x128xf32> to vector<64x128xf32>
    %cst_363 = arith.constant dense<0.000000e+00> : vector<64x128xf32>
    %270 = tpu.matmul %267, %269, %cst_363 {dimension_numbers = #tpu.dot_dimension_numbers<[1], [0], [0], [1], [0, 0, 1, 1], [], []>} : vector<64x64xf32>, vector<64x128xf32>, vector<64x128xf32> -> vector<64x128xf32>
    %271 = arith.addf %265, %270 : vector<64x128xf32>
    %c0_364 = arith.constant 0 : index
    %c1_365 = arith.constant 1 : index
    %c2_366 = arith.constant 2 : index
    %c0_367 = arith.constant 0 : index
    %272 = vector.load %arg21[%c0_364, %c1_365, %c2_366, %c0_367] : memref<1x10x10x64xf32, #tpu.memory_space<vmem>>, vector<1x8x8x64xf32>
    %273 = vector.shape_cast %272 : vector<1x8x8x64xf32> to vector<64x64xf32>
    %c5_368 = arith.constant 5 : index
    %c0_369 = arith.constant 0 : index
    %c0_370 = arith.constant 0 : index
    %274 = vector.load %arg11[%c5_368, %c0_369, %c0_370] : memref<9x64x128xf32, #tpu.memory_space<vmem>>, vector<1x64x128xf32>
    %275 = vector.shape_cast %274 : vector<1x64x128xf32> to vector<64x128xf32>
    %cst_371 = arith.constant dense<0.000000e+00> : vector<64x128xf32>
    %276 = tpu.matmul %273, %275, %cst_371 {dimension_numbers = #tpu.dot_dimension_numbers<[1], [0], [0], [1], [0, 0, 1, 1], [], []>} : vector<64x64xf32>, vector<64x128xf32>, vector<64x128xf32> -> vector<64x128xf32>
    %277 = arith.addf %271, %276 : vector<64x128xf32>
    %c0_372 = arith.constant 0 : index
    %c2_373 = arith.constant 2 : index
    %c0_374 = arith.constant 0 : index
    %c0_375 = arith.constant 0 : index
    %278 = vector.load %arg21[%c0_372, %c2_373, %c0_374, %c0_375] : memref<1x10x10x64xf32, #tpu.memory_space<vmem>>, vector<1x8x8x64xf32>
    %279 = vector.shape_cast %278 : vector<1x8x8x64xf32> to vector<64x64xf32>
    %c6_376 = arith.constant 6 : index
    %c0_377 = arith.constant 0 : index
    %c0_378 = arith.constant 0 : index
    %280 = vector.load %arg11[%c6_376, %c0_377, %c0_378] : memref<9x64x128xf32, #tpu.memory_space<vmem>>, vector<1x64x128xf32>
    %281 = vector.shape_cast %280 : vector<1x64x128xf32> to vector<64x128xf32>
    %cst_379 = arith.constant dense<0.000000e+00> : vector<64x128xf32>
    %282 = tpu.matmul %279, %281, %cst_379 {dimension_numbers = #tpu.dot_dimension_numbers<[1], [0], [0], [1], [0, 0, 1, 1], [], []>} : vector<64x64xf32>, vector<64x128xf32>, vector<64x128xf32> -> vector<64x128xf32>
    %283 = arith.addf %277, %282 : vector<64x128xf32>
    %c0_380 = arith.constant 0 : index
    %c2_381 = arith.constant 2 : index
    %c1_382 = arith.constant 1 : index
    %c0_383 = arith.constant 0 : index
    %284 = vector.load %arg21[%c0_380, %c2_381, %c1_382, %c0_383] : memref<1x10x10x64xf32, #tpu.memory_space<vmem>>, vector<1x8x8x64xf32>
    %285 = vector.shape_cast %284 : vector<1x8x8x64xf32> to vector<64x64xf32>
    %c7_384 = arith.constant 7 : index
    %c0_385 = arith.constant 0 : index
    %c0_386 = arith.constant 0 : index
    %286 = vector.load %arg11[%c7_384, %c0_385, %c0_386] : memref<9x64x128xf32, #tpu.memory_space<vmem>>, vector<1x64x128xf32>
    %287 = vector.shape_cast %286 : vector<1x64x128xf32> to vector<64x128xf32>
    %cst_387 = arith.constant dense<0.000000e+00> : vector<64x128xf32>
    %288 = tpu.matmul %285, %287, %cst_387 {dimension_numbers = #tpu.dot_dimension_numbers<[1], [0], [0], [1], [0, 0, 1, 1], [], []>} : vector<64x64xf32>, vector<64x128xf32>, vector<64x128xf32> -> vector<64x128xf32>
    %289 = arith.addf %283, %288 : vector<64x128xf32>
    %c0_388 = arith.constant 0 : index
    %c2_389 = arith.constant 2 : index
    %c2_390 = arith.constant 2 : index
    %c0_391 = arith.constant 0 : index
    %290 = vector.load %arg21[%c0_388, %c2_389, %c2_390, %c0_391] : memref<1x10x10x64xf32, #tpu.memory_space<vmem>>, vector<1x8x8x64xf32>
    %291 = vector.shape_cast %290 : vector<1x8x8x64xf32> to vector<64x64xf32>
    %c8_392 = arith.constant 8 : index
    %c0_393 = arith.constant 0 : index
    %c0_394 = arith.constant 0 : index
    %292 = vector.load %arg11[%c8_392, %c0_393, %c0_394] : memref<9x64x128xf32, #tpu.memory_space<vmem>>, vector<1x64x128xf32>
    %293 = vector.shape_cast %292 : vector<1x64x128xf32> to vector<64x128xf32>
    %cst_395 = arith.constant dense<0.000000e+00> : vector<64x128xf32>
    %294 = tpu.matmul %291, %293, %cst_395 {dimension_numbers = #tpu.dot_dimension_numbers<[1], [0], [0], [1], [0, 0, 1, 1], [], []>} : vector<64x64xf32>, vector<64x128xf32>, vector<64x128xf32> -> vector<64x128xf32>
    %295 = arith.addf %289, %294 : vector<64x128xf32>
    %c0_396 = arith.constant 0 : index
    %c0_397 = arith.constant 0 : index
    %296 = vector.load %arg12[%c0_396, %c0_397] : memref<1x128xf32, #tpu.memory_space<vmem>>, vector<1x128xf32>
    %297 = vector.broadcast %296 : vector<1x128xf32> to vector<64x128xf32>
    %298 = arith.addf %295, %297 : vector<64x128xf32>
    %cst_398 = arith.constant 0.000000e+00 : f32
    %299 = vector.broadcast %cst_398 : f32 to vector<64x128xf32>
    %300 = arith.maximumf %298, %299 : vector<64x128xf32>
    %c0_399 = arith.constant 0 : index
    %c0_400 = arith.constant 0 : index
    %301 = vector.load %arg13[%c0_399, %c0_400] : memref<1x128xf32, #tpu.memory_space<vmem>>, vector<1x128xf32>
    %302 = vector.broadcast %301 : vector<1x128xf32> to vector<64x128xf32>
    %303 = arith.addf %300, %302 : vector<64x128xf32>
    %304 = vector.shape_cast %303 : vector<64x128xf32> to vector<1x8x8x128xf32>
    %c0_401 = arith.constant 0 : index
    %c0_402 = arith.constant 0 : index
    %c0_403 = arith.constant 0 : index
    %c0_404 = arith.constant 0 : index
    %305 = vector.load %arg22[%c0_401, %c0_402, %c0_403, %c0_404] : memref<1x8x8x128xf32, #tpu.memory_space<vmem>>, vector<1x8x8x128xf32>
    tpu.vector_store %arg22[%c0_401, %c0_402, %c0_403, %c0_404], %304 {strides = array<i32>} : memref<1x8x8x128xf32, #tpu.memory_space<vmem>>, vector<1x8x8x128xf32>,
    %c0_405 = arith.constant 0 : index
    %c0_406 = arith.constant 0 : index
    %c0_407 = arith.constant 0 : index
    %c0_408 = arith.constant 0 : index
    %306 = tpu.strided_load %arg22[%c0_405, %c0_406, %c0_407, %c0_408] {strides = array<i32: 1, 1, 2, 1>} : memref<1x8x8x128xf32, #tpu.memory_space<vmem>>, vector<1x8x4x128xf32>
    %c0_409 = arith.constant 0 : index
    %c0_410 = arith.constant 0 : index
    %c1_411 = arith.constant 1 : index
    %c0_412 = arith.constant 0 : index
    %307 = tpu.strided_load %arg22[%c0_409, %c0_410, %c1_411, %c0_412] {strides = array<i32: 1, 1, 2, 1>} : memref<1x8x8x128xf32, #tpu.memory_space<vmem>>, vector<1x8x4x128xf32>
    %308 = arith.maximumf %306, %307 : vector<1x8x4x128xf32>
    %309 = vector.shape_cast %308 : vector<1x8x4x128xf32> to vector<1x4x2x4x128xf32>
    %310 = vector.extract_strided_slice %309 {offsets = [0, 0, 0, 0, 0], sizes = [1, 4, 1, 4, 128], strides = [1, 1, 1, 1, 1]} : vector<1x4x2x4x128xf32> to vector<1x4x1x4x128xf32>
    %311 = vector.shape_cast %310 : vector<1x4x1x4x128xf32> to vector<1x4x4x128xf32>
    %312 = vector.extract_strided_slice %309 {offsets = [0, 0, 1, 0, 0], sizes = [1, 4, 1, 4, 128], strides = [1, 1, 1, 1, 1]} : vector<1x4x2x4x128xf32> to vector<1x4x1x4x128xf32>
    %313 = vector.shape_cast %312 : vector<1x4x1x4x128xf32> to vector<1x4x4x128xf32>
    %314 = arith.maximumf %311, %313 : vector<1x4x4x128xf32>
    %c0_413 = arith.constant 0 : index
    %c1_414 = arith.constant 1 : index
    %c1_415 = arith.constant 1 : index
    %c0_416 = arith.constant 0 : index
    %315 = vector.load %arg23[%c0_413, %c1_414, %c1_415, %c0_416] : memref<1x6x6x128xf32, #tpu.memory_space<vmem>>, vector<1x4x4x128xf32>
    tpu.vector_store %arg23[%c0_413, %c1_414, %c1_415, %c0_416], %314 {strides = array<i32>} : memref<1x6x6x128xf32, #tpu.memory_space<vmem>>, vector<1x4x4x128xf32>,
    %c0_417 = arith.constant 0 : index
    %c0_418 = arith.constant 0 : index
    %c0_419 = arith.constant 0 : index
    %c0_420 = arith.constant 0 : index
    %316 = vector.load %arg23[%c0_417, %c0_418, %c0_419, %c0_420] : memref<1x6x6x128xf32, #tpu.memory_space<vmem>>, vector<1x4x4x128xf32>
    %317 = vector.shape_cast %316 : vector<1x4x4x128xf32> to vector<16x128xf32>
    %c0_421 = arith.constant 0 : index
    %c0_422 = arith.constant 0 : index
    %c0_423 = arith.constant 0 : index
    %318 = vector.load %arg14[%c0_421, %c0_422, %c0_423] : memref<9x128x256xf32, #tpu.memory_space<vmem>>, vector<1x128x256xf32>
    %319 = vector.shape_cast %318 : vector<1x128x256xf32> to vector<128x256xf32>
    %cst_424 = arith.constant dense<0.000000e+00> : vector<16x256xf32>
    %320 = tpu.matmul %317, %319, %cst_424 {dimension_numbers = #tpu.dot_dimension_numbers<[1], [0], [0], [1], [0, 0, 1, 1], [], []>} : vector<16x128xf32>, vector<128x256xf32>, vector<16x256xf32> -> vector<16x256xf32>
    %c0_425 = arith.constant 0 : index
    %c0_426 = arith.constant 0 : index
    %c1_427 = arith.constant 1 : index
    %c0_428 = arith.constant 0 : index
    %321 = vector.load %arg23[%c0_425, %c0_426, %c1_427, %c0_428] : memref<1x6x6x128xf32, #tpu.memory_space<vmem>>, vector<1x4x4x128xf32>
    %322 = vector.shape_cast %321 : vector<1x4x4x128xf32> to vector<16x128xf32>
    %c1_429 = arith.constant 1 : index
    %c0_430 = arith.constant 0 : index
    %c0_431 = arith.constant 0 : index
    %323 = vector.load %arg14[%c1_429, %c0_430, %c0_431] : memref<9x128x256xf32, #tpu.memory_space<vmem>>, vector<1x128x256xf32>
    %324 = vector.shape_cast %323 : vector<1x128x256xf32> to vector<128x256xf32>
    %cst_432 = arith.constant dense<0.000000e+00> : vector<16x256xf32>
    %325 = tpu.matmul %322, %324, %cst_432 {dimension_numbers = #tpu.dot_dimension_numbers<[1], [0], [0], [1], [0, 0, 1, 1], [], []>} : vector<16x128xf32>, vector<128x256xf32>, vector<16x256xf32> -> vector<16x256xf32>
    %326 = arith.addf %320, %325 : vector<16x256xf32>
    %c0_433 = arith.constant 0 : index
    %c0_434 = arith.constant 0 : index
    %c2_435 = arith.constant 2 : index
    %c0_436 = arith.constant 0 : index
    %327 = vector.load %arg23[%c0_433, %c0_434, %c2_435, %c0_436] : memref<1x6x6x128xf32, #tpu.memory_space<vmem>>, vector<1x4x4x128xf32>
    %328 = vector.shape_cast %327 : vector<1x4x4x128xf32> to vector<16x128xf32>
    %c2_437 = arith.constant 2 : index
    %c0_438 = arith.constant 0 : index
    %c0_439 = arith.constant 0 : index
    %329 = vector.load %arg14[%c2_437, %c0_438, %c0_439] : memref<9x128x256xf32, #tpu.memory_space<vmem>>, vector<1x128x256xf32>
    %330 = vector.shape_cast %329 : vector<1x128x256xf32> to vector<128x256xf32>
    %cst_440 = arith.constant dense<0.000000e+00> : vector<16x256xf32>
    %331 = tpu.matmul %328, %330, %cst_440 {dimension_numbers = #tpu.dot_dimension_numbers<[1], [0], [0], [1], [0, 0, 1, 1], [], []>} : vector<16x128xf32>, vector<128x256xf32>, vector<16x256xf32> -> vector<16x256xf32>
    %332 = arith.addf %326, %331 : vector<16x256xf32>
    %c0_441 = arith.constant 0 : index
    %c1_442 = arith.constant 1 : index
    %c0_443 = arith.constant 0 : index
    %c0_444 = arith.constant 0 : index
    %333 = vector.load %arg23[%c0_441, %c1_442, %c0_443, %c0_444] : memref<1x6x6x128xf32, #tpu.memory_space<vmem>>, vector<1x4x4x128xf32>
    %334 = vector.shape_cast %333 : vector<1x4x4x128xf32> to vector<16x128xf32>
    %c3_445 = arith.constant 3 : index
    %c0_446 = arith.constant 0 : index
    %c0_447 = arith.constant 0 : index
    %335 = vector.load %arg14[%c3_445, %c0_446, %c0_447] : memref<9x128x256xf32, #tpu.memory_space<vmem>>, vector<1x128x256xf32>
    %336 = vector.shape_cast %335 : vector<1x128x256xf32> to vector<128x256xf32>
    %cst_448 = arith.constant dense<0.000000e+00> : vector<16x256xf32>
    %337 = tpu.matmul %334, %336, %cst_448 {dimension_numbers = #tpu.dot_dimension_numbers<[1], [0], [0], [1], [0, 0, 1, 1], [], []>} : vector<16x128xf32>, vector<128x256xf32>, vector<16x256xf32> -> vector<16x256xf32>
    %338 = arith.addf %332, %337 : vector<16x256xf32>
    %c0_449 = arith.constant 0 : index
    %c1_450 = arith.constant 1 : index
    %c1_451 = arith.constant 1 : index
    %c0_452 = arith.constant 0 : index
    %339 = vector.load %arg23[%c0_449, %c1_450, %c1_451, %c0_452] : memref<1x6x6x128xf32, #tpu.memory_space<vmem>>, vector<1x4x4x128xf32>
    %340 = vector.shape_cast %339 : vector<1x4x4x128xf32> to vector<16x128xf32>
    %c4_453 = arith.constant 4 : index
    %c0_454 = arith.constant 0 : index
    %c0_455 = arith.constant 0 : index
    %341 = vector.load %arg14[%c4_453, %c0_454, %c0_455] : memref<9x128x256xf32, #tpu.memory_space<vmem>>, vector<1x128x256xf32>
    %342 = vector.shape_cast %341 : vector<1x128x256xf32> to vector<128x256xf32>
    %cst_456 = arith.constant dense<0.000000e+00> : vector<16x256xf32>
    %343 = tpu.matmul %340, %342, %cst_456 {dimension_numbers = #tpu.dot_dimension_numbers<[1], [0], [0], [1], [0, 0, 1, 1], [], []>} : vector<16x128xf32>, vector<128x256xf32>, vector<16x256xf32> -> vector<16x256xf32>
    %344 = arith.addf %338, %343 : vector<16x256xf32>
    %c0_457 = arith.constant 0 : index
    %c1_458 = arith.constant 1 : index
    %c2_459 = arith.constant 2 : index
    %c0_460 = arith.constant 0 : index
    %345 = vector.load %arg23[%c0_457, %c1_458, %c2_459, %c0_460] : memref<1x6x6x128xf32, #tpu.memory_space<vmem>>, vector<1x4x4x128xf32>
    %346 = vector.shape_cast %345 : vector<1x4x4x128xf32> to vector<16x128xf32>
    %c5_461 = arith.constant 5 : index
    %c0_462 = arith.constant 0 : index
    %c0_463 = arith.constant 0 : index
    %347 = vector.load %arg14[%c5_461, %c0_462, %c0_463] : memref<9x128x256xf32, #tpu.memory_space<vmem>>, vector<1x128x256xf32>
    %348 = vector.shape_cast %347 : vector<1x128x256xf32> to vector<128x256xf32>
    %cst_464 = arith.constant dense<0.000000e+00> : vector<16x256xf32>
    %349 = tpu.matmul %346, %348, %cst_464 {dimension_numbers = #tpu.dot_dimension_numbers<[1], [0], [0], [1], [0, 0, 1, 1], [], []>} : vector<16x128xf32>, vector<128x256xf32>, vector<16x256xf32> -> vector<16x256xf32>
    %350 = arith.addf %344, %349 : vector<16x256xf32>
    %c0_465 = arith.constant 0 : index
    %c2_466 = arith.constant 2 : index
    %c0_467 = arith.constant 0 : index
    %c0_468 = arith.constant 0 : index
    %351 = vector.load %arg23[%c0_465, %c2_466, %c0_467, %c0_468] : memref<1x6x6x128xf32, #tpu.memory_space<vmem>>, vector<1x4x4x128xf32>
    %352 = vector.shape_cast %351 : vector<1x4x4x128xf32> to vector<16x128xf32>
    %c6_469 = arith.constant 6 : index
    %c0_470 = arith.constant 0 : index
    %c0_471 = arith.constant 0 : index
    %353 = vector.load %arg14[%c6_469, %c0_470, %c0_471] : memref<9x128x256xf32, #tpu.memory_space<vmem>>, vector<1x128x256xf32>
    %354 = vector.shape_cast %353 : vector<1x128x256xf32> to vector<128x256xf32>
    %cst_472 = arith.constant dense<0.000000e+00> : vector<16x256xf32>
    %355 = tpu.matmul %352, %354, %cst_472 {dimension_numbers = #tpu.dot_dimension_numbers<[1], [0], [0], [1], [0, 0, 1, 1], [], []>} : vector<16x128xf32>, vector<128x256xf32>, vector<16x256xf32> -> vector<16x256xf32>
    %356 = arith.addf %350, %355 : vector<16x256xf32>
    %c0_473 = arith.constant 0 : index
    %c2_474 = arith.constant 2 : index
    %c1_475 = arith.constant 1 : index
    %c0_476 = arith.constant 0 : index
    %357 = vector.load %arg23[%c0_473, %c2_474, %c1_475, %c0_476] : memref<1x6x6x128xf32, #tpu.memory_space<vmem>>, vector<1x4x4x128xf32>
    %358 = vector.shape_cast %357 : vector<1x4x4x128xf32> to vector<16x128xf32>
    %c7_477 = arith.constant 7 : index
    %c0_478 = arith.constant 0 : index
    %c0_479 = arith.constant 0 : index
    %359 = vector.load %arg14[%c7_477, %c0_478, %c0_479] : memref<9x128x256xf32, #tpu.memory_space<vmem>>, vector<1x128x256xf32>
    %360 = vector.shape_cast %359 : vector<1x128x256xf32> to vector<128x256xf32>
    %cst_480 = arith.constant dense<0.000000e+00> : vector<16x256xf32>
    %361 = tpu.matmul %358, %360, %cst_480 {dimension_numbers = #tpu.dot_dimension_numbers<[1], [0], [0], [1], [0, 0, 1, 1], [], []>} : vector<16x128xf32>, vector<128x256xf32>, vector<16x256xf32> -> vector<16x256xf32>
    %362 = arith.addf %356, %361 : vector<16x256xf32>
    %c0_481 = arith.constant 0 : index
    %c2_482 = arith.constant 2 : index
    %c2_483 = arith.constant 2 : index
    %c0_484 = arith.constant 0 : index
    %363 = vector.load %arg23[%c0_481, %c2_482, %c2_483, %c0_484] : memref<1x6x6x128xf32, #tpu.memory_space<vmem>>, vector<1x4x4x128xf32>
    %364 = vector.shape_cast %363 : vector<1x4x4x128xf32> to vector<16x128xf32>
    %c8_485 = arith.constant 8 : index
    %c0_486 = arith.constant 0 : index
    %c0_487 = arith.constant 0 : index
    %365 = vector.load %arg14[%c8_485, %c0_486, %c0_487] : memref<9x128x256xf32, #tpu.memory_space<vmem>>, vector<1x128x256xf32>
    %366 = vector.shape_cast %365 : vector<1x128x256xf32> to vector<128x256xf32>
    %cst_488 = arith.constant dense<0.000000e+00> : vector<16x256xf32>
    %367 = tpu.matmul %364, %366, %cst_488 {dimension_numbers = #tpu.dot_dimension_numbers<[1], [0], [0], [1], [0, 0, 1, 1], [], []>} : vector<16x128xf32>, vector<128x256xf32>, vector<16x256xf32> -> vector<16x256xf32>
    %368 = arith.addf %362, %367 : vector<16x256xf32>
    %c0_489 = arith.constant 0 : index
    %c0_490 = arith.constant 0 : index
    %369 = vector.load %arg15[%c0_489, %c0_490] : memref<1x256xf32, #tpu.memory_space<vmem>>, vector<1x256xf32>
    %370 = vector.broadcast %369 : vector<1x256xf32> to vector<16x256xf32>
    %371 = arith.addf %368, %370 : vector<16x256xf32>
    %cst_491 = arith.constant 0.000000e+00 : f32
    %372 = vector.broadcast %cst_491 : f32 to vector<16x256xf32>
    %373 = arith.maximumf %371, %372 : vector<16x256xf32>
    %374 = vector.shape_cast %373 : vector<16x256xf32> to vector<1x16x256xf32>
    %c0_492 = arith.constant 0 : index
    %c0_493 = arith.constant 0 : index
    %c0_494 = arith.constant 0 : index
    %375 = vector.load %arg16[%c0_492, %c0_493, %c0_494] : memref<1x16x256xf32, #tpu.memory_space<vmem>>, vector<1x16x256xf32>
    tpu.vector_store %arg16[%c0_492, %c0_493, %c0_494], %374 {strides = array<i32>} : memref<1x16x256xf32, #tpu.memory_space<vmem>>, vector<1x16x256xf32>,
    return
  }
  func.func @transform_0(%arg0: i32) -> (i32, i32, i32, i32) {
    %c0_i32 = arith.constant 0 : i32
    %c0_i32_0 = arith.constant 0 : i32
    %c0_i32_1 = arith.constant 0 : i32
    %c0_i32_2 = arith.constant 0 : i32
    return %arg0, %c0_i32, %c0_i32_0, %c0_i32_1 : i32, i32, i32, i32
  }
  func.func @transform_1(%arg0: i32) -> (i32, i32) {
    %c0_i32 = arith.constant 0 : i32
    %c0_i32_0 = arith.constant 0 : i32
    %c0_i32_1 = arith.constant 0 : i32
    return %c0_i32, %c0_i32_0 : i32, i32
  }
  func.func @transform_2(%arg0: i32) -> (i32, i32) {
    %c0_i32 = arith.constant 0 : i32
    %c0_i32_0 = arith.constant 0 : i32
    %c0_i32_1 = arith.constant 0 : i32
    return %c0_i32, %c0_i32_0 : i32, i32
  }
  func.func @transform_3(%arg0: i32) -> (i32, i32) {
    %c0_i32 = arith.constant 0 : i32
    %c0_i32_0 = arith.constant 0 : i32
    %c0_i32_1 = arith.constant 0 : i32
    return %c0_i32, %c0_i32_0 : i32, i32
  }
  func.func @transform_4(%arg0: i32) -> (i32, i32, i32) {
    %c0_i32 = arith.constant 0 : i32
    %c0_i32_0 = arith.constant 0 : i32
    %c0_i32_1 = arith.constant 0 : i32
    %c0_i32_2 = arith.constant 0 : i32
    return %c0_i32, %c0_i32_0, %c0_i32_1 : i32, i32, i32
  }
  func.func @transform_5(%arg0: i32) -> (i32, i32) {
    %c0_i32 = arith.constant 0 : i32
    %c0_i32_0 = arith.constant 0 : i32
    %c0_i32_1 = arith.constant 0 : i32
    return %c0_i32, %c0_i32_0 : i32, i32
  }
  func.func @transform_6(%arg0: i32) -> (i32, i32) {
    %c0_i32 = arith.constant 0 : i32
    %c0_i32_0 = arith.constant 0 : i32
    %c0_i32_1 = arith.constant 0 : i32
    return %c0_i32, %c0_i32_0 : i32, i32
  }
  func.func @transform_7(%arg0: i32) -> (i32, i32, i32) {
    %c0_i32 = arith.constant 0 : i32
    %c0_i32_0 = arith.constant 0 : i32
    %c0_i32_1 = arith.constant 0 : i32
    %c0_i32_2 = arith.constant 0 : i32
    return %c0_i32, %c0_i32_0, %c0_i32_1 : i32, i32, i32
  }
  func.func @transform_8(%arg0: i32) -> (i32, i32) {
    %c0_i32 = arith.constant 0 : i32
    %c0_i32_0 = arith.constant 0 : i32
    %c0_i32_1 = arith.constant 0 : i32
    return %c0_i32, %c0_i32_0 : i32, i32
  }
  func.func @transform_9(%arg0: i32) -> (i32, i32) {
    %c0_i32 = arith.constant 0 : i32
    %c0_i32_0 = arith.constant 0 : i32
    %c0_i32_1 = arith.constant 0 : i32
    return %c0_i32, %c0_i32_0 : i32, i32
  }
  func.func @transform_10(%arg0: i32) -> (i32, i32, i32) {
    %c0_i32 = arith.constant 0 : i32
    %c0_i32_0 = arith.constant 0 : i32
    %c0_i32_1 = arith.constant 0 : i32
    %c0_i32_2 = arith.constant 0 : i32
    return %c0_i32, %c0_i32_0, %c0_i32_1 : i32, i32, i32
  }
  func.func @transform_11(%arg0: i32) -> (i32, i32) {
    %c0_i32 = arith.constant 0 : i32
    %c0_i32_0 = arith.constant 0 : i32
    %c0_i32_1 = arith.constant 0 : i32
    return %c0_i32, %c0_i32_0 : i32, i32
  }
  func.func @transform_12(%arg0: i32) -> (i32, i32) {
    %c0_i32 = arith.constant 0 : i32
    %c0_i32_0 = arith.constant 0 : i32
    %c0_i32_1 = arith.constant 0 : i32
    return %c0_i32, %c0_i32_0 : i32, i32
  }
  func.func @transform_13(%arg0: i32) -> (i32, i32, i32) {
    %c0_i32 = arith.constant 0 : i32
    %c0_i32_0 = arith.constant 0 : i32
    %c0_i32_1 = arith.constant 0 : i32
    %c0_i32_2 = arith.constant 0 : i32
    return %c0_i32, %c0_i32_0, %c0_i32_1 : i32, i32, i32
  }
  func.func @transform_14(%arg0: i32) -> (i32, i32) {
    %c0_i32 = arith.constant 0 : i32
    %c0_i32_0 = arith.constant 0 : i32
    %c0_i32_1 = arith.constant 0 : i32
    return %c0_i32, %c0_i32_0 : i32, i32
  }
  func.func @transform_15(%arg0: i32) -> (i32, i32, i32) {
    %c0_i32 = arith.constant 0 : i32
    %c0_i32_0 = arith.constant 0 : i32
    %c0_i32_1 = arith.constant 0 : i32
    return %arg0, %c0_i32, %c0_i32_0 : i32, i32, i32
  }
}

</mosaic_0001>

<bundles_post_ra>
// kernel: _lambda_.1
= control target key start
LH: loop header
LB: loop body
LE: loop exit
PB: predicated region body
PF: predicated region fallthrough
CT: control target
= control target key end

     0   :  { %s16313_s0 = inlined_call_operand.vmem [shape: f32[2,16,16,1], index: 0, kind: input, shape index: {}]   ;;  %s16314_s1 = inlined_call_operand.hbm [shape: f32[9,16], index: 1, kind: input, shape index: {}]   ;;  %s16315_s2 = inlined_call_operand.hbm [shape: f32[1,16], index: 2, kind: input, shape index: {}]   ;;  %s16316_s3 = inlined_call_operand.vmem [shape: f32[1,16], index: 3, kind: input, shape index: {}]   ;;  %s16317_s4 = inlined_call_operand.hbm [shape: f32[9,16,32], index: 4, kind: input, shape index: {}]   ;;  %s16318_s5 = inlined_call_operand.hbm [shape: f32[1,32], index: 5, kind: input, shape index: {}]   ;;  %s16319_s6 = inlined_call_operand.vmem [shape: f32[1,32], index: 6, kind: input, shape index: {}]   ;;  %s16320_s7 = inlined_call_operand.hbm [shape: f32[9,32,64], index: 7, kind: input, shape index: {}]   ;;  %s16321_s8 = inlined_call_operand.hbm [shape: f32[1,64], index: 8, kind: input, shape index: {}]   ;;  %s16322_s9 = inlined_call_operand.vmem [shape: f32[1,64], index: 9, kind: input, shape index: {}]   ;;  %s16323_s10 = inlined_call_operand.hbm [shape: f32[9,64,128], index: 10, kind: input, shape index: {}]   ;;  %s16324_s11 = inlined_call_operand.hbm [shape: f32[1,128], index: 11, kind: input, shape index: {}]   ;;  %s16325_s12 = inlined_call_operand.vmem [shape: f32[1,128], index: 12, kind: input, shape index: {}]   ;;  %s16326_s13 = inlined_call_operand.hbm [shape: f32[9,128,256], index: 13, kind: input, shape index: {}]   ;;  %s16327_s14 = inlined_call_operand.hbm [shape: f32[1,256], index: 14, kind: input, shape index: {}]   ;;  %s16328_s15 = inlined_call_operand.vmem [shape: f32[2,16,256], index: 15, kind: output, shape index: {}]  }
   0x1   :  { %16380 = sst [smem:[#allocation157_spill]] %s16315_s2 }
   0x2   :  { %16381 = sst [smem:[#allocation158_spill]] %s16318_s5 }
   0x3   :  { %16382 = sst [smem:[#allocation159_spill]] %s16321_s8 }
   0x4   :  { %20 = vsyncpa [#allocation10], 0 }
   0x5   :  { %21 = vsyncpa [#allocation12], 0 }
   0x6   :  { %22 = vsyncpa [#allocation15], 0 }
   0x7   :  { %23 = vsyncpa [#allocation18], 0 }
   0x8   :  { %24 = vsyncpa [#allocation21], 0 }
   0x9   :  { %25 = vsyncpa [#allocation24], 0  ;;  %s11844_s18 = smov 0  }
   0xa LB: > { %16383 = sst [smem:[#allocation31_spill]] %s11746_s18  ;;  %s11853_s22 = sadd.s32 4294967295, %s11746_s18   ;;  %s11746_s18 = sphi %s11844_s18, %s31_s18  }
   0xb   : > { %s16384_s2 = sld [smem:[#allocation157_spill]]  ;;  %p10549_p0 = scmp.ge.s32.totalorder %s11746_s18, 1 }
   0xc   : > { %p382_p1 = scmp.lt.s32.totalorder %s11746_s18, 3  ;;  %p11299_p2 = scmp.eq.s32.totalorder %s11853_s22, 0 }
   0xd   : > { %s11748_s24 = smov [#allocation11]   ;;  %s16386_s5 = sld [smem:[#allocation158_spill]] }
   0xe   : > { %p11858_p3 = pnand %p10549_p0, %p382_p1  ;;  %s410_s25 = sshll.u32 %s11748_s24, 4  ;;  %s411_s25 = int_to_ptr.vmem [resolvable:$true] %s410_s25 }
   0xf   : > { %s16387_s8 = sld [smem:[#allocation159_spill]]  ;;  %s11749_s19 = smov [#allocation14]  }
  0x10   : > { %p11268_p4 = pneg %p11858_p3  ;;  %s439_s20 = sshll.u32 %s11749_s19, 4  ;;  %s440_s20 = int_to_ptr.vmem [resolvable:$true] %s439_s20 }
  0x11   : > { %s408_s21 = sshll.u32 %s16384_s2, 4  ;;  %s11750_s24 = smov [#allocation17]   ;;  %s409_s21 = int_to_ptr.hbm [resolvable:$true] %s408_s21 }
  0x12   : > { %p11872_p5 = pnand %p11299_p2, %p11268_p4  ;;  %s468_s26 = sshll.u32 %s11750_s24, 4  ;;  %s469_s26 = int_to_ptr.vmem [resolvable:$true] %s468_s26 }
  0x13   : > { %s437_s28 = sshll.u32 %s16386_s5, 4  ;;  %s495_s30 = sshll.u32 %s16324_s11, 4  ;;  %s438_s28 = int_to_ptr.hbm [resolvable:$true] %s437_s28  ;;  %s496_s30 = int_to_ptr.hbm [resolvable:$true] %s495_s30 }
  0x14   : > { %11274 = dma.hbm_to_vmem [thread:$0]  (!%p11872_p5), %s409_s21, 16, %s411_s25, [#allocation12]  }
  0x15   : > { %s466_s16 = sshll.u32 %s16387_s8, 4  ;;  %s393_s5 = sshll.u32 %s16314_s1, 4  ;;  %s467_s16 = int_to_ptr.hbm [resolvable:$true] %s466_s16  ;;  %s394_s5 = int_to_ptr.hbm [resolvable:$true] %s393_s5 }
  0x16   : > { %11280 = dma.hbm_to_vmem [thread:$0]  (!%p11872_p5), %s438_s28, 16, %s440_s20, [#allocation15]  }
  0x17   : > { %11286 = dma.hbm_to_vmem [thread:$0]  (!%p11872_p5), %s467_s16, 16, %s469_s26, [#allocation18]  }
  0x18   : > { %s11751_s8 = smov [#allocation20]   ;;  %s11752_s21 = smov [#allocation9]  }
  0x19   : > { %s497_s18 = sshll.u32 %s11751_s8, 4  ;;  %s395_s25 = sshll.u32 %s11752_s21, 4  ;;  %s498_s18 = int_to_ptr.vmem [resolvable:$true] %s497_s18  ;;  %s396_s25 = int_to_ptr.vmem [resolvable:$true] %s395_s25 }
  0x1a   : > { %11292 = dma.hbm_to_vmem [thread:$0]  (!%p11872_p5), %s496_s30, 16, %s498_s18, [#allocation21]  }
  0x1b   : > { %s11753_s28 = smov 128   ;;  %s11754_s20 = smov 8  }
  0x1c   : > { %11271 = dma.hbm_to_vmem [thread:$0]  (!%p11872_p5), %s394_s5, 256, %s396_s25, [#allocation10], %s11753_s28, %s11753_s28, %s11754_s20  }
  0x1d   : > { %s422_s2 = sshll.u32 %s16317_s4, 4  ;;  %s11755_s26 = smov [#allocation13]   ;;  %s423_s2 = int_to_ptr.hbm [resolvable:$true] %s422_s2 }
  0x1e   : > { %s424_s8 = sshll.u32 %s11755_s26, 4  ;;  %s451_s18 = sshll.u32 %s16320_s7, 4  ;;  %s425_s8 = int_to_ptr.vmem [resolvable:$true] %s424_s8  ;;  %s452_s18 = int_to_ptr.hbm [resolvable:$true] %s451_s18 }
  0x1f   : > { %11277 = dma.hbm_to_vmem [thread:$0]  (!%p11872_p5), %s423_s2, 2304, %s425_s8, [#allocation12], %s11753_s28, %s11753_s28, %s11754_s20  }
  0x20   : > { %s11756_s30 = smov [#allocation16]   ;;  %s480_s25 = sshll.u32 %s16323_s10, 4  ;;  %s481_s25 = int_to_ptr.hbm [resolvable:$true] %s480_s25 }
  0x21   : > { %s453_s19 = sshll.u32 %s11756_s30, 4  ;;  %s509_s26 = sshll.u32 %s16326_s13, 4  ;;  %s454_s19 = int_to_ptr.vmem [resolvable:$true] %s453_s19  ;;  %s510_s26 = int_to_ptr.hbm [resolvable:$true] %s509_s26 }
  0x22   : > { %11283 = dma.hbm_to_vmem [thread:$0]  (!%p11872_p5), %s452_s18, 4608, %s454_s19, [#allocation15], %s11753_s28, %s11753_s28, %s11754_s20  }
  0x23   : > { %s11757_s27 = smov [#allocation19]   ;;  %s11758_s2 = smov [#allocation22]  }
  0x24   : > { %s482_s29 = sshll.u32 %s11757_s27, 4  ;;  %s511_s8 = sshll.u32 %s11758_s2, 4  ;;  %s483_s29 = int_to_ptr.vmem [resolvable:$true] %s482_s29  ;;  %s512_s8 = int_to_ptr.vmem [resolvable:$true] %s511_s8 }
  0x25   : > { %11289 = dma.hbm_to_vmem [thread:$0]  (!%p11872_p5), %s481_s25, 9216, %s483_s29, [#allocation18], %s11753_s28, %s11753_s28, %s11754_s20  }
  0x26   : > { %s11759_s30 = smov 256   ;;  %s11760_s21 = smov 16  }
  0x27   : > { %11295 = dma.hbm_to_vmem [thread:$0]  (!%p11872_p5), %s510_s26, 36864, %s512_s8, [#allocation21], %s11759_s30, %s11759_s30, %s11760_s21  }
  0x28   : > { %s524_s19 = sshll.u32 %s16327_s14, 4  ;;  %s11761_s16 = smov [#allocation23]   ;;  %s525_s19 = int_to_ptr.hbm [resolvable:$true] %s524_s19 }
  0x29   : > { %s526_s24 = sshll.u32 %s11761_s16, 4  ;;  %547 = sbr.rel (%p11858_p3) target bundleno = 2815 (0xaff), region = 80  ;;  %s527_s24 = int_to_ptr.vmem [resolvable:$true] %s526_s24 }
  0x2a   : > { %11298 = dma.hbm_to_vmem [thread:$0]  (!%p11872_p5), %s525_s19, 32, %s527_s24, [#allocation24]  }
  0x2e   : > { %11721 = dma.done.wait (%p11299_p2), [#allocation10], 256  }
  0x2f   : > { %11723 = vsyncadd (%p11299_p2), [#allocation10], 4294967040 }
  0x30   : > { %11725 = dma.done.wait (%p11299_p2), [#allocation12], 2320  }
  0x31   : > { %11727 = vsyncadd (%p11299_p2), [#allocation12], 4294964976 }
  0x32   : > { %11729 = dma.done.wait (%p11299_p2), [#allocation15], 4624  }
  0x33   : > { %11731 = vsyncadd (%p11299_p2), [#allocation15], 4294962672 }
  0x34   : > { %11733 = dma.done.wait (%p11299_p2), [#allocation18], 9232  }
  0x35   : > { %11735 = vsyncadd (%p11299_p2), [#allocation18], 4294958064 }
  0x36   : > { %11737 = dma.done.wait (%p11299_p2), [#allocation21], 36880  }
  0x37   : > { %11739 = vsyncadd (%p11299_p2), [#allocation21], 4294930416 }
  0x38   : > { %11741 = dma.done.wait (%p11299_p2), [#allocation24], 32  }
  0x39   : > { %11743 = vsyncadd (%p11299_p2), [#allocation24], 4294967264  ;;  %vm651_vm0 = vcmask 7168   ;;  %v11762_v0 = vmov 0   ;;  %v16330_v1 = vmov 0.0   ;;  %vm654_vm1 = vcmask 1024  }
  0x3a   : > { %11345 = vset.pattern.permute.xlu2 %v11762_v0  ;;  %11344 = vset.pattern.permute.xlu1 %v11762_v0  ;;  %653 = vst.msk [vmem:[#allocation2 + $0x8] sm:$0xff] %vm651_vm0, %v16330_v1  ;;  %vm660_vm2 = vcmask 0   ;;  %p641_p6 = scmp.lt.s32.totalorder %s11853_s22, 1  ;;  %vm697_vm3 = vcmask 130048   ;;  %vm706_vm4 = vcmask 122880   ;;  %v3425_v43 = vld [vmem:[#allocation13 + $0x18] sm:$0xff] }
  0x3b   : > { %11343 = vset.pattern.permute.xlu0 %v11762_v0  ;;  %652 = vst.msk [vmem:[#allocation2] sm:$0xff] %vm651_vm0, %v16330_v1  ;;  %v3390_v44 = vld [vmem:[#allocation13 + $0x8] sm:$0xff]  ;;  %3536 = vmatpush.msra.mxu0 %v3425_v43  ;;  %v3424_v47 = vld [vmem:[#allocation13 + $0x10] sm:$0xff]  ;;  %v3389_v48 = vld [vmem:[#allocation13] sm:$0xff]  ;;  %vm700_vm5 = vcmask 123904   ;;  %vm743_vm6 = vcmask 261120  }
  0x3c   : > { %657 = vst.msk [vmem:[#allocation2 + $0x198] sm:$0xff] %vm651_vm0, %v16330_v1  ;;  %s16841_s22 = smov (!%p641_p6, %s11853_s22), 1  ;;  %3745 = vmatpush.msra.mxu1 %v3390_v44  ;;  %v12128_v50 = vld [vmem:[#allocation9] ss:$0 sm:$0xff]  ;;  %v12132_v51 = vld [vmem:[#allocation9 + $0x1] ss:$0 sm:$0xff] }
  0x3d   : > { %658 = vst.msk [vmem:[#allocation2 + $0x1a0] sm:$0xff] %vm651_vm0, %v16330_v1  ;;  %s11226_s23 = sshll.u32 %s16841_s22, 8  ;;  %3537 = vmatpush.msra.mxu0 %v3424_v47  ;;  %v12148_v56 = vld [vmem:[#allocation9 + $0x2] ss:$0 sm:$0xff]  ;;  %v3878_v61 = vld [vmem:[#allocation13 + $0x28] sm:$0xff]  ;;  %vm752_vm7 = vcmask 253952  }
  0x3e   : > { %817 = vst [vmem:[#allocation8] sm:$0x3f] %v16330_v1  ;;  %s12037_s20 = scalar_lea.vmem %s16313_s0, %s11226_s23  ;;  %3746 = vmatpush.msra.mxu1 %v3389_v48  ;;  %3989 = vmatpush.msra.mxu2 %v3878_v61  ;;  %v12163_v0 = vld [vmem:[#allocation9 + $0x3] ss:$0 sm:$0xff]  ;;  %vm746_vm8 = vcmask 254976   ;;  %vm789_vm9 = vcmask 523264  }
  0x3f   : > { %819 = vst [vmem:[#allocation8 + $0x28] sm:$0x3f] %v16330_v1  ;;  %v832_v8 = vld [vmem:[%s12037_s20] sm:$0xff]  ;;  %v833_v9 = vld [vmem:[%s12037_s20 + $0x8] sm:$0xff]  ;;  %v834_v10 = vld [vmem:[%s12037_s20 + $0x10] sm:$0xff]  ;;  %vm791_vm10 = vcmask 517120  }
  0x40   : > { %821 = vst [vmem:[#allocation8 + $0x8] sm:$0x1] %v16330_v1  ;;  %v835_v11 = vld [vmem:[%s12037_s20 + $0x18] sm:$0xff]  ;;  %v836_v20 = vld [vmem:[%s12037_s20 + $0x20] sm:$0xff]  ;;  %v837_v24 = vld [vmem:[%s12037_s20 + $0x28] sm:$0xff]  ;;  %vm796_vm11 = vcmask 516096  }
  0x41   : > { %v898_v2 = vld [vmem:[#allocation2 + $0x8] sm:$0xff]  ;;  %822 = vst [vmem:[#allocation8 + $0x10] sm:$0x1] %v16330_v1  ;;  %v839_v33 = vld [vmem:[%s12037_s20 + $0x38] sm:$0xff]  ;;  %s11227_s26 = sshll.u32 %s16841_s22, 5 }
  0x42   : > { %937 = vperm.xlu2 %11345, %v898_v2   ;;  %823 = vst [vmem:[#allocation8 + $0x18] sm:$0x1] %v16330_v1  ;;  %v1413_v3 = vld [vmem:[#allocation2 + $0x2] sm:$0xff]  ;;  %s650_s2 = scalar_lea.vmem %s16328_s15, %s11227_s26 }
  0x43   : > { %v1155_v4 = vld [vmem:[#allocation2 + $0x1] sm:$0xff]  ;;  %824 = vst [vmem:[#allocation8 + $0x20] sm:$0x1] %v16330_v1  ;;  %1448 = vperm.xlu1 %11344, %v1413_v3   ;;  %v3877_v3 = vld [vmem:[#allocation13 + $0x20] sm:$0xff] }
  0x44   : > { %1190 = vperm.xlu0 %11343, %v1155_v4   ;;  %827 = vst [vmem:[#allocation8 + $0xd] sm:$0x1] %v16330_v1  ;;  %v838_v30 = vld [vmem:[%s12037_s20 + $0x30] sm:$0xff]  ;;  %3990 = vmatpush.msra.mxu2 %v3877_v3 }
  0x45   : > { %828 = vst [vmem:[#allocation8 + $0x15] sm:$0x1] %v16330_v1  ;;  %v4154_v4 = vld [vmem:[#allocation13 + $0x38] sm:$0xff] }
  0x46   : > { %829 = vst [vmem:[#allocation8 + $0x1d] sm:$0x1] %v16330_v1  ;;  %4265 = vmatpush.msra.mxu3 %v4154_v4 }
  0x47   : > { %830 = vst [vmem:[#allocation8 + $0x25] sm:$0x1] %v16330_v1 }
  0x48   : > { %820 = vst [vmem:[#allocation8] sm:$0x1] %v16330_v1 }
  0x49   : > { %825 = vst [vmem:[#allocation8 + $0x28] sm:$0x1] %v16330_v1 }
  0x4a   : > { %826 = vst [vmem:[#allocation8 + $0x5] sm:$0x1] %v16330_v1 }
  0x4b   : > { %831 = vst [vmem:[#allocation8 + $0x2d] sm:$0x1] %v16330_v1 }
  0x4c   : > { %655 = vst.msk [vmem:[#allocation2 + $0x10] sm:$0x3] %vm654_vm1, %v16330_v1 }
  0x4d   : > { %679 = vst.msk [vmem:[#allocation2 + $0x11] sm:$0x1] %vm660_vm2, %v16330_v1 }
  0x4e   : > { %659 = vst.msk [vmem:[#allocation2 + $0x1a8] sm:$0x3] %vm654_vm1, %v16330_v1 }
  0x4f   : > { %661 = vst.msk [vmem:[#allocation2] sm:$0x1] %vm660_vm2, %v16330_v1 }
  0x50   : > { %662 = vst.msk [vmem:[#allocation2 + $0x18] sm:$0x1] %vm660_vm2, %v16330_v1 }
  0x51   : > { %663 = vst.msk [vmem:[#allocation2 + $0x30] sm:$0x1] %vm660_vm2, %v16330_v1 }
  0x52   : > { %664 = vst.msk [vmem:[#allocation2 + $0x48] sm:$0x1] %vm660_vm2, %v16330_v1 }
  0x53   : > { %665 = vst.msk [vmem:[#allocation2 + $0x60] sm:$0x1] %vm660_vm2, %v16330_v1  ;;  %v1156_v7 = vld [vmem:[#allocation2 + $0x9] sm:$0xff] }
  0x54   : > { %v1414_v5 = vld [vmem:[#allocation2 + $0xa] sm:$0xff]  ;;  %666 = vst.msk [vmem:[#allocation2 + $0x78] sm:$0x1] %vm660_vm2, %v16330_v1 }
  0x55   : > { %1453 = vperm.xlu2 %11345, %v1414_v5   ;;  %667 = vst.msk [vmem:[#allocation2 + $0x90] sm:$0x1] %vm660_vm2, %v16330_v1 }
  0x56   : > { %668 = vst.msk [vmem:[#allocation2 + $0xa8] sm:$0x1] %vm660_vm2, %v16330_v1  ;;  %v897_v6 = vld [vmem:[#allocation2] sm:$0xff] }
  0x57   : > { %669 = vst.msk [vmem:[#allocation2 + $0xc0] sm:$0x1] %vm660_vm2, %v16330_v1  ;;  %932 = vperm.xlu0 %11343, %v897_v6  }
  0x58   : > { %670 = vst.msk [vmem:[#allocation2 + $0xd8] sm:$0x1] %vm660_vm2, %v16330_v1 }
  0x59   : > { %671 = vst.msk [vmem:[#allocation2 + $0xf0] sm:$0x1] %vm660_vm2, %v16330_v1 }
  0x5a   : > { %672 = vst.msk [vmem:[#allocation2 + $0x108] sm:$0x1] %vm660_vm2, %v16330_v1 }
  0x5b   : > { %673 = vst.msk [vmem:[#allocation2 + $0x120] sm:$0x1] %vm660_vm2, %v16330_v1 }
  0x5c   : > { %674 = vst.msk [vmem:[#allocation2 + $0x138] sm:$0x1] %vm660_vm2, %v16330_v1 }
  0x5d   : > { %675 = vst.msk [vmem:[#allocation2 + $0x150] sm:$0x1] %vm660_vm2, %v16330_v1 }
  0x5e   : > { %676 = vst.msk [vmem:[#allocation2 + $0x168] sm:$0x1] %vm660_vm2, %v16330_v1 }
  0x5f   : > { %677 = vst.msk [vmem:[#allocation2 + $0x180] sm:$0x1] %vm660_vm2, %v16330_v1  ;;  %1195 = vperm.xlu0 %11343, %v1156_v7  }
  0x60   : > { %678 = vst.msk [vmem:[#allocation2 + $0x198] sm:$0x1] %vm660_vm2, %v16330_v1 }
  0x61   : > { %680 = vst.msk [vmem:[#allocation2 + $0x29] sm:$0x1] %vm660_vm2, %v16330_v1 }
  0x62   : > { %681 = vst.msk [vmem:[#allocation2 + $0x41] sm:$0x1] %vm660_vm2, %v16330_v1 }
  0x63   : > { %682 = vst.msk [vmem:[#allocation2 + $0x59] sm:$0x1] %vm660_vm2, %v16330_v1 }
  0x64   : > { %683 = vst.msk [vmem:[#allocation2 + $0x71] sm:$0x1] %vm660_vm2, %v16330_v1 }
  0x65   : > { %684 = vst.msk [vmem:[#allocation2 + $0x89] sm:$0x1] %vm660_vm2, %v16330_v1 }
  0x66   : > { %685 = vst.msk [vmem:[#allocation2 + $0xa1] sm:$0x1] %vm660_vm2, %v16330_v1 }
  0x67   : > { %686 = vst.msk [vmem:[#allocation2 + $0xb9] sm:$0x1] %vm660_vm2, %v16330_v1 }
  0x68   : > { %687 = vst.msk [vmem:[#allocation2 + $0xd1] sm:$0x1] %vm660_vm2, %v16330_v1 }
  0x69   : > { %688 = vst.msk [vmem:[#allocation2 + $0xe9] sm:$0x1] %vm660_vm2, %v16330_v1 }
  0x6a   : > { %689 = vst.msk [vmem:[#allocation2 + $0x101] sm:$0x1] %vm660_vm2, %v16330_v1 }
  0x6b   : > { %690 = vst.msk [vmem:[#allocation2 + $0x119] sm:$0x1] %vm660_vm2, %v16330_v1 }
  0x6c   : > { %691 = vst.msk [vmem:[#allocation2 + $0x131] sm:$0x1] %vm660_vm2, %v16330_v1 }
  0x6d   : > { %692 = vst.msk [vmem:[#allocation2 + $0x149] sm:$0x1] %vm660_vm2, %v16330_v1 }
  0x6e   : > { %693 = vst.msk [vmem:[#allocation2 + $0x161] sm:$0x1] %vm660_vm2, %v16330_v1 }
  0x6f   : > { %694 = vst.msk [vmem:[#allocation2 + $0x179] sm:$0x1] %vm660_vm2, %v16330_v1 }
  0x70   : > { %695 = vst.msk [vmem:[#allocation2 + $0x191] sm:$0x1] %vm660_vm2, %v16330_v1 }
  0x71   : > { %865 = vst.msk [vmem:[#allocation2 + $0x19] sm:$0xff] %vm651_vm0, %v832_v8 }
  0x72   : > { %696 = vst.msk [vmem:[#allocation2 + $0x1a9] sm:$0x1] %vm660_vm2, %v16330_v1 }
  0x73   : > { %866 = vst.msk [vmem:[#allocation2 + $0x21] sm:$0xff] %vm651_vm0, %v833_v9  ;;  %v12180_v9 = vld [vmem:[#allocation9 + $0x4] ss:$0 sm:$0xff] }
  0x74   : > { %867 = vst.msk [vmem:[#allocation2 + $0x31] sm:$0xff] %vm651_vm0, %v834_v10 }
  0x75   : > { %868 = vst.msk [vmem:[#allocation2 + $0x39] sm:$0xff] %vm651_vm0, %v835_v11  ;;  %v4153_v11 = vld [vmem:[#allocation13 + $0x30] sm:$0xff] }
  0x76   : > { %869 = vst.msk [vmem:[#allocation2 + $0x49] sm:$0xff] %vm651_vm0, %v836_v20  ;;  %4266 = vmatpush.msra.mxu3 %v4153_v11 }
  0x77   : > { %870 = vst.msk [vmem:[#allocation2 + $0x51] sm:$0xff] %vm651_vm0, %v837_v24 }
  0x78   : > { %v1671_v12 = vld [vmem:[#allocation2 + $0x18] sm:$0xff]  ;;  %871 = vst.msk [vmem:[#allocation2 + $0x61] sm:$0xff] %vm651_vm0, %v838_v30 }
  0x79   : > { %v1929_v13 = vld [vmem:[#allocation2 + $0x19] sm:$0xff]  ;;  %1706 = vperm.xlu1 %11344, %v1671_v12   ;;  %872 = vst.msk [vmem:[#allocation2 + $0x69] sm:$0xff] %vm651_vm0, %v839_v33 }
  0x7a   : > { %1964 = vperm.xlu2 %11345, %v1929_v13   ;;  %v2187_v15 = vld [vmem:[#allocation2 + $0x1a] sm:$0xff]  ;;  %v2188_v22 = vld [vmem:[#allocation2 + $0x22] sm:$0xff]  ;;  %698 = vst.msk [vmem:[#allocation3] sm:$0xff] %vm697_vm3, %v16330_v1 }
  0x7b   : > { %v2446_v14 = vld [vmem:[#allocation2 + $0x30] sm:$0xff]  ;;  %v1930_v17 = vld [vmem:[#allocation2 + $0x21] sm:$0xff]  ;;  %699 = vst.msk [vmem:[#allocation3 + $0x8] sm:$0xff] %vm697_vm3, %v16330_v1 }
  0x7c   : > { %2481 = vperm.xlu0 %11343, %v2446_v14   ;;  %v2704_v16 = vld [vmem:[#allocation2 + $0x31] sm:$0xff]  ;;  %v1672_v18 = vld [vmem:[#allocation2 + $0x20] sm:$0xff]  ;;  %703 = vst.msk [vmem:[#allocation3 + $0x198] sm:$0xff] %vm697_vm3, %v16330_v1 }
  0x7d   : > { %v2962_v19 = vld [vmem:[#allocation2 + $0x32] sm:$0xff]  ;;  %v2963_v25 = vld [vmem:[#allocation2 + $0x3a] sm:$0xff]  ;;  %v12063_v26 = vld [vmem:[#allocation2 + $0x48] sm:$0xff]  ;;  %704 = vst.msk [vmem:[#allocation3 + $0x1a0] sm:$0xff] %vm697_vm3, %v16330_v1 }
  0x7e   : > { %v2447_v21 = vld [vmem:[#allocation2 + $0x38] sm:$0xff]  ;;  %v12066_v27 = vld [vmem:[#allocation2 + $0x49] sm:$0xff]  ;;  %707 = vst.msk [vmem:[#allocation3] sm:$0x1] %vm706_vm4, %v16330_v1 }
  0x7f   : > { %v2705_v23 = vld [vmem:[#allocation2 + $0x39] sm:$0xff]  ;;  %v12069_v28 = vld [vmem:[#allocation2 + $0x4a] sm:$0xff]  ;;  %v12100_v41 = vld [vmem:[#allocation2 + $0x61] sm:$0xff]  ;;  %708 = vst.msk [vmem:[#allocation3 + $0x18] sm:$0x1] %vm706_vm4, %v16330_v1 }
  0x80   : > { %v12075_v31 = vld [vmem:[#allocation2 + $0x50] sm:$0xff]  ;;  %v12093_v38 = vld [vmem:[#allocation2 + $0x60] sm:$0xff]  ;;  %709 = vst.msk [vmem:[#allocation3 + $0x30] sm:$0x1] %vm706_vm4, %v16330_v1  ;;  %v12169_v2 = vld [vmem:[#allocation2 + $0x68] sm:$0xff] }
  0x81   : > { %2222 = vperm.xlu1 %11344, %v2187_v15   ;;  %v12079_v32 = vld [vmem:[#allocation2 + $0x51] sm:$0xff]  ;;  %710 = vst.msk [vmem:[#allocation3 + $0x48] sm:$0x1] %vm706_vm4, %v16330_v1  ;;  %v12156_v59 = vld [vmem:[#allocation2 + $0x62] sm:$0xff] }
  0x82   : > { %2739 = vperm.xlu2 %11345, %v2704_v16   ;;  %v12090_v37 = vld [vmem:[#allocation2 + $0x52] sm:$0xff]  ;;  %711 = vst.msk [vmem:[#allocation3 + $0x60] sm:$0x1] %vm706_vm4, %v16330_v1  ;;  %v12254_v43 = vld [vmem:[#allocation2 + $0x6a] sm:$0xff] }
  0x83   : > { %v3391_v49 = vld [vmem:[#allocation3 + $0x1] sm:$0xff]  ;;  %712 = vst.msk [vmem:[#allocation3 + $0x78] sm:$0x1] %vm706_vm4, %v16330_v1 }
  0x84   : > { %1969 = vperm.xlu0 %11343, %v1930_v17   ;;  %10576 = vmatmul.msk.f32.vlgmr.msra.gmra.mxu0 %vm697_vm3, %v3391_v49  ;;  %713 = vst.msk [vmem:[#allocation3 + $0x90] sm:$0x1] %vm706_vm4, %v16330_v1  ;;  %v3358_v62 = vld [vmem:[#allocation3 + $0x8] sm:$0xff] }
  0x85   : > { %v3357_v52 = vld [vmem:[#allocation3] sm:$0xff]  ;;  %714 = vst.msk [vmem:[#allocation3 + $0xa8] sm:$0x1] %vm706_vm4, %v16330_v1 }
  0x86   : > { %715 = vst.msk [vmem:[#allocation3 + $0xc0] sm:$0x1] %vm706_vm4, %v16330_v1  ;;  %10608 = vmatmul.msk.f32.vlgmr.msra.gmra.mxu1 %vm697_vm3, %v3357_v52  ;;  %v3844_v8 = vld [vmem:[#allocation3 + $0x2] sm:$0xff] }
  0x87   : > { %716 = vst.msk [vmem:[#allocation3 + $0xd8] sm:$0x1] %vm706_vm4, %v16330_v1  ;;  %10640 = vmatmul.msk.f32.vlgmr.msra.gmra.mxu2 %vm697_vm3, %v3844_v8 }
  0x88   : > { %717 = vst.msk [vmem:[#allocation3 + $0xf0] sm:$0x1] %vm706_vm4, %v16330_v1 }
  0x89   : > { %1711 = vperm.xlu1 %11344, %v1672_v18   ;;  %718 = vst.msk [vmem:[#allocation3 + $0x108] sm:$0x1] %vm706_vm4, %v16330_v1 }
  0x8a   : > { %942 = vperm.xlu2 %11345, %v1671_v12   ;;  %719 = vst.msk [vmem:[#allocation3 + $0x120] sm:$0x1] %vm706_vm4, %v16330_v1  ;;  %v12189_v12 = vld [vmem:[#allocation9 + $0x5] ss:$0 sm:$0xff] }
  0x8b   : > { %720 = vst.msk [vmem:[#allocation3 + $0x138] sm:$0x1] %vm706_vm4, %v16330_v1 }
  0x8c   : > { %1200 = vperm.xlu0 %11343, %v1929_v13   ;;  %721 = vst.msk [vmem:[#allocation3 + $0x150] sm:$0x1] %vm706_vm4, %v16330_v1 }
  0x8d   : > { %722 = vst.msk [vmem:[#allocation3 + $0x168] sm:$0x1] %vm706_vm4, %v16330_v1 }
  0x8e   : > { %723 = vst.msk [vmem:[#allocation3 + $0x180] sm:$0x1] %vm706_vm4, %v16330_v1  ;;  %10609 = vmatmul.msk.f32.gmra.mxu1 %vm697_vm3, %v3358_v62 }
  0x8f   : > { %724 = vst.msk [vmem:[#allocation3 + $0x198] sm:$0x1] %vm706_vm4, %v16330_v1 }
  0x90   : > { %726 = vst.msk [vmem:[#allocation3 + $0x29] sm:$0x1] %vm706_vm4, %v16330_v1 }
  0x91   : > { %2997 = vperm.xlu1 %11344, %v2962_v19   ;;  %727 = vst.msk [vmem:[#allocation3 + $0x41] sm:$0x1] %vm706_vm4, %v16330_v1 }
  0x92   : > { %1458 = vperm.xlu2 %11345, %v2187_v15   ;;  %728 = vst.msk [vmem:[#allocation3 + $0x59] sm:$0x1] %vm706_vm4, %v16330_v1 }
  0x93   : > { %729 = vst.msk [vmem:[#allocation3 + $0x71] sm:$0x1] %vm706_vm4, %v16330_v1 }
  0x94   : > { %2486 = vperm.xlu0 %11343, %v2447_v21   ;;  %730 = vst.msk [vmem:[#allocation3 + $0x89] sm:$0x1] %vm706_vm4, %v16330_v1 }
  0x95   : > { %731 = vst.msk [vmem:[#allocation3 + $0xa1] sm:$0x1] %vm706_vm4, %v16330_v1 }
  0x96   : > { %732 = vst.msk [vmem:[#allocation3 + $0xb9] sm:$0x1] %vm706_vm4, %v16330_v1 }
  0x97   : > { %733 = vst.msk [vmem:[#allocation3 + $0xd1] sm:$0x1] %vm706_vm4, %v16330_v1 }
  0x98   : > { %734 = vst.msk [vmem:[#allocation3 + $0xe9] sm:$0x1] %vm706_vm4, %v16330_v1 }
  0x99   : > { %2227 = vperm.xlu1 %11344, %v2188_v22   ;;  %735 = vst.msk [vmem:[#allocation3 + $0x101] sm:$0x1] %vm706_vm4, %v16330_v1 }
  0x9a   : > { %2744 = vperm.xlu2 %11345, %v2705_v23   ;;  %736 = vst.msk [vmem:[#allocation3 + $0x119] sm:$0x1] %vm706_vm4, %v16330_v1 }
  0x9b   : > { %737 = vst.msk [vmem:[#allocation3 + $0x131] sm:$0x1] %vm706_vm4, %v16330_v1 }
  0x9c   : > { %1974 = vperm.xlu0 %11343, %v2704_v16   ;;  %v12071_v29 = vpop.permute.xlu2 %937  ;;  %738 = vst.msk [vmem:[#allocation3 + $0x149] sm:$0x1] %vm706_vm4, %v16330_v1 }
  0x9d   : > { %739 = vst.msk [vmem:[#allocation3 + $0x161] sm:$0x1] %vm706_vm4, %v16330_v1  ;;  %v1092_v49 = vmul.f32 %v12128_v50, %v12071_v29 }
  0x9e   : > { %740 = vst.msk [vmem:[#allocation3 + $0x179] sm:$0x1] %vm706_vm4, %v16330_v1 }
  0x9f   : > { %741 = vst.msk [vmem:[#allocation3 + $0x191] sm:$0x1] %vm706_vm4, %v16330_v1 }
  0xa0   : > { %701 = vst.msk [vmem:[#allocation3 + $0x10] sm:$0x3] %vm700_vm5, %v16330_v1 }
  0xa1   : > { %1716 = vperm.xlu1 %11344, %v2446_v14   ;;  %705 = vst.msk [vmem:[#allocation3 + $0x1a8] sm:$0x3] %vm700_vm5, %v16330_v1 }
  0xa2   : > { %947 = vperm.xlu2 %11345, %v1672_v18   ;;  %725 = vst.msk [vmem:[#allocation3 + $0x11] sm:$0x1] %vm706_vm4, %v16330_v1 }
  0xa3   : > { %742 = vst.msk [vmem:[#allocation3 + $0x1a9] sm:$0x1] %vm706_vm4, %v16330_v1 }
  0xa4   : > { %1205 = vperm.xlu0 %11343, %v1930_v17   ;;  %v12201_v17 = vld [vmem:[#allocation9 + $0x6] ss:$0 sm:$0xff] }
  0xa9   : > { %3002 = vperm.xlu1 %11344, %v2963_v25  }
  0xaa   : > { %1463 = vperm.xlu2 %11345, %v2188_v22  }
  0xac   : > { %2491 = vperm.xlu0 %11343, %v12063_v26  }
  0xaf   : > { %v12083_v34 = vpop.permute.xlu2 %1453 }
  0xb0   : > { %v1608_v61 = vmul.f32 %v12148_v56, %v12083_v34 }
  0xb1   : > { %2232 = vperm.xlu1 %11344, %v2962_v19  }
  0xb2   : > { %2749 = vperm.xlu2 %11345, %v12066_v27  }
  0xb4   : > { %1979 = vperm.xlu0 %11343, %v2705_v23  }
  0xb5   : > { %v1449_v42 = vpop.permute.xlu1 %1448 }
  0xb6   : > { %v1191_v35 = vpop.permute.xlu0 %1190  ;;  %v1607_v63 = vmul.f32 %v12148_v56, %v1449_v42 }
  0xb7   : > { %v1349_v57 = vmul.f32 %v12132_v51, %v1191_v35  ;;  %v12245_v35 = vld [vmem:[#allocation11] ss:$0 sm:$0xff] }
  0xb9   : > { %1721 = vperm.xlu1 %11344, %v2447_v21  }
  0xba   : > { %952 = vperm.xlu2 %11345, %v2446_v14   ;;  %v12191_v14 = vld [vmem:[#allocation2 + $0x69] sm:$0xff] }
  0xbc   : > { %1210 = vperm.xlu0 %11343, %v2704_v16  }
  0xc1   : > { %3007 = vperm.xlu1 %11344, %v12069_v28  }
  0xc2   : > { %1468 = vperm.xlu2 %11345, %v2962_v19  }
  0xc4   : > { %2496 = vperm.xlu0 %11343, %v12075_v31  }
  0xc9   : > { %2237 = vperm.xlu1 %11344, %v2963_v25   ;;  %v933_v39 = vpop.permute.xlu0 %932 }
  0xca   : > { %2754 = vperm.xlu2 %11345, %v12079_v32   ;;  %v1091_v53 = vmul.f32 %v12128_v50, %v933_v39 }
  0xcc   : > { %1984 = vperm.xlu0 %11343, %v12066_v27   ;;  %v1381_v58 = vadd.f32 %v1349_v57, %v1091_v53  ;;  %v3392_v53 = vld [vmem:[#allocation3 + $0x9] sm:$0xff] }
  0xcd   : > { %10577 = vmatmul.msk.f32.gmra.mxu0 %vm697_vm3, %v3392_v53 }
  0xce   : > { %v1639_v5 = vadd.f32 %v1607_v63, %v1381_v58 }
  0xd1   : > { %1726 = vperm.xlu1 %11344, %v12063_v26   ;;  %v12119_v46 = vpop.permute.xlu0 %1195 }
  0xd2   : > { %957 = vperm.xlu2 %11345, %v2447_v21   ;;  %v1350_v47 = vmul.f32 %v12132_v51, %v12119_v46 }
  0xd4   : > { %v12088_v36 = vpop.permute.xlu2 %1964  ;;  %1215 = vperm.xlu0 %11343, %v2705_v23   ;;  %v12222_v23 = vld [vmem:[#allocation9 + $0x7] ss:$0 sm:$0xff]  ;;  %v1382_v57 = vadd.f32 %v1350_v47, %v1092_v49 }
  0xd5   : > { %v2123_v16 = vmul.f32 %v12180_v9, %v12088_v36 }
  0xd6   : > { %v1640_v3 = vadd.f32 %v1608_v61, %v1382_v57  ;;  %v843_v57 = vld [vmem:[%s12037_s20 + $0x58] sm:$0xff] }
  0xd7   : > { %876 = vst.msk [vmem:[#allocation2 + $0x99] sm:$0xff] %vm651_vm0, %v843_v57 }
  0xd9   : > { %3012 = vperm.xlu1 %11344, %v12090_v37  }
  0xda   : > { %1473 = vperm.xlu2 %11345, %v2963_v25  }
  0xdc   : > { %v12095_v40 = vpop.permute.xlu2 %2739  ;;  %2501 = vperm.xlu0 %11343, %v12093_v38  }
  0xe1   : > { %2242 = vperm.xlu1 %11344, %v12069_v28  }
  0xe2   : > { %2759 = vperm.xlu2 %11345, %v12100_v41  }
  0xe4   : > { %v12114_v45 = vpop.permute.xlu2 %942  ;;  %1989 = vperm.xlu0 %11343, %v12079_v32  }
  0xe9   : > { %1731 = vperm.xlu1 %11344, %v12075_v31  }
  0xea   : > { %962 = vperm.xlu2 %11345, %v12063_v26  }
  0xeb   : > { %v1707_v54 = vpop.permute.xlu1 %1706 }
  0xec   : > { %v12144_v55 = vpop.permute.xlu2 %1458  ;;  %1220 = vperm.xlu0 %11343, %v12066_v27   ;;  %v1865_v10 = vmul.f32 %v12163_v0, %v1707_v54  ;;  %v12230_v27 = vld [vmem:[#allocation9 + $0x8] ss:$0 sm:$0xff] }
  0xed   : > { %v1609_v49 = vmul.f32 %v12148_v56, %v12144_v55 }
  0xee   : > { %v2482_v60 = vpop.permute.xlu0 %2481  ;;  %v1897_v13 = vadd.f32 %v1865_v10, %v1639_v5 }
  0xef   : > { %v2640_v22 = vmul.f32 %v12201_v17, %v2482_v60  ;;  %v3845_v60 = vld [vmem:[#allocation3 + $0xa] sm:$0xff] }
  0xf0   : > { %v2155_v18 = vadd.f32 %v2123_v16, %v1897_v13  ;;  %10641 = vmatmul.msk.f32.gmra.mxu2 %vm697_vm3, %v3845_v60 }
  0xf1   : > { %3017 = vperm.xlu1 %11344, %v12156_v59  }
  0xf2   : > { %1478 = vperm.xlu2 %11345, %v12069_v28   ;;  %v2898_v28 = vmul.f32 %v12222_v23, %v12095_v40  ;;  %v841_v40 = vld [vmem:[%s12037_s20 + $0x48] sm:$0xff] }
  0xf3   : > { %v2223_v6 = vpop.permute.xlu1 %2222  ;;  %874 = vst.msk [vmem:[#allocation2 + $0x81] sm:$0xff] %vm651_vm0, %v841_v40  ;;  %v1093_v40 = vmul.f32 %v12128_v50, %v12114_v45 }
  0xf4   : > { %v12176_v7 = vpop.permute.xlu2 %2744  ;;  %2506 = vperm.xlu0 %11343, %v12169_v2   ;;  %v2381_v19 = vmul.f32 %v12189_v12, %v2223_v6 }
  0xf6   : > { %v12193_v15 = vpop.permute.xlu0 %1969  ;;  %v2413_v24 = vadd.f32 %v2381_v19, %v2155_v18 }
  0xf7   : > { %v2124_v4 = vmul.f32 %v12180_v9, %v12193_v15 }
  0xf8   : > { %v2672_v26 = vadd.f32 %v2640_v22, %v2413_v24 }
  0xf9   : > { %2247 = vperm.xlu1 %11344, %v12090_v37  }
  0xfa   : > { %2764 = vperm.xlu2 %11345, %v12191_v14   ;;  %v2930_v36 = vadd.f32 %v2898_v28, %v2672_v26  ;;  %v12328_v45 = vld [vmem:[#allocation2 + $0x81] sm:$0xff] }
  0xfb   : > { %v1712_v20 = vpop.permute.xlu1 %1711 }
  0xfc   : > { %v12212_v21 = vpop.permute.xlu2 %947  ;;  %1994 = vperm.xlu0 %11343, %v12100_v41  }
  0xfe   : > { %v12226_v25 = vpop.permute.xlu0 %1200 }
 0x101   : > { %1736 = vperm.xlu1 %11344, %v12093_v38  }
 0x102   : > { %967 = vperm.xlu2 %11345, %v12075_v31   ;;  %v840_v31 = vld [vmem:[%s12037_s20 + $0x40] sm:$0xff] }
 0x103   : > { %v2998_v30 = vpop.permute.xlu1 %2997  ;;  %873 = vst.msk [vmem:[#allocation2 + $0x79] sm:$0xff] %vm651_vm0, %v840_v31  ;;  %v1351_v31 = vmul.f32 %v12132_v51, %v12226_v25 }
 0x104   : > { %v12242_v33 = vpop.permute.xlu2 %1463  ;;  %v3156_v39 = vmul.f32 %v12230_v27, %v2998_v30  ;;  %1225 = vperm.xlu0 %11343, %v12079_v32   ;;  %v12264_v32 = vld [vmem:[%s16316_s3] ss:$0 sm:$0xff] }
 0x106   : > { %v3188_v42 = vadd.f32 %v3156_v39, %v2930_v36  ;;  %v2487_v44 = vpop.permute.xlu0 %2486 }
 0x107   : > { %v2641_v11 = vmul.f32 %v12201_v17, %v2487_v44 }
 0x108   : > { %v3224_v48 = vadd.f32 %v12245_v35, %v3188_v42 }
 0x109   : > { %3022 = vperm.xlu1 %11344, %v12254_v43  }
 0x10a   : > { %1483 = vperm.xlu2 %11345, %v12090_v37   ;;  %v3256_v52 = vmax.f32 %v3224_v48, 0.0  ;;  %v1866_v37 = vmul.f32 %v12163_v0, %v1712_v20  ;;  %v12281_v29 = vld [vmem:[#allocation2 + $0x79] sm:$0xff]  ;;  %v2899_v20 = vmul.f32 %v12222_v23, %v12176_v7  ;;  %v842_v7 = vld [vmem:[%s12037_s20 + $0x50] sm:$0xff] }
 0x10b   : > { %v2228_v54 = vpop.permute.xlu1 %2227  ;;  %v12283_v62 = vld [vmem:[#allocation2 + $0x78] sm:$0xff]  ;;  %875 = vst.msk [vmem:[#allocation2 + $0x91] sm:$0xff] %vm651_vm0, %v842_v7  ;;  %v12322_v48 = vld [vmem:[#allocation2 + $0x80] sm:$0xff] }
 0x10c   : > { %v12273_v46 = vpop.permute.xlu2 %2749  ;;  %v3292_v58 = vadd.f32 %v12264_v32, %v3256_v52  ;;  %2511 = vperm.xlu0 %11343, %v12283_v62   ;;  %v1898_v34 = vadd.f32 %v1866_v37, %v1640_v3  ;;  %v2382_v5 = vmul.f32 %v12189_v12, %v2228_v54  ;;  %v12307_v36 = vld [vmem:[#allocation2 + $0x7a] sm:$0xff] }
 0x10e   : > { %3325 = vst.msk [vmem:[#allocation3 + $0x19] sm:$0xff] %vm697_vm3, %v3292_v58  ;;  %v1975_v63 = vpop.permute.xlu0 %1974  ;;  %v2156_v10 = vadd.f32 %v2124_v4, %v1898_v34 }
 0x10f   : > { %v2125_v54 = vmul.f32 %v12180_v9, %v1975_v63 }
 0x110   : > { %v2414_v18 = vadd.f32 %v2382_v5, %v2156_v10 }
 0x111   : > { %2252 = vperm.xlu1 %11344, %v12156_v59  }
 0x112   : > { %2769 = vperm.xlu2 %11345, %v12281_v29   ;;  %v2673_v19 = vadd.f32 %v2641_v11, %v2414_v18  ;;  %v2900_v11 = vmul.f32 %v12222_v23, %v12273_v46  ;;  %v1094_v46 = vmul.f32 %v12128_v50, %v12212_v21 }
 0x113   : > { %v1717_v6 = vpop.permute.xlu1 %1716 }
 0x114   : > { %v12291_v8 = vpop.permute.xlu2 %952  ;;  %1999 = vperm.xlu0 %11343, %v12191_v14   ;;  %v2931_v26 = vadd.f32 %v2899_v20, %v2673_v19 }
 0x115   : > { %v3393_v13 = vld [vmem:[#allocation3 + $0x19] sm:$0xff] }
 0x116   : > { %v3359_v16 = vld [vmem:[#allocation3 + $0x18] sm:$0xff]  ;;  %10578 = vmatmul.msk.f32.gmra.mxu0 %vm697_vm3, %v3393_v13  ;;  %v12296_v15 = vpop.permute.xlu0 %1205 }
 0x117   : > { %10610 = vmatmul.msk.f32.gmra.mxu1 %vm697_vm3, %v3359_v16  ;;  %10672 = vmatmul.msk.f32.vlgmr.msra.gmra.mxu3 %vm697_vm3, %v3359_v16 }
 0x119   : > { %1741 = vperm.xlu1 %11344, %v12169_v2  }
 0x11a   : > { %972 = vperm.xlu2 %11345, %v12093_v38  }
 0x11b   : > { %v3003_v22 = vpop.permute.xlu1 %3002 }
 0x11c   : > { %v12304_v24 = vpop.permute.xlu2 %1468  ;;  %v3157_v28 = vmul.f32 %v12230_v27, %v3003_v22  ;;  %1230 = vperm.xlu0 %11343, %v12100_v41   ;;  %v1383_v41 = vadd.f32 %v1351_v31, %v1093_v40 }
 0x11e   : > { %v3189_v30 = vadd.f32 %v3157_v28, %v2931_v26  ;;  %v2492_v39 = vpop.permute.xlu0 %2491  ;;  %v1641_v53 = vadd.f32 %v1609_v49, %v1383_v41  ;;  %v12354_v26 = vld [vmem:[#allocation2 + $0x82] sm:$0xff] }
 0x11f   : > { %v2642_v3 = vmul.f32 %v12201_v17, %v2492_v39 }
 0x120   : > { %v3225_v38 = vadd.f32 %v12245_v35, %v3189_v30  ;;  %v1352_v30 = vmul.f32 %v12132_v51, %v12296_v15  ;;  %v1610_v15 = vmul.f32 %v12148_v56, %v12242_v33 }
 0x121   : > { %3027 = vperm.xlu1 %11344, %v12307_v36  }
 0x122   : > { %1488 = vperm.xlu2 %11345, %v12156_v59   ;;  %v3257_v42 = vmax.f32 %v3225_v38, 0.0  ;;  %v1867_v59 = vmul.f32 %v12163_v0, %v1717_v6  ;;  %v1384_v7 = vadd.f32 %v1352_v30, %v1094_v46  ;;  %v12412_v30 = vld [vmem:[#allocation2 + $0x98] sm:$0xff] }
 0x123   : > { %v2233_v44 = vpop.permute.xlu1 %2232 }
 0x124   : > { %v12319_v47 = vpop.permute.xlu2 %2754  ;;  %v3293_v25 = vadd.f32 %v12264_v32, %v3257_v42  ;;  %2516 = vperm.xlu0 %11343, %v12322_v48   ;;  %v1899_v58 = vadd.f32 %v1867_v59, %v1641_v53  ;;  %v2383_v55 = vmul.f32 %v12189_v12, %v2233_v44  ;;  %v12368_v42 = vld [vmem:[#allocation2 + $0x90] sm:$0xff]  ;;  %v1642_v21 = vadd.f32 %v1610_v15, %v1384_v7 }
 0x126   : > { %3326 = vst.msk [vmem:[#allocation3 + $0x21] sm:$0xff] %vm697_vm3, %v3293_v25  ;;  %v1980_v52 = vpop.permute.xlu0 %1979  ;;  %v2157_v37 = vadd.f32 %v2125_v54, %v1899_v58 }
 0x127   : > { %v2126_v41 = vmul.f32 %v12180_v9, %v1980_v52 }
 0x128   : > { %v2415_v63 = vadd.f32 %v2383_v55, %v2157_v37  ;;  %v2901_v37 = vmul.f32 %v12222_v23, %v12319_v47  ;;  %v1095_v47 = vmul.f32 %v12128_v50, %v12291_v8  ;;  %v12418_v8 = vld [vmem:[#allocation2 + $0x99] sm:$0xff] }
 0x129   : > { %2257 = vperm.xlu1 %11344, %v12254_v43  }
 0x12a   : > { %2774 = vperm.xlu2 %11345, %v12328_v45   ;;  %v2674_v10 = vadd.f32 %v2642_v3, %v2415_v63 }
 0x12b   : > { %v1722_v60 = vpop.permute.xlu1 %1721 }
 0x12c   : > { %v12337_v61 = vpop.permute.xlu2 %957  ;;  %2004 = vperm.xlu0 %11343, %v12281_v29   ;;  %v2932_v18 = vadd.f32 %v2900_v11, %v2674_v10  ;;  %v12397_v10 = vld [vmem:[#allocation2 + $0x92] sm:$0xff] }
 0x12d   : > { %v3394_v4 = vld [vmem:[#allocation3 + $0x21] sm:$0xff] }
 0x12e   : > { %v3360_v34 = vld [vmem:[#allocation3 + $0x20] sm:$0xff]  ;;  %10579 = vmatmul.msk.f32.gmra.mxu0 %vm697_vm3, %v3394_v4  ;;  %v12342_v6 = vpop.permute.xlu0 %1210 }
 0x12f   : > { %v3846_v5 = vld [vmem:[#allocation3 + $0x1a] sm:$0xff]  ;;  %10611 = vmatmul.msk.f32.gmra.mxu1 %vm697_vm3, %v3360_v34  ;;  %10673 = vmatmul.msk.f32.gmra.mxu3 %vm697_vm3, %v3360_v34  ;;  %v3847_v22 = vld [vmem:[#allocation3 + $0x22] sm:$0xff] }
 0x130   : > { %10642 = vmatmul.msk.f32.gmra.mxu2 %vm697_vm3, %v3846_v5 }
 0x131   : > { %1746 = vperm.xlu1 %11344, %v12283_v62  }
 0x132   : > { %977 = vperm.xlu2 %11345, %v12169_v2  }
 0x133   : > { %v3008_v13 = vpop.permute.xlu1 %3007 }
 0x134   : > { %v12351_v16 = vpop.permute.xlu2 %1473  ;;  %v3158_v19 = vmul.f32 %v12230_v27, %v3008_v13  ;;  %1235 = vperm.xlu0 %11343, %v12191_v14   ;;  %v1868_v14 = vmul.f32 %v12163_v0, %v1722_v60  ;;  %v1353_v13 = vmul.f32 %v12132_v51, %v12342_v6 }
 0x136   : > { %v3190_v20 = vadd.f32 %v3158_v19, %v2932_v18  ;;  %v2497_v28 = vpop.permute.xlu0 %2496  ;;  %v1900_v25 = vadd.f32 %v1868_v14, %v1642_v21  ;;  %v1385_v6 = vadd.f32 %v1353_v13, %v1095_v47 }
 0x137   : > { %v2643_v54 = vmul.f32 %v12201_v17, %v2497_v28 }
 0x138   : > { %10643 = vmatmul.msk.f32.gmra.mxu2 %vm697_vm3, %v3847_v22  ;;  %v3226_v2 = vadd.f32 %v12245_v35, %v3190_v20  ;;  %v2158_v53 = vadd.f32 %v2126_v41, %v1900_v25 }
 0x139   : > { %3032 = vperm.xlu1 %11344, %v12354_v26  }
 0x13a   : > { %1493 = vperm.xlu2 %11345, %v12254_v43   ;;  %v3258_v39 = vmax.f32 %v3226_v2, 0.0  ;;  %v12374_v43 = vld [vmem:[#allocation2 + $0x91] sm:$0xff] }
 0x13b   : > { %v2238_v31 = vpop.permute.xlu1 %2237 }
 0x13c   : > { %v12365_v38 = vpop.permute.xlu2 %2759  ;;  %v3294_v40 = vadd.f32 %v12264_v32, %v3258_v39  ;;  %2521 = vperm.xlu0 %11343, %v12368_v42   ;;  %v2384_v49 = vmul.f32 %v12189_v12, %v2238_v31  ;;  %v845_v31 = vld [vmem:[%s12037_s20 + $0x68] sm:$0xff] }
 0x13d   : > { %878 = vst.msk [vmem:[#allocation2 + $0xb1] sm:$0xff] %vm651_vm0, %v845_v31 }
 0x13e   : > { %3327 = vst.msk [vmem:[#allocation3 + $0x31] sm:$0xff] %vm697_vm3, %v3294_v40  ;;  %v1985_v44 = vpop.permute.xlu0 %1984  ;;  %v2416_v55 = vadd.f32 %v2384_v49, %v2158_v53 }
 0x13f   : > { %v2127_v39 = vmul.f32 %v12180_v9, %v1985_v44 }
 0x140   : > { %v2675_v60 = vadd.f32 %v2643_v54, %v2416_v55  ;;  %v2902_v54 = vmul.f32 %v12222_v23, %v12365_v38  ;;  %v1096_v38 = vmul.f32 %v12128_v50, %v12337_v61 }
 0x141   : > { %2262 = vperm.xlu1 %11344, %v12307_v36  }
 0x142   : > { %2779 = vperm.xlu2 %11345, %v12374_v43   ;;  %v2933_v34 = vadd.f32 %v2901_v37, %v2675_v60 }
 0x143   : > { %v1727_v33 = vpop.permute.xlu1 %1726 }
 0x144   : > { %v12381_v59 = vpop.permute.xlu2 %962  ;;  %2009 = vperm.xlu0 %11343, %v12328_v45  }
 0x145   : > { %v3395_v57 = vld [vmem:[#allocation3 + $0x31] sm:$0xff] }
 0x146   : > { %v3361_v58 = vld [vmem:[#allocation3 + $0x30] sm:$0xff]  ;;  %10580 = vmatmul.msk.f32.gmra.mxu0 %vm697_vm3, %v3395_v57  ;;  %v12386_v52 = vpop.permute.xlu0 %1215 }
 0x147   : > { %10612 = vmatmul.msk.f32.gmra.mxu1 %vm697_vm3, %v3361_v58  ;;  %10674 = vmatmul.msk.f32.gmra.mxu3 %vm697_vm3, %v3361_v58 }
 0x149   : > { %1751 = vperm.xlu1 %11344, %v12322_v48  }
 0x14a   : > { %982 = vperm.xlu2 %11345, %v12283_v62   ;;  %v844_v62 = vld [vmem:[%s12037_s20 + $0x60] sm:$0xff] }
 0x14b   : > { %v3013_v3 = vpop.permute.xlu1 %3012  ;;  %877 = vst.msk [vmem:[#allocation2 + $0xa9] sm:$0xff] %vm651_vm0, %v844_v62 }
 0x14c   : > { %v12394_v4 = vpop.permute.xlu2 %1478  ;;  %v3159_v5 = vmul.f32 %v12230_v27, %v3013_v3  ;;  %1240 = vperm.xlu0 %11343, %v12281_v29   ;;  %v1611_v29 = vmul.f32 %v12148_v56, %v12304_v24 }
 0x14e   : > { %v3191_v63 = vadd.f32 %v3159_v5, %v2933_v34  ;;  %v2502_v11 = vpop.permute.xlu0 %2501  ;;  %v1643_v46 = vadd.f32 %v1611_v29, %v1385_v6  ;;  %v12444_v34 = vld [vmem:[#allocation2 + $0x9a] sm:$0xff] }
 0x14f   : > { %v2644_v21 = vmul.f32 %v12201_v17, %v2502_v11 }
 0x150   : > { %v3227_v18 = vadd.f32 %v12245_v35, %v3191_v63  ;;  %v1354_v63 = vmul.f32 %v12132_v51, %v12386_v52  ;;  %v1612_v52 = vmul.f32 %v12148_v56, %v12351_v16 }
 0x151   : > { %3037 = vperm.xlu1 %11344, %v12397_v10  }
 0x152   : > { %1498 = vperm.xlu2 %11345, %v12307_v36   ;;  %v3259_v19 = vmax.f32 %v3227_v18, 0.0  ;;  %v1869_v36 = vmul.f32 %v12163_v0, %v1727_v33  ;;  %v1386_v62 = vadd.f32 %v1354_v63, %v1096_v38 }
 0x153   : > { %v2243_v20 = vpop.permute.xlu1 %2242 }
 0x154   : > { %v12409_v22 = vpop.permute.xlu2 %2764  ;;  %v3295_v28 = vadd.f32 %v12264_v32, %v3259_v19  ;;  %2526 = vperm.xlu0 %11343, %v12412_v30   ;;  %v1901_v7 = vadd.f32 %v1869_v36, %v1643_v46  ;;  %v2385_v24 = vmul.f32 %v12189_v12, %v2243_v20  ;;  %v12458_v19 = vld [vmem:[#allocation2 + $0xa8] sm:$0xff]  ;;  %v1644_v61 = vadd.f32 %v1612_v52, %v1386_v62 }
 0x156   : > { %3328 = vst.msk [vmem:[#allocation3 + $0x39] sm:$0xff] %vm697_vm3, %v3295_v28  ;;  %v1990_v2 = vpop.permute.xlu0 %1989  ;;  %v2159_v14 = vadd.f32 %v2127_v39, %v1901_v7 }
 0x157   : > { %v2128_v6 = vmul.f32 %v12180_v9, %v1990_v2 }
 0x158   : > { %v2417_v49 = vadd.f32 %v2385_v24, %v2159_v14  ;;  %v2903_v14 = vmul.f32 %v12222_v23, %v12409_v22  ;;  %v846_v22 = vld [vmem:[%s12037_s20 + $0x70] sm:$0xff] }
 0x159   : > { %2267 = vperm.xlu1 %11344, %v12354_v26   ;;  %879 = vst.msk [vmem:[#allocation2 + $0xc1] sm:$0xff] %vm651_vm0, %v846_v22 }
 0x15a   : > { %2784 = vperm.xlu2 %11345, %v12418_v8   ;;  %v2676_v53 = vadd.f32 %v2644_v21, %v2417_v49 }
 0x15b   : > { %v1732_v40 = vpop.permute.xlu1 %1731 }
 0x15c   : > { %v12427_v15 = vpop.permute.xlu2 %967  ;;  %2014 = vperm.xlu0 %11343, %v12374_v43   ;;  %v2934_v55 = vadd.f32 %v2902_v54, %v2676_v53  ;;  %v12487_v53 = vld [vmem:[#allocation2 + $0xaa] sm:$0xff] }
 0x15d   : > { %v3396_v41 = vld [vmem:[#allocation3 + $0x39] sm:$0xff] }
 0x15e   : > { %v3362_v44 = vld [vmem:[#allocation3 + $0x38] sm:$0xff]  ;;  %10581 = vmatmul.msk.f32.gmra.mxu0 %vm697_vm3, %v3396_v41  ;;  %v12432_v33 = vpop.permute.xlu0 %1220 }
 0x15f   : > { %v3848_v25 = vld [vmem:[#allocation3 + $0x32] sm:$0xff]  ;;  %10613 = vmatmul.msk.f32.gmra.mxu1 %vm697_vm3, %v3362_v44  ;;  %10675 = vmatmul.msk.f32.gmra.mxu3 %vm697_vm3, %v3362_v44  ;;  %v3849_v3 = vld [vmem:[#allocation3 + $0x3a] sm:$0xff]  ;;  %v1355_v54 = vmul.f32 %v12132_v51, %v12432_v33 }
 0x160   : > { %10644 = vmatmul.msk.f32.gmra.mxu2 %vm697_vm3, %v3848_v25 }
 0x161   : > { %1756 = vperm.xlu1 %11344, %v12368_v42  }
 0x162   : > { %987 = vperm.xlu2 %11345, %v12322_v48  }
 0x163   : > { %v3018_v57 = vpop.permute.xlu1 %3017 }
 0x164   : > { %v12441_v58 = vpop.permute.xlu2 %1483  ;;  %v3160_v60 = vmul.f32 %v12230_v27, %v3018_v57  ;;  %1245 = vperm.xlu0 %11343, %v12328_v45   ;;  %v1870_v45 = vmul.f32 %v12163_v0, %v1732_v40 }
 0x166   : > { %v3192_v37 = vadd.f32 %v3160_v60, %v2934_v55  ;;  %v2507_v5 = vpop.permute.xlu0 %2506  ;;  %v1902_v28 = vadd.f32 %v1870_v45, %v1644_v61  ;;  %v1097_v55 = vmul.f32 %v12128_v50, %v12381_v59  ;;  %v12508_v59 = vld [vmem:[#allocation2 + $0xb1] sm:$0xff] }
 0x167   : > { %v2645_v39 = vmul.f32 %v12201_v17, %v2507_v5 }
 0x168   : > { %10645 = vmatmul.msk.f32.gmra.mxu2 %vm697_vm3, %v3849_v3  ;;  %v3228_v48 = vadd.f32 %v12245_v35, %v3192_v37  ;;  %v2160_v46 = vadd.f32 %v2128_v6, %v1902_v28  ;;  %v1387_v33 = vadd.f32 %v1355_v54, %v1097_v55 }
 0x169   : > { %3042 = vperm.xlu1 %11344, %v12444_v34  }
 0x16a   : > { %1503 = vperm.xlu2 %11345, %v12354_v26   ;;  %v3260_v11 = vmax.f32 %v3228_v48, 0.0  ;;  %v12464_v26 = vld [vmem:[#allocation2 + $0xa9] sm:$0xff] }
 0x16b   : > { %v2248_v13 = vpop.permute.xlu1 %2247 }
 0x16c   : > { %v12455_v18 = vpop.permute.xlu2 %2769  ;;  %v3296_v47 = vadd.f32 %v12264_v32, %v3260_v11  ;;  %2531 = vperm.xlu0 %11343, %v12458_v19   ;;  %v2386_v29 = vmul.f32 %v12189_v12, %v2248_v13  ;;  %v847_v13 = vld [vmem:[%s12037_s20 + $0x78] sm:$0xff] }
 0x16d   : > { %880 = vst.msk [vmem:[#allocation2 + $0xc9] sm:$0xff] %vm651_vm0, %v847_v13 }
 0x16e   : > { %3329 = vst.msk [vmem:[#allocation3 + $0x49] sm:$0xff] %vm697_vm3, %v3296_v47  ;;  %v1995_v20 = vpop.permute.xlu0 %1994  ;;  %v2418_v24 = vadd.f32 %v2386_v29, %v2160_v46 }
 0x16f   : > { %v2129_v38 = vmul.f32 %v12180_v9, %v1995_v20 }
 0x170   : > { %v2677_v40 = vadd.f32 %v2645_v39, %v2418_v24  ;;  %v2904_v39 = vmul.f32 %v12222_v23, %v12455_v18 }
 0x171   : > { %2272 = vperm.xlu1 %11344, %v12397_v10  }
 0x172   : > { %2789 = vperm.xlu2 %11345, %v12464_v26   ;;  %v2935_v44 = vadd.f32 %v2903_v14, %v2677_v40 }
 0x173   : > { %v1737_v16 = vpop.permute.xlu1 %1736 }
 0x174   : > { %v12471_v36 = vpop.permute.xlu2 %972  ;;  %2019 = vperm.xlu0 %11343, %v12418_v8   ;;  %v1871_v63 = vmul.f32 %v12163_v0, %v1737_v16 }
 0x175   : > { %v3397_v31 = vld [vmem:[#allocation3 + $0x49] sm:$0xff] }
 0x176   : > { %v3363_v7 = vld [vmem:[#allocation3 + $0x48] sm:$0xff]  ;;  %10582 = vmatmul.msk.f32.gmra.mxu0 %vm697_vm3, %v3397_v31  ;;  %v12477_v2 = vpop.permute.xlu0 %1225 }
 0x177   : > { %10614 = vmatmul.msk.f32.gmra.mxu1 %vm697_vm3, %v3363_v7  ;;  %10676 = vmatmul.msk.f32.gmra.mxu3 %vm697_vm3, %v3363_v7 }
 0x179   : > { %1761 = vperm.xlu1 %11344, %v12412_v30  }
 0x17a   : > { %992 = vperm.xlu2 %11345, %v12368_v42  }
 0x17b   : > { %v3023_v21 = vpop.permute.xlu1 %3022 }
 0x17c   : > { %v12484_v41 = vpop.permute.xlu2 %1488  ;;  %v3161_v25 = vmul.f32 %v12230_v27, %v3023_v21  ;;  %1250 = vperm.xlu0 %11343, %v12374_v43   ;;  %v12502_v43 = vld [vmem:[#allocation2 + $0xb0] sm:$0xff] }
 0x17e   : > { %v3193_v49 = vadd.f32 %v3161_v25, %v2935_v44  ;;  %v2512_v42 = vpop.permute.xlu0 %2511  ;;  %v12532_v44 = vld [vmem:[#allocation2 + $0xb2] sm:$0xff]  ;;  %v1356_v25 = vmul.f32 %v12132_v51, %v12477_v2  ;;  %v12546_v2 = vld [vmem:[#allocation2 + $0xc0] sm:$0xff] }
 0x17f   : > { %v2646_v61 = vmul.f32 %v12201_v17, %v2512_v42 }
 0x180   : > { %v3229_v57 = vadd.f32 %v12245_v35, %v3193_v49  ;;  %v1098_v49 = vmul.f32 %v12128_v50, %v12427_v15 }
 0x181   : > { %3047 = vperm.xlu1 %11344, %v12487_v53  }
 0x182   : > { %1508 = vperm.xlu2 %11345, %v12397_v10   ;;  %v3261_v60 = vmax.f32 %v3229_v57, 0.0  ;;  %v1613_v10 = vmul.f32 %v12148_v56, %v12394_v4  ;;  %v1388_v42 = vadd.f32 %v1356_v25, %v1098_v49 }
 0x183   : > { %v2253_v37 = vpop.permute.xlu1 %2252 }
 0x184   : > { %v12499_v3 = vpop.permute.xlu2 %2774  ;;  %v3297_v5 = vadd.f32 %v12264_v32, %v3261_v60  ;;  %v1645_v48 = vadd.f32 %v1613_v10, %v1387_v33  ;;  %2536 = vperm.xlu0 %11343, %v12502_v43   ;;  %v2387_v4 = vmul.f32 %v12189_v12, %v2253_v37 }
 0x186   : > { %3330 = vst.msk [vmem:[#allocation3 + $0x51] sm:$0xff] %vm697_vm3, %v3297_v5  ;;  %v2000_v11 = vpop.permute.xlu0 %1999  ;;  %v1903_v62 = vadd.f32 %v1871_v63, %v1645_v48 }
 0x187   : > { %v2130_v15 = vmul.f32 %v12180_v9, %v2000_v11 }
 0x188   : > { %v2161_v45 = vadd.f32 %v2129_v38, %v1903_v62 }
 0x189   : > { %2277 = vperm.xlu1 %11344, %v12444_v34  }
 0x18a   : > { %2794 = vperm.xlu2 %11345, %v12508_v59   ;;  %v2419_v29 = vadd.f32 %v2387_v4, %v2161_v45 }
 0x18b   : > { %v1742_v47 = vpop.permute.xlu1 %1741 }
 0x18c   : > { %v12517_v52 = vpop.permute.xlu2 %977  ;;  %v2678_v16 = vadd.f32 %v2646_v61, %v2419_v29  ;;  %2024 = vperm.xlu0 %11343, %v12464_v26   ;;  %v1872_v60 = vmul.f32 %v12163_v0, %v1742_v47  ;;  %v2905_v47 = vmul.f32 %v12222_v23, %v12499_v3  ;;  %v1099_v3 = vmul.f32 %v12128_v50, %v12471_v36  ;;  %v12595_v50 = vld [vmem:[#allocation2 + $0xc9] sm:$0xff] }
 0x18d   : > { %v3398_v20 = vld [vmem:[#allocation3 + $0x51] sm:$0xff] }
 0x18e   : > { %v3364_v6 = vld [vmem:[#allocation3 + $0x50] sm:$0xff]  ;;  %10583 = vmatmul.msk.f32.gmra.mxu0 %vm697_vm3, %v3398_v20  ;;  %v1231_v46 = vpop.permute.xlu0 %1230  ;;  %v2936_v7 = vadd.f32 %v2904_v39, %v2678_v16 }
 0x18f   : > { %v3850_v28 = vld [vmem:[#allocation3 + $0x4a] sm:$0xff]  ;;  %10615 = vmatmul.msk.f32.gmra.mxu1 %vm697_vm3, %v3364_v6  ;;  %10677 = vmatmul.msk.f32.gmra.mxu3 %vm697_vm3, %v3364_v6  ;;  %v3851_v21 = vld [vmem:[#allocation3 + $0x52] sm:$0xff]  ;;  %v1357_v39 = vmul.f32 %v12132_v51, %v1231_v46 }
 0x190   : > { %10646 = vmatmul.msk.f32.gmra.mxu2 %vm697_vm3, %v3850_v28  ;;  %v12575_v16 = vld [vmem:[#allocation2 + $0xc2] sm:$0xff] }
 0x191   : > { %1766 = vperm.xlu1 %11344, %v12458_v19  }
 0x192   : > { %997 = vperm.xlu2 %11345, %v12412_v30  }
 0x193   : > { %v3028_v31 = vpop.permute.xlu1 %3027 }
 0x194   : > { %v3162_v24 = vmul.f32 %v12230_v27, %v3028_v31  ;;  %v12530_v40 = vpop.permute.xlu2 %1493  ;;  %1255 = vperm.xlu0 %11343, %v12418_v8   ;;  %v1614_v8 = vmul.f32 %v12148_v56, %v12441_v58 }
 0x196   : > { %v3194_v14 = vadd.f32 %v3162_v24, %v2936_v7  ;;  %v2517_v18 = vpop.permute.xlu0 %2516  ;;  %v1646_v37 = vadd.f32 %v1614_v8, %v1388_v42 }
 0x197   : > { %v2647_v48 = vmul.f32 %v12201_v17, %v2517_v18  ;;  %v849_v18 = vld [vmem:[%s12037_s20 + $0x88] sm:$0xff] }
 0x198   : > { %10647 = vmatmul.msk.f32.gmra.mxu2 %vm697_vm3, %v3851_v21  ;;  %v3230_v30 = vadd.f32 %v12245_v35, %v3194_v14  ;;  %v1904_v33 = vadd.f32 %v1872_v60, %v1646_v37  ;;  %v1389_v21 = vadd.f32 %v1357_v39, %v1099_v3  ;;  %882 = vst.msk [vmem:[#allocation2 + $0xe1] sm:$0xff] %vm651_vm0, %v849_v18 }
 0x199   : > { %3052 = vperm.xlu1 %11344, %v12532_v44  }
 0x19a   : > { %1513 = vperm.xlu2 %11345, %v12444_v34   ;;  %v3262_v54 = vmax.f32 %v3230_v30, 0.0  ;;  %v12552_v34 = vld [vmem:[#allocation2 + $0xc1] sm:$0xff]  ;;  %v2162_v63 = vadd.f32 %v2130_v15, %v1904_v33 }
 0x19b   : > { %v2258_v57 = vpop.permute.xlu1 %2257 }
 0x19c   : > { %v3298_v22 = vadd.f32 %v12264_v32, %v3262_v54  ;;  %v12544_v55 = vpop.permute.xlu2 %2779  ;;  %2541 = vperm.xlu0 %11343, %v12546_v2   ;;  %v2388_v5 = vmul.f32 %v12189_v12, %v2258_v57 }
 0x19e   : > { %3331 = vst.msk [vmem:[#allocation3 + $0x61] sm:$0xff] %vm697_vm3, %v3298_v22  ;;  %v2005_v10 = vpop.permute.xlu0 %2004  ;;  %v2420_v4 = vadd.f32 %v2388_v5, %v2162_v63  ;;  %v2906_v5 = vmul.f32 %v12222_v23, %v12544_v55 }
 0x19f   : > { %v2131_v30 = vmul.f32 %v12180_v9, %v2005_v10 }
 0x1a0   : > { %v2679_v11 = vadd.f32 %v2647_v48, %v2420_v4 }
 0x1a1   : > { %2282 = vperm.xlu1 %11344, %v12487_v53  }
 0x1a2   : > { %2799 = vperm.xlu2 %11345, %v12552_v34   ;;  %v2937_v20 = vadd.f32 %v2905_v47, %v2679_v11  ;;  %v12619_v11 = vld [vmem:[#allocation2 + $0xca] sm:$0xff]  ;;  %v12622_v47 = vld [vmem:[#allocation9 + $0x1] ss:$0 sm:$0xff] }
 0x1a3   : > { %v1747_v58 = vpop.permute.xlu1 %1746 }
 0x1a4   : > { %v12560_v38 = vpop.permute.xlu2 %982  ;;  %2029 = vperm.xlu0 %11343, %v12508_v59   ;;  %v1873_v25 = vmul.f32 %v12163_v0, %v1747_v58 }
 0x1a5   : > { %v3399_v13 = vld [vmem:[#allocation3 + $0x61] sm:$0xff] }
 0x1a6   : > { %v3365_v62 = vld [vmem:[#allocation3 + $0x60] sm:$0xff]  ;;  %10584 = vmatmul.msk.f32.gmra.mxu0 %vm697_vm3, %v3399_v13  ;;  %v12570_v45 = vpop.permute.xlu0 %1235 }
 0x1a7   : > { %10616 = vmatmul.msk.f32.gmra.mxu1 %vm697_vm3, %v3365_v62  ;;  %10678 = vmatmul.msk.f32.gmra.mxu3 %vm697_vm3, %v3365_v62 }
 0x1a9   : > { %1771 = vperm.xlu1 %11344, %v12502_v43  }
 0x1aa   : > { %1002 = vperm.xlu2 %11345, %v12458_v19   ;;  %v848_v19 = vld [vmem:[%s12037_s20 + $0x80] sm:$0xff] }
 0x1ab   : > { %v3033_v61 = vpop.permute.xlu1 %3032  ;;  %881 = vst.msk [vmem:[#allocation2 + $0xd9] sm:$0xff] %vm651_vm0, %v848_v19 }
 0x1ac   : > { %v3163_v6 = vmul.f32 %v12230_v27, %v3033_v61  ;;  %v12573_v28 = vpop.permute.xlu2 %1498  ;;  %1260 = vperm.xlu0 %11343, %v12464_v26   ;;  %v12589_v26 = vld [vmem:[#allocation2 + $0xc8] sm:$0xff]  ;;  %v12630_v61 = vld [vmem:[#allocation9] ss:$0 sm:$0xff] }
 0x1ae   : > { %v3195_v29 = vadd.f32 %v3163_v6, %v2937_v20  ;;  %v2522_v14 = vpop.permute.xlu0 %2521  ;;  %v1100_v20 = vmul.f32 %v12630_v61, %v12517_v52 }
 0x1af   : > { %v2648_v42 = vmul.f32 %v12201_v17, %v2522_v14 }
 0x1b0   : > { %v3231_v31 = vadd.f32 %v12245_v35, %v3195_v29 }
 0x1b1   : > { %3057 = vperm.xlu1 %11344, %v12575_v16  }
 0x1b2   : > { %1518 = vperm.xlu2 %11345, %v12487_v53   ;;  %v3263_v7 = vmax.f32 %v3231_v31, 0.0  ;;  %v1615_v53 = vmul.f32 %v12148_v56, %v12484_v41  ;;  %v12637_v3 = vld [vmem:[#allocation2 + $0xd8] sm:$0xff] }
 0x1b3   : > { %v2263_v24 = vpop.permute.xlu1 %2262  ;;  %v12645_v52 = vld [vmem:[#allocation2 + $0xd9] sm:$0xff] }
 0x1b4   : > { %v3299_v51 = vadd.f32 %v12264_v32, %v3263_v7  ;;  %v12587_v46 = vpop.permute.xlu2 %2784  ;;  %v1647_v36 = vadd.f32 %v1615_v53, %v1389_v21  ;;  %2546 = vperm.xlu0 %11343, %v12589_v26   ;;  %v2389_v54 = vmul.f32 %v12189_v12, %v2263_v24 }
 0x1b6   : > { %3332 = vst.msk [vmem:[#allocation3 + $0x69] sm:$0xff] %vm697_vm3, %v3299_v51  ;;  %v1905_v49 = vadd.f32 %v1873_v25, %v1647_v36  ;;  %v2010_v41 = vpop.permute.xlu0 %2009 }
 0x1b7   : > { %v2132_v14 = vmul.f32 %v12180_v9, %v2010_v41 }
 0x1b8   : > { %v2163_v57 = vadd.f32 %v2131_v30, %v1905_v49 }
 0x1b9   : > { %2287 = vperm.xlu1 %11344, %v12532_v44  }
 0x1ba   : > { %2804 = vperm.xlu2 %11345, %v12595_v50   ;;  %v2421_v15 = vadd.f32 %v2389_v54, %v2163_v57 }
 0x1bb   : > { %v1752_v56 = vpop.permute.xlu1 %1751 }
 0x1bc   : > { %v12605_v22 = vpop.permute.xlu2 %987  ;;  %v2680_v33 = vadd.f32 %v2648_v42, %v2421_v15  ;;  %2034 = vperm.xlu0 %11343, %v12552_v34   ;;  %v1874_v7 = vmul.f32 %v12163_v0, %v1752_v56 }
 0x1bd   : > { %v3400_v8 = vld [vmem:[#allocation3 + $0x69] sm:$0xff] }
 0x1be   : > { %v3366_v60 = vld [vmem:[#allocation3 + $0x68] sm:$0xff]  ;;  %10585 = vmatmul.msk.f32.gmra.mxu0 %vm697_vm3, %v3400_v8  ;;  %v2938_v58 = vadd.f32 %v2906_v5, %v2680_v33  ;;  %v1241_v13 = vpop.permute.xlu0 %1240 }
 0x1bf   : > { %v3852_v37 = vld [vmem:[#allocation3 + $0x62] sm:$0xff]  ;;  %10617 = vmatmul.msk.f32.gmra.mxu1 %vm697_vm3, %v3366_v60  ;;  %10679 = vmatmul.msk.f32.gmra.mxu3 %vm697_vm3, %v3366_v60  ;;  %v3853_v4 = vld [vmem:[#allocation3 + $0x6a] sm:$0xff]  ;;  %v1359_v60 = vmul.f32 %v12622_v47, %v1241_v13  ;;  %v12692_v13 = vld [vmem:[#allocation9 + $0x4] ss:$0 sm:$0xff] }
 0x1c0   : > { %10648 = vmatmul.msk.f32.gmra.mxu2 %vm697_vm3, %v3852_v37  ;;  %v12668_v8 = vld [vmem:[#allocation2 + $0xda] sm:$0xff] }
 0x1c1   : > { %1776 = vperm.xlu1 %11344, %v12546_v2  }
 0x1c2   : > { %1007 = vperm.xlu2 %11345, %v12502_v43   ;;  %v1358_v43 = vmul.f32 %v12622_v47, %v12570_v45 }
 0x1c3   : > { %v3038_v10 = vpop.permute.xlu1 %3037 }
 0x1c4   : > { %v3164_v63 = vmul.f32 %v12230_v27, %v3038_v10  ;;  %v12617_v48 = vpop.permute.xlu2 %1503  ;;  %1265 = vperm.xlu0 %11343, %v12508_v59   ;;  %v1390_v39 = vadd.f32 %v1358_v43, %v1100_v20  ;;  %v12639_v59 = vld [vmem:[#allocation9 + $0x2] ss:$0 sm:$0xff]  ;;  %v12686_v10 = vld [vmem:[#allocation9 + $0x3] ss:$0 sm:$0xff] }
 0x1c6   : > { %v3196_v62 = vadd.f32 %v3164_v63, %v2938_v58  ;;  %v2527_v45 = vpop.permute.xlu0 %2526  ;;  %v12690_v58 = vld [vmem:[#allocation2 + $0xe1] sm:$0xff] }
 0x1c7   : > { %v2649_v0 = vmul.f32 %v12201_v17, %v2527_v45 }
 0x1c8   : > { %10649 = vmatmul.msk.f32.gmra.mxu2 %vm697_vm3, %v3853_v4  ;;  %v3232_v55 = vadd.f32 %v12245_v35, %v3196_v62  ;;  %v12699_v4 = vld [vmem:[#allocation9 + $0x5] ss:$0 sm:$0xff] }
 0x1c9   : > { %3062 = vperm.xlu1 %11344, %v12619_v11  }
 0x1ca   : > { %1523 = vperm.xlu2 %11345, %v12532_v44   ;;  %v3264_v6 = vmax.f32 %v3232_v55, 0.0  ;;  %v1616_v44 = vmul.f32 %v12639_v59, %v12530_v40 }
 0x1cb   : > { %v2268_v29 = vpop.permute.xlu1 %2267 }
 0x1cc   : > { %v3300_v31 = vadd.f32 %v12264_v32, %v3264_v6  ;;  %v12635_v19 = vpop.permute.xlu2 %2789  ;;  %v1648_v24 = vadd.f32 %v1616_v44, %v1390_v39  ;;  %2551 = vperm.xlu0 %11343, %v12637_v3   ;;  %v2390_v51 = vmul.f32 %v12189_v12, %v2268_v29  ;;  %v2907_v12 = vmul.f32 %v12222_v23, %v12587_v46  ;;  %v850_v23 = vld [vmem:[%s12037_s20 + $0x90] sm:$0xff]  ;;  %v12703_v6 = vld [vmem:[#allocation9 + $0x6] ss:$0 sm:$0xff] }
 0x1cd   : > { %883 = vst.msk [vmem:[#allocation2 + $0xf1] sm:$0xff] %vm651_vm0, %v850_v23 }
 0x1ce   : > { %3333 = vst.msk [vmem:[#allocation3 + $0x79] sm:$0xff] %vm697_vm3, %v3300_v31  ;;  %v1906_v21 = vadd.f32 %v1874_v7, %v1648_v24  ;;  %v2015_v18 = vpop.permute.xlu0 %2014 }
 0x1d0   : > { %v2164_v40 = vadd.f32 %v2132_v14, %v1906_v21  ;;  %v12715_v21 = vld [vmem:[#allocation9 + $0x7] ss:$0 sm:$0xff] }
 0x1d1   : > { %2292 = vperm.xlu1 %11344, %v12575_v16  }
 0x1d2   : > { %2809 = vperm.xlu2 %11345, %v12645_v52   ;;  %v2422_v49 = vadd.f32 %v2390_v51, %v2164_v40  ;;  %v2908_v51 = vmul.f32 %v12715_v21, %v12635_v19 }
 0x1d3   : > { %v1757_v53 = vpop.permute.xlu1 %1756 }
 0x1d4   : > { %v12653_v25 = vpop.permute.xlu2 %992  ;;  %v2681_v9 = vadd.f32 %v2649_v0, %v2422_v49  ;;  %2039 = vperm.xlu0 %11343, %v12595_v50   ;;  %v12719_v0 = vld [vmem:[#allocation9 + $0x8] ss:$0 sm:$0xff] }
 0x1d5   : > { %v3401_v36 = vld [vmem:[#allocation3 + $0x79] sm:$0xff] }
 0x1d6   : > { %v3367_v30 = vld [vmem:[#allocation3 + $0x78] sm:$0xff]  ;;  %10586 = vmatmul.msk.f32.gmra.mxu0 %vm697_vm3, %v3401_v36  ;;  %v2939_v54 = vadd.f32 %v2907_v12, %v2681_v9  ;;  %v12666_v57 = vpop.permute.xlu0 %1245 }
 0x1d7   : > { %10618 = vmatmul.msk.f32.gmra.mxu1 %vm697_vm3, %v3367_v30  ;;  %10680 = vmatmul.msk.f32.gmra.mxu3 %vm697_vm3, %v3367_v30  ;;  %v12724_v12 = vld [vmem:[#allocation2 + $0xe2] sm:$0xff] }
 0x1d9   : > { %1781 = vperm.xlu1 %11344, %v12589_v26  }
 0x1da   : > { %1012 = vperm.xlu2 %11345, %v12546_v2  }
 0x1db   : > { %v3043_v17 = vpop.permute.xlu1 %3042 }
 0x1dc   : > { %v3165_v56 = vmul.f32 %v12230_v27, %v3043_v17  ;;  %v12664_v41 = vpop.permute.xlu2 %1508  ;;  %1270 = vperm.xlu0 %11343, %v12552_v34   ;;  %v1101_v27 = vmul.f32 %v12630_v61, %v12560_v38  ;;  %v12682_v34 = vld [vmem:[#allocation2 + $0xe0] sm:$0xff]  ;;  %v1875_v38 = vmul.f32 %v12686_v10, %v1757_v53  ;;  %v12729_v17 = vld [vmem:[#allocation11] ss:$0 sm:$0xff] }
 0x1de   : > { %v3197_v42 = vadd.f32 %v3165_v56, %v2939_v54  ;;  %v1391_v15 = vadd.f32 %v1359_v60, %v1101_v27  ;;  %v1102_v54 = vmul.f32 %v12630_v61, %v12605_v22  ;;  %v12745_v27 = vld [vmem:[#allocation2 + $0xf0] sm:$0xff] }
 0x1e0   : > { %v3233_v37 = vadd.f32 %v12245_v35, %v3197_v42  ;;  %v2532_v35 = vpop.permute.xlu0 %2531 }
 0x1e1   : > { %3067 = vperm.xlu1 %11344, %v12668_v8   ;;  %v2650_v29 = vmul.f32 %v12703_v6, %v2532_v35 }
 0x1e2   : > { %1528 = vperm.xlu2 %11345, %v12575_v16   ;;  %v3265_v2 = vmax.f32 %v3233_v37, 0.0  ;;  %v1617_v16 = vmul.f32 %v12639_v59, %v12573_v28  ;;  %v851_v28 = vld [vmem:[%s12037_s20 + $0x98] sm:$0xff] }
 0x1e3   : > { %v2273_v46 = vpop.permute.xlu1 %2272  ;;  %884 = vst.msk [vmem:[#allocation2 + $0xf9] sm:$0xff] %vm651_vm0, %v851_v28 }
 0x1e4   : > { %v3301_v33 = vadd.f32 %v12264_v32, %v3265_v2  ;;  %v12680_v5 = vpop.permute.xlu2 %2794  ;;  %v1649_v63 = vadd.f32 %v1617_v16, %v1391_v15  ;;  %v2133_v32 = vmul.f32 %v12692_v13, %v2015_v18  ;;  %2556 = vperm.xlu0 %11343, %v12682_v34   ;;  %v2391_v43 = vmul.f32 %v12699_v4, %v2273_v46  ;;  %v12751_v2 = vld [vmem:[#allocation2 + $0xf1] sm:$0xff] }
 0x1e6   : > { %3334 = vst.msk [vmem:[#allocation3 + $0x81] sm:$0xff] %vm697_vm3, %v3301_v33  ;;  %v1907_v62 = vadd.f32 %v1875_v38, %v1649_v63 }
 0x1e8   : > { %v2165_v20 = vadd.f32 %v2133_v32, %v1907_v62  ;;  %v2020_v7 = vpop.permute.xlu0 %2019 }
 0x1e9   : > { %2297 = vperm.xlu1 %11344, %v12619_v11   ;;  %v2134_v15 = vmul.f32 %v12692_v13, %v2020_v7 }
 0x1ea   : > { %2814 = vperm.xlu2 %11345, %v12690_v58   ;;  %v2423_v24 = vadd.f32 %v2391_v43, %v2165_v20  ;;  %v2909_v20 = vmul.f32 %v12715_v21, %v12680_v5  ;;  %v1103_v5 = vmul.f32 %v12630_v61, %v12653_v25  ;;  %v12792_v25 = vld [vmem:[#allocation2 + $0xf9] sm:$0xff] }
 0x1eb   : > { %v1762_v55 = vpop.permute.xlu1 %1761 }
 0x1ec   : > { %v12706_v39 = vpop.permute.xlu2 %997  ;;  %v2682_v14 = vadd.f32 %v2650_v29, %v2423_v24  ;;  %2044 = vperm.xlu0 %11343, %v12645_v52   ;;  %v1876_v22 = vmul.f32 %v12686_v10, %v1762_v55 }
 0x1ed   : > { %v3402_v31 = vld [vmem:[#allocation3 + $0x81] sm:$0xff] }
 0x1ee   : > { %v3368_v45 = vld [vmem:[#allocation3 + $0x80] sm:$0xff]  ;;  %10587 = vmatmul.msk.f32.gmra.mxu0 %vm697_vm3, %v3402_v31  ;;  %v2940_v40 = vadd.f32 %v2908_v51, %v2682_v14 }
 0x1ef   : > { %v3854_v44 = vld [vmem:[#allocation3 + $0x7a] sm:$0xff]  ;;  %10619 = vmatmul.msk.f32.gmra.mxu1 %vm697_vm3, %v3368_v45  ;;  %10681 = vmatmul.msk.f32.gmra.mxu3 %vm697_vm3, %v3368_v45  ;;  %v3855_v9 = vld [vmem:[#allocation3 + $0x82] sm:$0xff] }
 0x1f0   : > { %10650 = vmatmul.msk.f32.gmra.mxu2 %vm697_vm3, %v3854_v44  ;;  %v1251_v18 = vpop.permute.xlu0 %1250  ;;  %v12772_v14 = vld [vmem:[#allocation2 + $0xf2] sm:$0xff] }
 0x1f1   : > { %1786 = vperm.xlu1 %11344, %v12637_v3   ;;  %v1361_v51 = vmul.f32 %v12622_v47, %v1251_v18 }
 0x1f2   : > { %1017 = vperm.xlu2 %11345, %v12589_v26   ;;  %v1360_v26 = vmul.f32 %v12622_v47, %v12666_v57  ;;  %v12740_v57 = vld [vmem:[%s16316_s3] ss:$0 sm:$0xff] }
 0x1f3   : > { %v3048_v53 = vpop.permute.xlu1 %3047 }
 0x1f4   : > { %v3166_v36 = vmul.f32 %v12719_v0, %v3048_v53  ;;  %v12722_v30 = vpop.permute.xlu2 %1513  ;;  %1275 = vperm.xlu0 %11343, %v12595_v50   ;;  %v1392_v60 = vadd.f32 %v1360_v26, %v1102_v54 }
 0x1f6   : > { %v3198_v49 = vadd.f32 %v3166_v36, %v2940_v40 }
 0x1f8   : > { %10651 = vmatmul.msk.f32.gmra.mxu2 %vm697_vm3, %v3855_v9  ;;  %v3234_v19 = vadd.f32 %v12729_v17, %v3198_v49  ;;  %v2537_v50 = vpop.permute.xlu0 %2536  ;;  %v1393_v49 = vadd.f32 %v1361_v51, %v1103_v5 }
 0x1f9   : > { %3072 = vperm.xlu1 %11344, %v12724_v12   ;;  %v2651_v38 = vmul.f32 %v12703_v6, %v2537_v50 }
 0x1fa   : > { %1533 = vperm.xlu2 %11345, %v12619_v11   ;;  %v3266_v56 = vmax.f32 %v3234_v19, 0.0  ;;  %v1618_v11 = vmul.f32 %v12639_v59, %v12617_v48 }
 0x1fb   : > { %v2278_v42 = vpop.permute.xlu1 %2277 }
 0x1fc   : > { %v3302_v37 = vadd.f32 %v12740_v57, %v3266_v56  ;;  %v12743_v23 = vpop.permute.xlu2 %2799  ;;  %v1650_v46 = vadd.f32 %v1618_v11, %v1392_v60  ;;  %2561 = vperm.xlu0 %11343, %v12745_v27   ;;  %v2392_v35 = vmul.f32 %v12699_v4, %v2278_v42  ;;  %v853_v42 = vld [vmem:[%s12037_s20 + $0xa8] sm:$0xff] }
 0x1fd   : > { %886 = vst.msk [vmem:[#allocation2 + $0x111] sm:$0xff] %vm651_vm0, %v853_v42 }
 0x1fe   : > { %3335 = vst.msk [vmem:[#allocation3 + $0x91] sm:$0xff] %vm697_vm3, %v3302_v37  ;;  %v1908_v33 = vadd.f32 %v1876_v22, %v1650_v46 }
 0x200   : > { %v2166_v48 = vadd.f32 %v2134_v15, %v1908_v33  ;;  %v2025_v62 = vpop.permute.xlu0 %2024 }
 0x201   : > { %2302 = vperm.xlu1 %11344, %v12668_v8   ;;  %v2135_v56 = vmul.f32 %v12692_v13, %v2025_v62 }
 0x202   : > { %2819 = vperm.xlu2 %11345, %v12751_v2   ;;  %v2424_v43 = vadd.f32 %v2392_v35, %v2166_v48 }
 0x203   : > { %v1767_v16 = vpop.permute.xlu1 %1766 }
 0x204   : > { %v12759_v63 = vpop.permute.xlu2 %1002  ;;  %v2683_v55 = vadd.f32 %v2651_v38, %v2424_v43  ;;  %2049 = vperm.xlu0 %11343, %v12690_v58   ;;  %v1877_v19 = vmul.f32 %v12686_v10, %v1767_v16  ;;  %v2910_v38 = vmul.f32 %v12715_v21, %v12743_v23  ;;  %v1104_v23 = vmul.f32 %v12630_v61, %v12706_v39 }
 0x205   : > { %v3403_v32 = vld [vmem:[#allocation3 + $0x91] sm:$0xff] }
 0x206   : > { %v3369_v28 = vld [vmem:[#allocation3 + $0x90] sm:$0xff]  ;;  %10588 = vmatmul.msk.f32.gmra.mxu0 %vm697_vm3, %v3403_v32  ;;  %v2941_v31 = vadd.f32 %v2909_v20, %v2683_v55 }
 0x207   : > { %10620 = vmatmul.msk.f32.gmra.mxu1 %vm697_vm3, %v3369_v28  ;;  %10682 = vmatmul.msk.f32.gmra.mxu3 %vm697_vm3, %v3369_v28 }
 0x208   : > { %v1256_v7 = vpop.permute.xlu0 %1255 }
 0x209   : > { %1791 = vperm.xlu1 %11344, %v12682_v34  }
 0x20a   : > { %1022 = vperm.xlu2 %11345, %v12637_v3   ;;  %v852_v3 = vld [vmem:[%s12037_s20 + $0xa0] sm:$0xff] }
 0x20b   : > { %v3053_v29 = vpop.permute.xlu1 %3052  ;;  %885 = vst.msk [vmem:[#allocation2 + $0x109] sm:$0xff] %vm651_vm0, %v852_v3 }
 0x20c   : > { %v3167_v45 = vmul.f32 %v12719_v0, %v3053_v29  ;;  %v12770_v44 = vpop.permute.xlu2 %1518  ;;  %1280 = vperm.xlu0 %11343, %v12645_v52   ;;  %v12786_v52 = vld [vmem:[#allocation2 + $0xf8] sm:$0xff] }
 0x20e   : > { %v3199_v24 = vadd.f32 %v3167_v45, %v2941_v31  ;;  %v12816_v31 = vld [vmem:[#allocation2 + $0xfa] sm:$0xff]  ;;  %v1362_v45 = vmul.f32 %v12622_v47, %v1256_v7 }
 0x210   : > { %v3235_v53 = vadd.f32 %v12729_v17, %v3199_v24  ;;  %v2542_v26 = vpop.permute.xlu0 %2541 }
 0x211   : > { %3077 = vperm.xlu1 %11344, %v12772_v14   ;;  %v2652_v11 = vmul.f32 %v12703_v6, %v2542_v26 }
 0x212   : > { %1538 = vperm.xlu2 %11345, %v12668_v8   ;;  %v3267_v40 = vmax.f32 %v3235_v53, 0.0  ;;  %v1619_v8 = vmul.f32 %v12639_v59, %v12664_v41  ;;  %v1394_v53 = vadd.f32 %v1362_v45, %v1104_v23  ;;  %v12829_v7 = vld [vmem:[#allocation2 + $0x108] sm:$0xff] }
 0x213   : > { %v2283_v36 = vpop.permute.xlu1 %2282 }
 0x214   : > { %v3303_v18 = vadd.f32 %v12740_v57, %v3267_v40  ;;  %v12784_v9 = vpop.permute.xlu2 %2804  ;;  %v1651_v54 = vadd.f32 %v1619_v8, %v1393_v49  ;;  %2566 = vperm.xlu0 %11343, %v12786_v52   ;;  %v2393_v37 = vmul.f32 %v12699_v4, %v2283_v36 }
 0x216   : > { %3336 = vst.msk [vmem:[#allocation3 + $0x99] sm:$0xff] %vm697_vm3, %v3303_v18  ;;  %v1909_v60 = vadd.f32 %v1877_v19, %v1651_v54 }
 0x218   : > { %v2167_v50 = vadd.f32 %v2135_v56, %v1909_v60  ;;  %v2030_v35 = vpop.permute.xlu0 %2029 }
 0x219   : > { %2307 = vperm.xlu1 %11344, %v12724_v12   ;;  %v2136_v49 = vmul.f32 %v12692_v13, %v2030_v35 }
 0x21a   : > { %2824 = vperm.xlu2 %11345, %v12792_v25   ;;  %v2425_v16 = vadd.f32 %v2393_v37, %v2167_v50  ;;  %v2911_v50 = vmul.f32 %v12715_v21, %v12784_v9  ;;  %v1105_v9 = vmul.f32 %v12630_v61, %v12759_v63  ;;  %v12876_v63 = vld [vmem:[#allocation2 + $0x111] sm:$0xff] }
 0x21b   : > { %v1772_v41 = vpop.permute.xlu1 %1771 }
 0x21c   : > { %v12802_v22 = vpop.permute.xlu2 %1007  ;;  %v2684_v48 = vadd.f32 %v2652_v11, %v2425_v16  ;;  %2054 = vperm.xlu0 %11343, %v12751_v2   ;;  %v1878_v36 = vmul.f32 %v12686_v10, %v1772_v41 }
 0x21d   : > { %v3404_v46 = vld [vmem:[#allocation3 + $0x99] sm:$0xff] }
 0x21e   : > { %v3370_v15 = vld [vmem:[#allocation3 + $0x98] sm:$0xff]  ;;  %10589 = vmatmul.msk.f32.gmra.mxu0 %vm697_vm3, %v3404_v46  ;;  %v2942_v28 = vadd.f32 %v2910_v38, %v2684_v48 }
 0x21f   : > { %v3856_v33 = vld [vmem:[#allocation3 + $0x92] sm:$0xff]  ;;  %10621 = vmatmul.msk.f32.gmra.mxu1 %vm697_vm3, %v3370_v15  ;;  %10683 = vmatmul.msk.f32.gmra.mxu3 %vm697_vm3, %v3370_v15  ;;  %v3857_v29 = vld [vmem:[#allocation3 + $0x9a] sm:$0xff] }
 0x220   : > { %10652 = vmatmul.msk.f32.gmra.mxu2 %vm697_vm3, %v3856_v33  ;;  %v1261_v55 = vpop.permute.xlu0 %1260  ;;  %v12856_v48 = vld [vmem:[#allocation2 + $0x10a] sm:$0xff] }
 0x221   : > { %1796 = vperm.xlu1 %11344, %v12745_v27   ;;  %v1363_v38 = vmul.f32 %v12622_v47, %v1261_v55 }
 0x222   : > { %1027 = vperm.xlu2 %11345, %v12682_v34  }
 0x223   : > { %v3058_v32 = vpop.permute.xlu1 %3057 }
 0x224   : > { %v3168_v62 = vmul.f32 %v12719_v0, %v3058_v32  ;;  %v12814_v43 = vpop.permute.xlu2 %1523  ;;  %1285 = vperm.xlu0 %11343, %v12690_v58   ;;  %v1620_v58 = vmul.f32 %v12639_v59, %v12722_v30 }
 0x226   : > { %v3200_v20 = vadd.f32 %v3168_v62, %v2942_v28  ;;  %v1652_v39 = vadd.f32 %v1620_v58, %v1394_v53 }
 0x228   : > { %10653 = vmatmul.msk.f32.gmra.mxu2 %vm697_vm3, %v3857_v29  ;;  %v3236_v34 = vadd.f32 %v12729_v17, %v3200_v20  ;;  %v2547_v40 = vpop.permute.xlu0 %2546  ;;  %v1910_v18 = vadd.f32 %v1878_v36, %v1652_v39  ;;  %v1395_v20 = vadd.f32 %v1363_v38, %v1105_v9 }
 0x229   : > { %3082 = vperm.xlu1 %11344, %v12816_v31   ;;  %v2653_v19 = vmul.f32 %v12703_v6, %v2547_v40 }
 0x22a   : > { %1543 = vperm.xlu2 %11345, %v12724_v12   ;;  %v3268_v24 = vmax.f32 %v3236_v34, 0.0  ;;  %v12835_v12 = vld [vmem:[#allocation2 + $0x109] sm:$0xff]  ;;  %v2168_v30 = vadd.f32 %v2136_v49, %v1910_v18 }
 0x22b   : > { %v2288_v51 = vpop.permute.xlu1 %2287 }
 0x22c   : > { %v3304_v3 = vadd.f32 %v12740_v57, %v3268_v24  ;;  %v12827_v5 = vpop.permute.xlu2 %2809  ;;  %2571 = vperm.xlu0 %11343, %v12829_v7   ;;  %v2394_v26 = vmul.f32 %v12699_v4, %v2288_v51  ;;  %v855_v51 = vld [vmem:[%s12037_s20 + $0xb8] sm:$0xff] }
 0x22d   : > { %888 = vst.msk [vmem:[#allocation2 + $0x129] sm:$0xff] %vm651_vm0, %v855_v51 }
 0x22e   : > { %3337 = vst.msk [vmem:[#allocation3 + $0xa9] sm:$0xff] %vm697_vm3, %v3304_v3  ;;  %v2426_v37 = vadd.f32 %v2394_v26, %v2168_v30 }
 0x230   : > { %v2035_v60 = vpop.permute.xlu0 %2034  ;;  %v2685_v41 = vadd.f32 %v2653_v19, %v2426_v37  ;;  %v2912_v19 = vmul.f32 %v12715_v21, %v12827_v5  ;;  %v1106_v5 = vmul.f32 %v12630_v61, %v12802_v22 }
 0x231   : > { %2312 = vperm.xlu1 %11344, %v12772_v14   ;;  %v2137_v24 = vmul.f32 %v12692_v13, %v2035_v60 }
 0x232   : > { %2829 = vperm.xlu2 %11345, %v12835_v12   ;;  %v2943_v46 = vadd.f32 %v2911_v50, %v2685_v41 }
 0x233   : > { %v1777_v8 = vpop.permute.xlu1 %1776 }
 0x234   : > { %v12843_v54 = vpop.permute.xlu2 %1012  ;;  %2059 = vperm.xlu0 %11343, %v12792_v25   ;;  %v1879_v34 = vmul.f32 %v12686_v10, %v1777_v8 }
 0x235   : > { %v3405_v56 = vld [vmem:[#allocation3 + $0xa9] sm:$0xff] }
 0x236   : > { %v3371_v42 = vld [vmem:[#allocation3 + $0xa8] sm:$0xff]  ;;  %10590 = vmatmul.msk.f32.gmra.mxu0 %vm697_vm3, %v3405_v56 }
 0x237   : > { %10622 = vmatmul.msk.f32.gmra.mxu1 %vm697_vm3, %v3371_v42  ;;  %10684 = vmatmul.msk.f32.gmra.mxu3 %vm697_vm3, %v3371_v42 }
 0x238   : > { %v1266_v35 = vpop.permute.xlu0 %1265 }
 0x239   : > { %1801 = vperm.xlu1 %11344, %v12786_v52  }
 0x23a   : > { %1032 = vperm.xlu2 %11345, %v12745_v27   ;;  %v854_v27 = vld [vmem:[%s12037_s20 + $0xb0] sm:$0xff] }
 0x23b   : > { %v3063_v11 = vpop.permute.xlu1 %3062  ;;  %887 = vst.msk [vmem:[#allocation2 + $0x121] sm:$0xff] %vm651_vm0, %v854_v27 }
 0x23c   : > { %v3169_v15 = vmul.f32 %v12719_v0, %v3063_v11  ;;  %v12854_v33 = vpop.permute.xlu2 %1528  ;;  %1290 = vperm.xlu0 %11343, %v12751_v2   ;;  %v12870_v2 = vld [vmem:[#allocation2 + $0x110] sm:$0xff] }
 0x23e   : > { %v3201_v16 = vadd.f32 %v3169_v15, %v2943_v46  ;;  %v12900_v46 = vld [vmem:[#allocation2 + $0x112] sm:$0xff]  ;;  %v1364_v15 = vmul.f32 %v12622_v47, %v1266_v35 }
 0x240   : > { %v3237_v32 = vadd.f32 %v12729_v17, %v3201_v16  ;;  %v2552_v45 = vpop.permute.xlu0 %2551 }
 0x241   : > { %3087 = vperm.xlu1 %11344, %v12856_v48   ;;  %v2654_v58 = vmul.f32 %v12703_v6, %v2552_v45 }
 0x242   : > { %1548 = vperm.xlu2 %11345, %v12772_v14   ;;  %v3269_v28 = vmax.f32 %v3237_v32, 0.0  ;;  %v1621_v14 = vmul.f32 %v12639_v59, %v12770_v44  ;;  %v1396_v32 = vadd.f32 %v1364_v15, %v1106_v5  ;;  %v12913_v35 = vld [vmem:[#allocation2 + $0x120] sm:$0xff] }
 0x243   : > { %v2293_v62 = vpop.permute.xlu1 %2292 }
 0x244   : > { %v3305_v55 = vadd.f32 %v12740_v57, %v3269_v28  ;;  %v12868_v29 = vpop.permute.xlu2 %2814  ;;  %v1653_v23 = vadd.f32 %v1621_v14, %v1395_v20  ;;  %2576 = vperm.xlu0 %11343, %v12870_v2   ;;  %v2395_v3 = vmul.f32 %v12699_v4, %v2293_v62 }
 0x246   : > { %3338 = vst.msk [vmem:[#allocation3 + $0xb1] sm:$0xff] %vm697_vm3, %v3305_v55  ;;  %v1911_v53 = vadd.f32 %v1879_v34, %v1653_v23 }
 0x248   : > { %v2169_v40 = vadd.f32 %v2137_v24, %v1911_v53  ;;  %v2040_v26 = vpop.permute.xlu0 %2039 }
 0x249   : > { %2317 = vperm.xlu1 %11344, %v12816_v31   ;;  %v2138_v20 = vmul.f32 %v12692_v13, %v2040_v26 }
 0x24a   : > { %2834 = vperm.xlu2 %11345, %v12876_v63   ;;  %v2427_v8 = vadd.f32 %v2395_v3, %v2169_v40  ;;  %v2913_v40 = vmul.f32 %v12715_v21, %v12868_v29  ;;  %v1107_v29 = vmul.f32 %v12630_v61, %v12843_v54  ;;  %v12960_v54 = vld [vmem:[#allocation2 + $0x129] sm:$0xff] }
 0x24b   : > { %v1782_v44 = vpop.permute.xlu1 %1781 }
 0x24c   : > { %v12886_v36 = vpop.permute.xlu2 %1017  ;;  %v2686_v30 = vadd.f32 %v2654_v58, %v2427_v8  ;;  %2064 = vperm.xlu0 %11343, %v12835_v12   ;;  %v1880_v62 = vmul.f32 %v12686_v10, %v1782_v44 }
 0x24d   : > { %v3406_v39 = vld [vmem:[#allocation3 + $0xb1] sm:$0xff] }
 0x24e   : > { %v3372_v49 = vld [vmem:[#allocation3 + $0xb0] sm:$0xff]  ;;  %10591 = vmatmul.msk.f32.gmra.mxu0 %vm697_vm3, %v3406_v39  ;;  %v2944_v42 = vadd.f32 %v2912_v19, %v2686_v30 }
 0x24f   : > { %v3858_v18 = vld [vmem:[#allocation3 + $0xaa] sm:$0xff]  ;;  %10623 = vmatmul.msk.f32.gmra.mxu1 %vm697_vm3, %v3372_v49  ;;  %10685 = vmatmul.msk.f32.gmra.mxu3 %vm697_vm3, %v3372_v49  ;;  %v3859_v11 = vld [vmem:[#allocation3 + $0xb2] sm:$0xff] }
 0x250   : > { %10654 = vmatmul.msk.f32.gmra.mxu2 %vm697_vm3, %v3858_v18  ;;  %v1271_v41 = vpop.permute.xlu0 %1270  ;;  %v12940_v30 = vld [vmem:[#allocation2 + $0x122] sm:$0xff] }
 0x251   : > { %1806 = vperm.xlu1 %11344, %v12829_v7   ;;  %v1365_v19 = vmul.f32 %v12622_v47, %v1271_v41 }
 0x252   : > { %1037 = vperm.xlu2 %11345, %v12786_v52  }
 0x253   : > { %v3068_v56 = vpop.permute.xlu1 %3067 }
 0x254   : > { %v3170_v60 = vmul.f32 %v12719_v0, %v3068_v56  ;;  %v12898_v37 = vpop.permute.xlu2 %1533  ;;  %1295 = vperm.xlu0 %11343, %v12792_v25   ;;  %v1622_v25 = vmul.f32 %v12639_v59, %v12814_v43 }
 0x256   : > { %v3202_v50 = vadd.f32 %v3170_v60, %v2944_v42  ;;  %v1654_v22 = vadd.f32 %v1622_v25, %v1396_v32 }
 0x258   : > { %10655 = vmatmul.msk.f32.gmra.mxu2 %vm697_vm3, %v3859_v11  ;;  %v3238_v52 = vadd.f32 %v12729_v17, %v3202_v50  ;;  %v2557_v28 = vpop.permute.xlu0 %2556  ;;  %v1912_v55 = vadd.f32 %v1880_v62, %v1654_v22  ;;  %v1397_v50 = vadd.f32 %v1365_v19, %v1107_v29 }
 0x259   : > { %3092 = vperm.xlu1 %11344, %v12900_v46   ;;  %v2655_v34 = vmul.f32 %v12703_v6, %v2557_v28 }
 0x25a   : > { %1553 = vperm.xlu2 %11345, %v12816_v31   ;;  %v3270_v16 = vmax.f32 %v3238_v52, 0.0  ;;  %v12919_v31 = vld [vmem:[#allocation2 + $0x121] sm:$0xff]  ;;  %v2170_v43 = vadd.f32 %v2138_v20, %v1912_v55 }
 0x25b   : > { %v2298_v38 = vpop.permute.xlu1 %2297 }
 0x25c   : > { %v3306_v27 = vadd.f32 %v12740_v57, %v3270_v16  ;;  %v12911_v9 = vpop.permute.xlu2 %2819  ;;  %2581 = vperm.xlu0 %11343, %v12913_v35   ;;  %v2396_v45 = vmul.f32 %v12699_v4, %v2298_v38  ;;  %v857_v38 = vld [vmem:[%s12037_s20 + $0xc8] sm:$0xff] }
 0x25d   : > { %890 = vst.msk [vmem:[#allocation2 + $0x141] sm:$0xff] %vm651_vm0, %v857_v38 }
 0x25e   : > { %3339 = vst.msk [vmem:[#allocation3 + $0xc1] sm:$0xff] %vm697_vm3, %v3306_v27  ;;  %v2428_v3 = vadd.f32 %v2396_v45, %v2170_v43 }
 0x260   : > { %v2045_v53 = vpop.permute.xlu0 %2044  ;;  %v2687_v44 = vadd.f32 %v2655_v34, %v2428_v3  ;;  %v2914_v34 = vmul.f32 %v12715_v21, %v12911_v9  ;;  %v1108_v9 = vmul.f32 %v12630_v61, %v12886_v36 }
 0x261   : > { %2322 = vperm.xlu1 %11344, %v12856_v48   ;;  %v2139_v16 = vmul.f32 %v12692_v13, %v2045_v53 }
 0x262   : > { %2839 = vperm.xlu2 %11345, %v12919_v31   ;;  %v2945_v39 = vadd.f32 %v2913_v40, %v2687_v44 }
 0x263   : > { %v1787_v14 = vpop.permute.xlu1 %1786 }
 0x264   : > { %v12927_v23 = vpop.permute.xlu2 %1022  ;;  %2069 = vperm.xlu0 %11343, %v12876_v63   ;;  %v1881_v52 = vmul.f32 %v12686_v10, %v1787_v14 }
 0x265   : > { %v3407_v24 = vld [vmem:[#allocation3 + $0xc1] sm:$0xff] }
 0x266   : > { %v3373_v51 = vld [vmem:[#allocation3 + $0xc0] sm:$0xff]  ;;  %10592 = vmatmul.msk.f32.gmra.mxu0 %vm697_vm3, %v3407_v24 }
 0x267   : > { %10624 = vmatmul.msk.f32.gmra.mxu1 %vm697_vm3, %v3373_v51  ;;  %10686 = vmatmul.msk.f32.gmra.mxu3 %vm697_vm3, %v3373_v51 }
 0x268   : > { %v1276_v26 = vpop.permute.xlu0 %1275 }
 0x269   : > { %1811 = vperm.xlu1 %11344, %v12870_v2  }
 0x26a   : > { %1042 = vperm.xlu2 %11345, %v12829_v7   ;;  %v856_v7 = vld [vmem:[%s12037_s20 + $0xc0] sm:$0xff] }
 0x26b   : > { %v3073_v58 = vpop.permute.xlu1 %3072  ;;  %889 = vst.msk [vmem:[#allocation2 + $0x139] sm:$0xff] %vm651_vm0, %v856_v7 }
 0x26c   : > { %v3171_v49 = vmul.f32 %v12719_v0, %v3073_v58  ;;  %v12938_v18 = vpop.permute.xlu2 %1538  ;;  %1300 = vperm.xlu0 %11343, %v12835_v12   ;;  %v12954_v12 = vld [vmem:[#allocation2 + $0x128] sm:$0xff] }
 0x26e   : > { %v3203_v8 = vadd.f32 %v3171_v49, %v2945_v39  ;;  %v12984_v39 = vld [vmem:[#allocation2 + $0x12a] sm:$0xff]  ;;  %v1366_v49 = vmul.f32 %v12622_v47, %v1276_v26 }
 0x270   : > { %v3239_v56 = vadd.f32 %v12729_v17, %v3203_v8  ;;  %v2562_v15 = vpop.permute.xlu0 %2561 }
 0x271   : > { %3097 = vperm.xlu1 %11344, %v12940_v30   ;;  %v2656_v25 = vmul.f32 %v12703_v6, %v2562_v15 }
 0x272   : > { %1558 = vperm.xlu2 %11345, %v12856_v48   ;;  %v3271_v42 = vmax.f32 %v3239_v56, 0.0  ;;  %v1623_v48 = vmul.f32 %v12639_v59, %v12854_v33  ;;  %v1398_v56 = vadd.f32 %v1366_v49, %v1108_v9  ;;  %v12997_v26 = vld [vmem:[#allocation2 + $0x138] sm:$0xff]  ;;  %v859_v9 = vld [vmem:[%s12037_s20 + $0xd8] sm:$0xff] }
 0x273   : > { %v2303_v60 = vpop.permute.xlu1 %2302  ;;  %892 = vst.msk [vmem:[#allocation2 + $0x159] sm:$0xff] %vm651_vm0, %v859_v9 }
 0x274   : > { %v3307_v41 = vadd.f32 %v12740_v57, %v3271_v42  ;;  %v12952_v11 = vpop.permute.xlu2 %2824  ;;  %v1655_v5 = vadd.f32 %v1623_v48, %v1397_v50  ;;  %2586 = vperm.xlu0 %11343, %v12954_v12   ;;  %v2397_v27 = vmul.f32 %v12699_v4, %v2303_v60 }
 0x276   : > { %3340 = vst.msk [vmem:[#allocation3 + $0xc9] sm:$0xff] %vm697_vm3, %v3307_v41  ;;  %v1913_v32 = vadd.f32 %v1881_v52, %v1655_v5 }
 0x278   : > { %v2171_v28 = vadd.f32 %v2139_v16, %v1913_v32  ;;  %v2050_v45 = vpop.permute.xlu0 %2049 }
 0x279   : > { %2327 = vperm.xlu1 %11344, %v12900_v46   ;;  %v2140_v50 = vmul.f32 %v12692_v13, %v2050_v45 }
 0x27a   : > { %2844 = vperm.xlu2 %11345, %v12960_v54   ;;  %v2429_v14 = vadd.f32 %v2397_v27, %v2171_v28  ;;  %v2915_v28 = vmul.f32 %v12715_v21, %v12952_v11  ;;  %v1109_v11 = vmul.f32 %v12630_v61, %v12927_v23  ;;  %v13044_v61 = vld [vmem:[#allocation2 + $0x141] sm:$0xff] }
 0x27b   : > { %v1792_v33 = vpop.permute.xlu1 %1791 }
 0x27c   : > { %v12970_v62 = vpop.permute.xlu2 %1027  ;;  %v2688_v43 = vadd.f32 %v2656_v25, %v2429_v14  ;;  %2074 = vperm.xlu0 %11343, %v12919_v31   ;;  %v1882_v60 = vmul.f32 %v12686_v10, %v1792_v33 }
 0x27d   : > { %v3408_v22 = vld [vmem:[#allocation3 + $0xc9] sm:$0xff] }
 0x27e   : > { %v3374_v20 = vld [vmem:[#allocation3 + $0xc8] sm:$0xff]  ;;  %10593 = vmatmul.msk.f32.gmra.mxu0 %vm697_vm3, %v3408_v22  ;;  %v2946_v51 = vadd.f32 %v2914_v34, %v2688_v43 }
 0x27f   : > { %v3860_v55 = vld [vmem:[#allocation3 + $0xc2] sm:$0xff]  ;;  %10625 = vmatmul.msk.f32.gmra.mxu1 %vm697_vm3, %v3374_v20  ;;  %10687 = vmatmul.msk.f32.gmra.mxu3 %vm697_vm3, %v3374_v20  ;;  %v3861_v58 = vld [vmem:[#allocation3 + $0xca] sm:$0xff] }
 0x280   : > { %10656 = vmatmul.msk.f32.gmra.mxu2 %vm697_vm3, %v3860_v55  ;;  %v1281_v44 = vpop.permute.xlu0 %1280  ;;  %v13024_v43 = vld [vmem:[#allocation2 + $0x13a] sm:$0xff] }
 0x281   : > { %1816 = vperm.xlu1 %11344, %v12913_v35   ;;  %v1367_v34 = vmul.f32 %v12622_v47, %v1281_v44 }
 0x282   : > { %1047 = vperm.xlu2 %11345, %v12870_v2  }
 0x283   : > { %v3078_v24 = vpop.permute.xlu1 %3077 }
 0x284   : > { %v3172_v53 = vmul.f32 %v12719_v0, %v3078_v24  ;;  %v12982_v3 = vpop.permute.xlu2 %1543  ;;  %1305 = vperm.xlu0 %11343, %v12876_v63   ;;  %v1624_v63 = vmul.f32 %v12639_v59, %v12898_v37 }
 0x286   : > { %v3204_v40 = vadd.f32 %v3172_v53, %v2946_v51  ;;  %v1656_v36 = vadd.f32 %v1624_v63, %v1398_v56 }
 0x288   : > { %10657 = vmatmul.msk.f32.gmra.mxu2 %vm697_vm3, %v3861_v58  ;;  %v3240_v2 = vadd.f32 %v12729_v17, %v3204_v40  ;;  %v2567_v42 = vpop.permute.xlu0 %2566  ;;  %v1914_v41 = vadd.f32 %v1882_v60, %v1656_v36  ;;  %v1399_v40 = vadd.f32 %v1367_v34, %v1109_v11 }
 0x289   : > { %3102 = vperm.xlu1 %11344, %v12984_v39   ;;  %v2657_v52 = vmul.f32 %v12703_v6, %v2567_v42 }
 0x28a   : > { %1563 = vperm.xlu2 %11345, %v12900_v46   ;;  %v3272_v8 = vmax.f32 %v3240_v2, 0.0  ;;  %v13003_v46 = vld [vmem:[#allocation2 + $0x139] sm:$0xff]  ;;  %v2172_v37 = vadd.f32 %v2140_v50, %v1914_v41 }
 0x28b   : > { %v2308_v19 = vpop.permute.xlu1 %2307 }
 0x28c   : > { %v3308_v7 = vadd.f32 %v12740_v57, %v3272_v8  ;;  %v12995_v29 = vpop.permute.xlu2 %2829  ;;  %2591 = vperm.xlu0 %11343, %v12997_v26   ;;  %v2398_v15 = vmul.f32 %v12699_v4, %v2308_v19 }
 0x28e   : > { %3341 = vst.msk [vmem:[#allocation3 + $0xd9] sm:$0xff] %vm697_vm3, %v3308_v7  ;;  %v2430_v27 = vadd.f32 %v2398_v15, %v2172_v37  ;;  %v2916_v15 = vmul.f32 %v12715_v21, %v12995_v29 }
 0x290   : > { %v2055_v32 = vpop.permute.xlu0 %2054  ;;  %v2689_v33 = vadd.f32 %v2657_v52, %v2430_v27 }
 0x291   : > { %2332 = vperm.xlu1 %11344, %v12940_v30   ;;  %v2141_v2 = vmul.f32 %v12692_v13, %v2055_v32 }
 0x292   : > { %2849 = vperm.xlu2 %11345, %v13003_v46   ;;  %v2947_v22 = vadd.f32 %v2915_v28, %v2689_v33  ;;  %v13068_v33 = vld [vmem:[#allocation2 + $0x142] sm:$0xff]  ;;  %v4430_v28 = vld [vmem:[#allocation13 + $0x48] sm:$0xff] }
 0x293   : > { %v1797_v48 = vpop.permute.xlu1 %1796  ;;  %4541 = vmatpush.msrb.mxu0 %v4430_v28  ;;  %v13147_v28 = vld [vmem:[#allocation9 + $0x5] ss:$0 sm:$0xff] }
 0x294   : > { %v13011_v5 = vpop.permute.xlu2 %1032  ;;  %2079 = vperm.xlu0 %11343, %v12960_v54   ;;  %v1883_v49 = vmul.f32 %v12686_v10, %v1797_v48 }
 0x295   : > { %v3409_v16 = vld [vmem:[#allocation3 + $0xd9] sm:$0xff] }
 0x296   : > { %v3375_v38 = vld [vmem:[#allocation3 + $0xd8] sm:$0xff]  ;;  %10594 = vmatmul.msk.f32.gmra.mxu0 %vm697_vm3, %v3409_v16 }
 0x297   : > { %10626 = vmatmul.msk.f32.gmra.mxu1 %vm697_vm3, %v3375_v38  ;;  %10688 = vmatmul.msk.f32.gmra.mxu3 %vm697_vm3, %v3375_v38 }
 0x298   : > { %v1286_v45 = vpop.permute.xlu0 %1285 }
 0x299   : > { %1821 = vperm.xlu1 %11344, %v12954_v12  }
 0x29a   : > { %1052 = vperm.xlu2 %11345, %v12913_v35   ;;  %v858_v35 = vld [vmem:[%s12037_s20 + $0xd0] sm:$0xff] }
 0x29b   : > { %v3083_v25 = vpop.permute.xlu1 %3082  ;;  %891 = vst.msk [vmem:[#allocation2 + $0x151] sm:$0xff] %vm651_vm0, %v858_v35 }
 0x29c   : > { %v3173_v20 = vmul.f32 %v12719_v0, %v3083_v25  ;;  %v13022_v55 = vpop.permute.xlu2 %1548  ;;  %1310 = vperm.xlu0 %11343, %v12919_v31   ;;  %v13038_v31 = vld [vmem:[#allocation2 + $0x140] sm:$0xff] }
 0x29d   : > { %v13071_v25 = vld [vmem:[#allocation9 + $0x1] ss:$0 sm:$0xff] }
 0x29e   : > { %v3205_v14 = vadd.f32 %v3173_v20, %v2947_v22  ;;  %v13078_v22 = vld [vmem:[#allocation9] ss:$0 sm:$0xff] }
 0x29f   : > { %v1110_v20 = vmul.f32 %v13078_v22, %v12970_v62 }
 0x2a0   : > { %v3241_v24 = vadd.f32 %v12729_v17, %v3205_v14  ;;  %v2572_v58 = vpop.permute.xlu0 %2571 }
 0x2a1   : > { %3107 = vperm.xlu1 %11344, %v13024_v43   ;;  %v2658_v56 = vmul.f32 %v12703_v6, %v2572_v58 }
 0x2a2   : > { %1568 = vperm.xlu2 %11345, %v12940_v30   ;;  %v3273_v51 = vmax.f32 %v3241_v24, 0.0  ;;  %v1625_v30 = vmul.f32 %v12639_v59, %v12938_v18  ;;  %v13093_v62 = vld [vmem:[#allocation2 + $0x151] sm:$0xff] }
 0x2a3   : > { %v2313_v53 = vpop.permute.xlu1 %2312 }
 0x2a4   : > { %v3309_v47 = vadd.f32 %v12740_v57, %v3273_v51  ;;  %v13036_v44 = vpop.permute.xlu2 %2834  ;;  %v1657_v23 = vadd.f32 %v1625_v30, %v1399_v40  ;;  %2596 = vperm.xlu0 %11343, %v13038_v31   ;;  %v2399_v19 = vmul.f32 %v12699_v4, %v2313_v53  ;;  %v13085_v51 = vld [vmem:[#allocation2 + $0x150] sm:$0xff] }
 0x2a6   : > { %3342 = vst.msk [vmem:[#allocation3 + $0xe1] sm:$0xff] %vm697_vm3, %v3309_v47  ;;  %v1915_v8 = vadd.f32 %v1883_v49, %v1657_v23 }
 0x2a8   : > { %v2173_v18 = vadd.f32 %v2141_v2, %v1915_v8  ;;  %v2060_v36 = vpop.permute.xlu0 %2059 }
 0x2a9   : > { %2337 = vperm.xlu1 %11344, %v12984_v39   ;;  %v2142_v47 = vmul.f32 %v12692_v13, %v2060_v36 }
 0x2aa   : > { %2854 = vperm.xlu2 %11345, %v13044_v61   ;;  %v2431_v50 = vadd.f32 %v2399_v19, %v2173_v18 }
 0x2ab   : > { %v1802_v59 = vpop.permute.xlu1 %1801 }
 0x2ac   : > { %v13054_v7 = vpop.permute.xlu2 %1037  ;;  %v2690_v41 = vadd.f32 %v2658_v56, %v2431_v50  ;;  %2084 = vperm.xlu0 %11343, %v13003_v46   ;;  %v1884_v53 = vmul.f32 %v12686_v10, %v1802_v59 }
 0x2ad   : > { %v3410_v42 = vld [vmem:[#allocation3 + $0xe1] sm:$0xff] }
 0x2ae   : > { %v3376_v63 = vld [vmem:[#allocation3 + $0xe0] sm:$0xff]  ;;  %10595 = vmatmul.msk.f32.gmra.mxu0 %vm697_vm3, %v3410_v42  ;;  %v2948_v37 = vadd.f32 %v2916_v15, %v2690_v41 }
 0x2af   : > { %v3862_v60 = vld [vmem:[#allocation3 + $0xda] sm:$0xff]  ;;  %10627 = vmatmul.msk.f32.gmra.mxu1 %vm697_vm3, %v3376_v63  ;;  %10689 = vmatmul.msk.f32.gmra.mxu3 %vm697_vm3, %v3376_v63  ;;  %v3863_v27 = vld [vmem:[#allocation3 + $0xe2] sm:$0xff] }
 0x2b0   : > { %10658 = vmatmul.msk.f32.gmra.mxu2 %vm697_vm3, %v3862_v60  ;;  %v1291_v38 = vpop.permute.xlu0 %1290  ;;  %v13116_v60 = vld [vmem:[#allocation2 + $0x152] sm:$0xff] }
 0x2b1   : > { %1826 = vperm.xlu1 %11344, %v12997_v26   ;;  %v1369_v36 = vmul.f32 %v13071_v25, %v1291_v38 }
 0x2b2   : > { %1057 = vperm.xlu2 %11345, %v12954_v12   ;;  %v1368_v12 = vmul.f32 %v13071_v25, %v1286_v45 }
 0x2b3   : > { %v3088_v48 = vpop.permute.xlu1 %3087 }
 0x2b4   : > { %v3174_v52 = vmul.f32 %v12719_v0, %v3088_v48  ;;  %v13066_v16 = vpop.permute.xlu2 %1553  ;;  %1315 = vperm.xlu0 %11343, %v12960_v54   ;;  %v1400_v24 = vadd.f32 %v1368_v12, %v1110_v20  ;;  %v13087_v54 = vld [vmem:[#allocation9 + $0x2] ss:$0 sm:$0xff] }
 0x2b6   : > { %v3206_v32 = vadd.f32 %v3174_v52, %v2948_v37  ;;  %v13134_v37 = vld [vmem:[#allocation9 + $0x3] ss:$0 sm:$0xff]  ;;  %v13138_v52 = vld [vmem:[#allocation2 + $0x159] sm:$0xff] }
 0x2b8   : > { %10659 = vmatmul.msk.f32.gmra.mxu2 %vm697_vm3, %v3863_v27  ;;  %v3242_v29 = vadd.f32 %v12729_v17, %v3206_v32  ;;  %v2577_v45 = vpop.permute.xlu0 %2576  ;;  %v13140_v32 = vld [vmem:[#allocation9 + $0x4] ss:$0 sm:$0xff] }
 0x2b9   : > { %3112 = vperm.xlu1 %11344, %v13068_v33   ;;  %v2659_v10 = vmul.f32 %v12703_v6, %v2577_v45 }
 0x2ba   : > { %1573 = vperm.xlu2 %11345, %v12984_v39   ;;  %v3274_v14 = vmax.f32 %v3242_v29, 0.0  ;;  %v1626_v39 = vmul.f32 %v13087_v54, %v12982_v3 }
 0x2bb   : > { %v2318_v34 = vpop.permute.xlu1 %2317 }
 0x2bc   : > { %v3310_v35 = vadd.f32 %v12740_v57, %v3274_v14  ;;  %v13083_v11 = vpop.permute.xlu2 %2839  ;;  %v1658_v40 = vadd.f32 %v1626_v39, %v1400_v24  ;;  %2601 = vperm.xlu0 %11343, %v13085_v51   ;;  %v2400_v30 = vmul.f32 %v12699_v4, %v2318_v34  ;;  %v2917_v4 = vmul.f32 %v12715_v21, %v13036_v44  ;;  %v860_v21 = vld [vmem:[%s12037_s20 + $0xe0] sm:$0xff]  ;;  %v13151_v14 = vld [vmem:[#allocation9 + $0x6] ss:$0 sm:$0xff] }
 0x2bd   : > { %893 = vst.msk [vmem:[#allocation2 + $0x169] sm:$0xff] %vm651_vm0, %v860_v21 }
 0x2be   : > { %3343 = vst.msk [vmem:[#allocation3 + $0xf1] sm:$0xff] %vm697_vm3, %v3310_v35  ;;  %v1916_v58 = vadd.f32 %v1884_v53, %v1658_v40 }
 0x2c0   : > { %v2174_v3 = vadd.f32 %v2142_v47, %v1916_v58  ;;  %v2065_v8 = vpop.permute.xlu0 %2064  ;;  %v13163_v58 = vld [vmem:[#allocation9 + $0x7] ss:$0 sm:$0xff] }
 0x2c1   : > { %2342 = vperm.xlu1 %11344, %v13024_v43  }
 0x2c2   : > { %2859 = vperm.xlu2 %11345, %v13093_v62   ;;  %v2432_v19 = vadd.f32 %v2400_v30, %v2174_v3  ;;  %v2918_v30 = vmul.f32 %v13163_v58, %v13083_v11 }
 0x2c3   : > { %v1807_v49 = vpop.permute.xlu1 %1806 }
 0x2c4   : > { %v13101_v23 = vpop.permute.xlu2 %1042  ;;  %v2691_v13 = vadd.f32 %v2659_v10, %v2432_v19  ;;  %2089 = vperm.xlu0 %11343, %v13044_v61   ;;  %v13167_v10 = vld [vmem:[#allocation9 + $0x8] ss:$0 sm:$0xff] }
 0x2c5   : > { %v3411_v2 = vld [vmem:[#allocation3 + $0xf1] sm:$0xff] }
 0x2c6   : > { %v3377_v9 = vld [vmem:[#allocation3 + $0xf0] sm:$0xff]  ;;  %10596 = vmatmul.msk.f32.gmra.mxu0 %vm697_vm3, %v3411_v2  ;;  %v2949_v59 = vadd.f32 %v2917_v4, %v2691_v13 }
 0x2c7   : > { %10628 = vmatmul.msk.f32.gmra.mxu1 %vm697_vm3, %v3377_v9  ;;  %10690 = vmatmul.msk.f32.gmra.mxu3 %vm697_vm3, %v3377_v9  ;;  %v13172_v4 = vld [vmem:[#allocation2 + $0x15a] sm:$0xff] }
 0x2c8   : > { %v13114_v42 = vpop.permute.xlu0 %1295 }
 0x2c9   : > { %1831 = vperm.xlu1 %11344, %v13038_v31  }
 0x2ca   : > { %1062 = vperm.xlu2 %11345, %v12997_v26  }
 0x2cb   : > { %v3093_v6 = vpop.permute.xlu1 %3092 }
 0x2cc   : > { %v3175_v18 = vmul.f32 %v12719_v0, %v3093_v6  ;;  %v13112_v56 = vpop.permute.xlu2 %1558  ;;  %1320 = vperm.xlu0 %11343, %v13003_v46   ;;  %v1111_v0 = vmul.f32 %v13078_v22, %v13011_v5  ;;  %v13130_v46 = vld [vmem:[#allocation2 + $0x158] sm:$0xff]  ;;  %v1885_v5 = vmul.f32 %v13134_v37, %v1807_v49  ;;  %v13177_v6 = vld [vmem:[#allocation11] ss:$0 sm:$0xff] }
 0x2ce   : > { %v3207_v63 = vadd.f32 %v3175_v18, %v2949_v59  ;;  %v1401_v41 = vadd.f32 %v1369_v36, %v1111_v0  ;;  %v1112_v59 = vmul.f32 %v13078_v22, %v13054_v7  ;;  %v13193_v0 = vld [vmem:[#allocation2 + $0x168] sm:$0xff] }
 0x2d0   : > { %v3243_v50 = vadd.f32 %v12729_v17, %v3207_v63  ;;  %v2582_v17 = vpop.permute.xlu0 %2581 }
 0x2d1   : > { %3117 = vperm.xlu1 %11344, %v13116_v60   ;;  %v2660_v34 = vmul.f32 %v13151_v14, %v2582_v17 }
 0x2d2   : > { %1578 = vperm.xlu2 %11345, %v13024_v43   ;;  %v3275_v26 = vmax.f32 %v3243_v50, 0.0  ;;  %v1627_v43 = vmul.f32 %v13087_v54, %v13022_v55  ;;  %v861_v55 = vld [vmem:[%s12037_s20 + $0xe8] sm:$0xff] }
 0x2d3   : > { %v2323_v44 = vpop.permute.xlu1 %2322  ;;  %894 = vst.msk [vmem:[#allocation2 + $0x171] sm:$0xff] %vm651_vm0, %v861_v55 }
 0x2d4   : > { %v3311_v15 = vadd.f32 %v12740_v57, %v3275_v26  ;;  %v13128_v48 = vpop.permute.xlu2 %2844  ;;  %v1659_v38 = vadd.f32 %v1627_v43, %v1401_v41  ;;  %v2143_v57 = vmul.f32 %v13140_v32, %v2065_v8  ;;  %2606 = vperm.xlu0 %11343, %v13130_v46   ;;  %v2401_v12 = vmul.f32 %v13147_v28, %v2323_v44  ;;  %v13199_v26 = vld [vmem:[#allocation2 + $0x169] sm:$0xff] }
 0x2d6   : > { %3344 = vst.msk [vmem:[#allocation3 + $0xf9] sm:$0xff] %vm697_vm3, %v3311_v15  ;;  %v1917_v27 = vadd.f32 %v1885_v5, %v1659_v38 }
 0x2d8   : > { %v2175_v20 = vadd.f32 %v2143_v57, %v1917_v27  ;;  %v2070_v53 = vpop.permute.xlu0 %2069 }
 0x2d9   : > { %2347 = vperm.xlu1 %11344, %v13068_v33   ;;  %v2144_v41 = vmul.f32 %v13140_v32, %v2070_v53 }
 0x2da   : > { %2864 = vperm.xlu2 %11345, %v13138_v52   ;;  %v2433_v40 = vadd.f32 %v2401_v12, %v2175_v20  ;;  %v2919_v20 = vmul.f32 %v13163_v58, %v13128_v48  ;;  %v1113_v48 = vmul.f32 %v13078_v22, %v13101_v23  ;;  %v13240_v23 = vld [vmem:[#allocation2 + $0x171] sm:$0xff] }
 0x2db   : > { %v1812_v29 = vpop.permute.xlu1 %1811 }
 0x2dc   : > { %v13154_v24 = vpop.permute.xlu2 %1047  ;;  %v2692_v47 = vadd.f32 %v2660_v34, %v2433_v40  ;;  %2094 = vperm.xlu0 %11343, %v13093_v62   ;;  %v1886_v7 = vmul.f32 %v13134_v37, %v1812_v29 }
 0x2dd   : > { %v3412_v35 = vld [vmem:[#allocation3 + $0xf9] sm:$0xff] }
 0x2de   : > { %v3378_v45 = vld [vmem:[#allocation3 + $0xf8] sm:$0xff]  ;;  %10597 = vmatmul.msk.f32.gmra.mxu0 %vm697_vm3, %v3412_v35  ;;  %v2950_v3 = vadd.f32 %v2918_v30, %v2692_v47 }
 0x2df   : > { %v3864_v39 = vld [vmem:[#allocation3 + $0xf2] sm:$0xff]  ;;  %10629 = vmatmul.msk.f32.gmra.mxu1 %vm697_vm3, %v3378_v45  ;;  %10691 = vmatmul.msk.f32.gmra.mxu3 %vm697_vm3, %v3378_v45  ;;  %v3865_v13 = vld [vmem:[#allocation3 + $0xfa] sm:$0xff] }
 0x2e0   : > { %10660 = vmatmul.msk.f32.gmra.mxu2 %vm697_vm3, %v3864_v39  ;;  %v1301_v8 = vpop.permute.xlu0 %1300  ;;  %v13220_v47 = vld [vmem:[#allocation2 + $0x16a] sm:$0xff] }
 0x2e1   : > { %1836 = vperm.xlu1 %11344, %v13085_v51   ;;  %v1371_v30 = vmul.f32 %v13071_v25, %v1301_v8 }
 0x2e2   : > { %1067 = vperm.xlu2 %11345, %v13038_v31   ;;  %v1370_v31 = vmul.f32 %v13071_v25, %v13114_v42  ;;  %v13188_v42 = vld [vmem:[%s16316_s3] ss:$0 sm:$0xff] }
 0x2e3   : > { %v3098_v49 = vpop.permute.xlu1 %3097 }
 0x2e4   : > { %v3176_v2 = vmul.f32 %v13167_v10, %v3098_v49  ;;  %v13170_v9 = vpop.permute.xlu2 %1563  ;;  %1325 = vperm.xlu0 %11343, %v13044_v61   ;;  %v1402_v36 = vadd.f32 %v1370_v31, %v1112_v59 }
 0x2e6   : > { %v3208_v19 = vadd.f32 %v3176_v2, %v2950_v3 }
 0x2e8   : > { %10661 = vmatmul.msk.f32.gmra.mxu2 %vm697_vm3, %v3865_v13  ;;  %v3244_v11 = vadd.f32 %v13177_v6, %v3208_v19  ;;  %v2587_v61 = vpop.permute.xlu0 %2586  ;;  %v1403_v19 = vadd.f32 %v1371_v30, %v1113_v48 }
 0x2e9   : > { %3122 = vperm.xlu1 %11344, %v13172_v4   ;;  %v2661_v5 = vmul.f32 %v13151_v14, %v2587_v61 }
 0x2ea   : > { %1583 = vperm.xlu2 %11345, %v13068_v33   ;;  %v3276_v18 = vmax.f32 %v3244_v11, 0.0  ;;  %v1628_v33 = vmul.f32 %v13087_v54, %v13066_v16 }
 0x2eb   : > { %v2328_v63 = vpop.permute.xlu1 %2327 }
 0x2ec   : > { %v3312_v50 = vadd.f32 %v13188_v42, %v3276_v18  ;;  %v13191_v21 = vpop.permute.xlu2 %2849  ;;  %v1660_v44 = vadd.f32 %v1628_v33, %v1402_v36  ;;  %2611 = vperm.xlu0 %11343, %v13193_v0   ;;  %v2402_v17 = vmul.f32 %v13147_v28, %v2328_v63  ;;  %v863_v63 = vld [vmem:[%s12037_s20 + $0xf8] sm:$0xff] }
 0x2ed   : > { %896 = vst.msk [vmem:[#allocation2 + $0x189] sm:$0xff] %vm651_vm0, %v863_v63 }
 0x2ee   : > { %3345 = vst.msk [vmem:[#allocation3 + $0x109] sm:$0xff] %vm697_vm3, %v3312_v50  ;;  %v1918_v15 = vadd.f32 %v1886_v7, %v1660_v44 }
 0x2f0   : > { %v2176_v16 = vadd.f32 %v2144_v41, %v1918_v15  ;;  %v2075_v27 = vpop.permute.xlu0 %2074 }
 0x2f1   : > { %2352 = vperm.xlu1 %11344, %v13116_v60   ;;  %v2145_v18 = vmul.f32 %v13140_v32, %v2075_v27 }
 0x2f2   : > { %2869 = vperm.xlu2 %11345, %v13199_v26   ;;  %v2434_v12 = vadd.f32 %v2402_v17, %v2176_v16 }
 0x2f3   : > { %v1817_v43 = vpop.permute.xlu1 %1816 }
 0x2f4   : > { %v13207_v38 = vpop.permute.xlu2 %1052  ;;  %v2693_v29 = vadd.f32 %v2661_v5, %v2434_v12  ;;  %2099 = vperm.xlu0 %11343, %v13138_v52   ;;  %v1887_v11 = vmul.f32 %v13134_v37, %v1817_v43  ;;  %v2920_v5 = vmul.f32 %v13163_v58, %v13191_v21  ;;  %v1114_v21 = vmul.f32 %v13078_v22, %v13154_v24 }
 0x2f5   : > { %v3413_v57 = vld [vmem:[#allocation3 + $0x109] sm:$0xff] }
 0x2f6   : > { %v3379_v55 = vld [vmem:[#allocation3 + $0x108] sm:$0xff]  ;;  %10598 = vmatmul.msk.f32.gmra.mxu0 %vm697_vm3, %v3413_v57  ;;  %v2951_v35 = vadd.f32 %v2919_v20, %v2693_v29 }
 0x2f7   : > { %10630 = vmatmul.msk.f32.gmra.mxu1 %vm697_vm3, %v3379_v55  ;;  %10692 = vmatmul.msk.f32.gmra.mxu3 %vm697_vm3, %v3379_v55 }
 0x2f8   : > { %v1306_v53 = vpop.permute.xlu0 %1305 }
 0x2f9   : > { %1841 = vperm.xlu1 %11344, %v13130_v46  }
 0x2fa   : > { %1072 = vperm.xlu2 %11345, %v13085_v51   ;;  %v862_v51 = vld [vmem:[%s12037_s20 + $0xf0] sm:$0xff] }
 0x2fb   : > { %v3103_v34 = vpop.permute.xlu1 %3102  ;;  %895 = vst.msk [vmem:[#allocation2 + $0x181] sm:$0xff] %vm651_vm0, %v862_v51 }
 0x2fc   : > { %v3177_v45 = vmul.f32 %v13167_v10, %v3103_v34  ;;  %v13218_v39 = vpop.permute.xlu2 %1568  ;;  %1330 = vperm.xlu0 %11343, %v13093_v62   ;;  %v13234_v62 = vld [vmem:[#allocation2 + $0x170] sm:$0xff] }
 0x2fe   : > { %v3209_v40 = vadd.f32 %v3177_v45, %v2951_v35  ;;  %v13264_v35 = vld [vmem:[#allocation2 + $0x172] sm:$0xff]  ;;  %v1372_v45 = vmul.f32 %v13071_v25, %v1306_v53 }
 0x300   : > { %v3245_v49 = vadd.f32 %v13177_v6, %v3209_v40  ;;  %v2592_v31 = vpop.permute.xlu0 %2591 }
 0x301   : > { %3127 = vperm.xlu1 %11344, %v13220_v47   ;;  %v2662_v33 = vmul.f32 %v13151_v14, %v2592_v31 }
 0x302   : > { %1588 = vperm.xlu2 %11345, %v13116_v60   ;;  %v3277_v3 = vmax.f32 %v3245_v49, 0.0  ;;  %v1629_v60 = vmul.f32 %v13087_v54, %v13112_v56  ;;  %v1404_v49 = vadd.f32 %v1372_v45, %v1114_v21  ;;  %v13277_v53 = vld [vmem:[#allocation2 + $0x180] sm:$0xff] }
 0x303   : > { %v2333_v2 = vpop.permute.xlu1 %2332 }
 0x304   : > { %v3313_v8 = vadd.f32 %v13188_v42, %v3277_v3  ;;  %v13232_v13 = vpop.permute.xlu2 %2854  ;;  %v1661_v59 = vadd.f32 %v1629_v60, %v1403_v19  ;;  %2616 = vperm.xlu0 %11343, %v13234_v62   ;;  %v2403_v50 = vmul.f32 %v13147_v28, %v2333_v2 }
 0x306   : > { %3346 = vst.msk [vmem:[#allocation3 + $0x111] sm:$0xff] %vm697_vm3, %v3313_v8  ;;  %v1919_v36 = vadd.f32 %v1887_v11, %v1661_v59 }
 0x308   : > { %v2177_v61 = vadd.f32 %v2145_v18, %v1919_v36  ;;  %v2080_v17 = vpop.permute.xlu0 %2079 }
 0x309   : > { %2357 = vperm.xlu1 %11344, %v13172_v4   ;;  %v2146_v19 = vmul.f32 %v13140_v32, %v2080_v17 }
 0x30a   : > { %2874 = vperm.xlu2 %11345, %v13240_v23   ;;  %v2435_v43 = vadd.f32 %v2403_v50, %v2177_v61  ;;  %v13293_v50 = vpop.f32.mrf.mxu0 }
 0x30b   : > { %v1822_v56 = vpop.permute.xlu1 %1821 }
 0x30c   : > { %v13250_v7 = vpop.permute.xlu2 %1057  ;;  %v2694_v16 = vadd.f32 %v2662_v33, %v2435_v43  ;;  %2104 = vperm.xlu0 %11343, %v13199_v26   ;;  %v1888_v2 = vmul.f32 %v13134_v37, %v1822_v56  ;;  %v13295_v56 = vpop.f32.mrf.mxu1 }
 0x30d   : > { %v3414_v44 = vld [vmem:[#allocation3 + $0x111] sm:$0xff] }
 0x30e   : > { %v3380_v41 = vld [vmem:[#allocation3 + $0x110] sm:$0xff]  ;;  %10599 = vmatmul.msk.f32.gmra.mxu0 %vm697_vm3, %v3414_v44  ;;  %v2952_v55 = vadd.f32 %v2920_v5, %v2694_v16  ;;  %v2921_v44 = vmul.f32 %v13163_v58, %v13232_v13  ;;  %v13308_v5 = vld [vmem:[#allocation2 + $0x188] sm:$0xff]  ;;  %v1115_v13 = vmul.f32 %v13078_v22, %v13207_v38 }
 0x30f   : > { %v3866_v15 = vld [vmem:[#allocation3 + $0x10a] sm:$0xff]  ;;  %10631 = vmatmul.msk.f32.gmra.mxu1 %vm697_vm3, %v3380_v41  ;;  %10693 = vmatmul.msk.f32.gmra.mxu3 %vm697_vm3, %v3380_v41  ;;  %v3867_v34 = vld [vmem:[#allocation3 + $0x112] sm:$0xff] }
 0x310   : > { %10662 = vmatmul.msk.f32.gmra.mxu2 %vm697_vm3, %v3866_v15  ;;  %v1311_v29 = vpop.permute.xlu0 %1310 }
 0x311   : > { %1846 = vperm.xlu1 %11344, %v13193_v0  }
 0x312   : > { %1077 = vperm.xlu2 %11345, %v13130_v46  }
 0x313   : > { %v3108_v57 = vpop.permute.xlu1 %3107 }
 0x314   : > { %v3178_v27 = vmul.f32 %v13167_v10, %v3108_v57  ;;  %v13262_v12 = vpop.permute.xlu2 %1573  ;;  %1335 = vperm.xlu0 %11343, %v13138_v52   ;;  %v1630_v52 = vmul.f32 %v13087_v54, %v13170_v9 }
 0x316   : > { %v3210_v20 = vadd.f32 %v3178_v27, %v2952_v55  ;;  %v1662_v24 = vadd.f32 %v1630_v52, %v1404_v49  ;;  %v13310_v55 = vld [vmem:[#allocation2 + $0x182] sm:$0xff]  ;;  %v13312_v27 = vld [vmem:[#allocation2 + $0x18a] sm:$0xff] }
 0x317   : > { %v4706_v52 = vld [vmem:[#allocation13 + $0x58] sm:$0xff] }
 0x318   : > { %10663 = vmatmul.msk.f32.gmra.mxu2 %vm697_vm3, %v3867_v34  ;;  %v3246_v46 = vadd.f32 %v13177_v6, %v3210_v20  ;;  %v2597_v3 = vpop.permute.xlu0 %2596  ;;  %v1920_v8 = vadd.f32 %v1888_v2, %v1662_v24  ;;  %v1373_v20 = vmul.f32 %v13071_v25, %v1311_v29  ;;  %v1631_v29 = vmul.f32 %v13087_v54, %v13218_v39  ;;  %v4429_v2 = vld [vmem:[#allocation13 + $0x40] sm:$0xff] }
 0x319   : > { %3132 = vperm.xlu1 %11344, %v13264_v35   ;;  %v2663_v11 = vmul.f32 %v13151_v14, %v2597_v3  ;;  %v13328_v3 = vld [vmem:[#allocation2 + $0x189] sm:$0xff]  ;;  %4817 = vmatpush.msrb.mxu1 %v4706_v52 }
 0x31a   : > { %1593 = vperm.xlu2 %11345, %v13172_v4   ;;  %v3278_v40 = vmax.f32 %v3246_v46, 0.0  ;;  %v13283_v4 = vld [vmem:[#allocation2 + $0x181] sm:$0xff]  ;;  %v2178_v9 = vadd.f32 %v2146_v19, %v1920_v8  ;;  %v1405_v21 = vadd.f32 %v1373_v20, %v1115_v13  ;;  %4542 = vmatpush.msrb.mxu0 %v4429_v2 }
 0x31b   : > { %v2338_v30 = vpop.permute.xlu1 %2337 }
 0x31c   : > { %v3314_v51 = vadd.f32 %v13188_v42, %v3278_v40  ;;  %v13275_v48 = vpop.permute.xlu2 %2859  ;;  %2621 = vperm.xlu0 %11343, %v13277_v53   ;;  %v2404_v31 = vmul.f32 %v13147_v28, %v2338_v30  ;;  %v1663_v38 = vadd.f32 %v1631_v29, %v1405_v21 }
 0x31e   : > { %3347 = vst.msk [vmem:[#allocation3 + $0x121] sm:$0xff] %vm697_vm3, %v3314_v51  ;;  %v2436_v61 = vadd.f32 %v2404_v31, %v2178_v9 }
 0x320   : > { %v2085_v36 = vpop.permute.xlu0 %2084  ;;  %v2695_v33 = vadd.f32 %v2663_v11, %v2436_v61  ;;  %v13340_v61 = vpop.f32.mrf.mxu1 }
 0x321   : > { %2362 = vperm.xlu1 %11344, %v13220_v47   ;;  %v2147_v24 = vmul.f32 %v13140_v32, %v2085_v36 }
 0x322   : > { %2879 = vperm.xlu2 %11345, %v13283_v4   ;;  %v2953_v15 = vadd.f32 %v2921_v44, %v2695_v33 }
 0x323   : > { %v1827_v60 = vpop.permute.xlu1 %1826 }
 0x324   : > { %v13291_v59 = vpop.permute.xlu2 %1062  ;;  %2109 = vperm.xlu0 %11343, %v13240_v23   ;;  %v1889_v51 = vmul.f32 %v13134_v37, %v1827_v60 }
 0x325   : > { %v3415_v18 = vld [vmem:[#allocation3 + $0x121] sm:$0xff] }
 0x326   : > { %v3381_v63 = vld [vmem:[#allocation3 + $0x120] sm:$0xff]  ;;  %10600 = vmatmul.msk.f32.gmra.mxu0 %vm697_vm3, %v3415_v18  ;;  %v1921_v19 = vadd.f32 %v1889_v51, %v1663_v38  ;;  %v2476_v51 = vld [vmem:[#allocation2 + $0x198] sm:$0xff] }
 0x327   : > { %10632 = vmatmul.msk.f32.gmra.mxu1 %vm697_vm3, %v3381_v63  ;;  %10694 = vmatmul.msk.f32.gmra.mxu3 %vm697_vm3, %v3381_v63 }
 0x328   : > { %v1316_v16 = vpop.permute.xlu0 %1315  ;;  %v2179_v31 = vadd.f32 %v2147_v24, %v1921_v19 }
 0x329   : > { %1851 = vperm.xlu1 %11344, %v13234_v62  }
 0x32a   : > { %2367 = vperm.xlu2 %11345, %v13264_v35  }
 0x32b   : > { %v3113_v41 = vpop.permute.xlu1 %3112 }
 0x32c   : > { %v3179_v17 = vmul.f32 %v13167_v10, %v3113_v41  ;;  %v13306_v43 = vpop.permute.xlu2 %1578  ;;  %2626 = vperm.xlu0 %11343, %v13308_v5   ;;  %v2922_v41 = vmul.f32 %v13163_v58, %v13275_v48  ;;  %v1116_v48 = vmul.f32 %v13078_v22, %v13250_v7 }
 0x32e   : > { %v3211_v57 = vadd.f32 %v3179_v17, %v2953_v15 }
 0x330   : > { %v3247_v34 = vadd.f32 %v13177_v6, %v3211_v57  ;;  %v2602_v49 = vpop.permute.xlu0 %2601 }
 0x331   : > { %3137 = vperm.xlu1 %11344, %v13310_v55   ;;  %v2664_v60 = vmul.f32 %v13151_v14, %v2602_v49 }
 0x332   : > { %3142 = vperm.xlu2 %11345, %v13312_v27   ;;  %v3279_v45 = vmax.f32 %v3247_v34, 0.0 }
 0x333   : > { %v2343_v46 = vpop.permute.xlu1 %2342 }
 0x334   : > { %v3315_v40 = vadd.f32 %v13188_v42, %v3279_v45  ;;  %v13322_v30 = vpop.permute.xlu2 %2864  ;;  %1082 = vperm.xlu0 %11343, %v13193_v0   ;;  %v2405_v39 = vmul.f32 %v13147_v28, %v2343_v46  ;;  %v13338_v0 = vpop.f32.mrf.mxu0 }
 0x336   : > { %3348 = vst.msk [vmem:[#allocation3 + $0x129] sm:$0xff] %vm697_vm3, %v3315_v40  ;;  %v2437_v33 = vadd.f32 %v2405_v39, %v2179_v31 }
 0x338   : > { %v2090_v36 = vpop.permute.xlu0 %2089  ;;  %v2696_v44 = vadd.f32 %v2664_v60, %v2437_v33 }
 0x339   : > { %2884 = vperm.xlu1 %11344, %v13328_v3   ;;  %v2148_v7 = vmul.f32 %v13140_v32, %v2090_v36 }
 0x33a   : > { %1598 = vperm.xlu2 %11345, %v13220_v47   ;;  %v13344_v47 = vpop.f32.mrf.mxu2  ;;  %v2954_v17 = vadd.f32 %v2922_v41, %v2696_v44  ;;  %v2923_v44 = vmul.f32 %v13163_v58, %v13322_v30  ;;  %v1117_v30 = vmul.f32 %v13078_v22, %v13291_v59 }
 0x33b   : > { %v1832_v8 = vpop.permute.xlu1 %1831 }
 0x33c   : > { %v13336_v9 = vpop.permute.xlu2 %1067  ;;  %1856 = vperm.xlu0 %11343, %v13277_v53   ;;  %v1890_v52 = vmul.f32 %v13134_v37, %v1832_v8  ;;  %v13376_v19 = vpop.f32.mrf.mxu0 }
 0x33d   : > { %v3416_v11 = vld [vmem:[#allocation3 + $0x129] sm:$0xff] }
 0x33e   : > { %v3382_v18 = vld [vmem:[#allocation3 + $0x128] sm:$0xff]  ;;  %10601 = vmatmul.msk.f32.gmra.mxu0 %vm697_vm3, %v3416_v11  ;;  %v13379_v11 = vpop.f32.mrf.mxu1 }
 0x33f   : > { %v3868_v63 = vld [vmem:[#allocation3 + $0x122] sm:$0xff]  ;;  %10633 = vmatmul.msk.f32.gmra.mxu1 %vm697_vm3, %v3382_v18  ;;  %10695 = vmatmul.msk.f32.gmra.mxu3 %vm697_vm3, %v3382_v18  ;;  %v3869_v45 = vld [vmem:[#allocation3 + $0x12a] sm:$0xff] }
 0x340   : > { %10664 = vmatmul.msk.f32.gmra.mxu2 %vm697_vm3, %v3868_v63  ;;  %v1321_v34 = vpop.permute.xlu0 %1320 }
 0x341   : > { %1340 = vperm.xlu1 %11344, %v13199_v26   ;;  %v1374_v26 = vmul.f32 %v13071_v25, %v1316_v16  ;;  %v1632_v16 = vmul.f32 %v13087_v54, %v13262_v12 }
 0x342   : > { %1087 = vperm.xlu2 %11345, %v13234_v62   ;;  %v13356_v46 = vpop.f32.mrf.mxu2 }
 0x343   : > { %v3118_v15 = vpop.permute.xlu1 %3117  ;;  %v1406_v40 = vadd.f32 %v1374_v26, %v1116_v48 }
 0x344   : > { %v3180_v57 = vmul.f32 %v13167_v10, %v3118_v15  ;;  %v13354_v20 = vpop.permute.xlu2 %1583  ;;  %1345 = vperm.xlu0 %11343, %v13240_v23   ;;  %v2734_v23 = vld [vmem:[#allocation2 + $0x199] sm:$0xff]  ;;  %v13395_v15 = vpop.f32.mrf.mxu0 }
 0x346   : > { %v3212_v13 = vadd.f32 %v3180_v57, %v2954_v17 }
 0x348   : > { %10665 = vmatmul.msk.f32.gmra.mxu2 %vm697_vm3, %v3869_v45  ;;  %v3248_v62 = vadd.f32 %v13177_v6, %v3212_v13  ;;  %v2607_v29 = vpop.permute.xlu0 %2606  ;;  %v2477_v45 = vld [vmem:[#allocation2 + $0x1a0] sm:$0xff] }
 0x349   : > { %2114 = vperm.xlu1 %11344, %v13283_v4   ;;  %v2665_v39 = vmul.f32 %v13151_v14, %v2607_v29 }
 0x34a   : > { %1603 = vperm.xlu2 %11345, %v13264_v35   ;;  %v3280_v53 = vmax.f32 %v3248_v62, 0.0  ;;  %v1664_v35 = vadd.f32 %v1632_v16, %v1406_v40  ;;  %v13386_v63 = vpop.f32.mrf.mxu2  ;;  %v2992_v62 = vld [vmem:[#allocation2 + $0x19a] sm:$0xff]  ;;  %v1633_v16 = vmul.f32 %v13087_v54, %v13306_v43 }
 0x34b   : > { %v2348_v21 = vpop.permute.xlu1 %2347 }
 0x34c   : > { %v3316_v49 = vadd.f32 %v13188_v42, %v3280_v53  ;;  %v13371_v4 = vpop.permute.xlu2 %2869  ;;  %2631 = vperm.xlu0 %11343, %v2476_v51   ;;  %v1922_v2 = vadd.f32 %v1890_v52, %v1664_v35  ;;  %v2406_v38 = vmul.f32 %v13147_v28, %v2348_v21 }
 0x34e   : > { %3349 = vst.msk [vmem:[#allocation3 + $0x139] sm:$0xff] %vm697_vm3, %v3316_v49  ;;  %v2180_v12 = vadd.f32 %v2148_v7, %v1922_v2  ;;  %v13406_v49 = vpop.f32.mrf.mxu0 }
 0x350   : > { %v2095_v60 = vpop.permute.xlu0 %2094  ;;  %v2438_v18 = vadd.f32 %v2406_v38, %v2180_v12 }
 0x351   : > { %2372 = vperm.xlu1 %11344, %v13310_v55   ;;  %v13383_v55 = vpop.f32.mrf.mxu3  ;;  %v2149_v59 = vmul.f32 %v13140_v32, %v2095_v60 }
 0x352   : > { %2889 = vperm.xlu2 %11345, %v2734_v23   ;;  %v2697_v36 = vadd.f32 %v2665_v39, %v2438_v18  ;;  %v2735_v23 = vld [vmem:[#allocation2 + $0x1a1] sm:$0xff] }
 0x353   : > { %v1837_v24 = vpop.permute.xlu1 %1836 }
 0x354   : > { %2119 = vperm.xlu0 %11343, %v13328_v3   ;;  %v13390_v33 = vpop.permute.xlu2 %1072  ;;  %v2955_v17 = vadd.f32 %v2923_v44, %v2697_v36  ;;  %v2993_v3 = vld [vmem:[#allocation2 + $0x1a2] sm:$0xff]  ;;  %v1891_v52 = vmul.f32 %v13134_v37, %v1837_v24 }
 0x355   : > { %v3417_v8 = vld [vmem:[#allocation3 + $0x139] sm:$0xff] }
 0x356   : > { %v3383_v31 = vld [vmem:[#allocation3 + $0x138] sm:$0xff]  ;;  %10602 = vmatmul.msk.f32.gmra.mxu0 %vm697_vm3, %v3417_v8  ;;  %v13417_v39 = vpop.f32.mrf.mxu0 }
 0x357   : > { %10634 = vmatmul.msk.f32.gmra.mxu1 %vm697_vm3, %v3383_v31  ;;  %10696 = vmatmul.msk.f32.gmra.mxu3 %vm697_vm3, %v3383_v31 }
 0x358   : > { %v1326_v13 = vpop.permute.xlu0 %1325 }
 0x359   : > { %1861 = vperm.xlu1 %11344, %v13308_v5   ;;  %v1375_v5 = vmul.f32 %v13071_v25, %v1321_v34 }
 0x35a   : > { %2377 = vperm.xlu2 %11345, %v13312_v27   ;;  %v13400_v27 = vpop.f32.mrf.mxu2 }
 0x35b   : > { %v3123_v41 = vpop.permute.xlu1 %3122  ;;  %v1407_v29 = vadd.f32 %v1375_v5, %v1117_v30 }
 0x35c   : > { %v3181_v57 = vmul.f32 %v13167_v10, %v3123_v41  ;;  %2636 = vperm.xlu0 %11343, %v2477_v45   ;;  %v13404_v21 = vpop.permute.xlu2 %1588  ;;  %v13420_v41 = vpop.f32.mrf.mxu1  ;;  %v2924_v45 = vmul.f32 %v13163_v58, %v13371_v4  ;;  %v1118_v4 = vmul.f32 %v13078_v22, %v13336_v9 }
 0x35d   : > { %v1665_v35 = vadd.f32 %v1633_v16, %v1407_v29 }
 0x35e   : > { %v3213_v26 = vadd.f32 %v3181_v57, %v2955_v17  ;;  %v13424_v17 = vpop.f32.mrf.mxu3 }
 0x35f   : > { %v1923_v2 = vadd.f32 %v1891_v52, %v1665_v35 }
 0x360   : > { %v3249_v48 = vadd.f32 %v13177_v6, %v3213_v26  ;;  %v2612_v34 = vpop.permute.xlu0 %2611 }
 0x361   : > { %3147 = vperm.xlu1 %11344, %v2992_v62   ;;  %v2181_v8 = vadd.f32 %v2149_v59, %v1923_v2  ;;  %v2666_v43 = vmul.f32 %v13151_v14, %v2612_v34 }
 0x362   : > { %3152 = vperm.xlu2 %11345, %v2993_v3   ;;  %v3281_v53 = vmax.f32 %v3249_v48, 0.0  ;;  %v13414_v7 = vpop.f32.mrf.mxu2  ;;  %v13432_v3 = vpop.f32.mrf.mxu0 }
 0x363   : > { %v2353_v40 = vpop.permute.xlu1 %2352 }
 0x364   : > { %v3317_v51 = vadd.f32 %v13188_v42, %v3281_v53  ;;  %v2407_v38 = vmul.f32 %v13147_v28, %v2353_v40  ;;  %v2875_v31 = vpop.permute.xlu2 %2874 }
 0x366   : > { %3350 = vst.msk [vmem:[#allocation3 + $0x141] sm:$0xff] %vm697_vm3, %v3317_v51  ;;  %v2439_v60 = vadd.f32 %v2407_v38, %v2181_v8  ;;  %v1376_v51 = vmul.f32 %v13071_v25, %v1326_v13  ;;  %v1634_v8 = vmul.f32 %v13087_v54, %v13354_v20 }
 0x368   : > { %v2100_v44 = vpop.permute.xlu0 %2099  ;;  %v2698_v57 = vadd.f32 %v2666_v43, %v2439_v60  ;;  %v1408_v59 = vadd.f32 %v1376_v51, %v1118_v4 }
 0x369   : > { %2894 = vperm.xlu1 %11344, %v2735_v23   ;;  %v2150_v9 = vmul.f32 %v13140_v32, %v2100_v44  ;;  %v13465_v44 = vpop.f32.mrf.mxu3 }
 0x36a   : > { %v13430_v62 = vpop.f32.mrf.mxu2  ;;  %v2956_v5 = vadd.f32 %v2924_v45, %v2698_v57  ;;  %v13442_v23 = vpop.f32.mrf.mxu0  ;;  %v1666_v43 = vadd.f32 %v1634_v8, %v1408_v59 }
 0x36b   : > { %v1842_v12 = vpop.permute.xlu1 %1841 }
 0x36c   : > { %v13435_v29 = vpop.permute.xlu2 %1077  ;;  %v1892_v13 = vmul.f32 %v13134_v37, %v1842_v12  ;;  %v13458_v12 = vpop.f32.mrf.mxu1 }
 0x36d   : > { %v3418_v24 = vld [vmem:[#allocation3 + $0x141] sm:$0xff] }
 0x36e   : > { %v3384_v18 = vld [vmem:[#allocation3 + $0x140] sm:$0xff]  ;;  %10603 = vmatmul.msk.f32.gmra.mxu0 %vm697_vm3, %v3418_v24 }
 0x36f   : > { %v3870_v36 = vld [vmem:[#allocation3 + $0x13a] sm:$0xff]  ;;  %10635 = vmatmul.msk.f32.gmra.mxu1 %vm697_vm3, %v3384_v18  ;;  %10697 = vmatmul.msk.f32.gmra.mxu3 %vm697_vm3, %v3384_v18  ;;  %v3871_v40 = vld [vmem:[#allocation3 + $0x142] sm:$0xff]  ;;  %v1924_v18 = vadd.f32 %v1892_v13, %v1666_v43 }
 0x370   : > { %10666 = vmatmul.msk.f32.gmra.mxu2 %vm697_vm3, %v3870_v36  ;;  %v1331_v30 = vpop.permute.xlu0 %1330 }
 0x371   : > { %v2182_v45 = vadd.f32 %v2150_v9, %v1924_v18  ;;  %v1377_v9 = vmul.f32 %v13071_v25, %v1331_v30  ;;  %v1635_v30 = vmul.f32 %v13087_v54, %v13404_v21 }
 0x372   : > { %v13444_v35 = vpop.f32.mrf.mxu2  ;;  %v13453_v57 = vpop.f32.mrf.mxu0 }
 0x373   : > { %v3128_v26 = vpop.permute.xlu1 %3127  ;;  %16389 = vst [vmem:[#allocation32_spill] sm:$0xff] %v13453_v57 }
 0x374   : > { %v3182_v48 = vmul.f32 %v13167_v10, %v3128_v26  ;;  %v1594_v24 = vpop.permute.xlu2 %1593  ;;  %v13473_v8 = vpop.f32.mrf.mxu1 }
 0x376   : > { %v3214_v53 = vadd.f32 %v3182_v48, %v2956_v5 }
 0x378   : > { %10667 = vmatmul.msk.f32.gmra.mxu2 %vm697_vm3, %v3871_v40  ;;  %v3250_v34 = vadd.f32 %v13177_v6, %v3214_v53  ;;  %v2617_v38 = vpop.permute.xlu0 %2616 }
 0x379   : > { %v2667_v26 = vmul.f32 %v13151_v14, %v2617_v38 }
 0x37a   : > { %v3282_v16 = vmax.f32 %v3250_v34, 0.0  ;;  %v13460_v53 = vpop.f32.mrf.mxu2  ;;  %v2925_v34 = vmul.f32 %v13163_v58, %v2875_v31  ;;  %v1119_v31 = vmul.f32 %v13078_v22, %v13390_v33 }
 0x37b   : > { %v2358_v52 = vpop.permute.xlu1 %2357  ;;  %16390 = vst [vmem:[#allocation33_spill] sm:$0xff] %v13460_v53 }
 0x37c   : > { %v3318_v2 = vadd.f32 %v13188_v42, %v3282_v16  ;;  %v2408_v36 = vmul.f32 %v13147_v28, %v2358_v52  ;;  %v2880_v4 = vpop.permute.xlu2 %2879  ;;  %v13470_v52 = vpop.f32.mrf.mxu0 }
 0x37d   : > { %16391 = vst [vmem:[#allocation34_spill] sm:$0xff] %v13470_v52  ;;  %v13486_v1 = vpop.f32.mrf.mxu1 }
 0x37e   : > { %3351 = vst.msk [vmem:[#allocation3 + $0x151] sm:$0xff] %vm697_vm3, %v3318_v2  ;;  %v2440_v40 = vadd.f32 %v2408_v36, %v2182_v45  ;;  %v13479_v36 = vpop.f32.mrf.mxu3 }
 0x380   : > { %v2105_v20 = vpop.permute.xlu0 %2104  ;;  %v2699_v51 = vadd.f32 %v2667_v26, %v2440_v40  ;;  %v1409_v40 = vadd.f32 %v1377_v9, %v1119_v31  ;;  %v1120_v31 = vmul.f32 %v13078_v22, %v13435_v29  ;;  %v1636_v22 = vmul.f32 %v13087_v54, %v1594_v24 }
 0x382   : > { %v2957_v59 = vadd.f32 %v2925_v34, %v2699_v51  ;;  %v13475_v13 = vpop.f32.mrf.mxu2  ;;  %v1667_v33 = vadd.f32 %v1635_v30, %v1409_v40 }
 0x383   : > { %v1847_v60 = vpop.permute.xlu1 %1846  ;;  %16392 = vst [vmem:[#allocation35_spill] sm:$0xff] %v13475_v13 }
 0x384   : > { %v2368_v34 = vpop.permute.xlu2 %2367 }
 0x385   : > { %v3419_v5 = vld [vmem:[#allocation3 + $0x151] sm:$0xff]  ;;  %v13510_v30 = vpop.f32.mrf.mxu1 }
 0x386   : > { %v13456_v48 = vld [vmem:[#allocation3 + $0x150] sm:$0xff]  ;;  %10604 = vmatmul.msk.f32.gmra.mxu0 %vm697_vm3, %v3419_v5  ;;  %v13483_v5 = vpop.f32.mrf.mxu0  ;;  %16396 = vst [vmem:[#allocation39_spill] sm:$0xff] %v13510_v30 }
 0x387   : > { %10636 = vmatmul.msk.f32.gmra.mxu1 %vm697_vm3, %v13456_v48  ;;  %10698 = vmatmul.msk.f32.gmra.mxu3 %vm697_vm3, %v13456_v48  ;;  %16393 = vst [vmem:[#allocation36_spill] sm:$0xff] %v13483_v5 }
 0x388   : > { %v1336_v38 = vpop.permute.xlu0 %1335 }
 0x389   : > { %v1378_v9 = vmul.f32 %v13071_v25, %v1336_v38 }
 0x38b   : > { %v3133_v16 = vpop.permute.xlu1 %3132 }
 0x38c   : > { %v3183_v2 = vmul.f32 %v13167_v10, %v3133_v16 }
 0x38d   : > { %v13531_v13 = vpop.f32.mrf.mxu1 }
 0x38e   : > { %v3215_v43 = vadd.f32 %v3183_v2, %v2957_v59  ;;  %v1893_v59 = vmul.f32 %v13134_v37, %v1847_v60  ;;  %v13492_v2 = vpop.f32.mrf.mxu2  ;;  %v13501_v52 = vpop.f32.mrf.mxu0  ;;  %16399 = vst [vmem:[#allocation42_spill] sm:$0xff] %v13531_v13 }
 0x38f   : > { %16394 = vst [vmem:[#allocation37_spill] sm:$0xff] %v13492_v2 }
 0x390   : > { %v3251_v18 = vadd.f32 %v13177_v6, %v3215_v43  ;;  %v2622_v16 = vpop.permute.xlu0 %2621  ;;  %v2151_v43 = vmul.f32 %v13140_v32, %v2105_v20  ;;  %16395 = vst [vmem:[#allocation38_spill] sm:$0xff] %v13501_v52 }
 0x391   : > { %v2668_v2 = vmul.f32 %v13151_v14, %v2622_v16  ;;  %v3143_v16 = vpop.permute.xlu2 %3142 }
 0x392   : > { %v3283_v45 = vmax.f32 %v3251_v18, 0.0  ;;  %v13496_v18 = vpop.f32.mrf.mxu3 }
 0x393   : > { %v2363_v26 = vpop.permute.xlu1 %2362 }
 0x394   : > { %v3319_v51 = vadd.f32 %v13188_v42, %v3283_v45  ;;  %v1925_v45 = vadd.f32 %v1893_v59, %v1667_v33  ;;  %v2409_v5 = vmul.f32 %v13147_v28, %v2363_v26 }
 0x396   : > { %3352 = vst.msk [vmem:[#allocation3 + $0x159] sm:$0xff] %vm697_vm3, %v3319_v51  ;;  %v2183_v60 = vadd.f32 %v2151_v43, %v1925_v45  ;;  %v1410_v51 = vadd.f32 %v1378_v9, %v1120_v31  ;;  %v13522_v59 = vpop.f32.mrf.mxu2  ;;  %v13528_v31 = vpop.f32.mrf.mxu0 }
 0x397   : > { %16397 = vst [vmem:[#allocation40_spill] sm:$0xff] %v13522_v59  ;;  %v11388_v59 = vld [vmem:[#allocation9 + $0x3] ss:$0 sm:$0xff] }
 0x398   : > { %v2110_v38 = vpop.permute.xlu0 %2109  ;;  %v2441_v29 = vadd.f32 %v2409_v5, %v2183_v60  ;;  %v1668_v33 = vadd.f32 %v1636_v22, %v1410_v51  ;;  %v2926_v5 = vmul.f32 %v13163_v58, %v2880_v4  ;;  %16398 = vst [vmem:[#allocation41_spill] sm:$0xff] %v13528_v31  ;;  %v2410_v51 = vmul.f32 %v13147_v28, %v2368_v34 }
 0x399   : > { %v2152_v24 = vmul.f32 %v13140_v32, %v2110_v38 }
 0x39a   : > { %v2700_v54 = vadd.f32 %v2668_v2, %v2441_v29 }
 0x39b   : > { %v1852_v21 = vpop.permute.xlu1 %1851 }
 0x39c   : > { %v1894_v26 = vmul.f32 %v13134_v37, %v1852_v21  ;;  %v13525_v37 = vpop.f32.mrf.mxu3  ;;  %v2958_v45 = vadd.f32 %v2926_v5, %v2700_v54 }
 0x39d   : > { %v13504_v40 = vld [vmem:[#allocation3 + $0x159] sm:$0xff] }
 0x39e   : > { %v13506_v20 = vld [vmem:[#allocation3 + $0x158] sm:$0xff]  ;;  %10605 = vmatmul.msk.f32.gmra.mxu0 %vm697_vm3, %v13504_v40  ;;  %v1926_v43 = vadd.f32 %v1894_v26, %v1668_v33  ;;  %v13542_v26 = vpop.permute.xlu2 %1598  ;;  %v13544_v54 = vpop.f32.mrf.mxu2 }
 0x39f   : > { %v13508_v25 = vld [vmem:[#allocation3 + $0x152] sm:$0xff]  ;;  %10637 = vmatmul.msk.f32.gmra.mxu1 %vm697_vm3, %v13506_v20  ;;  %10699 = vmatmul.msk.f32.gmra.mxu3 %vm697_vm3, %v13506_v20  ;;  %v13534_v22 = vld [vmem:[#allocation3 + $0x15a] sm:$0xff]  ;;  %16400 = vst [vmem:[#allocation43_spill] sm:$0xff] %v13544_v54  ;;  %v13546_v5 = vpop.f32.mrf.mxu0 }
 0x3a0   : > { %10668 = vmatmul.msk.f32.gmra.mxu2 %vm697_vm3, %v13508_v25  ;;  %v2184_v60 = vadd.f32 %v2152_v24, %v1926_v43  ;;  %v2627_v52 = vpop.permute.xlu0 %2626  ;;  %v4705_v33 = vld [vmem:[#allocation13 + $0x50] sm:$0xff]  ;;  %16401 = vst [vmem:[#allocation44_spill] sm:$0xff] %v13546_v5 }
 0x3a1   : > { %v2669_v32 = vmul.f32 %v13151_v14, %v2627_v52  ;;  %4818 = vmatpush.msrb.mxu1 %v4705_v33 }
 0x3a2   : > { %v2442_v38 = vadd.f32 %v2410_v51, %v2184_v60  ;;  %v4983_v60 = vld [vmem:[#allocation13 + $0x68] sm:$0xff]  ;;  %v5259_v51 = vld [vmem:[#allocation13 + $0x78] sm:$0xff] }
 0x3a3   : > { %v3138_v9 = vpop.permute.xlu1 %3137  ;;  %5094 = vmatpush.msrb.mxu2 %v4983_v60  ;;  %5370 = vmatpush.msrb.mxu3 %v5259_v51 }
 0x3a4   : > { %v3184_v21 = vmul.f32 %v13167_v10, %v3138_v9  ;;  %v13540_v29 = vpop.f32.mrf.mxu3  ;;  %v2701_v28 = vadd.f32 %v2669_v32, %v2442_v38  ;;  %v13550_v9 = vpop.f32.mrf.mxu1 }
 0x3a5   : > { %16402 = vst [vmem:[#allocation45_spill] sm:$0xff] %v13550_v9 }
 0x3a6   : > { %v3216_v2 = vadd.f32 %v3184_v21, %v2958_v45  ;;  %v3185_v45 = vmul.f32 %v13167_v10, %v3143_v16  ;;  %v13556_v38 = vpop.f32.mrf.mxu2  ;;  %v1088_v33 = vpop.permute.xlu2 %1087 }
 0x3a7   : > { %16404 = vst [vmem:[#allocation47_spill] sm:$0xff] %v13556_v38  ;;  %v5535_v38 = vld [vmem:[#allocation13 + $0x88] sm:$0xff] }
 0x3a8   : > { %10669 = vmatmul.msk.f32.gmra.mxu2 %vm697_vm3, %v13534_v22  ;;  %v3252_v4 = vadd.f32 %v13177_v6, %v3216_v2  ;;  %v1083_v43 = vpop.permute.xlu0 %1082  ;;  %v4982_v2 = vld [vmem:[#allocation13 + $0x60] sm:$0xff]  ;;  %5646 = vmatpush.msra.mxu0 %v5535_v38 }
 0x3a9   : > { %5095 = vmatpush.msrb.mxu2 %v4982_v2 }
 0x3aa   : > { %v3284_v24 = vmax.f32 %v3252_v4, 0.0 }
 0x3ab   : > { %v2885_v34 = vpop.permute.xlu1 %2884 }
 0x3ac   : > { %v3320_v14 = vadd.f32 %v13188_v42, %v3284_v24  ;;  %v2927_v52 = vmul.f32 %v13163_v58, %v2885_v34  ;;  %v13554_v4 = vpop.f32.mrf.mxu3  ;;  %v13559_v34 = vpop.f32.mrf.mxu0 }
 0x3ad   : > { %16403 = vst [vmem:[#allocation46_spill] sm:$0xff] %v13554_v4  ;;  %v4672_v4 = vld [vmem:[#allocation3 + $0x1a] sm:$0xff] }
 0x3ae   : > { %3353 = vst.msk [vmem:[#allocation3 + $0x169] sm:$0xff] %vm697_vm3, %v3320_v14  ;;  %v2959_v21 = vadd.f32 %v2927_v52, %v2701_v28  ;;  %v13565_v52 = vpop.f32.mrf.mxu1  ;;  %v13577_v60 = vpop.f32.mrf.mxu2 }
 0x3af   : > { %16405 = vst [vmem:[#allocation48_spill] sm:$0xff] %v13559_v34  ;;  %v1604_v2 = vpop.permute.xlu2 %1603  ;;  %v11386_v34 = vld [vmem:[#allocation9] ss:$0 sm:$0xff] }
 0x3b0   : > { %v3217_v32 = vadd.f32 %v3185_v45, %v2959_v21  ;;  %v1857_v14 = vpop.permute.xlu0 %1856  ;;  %16407 = vst [vmem:[#allocation50_spill] sm:$0xff] %v13565_v52  ;;  %v1121_v5 = vmul.f32 %v11386_v34, %v1083_v43 }
 0x3b1   : > { %16409 = vst [vmem:[#allocation52_spill] sm:$0xff] %v13577_v60  ;;  %v1895_v52 = vmul.f32 %v11388_v59, %v1857_v14  ;;  %v1122_v14 = vmul.f32 %v11386_v34, %v1088_v33  ;;  %v4397_v33 = vld [vmem:[#allocation3 + $0x21] sm:$0xff] }
 0x3b2   : > { %v3253_v58 = vadd.f32 %v13177_v6, %v3217_v32  ;;  %v4673_v34 = vld [vmem:[#allocation3 + $0x22] sm:$0xff] }
 0x3b3   : > { %v1341_v24 = vpop.permute.xlu1 %1340 }
 0x3b4   : > { %v3285_v10 = vmax.f32 %v3253_v58, 0.0  ;;  %v13575_v6 = vpop.f32.mrf.mxu3  ;;  %v13579_v51 = vpop.f32.mrf.mxu0  ;;  %v11385_v58 = vld [vmem:[#allocation9 + $0x1] ss:$0 sm:$0xff] }
 0x3b5   : > { %v13561_v16 = vld [vmem:[#allocation3 + $0x169] sm:$0xff]  ;;  %16408 = vst [vmem:[#allocation51_spill] sm:$0xff] %v13575_v6 }
 0x3b6   : > { %16406 = vst [vmem:[#allocation49_spill] sm:$0xff] %v13561_v16  ;;  %v13563_v28 = vld [vmem:[#allocation3 + $0x168] sm:$0xff]  ;;  %v3321_v45 = vadd.f32 %v13188_v42, %v3285_v10  ;;  %10606 = vmatmul.msk.f32.gmra.mxu0 %vm697_vm3, %v13561_v16  ;;  %v13581_v32 = vpop.f32.mrf.mxu1  ;;  %v1379_v10 = vmul.f32 %v11385_v58, %v1341_v24  ;;  %v13599_v60 = vpop.f32.mrf.mxu2 }
 0x3b7   : > { %10638 = vmatmul.msk.f32.gmra.mxu1 %vm697_vm3, %v13563_v28  ;;  %10700 = vmatmul.msk.f32.gmra.mxu3 %vm697_vm3, %v13563_v28  ;;  %16410 = vst [vmem:[#allocation53_spill] sm:$0xff] %v13579_v51  ;;  %v2890_v57 = vpop.permute.xlu2 %2889 }
 0x3b8   : > { %3354 = vst.msk [vmem:[#allocation3 + $0x171] sm:$0xff] %vm697_vm3, %v3321_v45  ;;  %v1346_v42 = vpop.permute.xlu0 %1345  ;;  %v1411_v43 = vadd.f32 %v1379_v10, %v1121_v5  ;;  %v11389_v10 = vld [vmem:[#allocation9 + $0x4] ss:$0 sm:$0xff] }
 0x3b9   : > { %16411 = vst [vmem:[#allocation54_spill] sm:$0xff] %v13581_v32  ;;  %v11387_v32 = vld [vmem:[#allocation9 + $0x2] ss:$0 sm:$0xff] }
 0x3ba   : > { %16416 = vst [vmem:[#allocation59_spill] sm:$0xff] %v13599_v60  ;;  %v1637_v38 = vmul.f32 %v11387_v32, %v13542_v26 }
 0x3bb   : > { %v2115_v21 = vpop.permute.xlu1 %2114 }
 0x3bc   : > { %v13593_v51 = vpop.f32.mrf.mxu3  ;;  %v13602_v9 = vpop.f32.mrf.mxu0 }
 0x3bd   : > { %16415 = vst [vmem:[#allocation58_spill] sm:$0xff] %v13593_v51  ;;  %v1669_v51 = vadd.f32 %v1637_v38, %v1411_v43  ;;  %v11390_v43 = vld [vmem:[#allocation9 + $0x5] ss:$0 sm:$0xff] }
 0x3be   : > { %16417 = vst [vmem:[#allocation60_spill] sm:$0xff] %v13602_v9  ;;  %v13604_v13 = vpop.f32.mrf.mxu1  ;;  %v2153_v9 = vmul.f32 %v11389_v10, %v2115_v21  ;;  %v13618_v30 = vpop.f32.mrf.mxu2 }
 0x3bf   : > { %v13583_v31 = vld [vmem:[#allocation3 + $0x171] sm:$0xff]  ;;  %16418 = vst [vmem:[#allocation61_spill] sm:$0xff] %v13604_v13 }
 0x3c0   : > { %16412 = vst [vmem:[#allocation55_spill] sm:$0xff] %v13583_v31  ;;  %v13585_v54 = vld [vmem:[#allocation3 + $0x170] sm:$0xff]  ;;  %10607 = vmatmul.msk.f32.gmra.mxu0 %vm697_vm3, %v13583_v31  ;;  %v2632_v6 = vpop.permute.xlu0 %2631  ;;  %v4396_v31 = vld [vmem:[#allocation3 + $0x19] sm:$0xff] }
 0x3c1   : > { %16413 = vst [vmem:[#allocation56_spill] sm:$0xff] %v13585_v54  ;;  %v13587_v45 = vld [vmem:[#allocation3 + $0x16a] sm:$0xff]  ;;  %10639 = vmatmul.msk.f32.gmra.mxu1 %vm697_vm3, %v13585_v54  ;;  %10701 = vmatmul.msk.f32.gmra.mxu3 %vm697_vm3, %v13585_v54  ;;  %v1380_v54 = vmul.f32 %v11385_v58, %v1346_v42  ;;  %v13606_v5 = vld [vmem:[#allocation3 + $0x172] sm:$0xff] }
 0x3c2   : > { %16414 = vst [vmem:[#allocation57_spill] sm:$0xff] %v13587_v45  ;;  %10670 = vmatmul.msk.f32.gmra.mxu2 %vm697_vm3, %v13587_v45  ;;  %v1927_v45 = vadd.f32 %v1895_v52, %v1669_v51  ;;  %v11391_v51 = vld [vmem:[#allocation9 + $0x6] ss:$0 sm:$0xff] }
 0x3c3   : > { %v2373_v24 = vpop.permute.xlu1 %2372  ;;  %16419 = vst [vmem:[#allocation62_spill] sm:$0xff] %v13606_v5  ;;  %v1412_v52 = vadd.f32 %v1380_v54, %v1122_v14  ;;  %v2670_v42 = vmul.f32 %v11391_v51, %v2632_v6  ;;  %v4949_v54 = vld [vmem:[#allocation3 + $0x30] sm:$0xff] }
 0x3c4   : > { %v13610_v26 = vpop.f32.mrf.mxu3  ;;  %v2411_v38 = vmul.f32 %v11390_v43, %v2373_v24  ;;  %v2185_v13 = vadd.f32 %v2153_v9, %v1927_v45  ;;  %v13614_v58 = vpop.f32.mrf.mxu0  ;;  %16423 = vst [vmem:[#allocation66_spill] sm:$0xff] %v13618_v30  ;;  %v11393_v24 = vld [vmem:[#allocation9 + $0x8] ss:$0 sm:$0xff]  ;;  %v4957_v30 = vld [vmem:[#allocation3 + $0x90] sm:$0xff] }
 0x3c5   : > { %16420 = vst [vmem:[#allocation63_spill] sm:$0xff] %v13610_v26  ;;  %v2378_v45 = vpop.permute.xlu2 %2377 }
 0x3c6   : > { %16421 = vst [vmem:[#allocation64_spill] sm:$0xff] %v13614_v58  ;;  %v13616_v16 = vpop.f32.mrf.mxu1  ;;  %v2443_v26 = vadd.f32 %v2411_v38, %v2185_v13 }
 0x3c7   : > { %16422 = vst [vmem:[#allocation65_spill] sm:$0xff] %v13616_v16  ;;  %v13821_v16 = vld [vmem:[#allocation3 + $0xc2] sm:$0xff] }
 0x3c8   : > { %10704 = vmatmul.msk.f32.vlgmr.msrb.gmra.mxu0 %vm697_vm3, %v4396_v31  ;;  %v2120_v31 = vpop.permute.xlu0 %2119  ;;  %16483 = vst [vmem:[#allocation126_spill] sm:$0xff] %v13821_v16 }
 0x3c9   : > { %10736 = vmatmul.msk.f32.vlgmr.msrb.gmra.mxu1 %vm697_vm3, %v4672_v4  ;;  %v1638_v4 = vmul.f32 %v11387_v32, %v1604_v2  ;;  %v2154_v9 = vmul.f32 %v11389_v10, %v2120_v31  ;;  %v11392_v2 = vld [vmem:[#allocation9 + $0x7] ss:$0 sm:$0xff] }
 0x3ca   : > { %10671 = vmatmul.msk.f32.gmra.mxu2 %vm697_vm3, %v13606_v5  ;;  %v2702_v5 = vadd.f32 %v2670_v42, %v2443_v26  ;;  %v2928_v13 = vmul.f32 %v11392_v2, %v2890_v57  ;;  %v11394_v57 = vld [vmem:[#allocation11] ss:$0 sm:$0xff] }
 0x3cb   : > { %v1862_v60 = vpop.permute.xlu1 %1861  ;;  %v1670_v21 = vadd.f32 %v1638_v4, %v1412_v52  ;;  %v2412_v4 = vmul.f32 %v11390_v43, %v2378_v45  ;;  %v5258_v45 = vld [vmem:[#allocation13 + $0x70] sm:$0xff] }
 0x3cc   : > { %v1896_v53 = vmul.f32 %v11388_v59, %v1862_v60  ;;  %v13622_v6 = vpop.f32.mrf.mxu3  ;;  %v2960_v32 = vadd.f32 %v2928_v13, %v2702_v5  ;;  %v13625_v26 = vpop.f32.mrf.mxu0  ;;  %v4950_v5 = vld [vmem:[#allocation3 + $0x38] sm:$0xff]  ;;  %5371 = vmatpush.msrb.mxu3 %v5258_v45 }
 0x3cd   : > { %16424 = vst [vmem:[#allocation67_spill] sm:$0xff] %v13622_v6  ;;  %v3153_v13 = vpop.permute.xlu2 %3152  ;;  %v13836_v6 = vld [vmem:[#allocation3 + $0xca] sm:$0xff] }
 0x3ce   : > { %v1928_v59 = vadd.f32 %v1896_v53, %v1670_v21  ;;  %16425 = vst [vmem:[#allocation68_spill] sm:$0xff] %v13625_v26  ;;  %v13627_v42 = vpop.f32.mrf.mxu1  ;;  %v4402_v26 = vld [vmem:[#allocation3 + $0x61] sm:$0xff] }
 0x3cf   : > { %16426 = vst [vmem:[#allocation69_spill] sm:$0xff] %v13627_v42  ;;  %v13806_v42 = vld [vmem:[#allocation3 + $0xb2] sm:$0xff] }
 0x3d0   : > { %10705 = vmatmul.msk.f32.gmra.mxu0 %vm697_vm3, %v4397_v33  ;;  %v2186_v38 = vadd.f32 %v2154_v9, %v1928_v59  ;;  %v2637_v52 = vpop.permute.xlu0 %2636  ;;  %v13629_v33 = vpop.f32.mrf.mxu2  ;;  %16479 = vst [vmem:[#allocation122_spill] sm:$0xff] %v13806_v42 }
 0x3d1   : > { %10737 = vmatmul.msk.f32.gmra.mxu1 %vm697_vm3, %v4673_v34  ;;  %v2671_v31 = vmul.f32 %v11391_v51, %v2637_v52  ;;  %16427 = vst [vmem:[#allocation70_spill] sm:$0xff] %v13629_v33  ;;  %v13631_v34 = vld [vmem:[#allocation3 + $0x31] sm:$0xff] }
 0x3d2   : > { %10768 = vmatmul.msk.f32.vlgmr.msrb.gmra.mxu2 %vm697_vm3, %v4949_v54  ;;  %v13633_v54 = vld [vmem:[#allocation3 + $0x32] sm:$0xff]  ;;  %v2444_v21 = vadd.f32 %v2412_v4, %v2186_v38  ;;  %v3187_v38 = vmul.f32 %v11393_v24, %v3153_v13  ;;  %v13718_v33 = vld [vmem:[#allocation3 + $0x6a] sm:$0xff]  ;;  %16487 = vst [vmem:[#allocation130_spill] sm:$0xff] %v13836_v6 }
 0x3d3   : > { %v3148_v60 = vpop.permute.xlu1 %3147  ;;  %16450 = vst [vmem:[#allocation93_spill] sm:$0xff] %v13718_v33 }
 0x3d4   : > { %v3186_v14 = vmul.f32 %v11393_v24, %v3148_v60  ;;  %v13639_v9 = vpop.f32.mrf.mxu3  ;;  %v2703_v51 = vadd.f32 %v2671_v31, %v2444_v21  ;;  %v11395_v60 = vld [vmem:[%s16316_s3] ss:$0 sm:$0xff]  ;;  %v13645_v52 = vpop.f32.mrf.mxu0  ;;  %v13650_v31 = vld [vmem:[#allocation3 + $0x3a] sm:$0xff] }
 0x3d5   : > { %16428 = vst [vmem:[#allocation71_spill] sm:$0xff] %v13639_v9  ;;  %v4951_v21 = vld [vmem:[#allocation3 + $0x48] sm:$0xff] }
 0x3d6   : > { %v3218_v10 = vadd.f32 %v3186_v14, %v2960_v32  ;;  %16429 = vst [vmem:[#allocation72_spill] sm:$0xff] %v13645_v52  ;;  %v4411_v9 = vld [vmem:[#allocation3 + $0xc9] sm:$0xff] }
 0x3d8   : > { %v3254_v53 = vadd.f32 %v11394_v57, %v3218_v10  ;;  %10706 = vmatmul.msk.f32.gmra.mxu0 %vm697_vm3, %v13631_v34  ;;  %v13647_v10 = vpop.f32.mrf.mxu1 }
 0x3d9   : > { %10738 = vmatmul.msk.f32.gmra.mxu1 %vm697_vm3, %v13633_v54  ;;  %16430 = vst [vmem:[#allocation73_spill] sm:$0xff] %v13647_v10  ;;  %v4958_v10 = vld [vmem:[#allocation3 + $0x98] sm:$0xff] }
 0x3da   : > { %10769 = vmatmul.msk.f32.gmra.mxu2 %vm697_vm3, %v4950_v5  ;;  %v3286_v43 = vmax.f32 %v3254_v53, 0.0  ;;  %v4399_v53 = vld [vmem:[#allocation3 + $0x39] sm:$0xff] }
 0x3db   : > { %v2895_v59 = vpop.permute.xlu1 %2894 }
 0x3dc   : > { %v3322_v32 = vadd.f32 %v11395_v60, %v3286_v43  ;;  %v2929_v14 = vmul.f32 %v11392_v2, %v2895_v59  ;;  %v13655_v43 = vpop.f32.mrf.mxu3  ;;  %v13657_v2 = vpop.f32.mrf.mxu2 }
 0x3dd   : > { %16431 = vst [vmem:[#allocation74_spill] sm:$0xff] %v13655_v43  ;;  %v13660_v13 = vpop.f32.mrf.mxu0  ;;  %v4961_v43 = vld [vmem:[#allocation3 + $0xc0] sm:$0xff] }
 0x3de   : > { %3355 = vst.msk [vmem:[#allocation3 + $0x181] sm:$0xff] %vm697_vm3, %v3322_v32  ;;  %v2961_v4 = vadd.f32 %v2929_v14, %v2703_v51  ;;  %v4400_v14 = vld [vmem:[#allocation3 + $0x49] sm:$0xff] }
 0x3df   : > { %16432 = vst [vmem:[#allocation75_spill] sm:$0xff] %v13657_v2  ;;  %v13702_v2 = vld [vmem:[#allocation3 + $0x62] sm:$0xff] }
 0x3e0   : > { %v3219_v5 = vadd.f32 %v3187_v38, %v2961_v4  ;;  %10707 = vmatmul.msk.f32.gmra.mxu0 %vm697_vm3, %v4399_v53  ;;  %16433 = vst [vmem:[#allocation76_spill] sm:$0xff] %v13660_v13  ;;  %v13664_v59 = vpop.f32.mrf.mxu1  ;;  %v13668_v38 = vld [vmem:[#allocation3 + $0x4a] sm:$0xff]  ;;  %v4953_v13 = vld [vmem:[#allocation3 + $0x60] sm:$0xff] }
 0x3e1   : > { %10739 = vmatmul.msk.f32.gmra.mxu1 %vm697_vm3, %v13650_v31  ;;  %16434 = vst [vmem:[#allocation77_spill] sm:$0xff] %v13664_v59  ;;  %v4955_v59 = vld [vmem:[#allocation3 + $0x78] sm:$0xff] }
 0x3e2   : > { %10770 = vmatmul.msk.f32.gmra.mxu2 %vm697_vm3, %v4951_v21  ;;  %v3255_v24 = vadd.f32 %v11394_v57, %v3219_v5  ;;  %16435 = vst [vmem:[#allocation78_spill] sm:$0xff] %v13668_v38  ;;  %v4952_v57 = vld [vmem:[#allocation3 + $0x50] sm:$0xff] }
 0x3e3   : > { %16445 = vst [vmem:[#allocation88_spill] sm:$0xff] %v13702_v2 }
 0x3e4   : > { %v3287_v45 = vmax.f32 %v3255_v24, 0.0  ;;  %v13674_v4 = vpop.f32.mrf.mxu3  ;;  %v13676_v5 = vpop.f32.mrf.mxu2 }
 0x3e5   : > { %v13662_v51 = vld [vmem:[#allocation3 + $0x180] sm:$0xff]  ;;  %16436 = vst [vmem:[#allocation79_spill] sm:$0xff] %v13674_v4  ;;  %v4959_v4 = vld [vmem:[#allocation3 + $0xa8] sm:$0xff] }
 0x3e6   : > { %v3323_v32 = vadd.f32 %v11395_v60, %v3287_v45  ;;  %10702 = vmatmul.msk.f32.gmra.mxu3 %vm697_vm3, %v13662_v51  ;;  %16437 = vst [vmem:[#allocation80_spill] sm:$0xff] %v13676_v5  ;;  %v13679_v60 = vpop.f32.mrf.mxu0  ;;  %v4401_v45 = vld [vmem:[#allocation3 + $0x51] sm:$0xff] }
 0x3e7   : > { %16438 = vst [vmem:[#allocation81_spill] sm:$0xff] %v13679_v60 }
 0x3e8   : > { %3356 = vst.msk [vmem:[#allocation3 + $0x189] sm:$0xff] %vm697_vm3, %v3323_v32  ;;  %10708 = vmatmul.msk.f32.gmra.mxu0 %vm697_vm3, %v4400_v14  ;;  %v13681_v21 = vpop.f32.mrf.mxu1  ;;  %v13688_v32 = vld [vmem:[#allocation3 + $0x52] sm:$0xff] }
 0x3e9   : > { %10740 = vmatmul.msk.f32.gmra.mxu1 %vm697_vm3, %v13668_v38  ;;  %16439 = vst [vmem:[#allocation82_spill] sm:$0xff] %v13681_v21  ;;  %v4954_v21 = vld [vmem:[#allocation3 + $0x68] sm:$0xff]  ;;  %v13924_v38 = vld [vmem:[#allocation3 + $0x112] sm:$0xff] }
 0x3ea   : > { %10771 = vmatmul.msk.f32.gmra.mxu2 %vm697_vm3, %v4952_v57  ;;  %16440 = vst [vmem:[#allocation83_spill] sm:$0xff] %v13688_v32 }
 0x3eb   : > { %16503 = vst [vmem:[#allocation146_spill] sm:$0xff] %v13924_v38 }
 0x3ec   : > { %v13690_v52 = vpop.f32.mrf.mxu3  ;;  %v13695_v57 = vpop.f32.mrf.mxu2 }
 0x3ed   : > { %16441 = vst [vmem:[#allocation84_spill] sm:$0xff] %v13690_v52  ;;  %v4956_v52 = vld [vmem:[#allocation3 + $0x80] sm:$0xff] }
 0x3ee   : > { %16442 = vst [vmem:[#allocation85_spill] sm:$0xff] %v13695_v57  ;;  %v13697_v60 = vpop.f32.mrf.mxu0 }
 0x3ef   : > { %v13683_v24 = vld [vmem:[#allocation3 + $0x188] sm:$0xff]  ;;  %16443 = vst [vmem:[#allocation86_spill] sm:$0xff] %v13697_v60 }
 0x3f0   : > { %10703 = vmatmul.msk.f32.gmra.mxu3 %vm697_vm3, %v13683_v24  ;;  %10709 = vmatmul.msk.f32.gmra.mxu0 %vm697_vm3, %v4401_v45  ;;  %v13699_v5 = vpop.f32.mrf.mxu1 }
 0x3f1   : > { %10741 = vmatmul.msk.f32.gmra.mxu1 %vm697_vm3, %v13688_v32  ;;  %16444 = vst [vmem:[#allocation87_spill] sm:$0xff] %v13699_v5  ;;  %v4403_v5 = vld [vmem:[#allocation3 + $0x69] sm:$0xff] }
 0x3f2   : > { %10772 = vmatmul.msk.f32.gmra.mxu2 %vm697_vm3, %v4953_v13  ;;  %v13906_v32 = vld [vmem:[#allocation3 + $0x10a] sm:$0xff] }
 0x3f3   : > { %16501 = vst [vmem:[#allocation144_spill] sm:$0xff] %v13906_v32 }
 0x3f4   : > { %v13706_v58 = vpop.f32.mrf.mxu3  ;;  %v13711_v13 = vpop.f32.mrf.mxu2 }
 0x3f5   : > { %16446 = vst [vmem:[#allocation89_spill] sm:$0xff] %v13706_v58  ;;  %v13733_v58 = vld [vmem:[#allocation3 + $0x7a] sm:$0xff] }
 0x3f6   : > { %16447 = vst [vmem:[#allocation90_spill] sm:$0xff] %v13711_v13  ;;  %v13713_v60 = vpop.f32.mrf.mxu0 }
 0x3f7   : > { %16448 = vst [vmem:[#allocation91_spill] sm:$0xff] %v13713_v60 }
 0x3f8   : > { %10710 = vmatmul.msk.f32.gmra.mxu0 %vm697_vm3, %v4402_v26  ;;  %10800 = vmatmul.msk.f32.vlgmr.msrb.gmra.mxu3 %vm697_vm3, %v13631_v34  ;;  %v13715_v57 = vpop.f32.mrf.mxu1  ;;  %16455 = vst [vmem:[#allocation98_spill] sm:$0xff] %v13733_v58 }
 0x3f9   : > { %10742 = vmatmul.msk.f32.gmra.mxu1 %vm697_vm3, %v13702_v2  ;;  %16449 = vst [vmem:[#allocation92_spill] sm:$0xff] %v13715_v57  ;;  %v4404_v57 = vld [vmem:[#allocation3 + $0x79] sm:$0xff] }
 0x3fa   : > { %10773 = vmatmul.msk.f32.gmra.mxu2 %vm697_vm3, %v4954_v21 }
 0x3fc   : > { %v13721_v34 = vpop.f32.mrf.mxu3  ;;  %v13726_v21 = vpop.f32.mrf.mxu2 }
 0x3fd   : > { %16451 = vst [vmem:[#allocation94_spill] sm:$0xff] %v13721_v34  ;;  %v13748_v34 = vld [vmem:[#allocation3 + $0x82] sm:$0xff] }
 0x3fe   : > { %16452 = vst [vmem:[#allocation95_spill] sm:$0xff] %v13726_v21  ;;  %v13728_v60 = vpop.f32.mrf.mxu0 }
 0x3ff   : > { %16453 = vst [vmem:[#allocation96_spill] sm:$0xff] %v13728_v60 }
 0x400   : > { %10711 = vmatmul.msk.f32.gmra.mxu0 %vm697_vm3, %v4403_v5  ;;  %10801 = vmatmul.msk.f32.gmra.mxu3 %vm697_vm3, %v4399_v53  ;;  %v13730_v13 = vpop.f32.mrf.mxu1  ;;  %16460 = vst [vmem:[#allocation103_spill] sm:$0xff] %v13748_v34 }
 0x401   : > { %10743 = vmatmul.msk.f32.gmra.mxu1 %vm697_vm3, %v13718_v33  ;;  %16454 = vst [vmem:[#allocation97_spill] sm:$0xff] %v13730_v13  ;;  %v4405_v13 = vld [vmem:[#allocation3 + $0x81] sm:$0xff] }
 0x402   : > { %10774 = vmatmul.msk.f32.gmra.mxu2 %vm697_vm3, %v4955_v59 }
 0x404   : > { %v13736_v53 = vpop.f32.mrf.mxu3  ;;  %v13741_v59 = vpop.f32.mrf.mxu2 }
 0x405   : > { %16456 = vst [vmem:[#allocation99_spill] sm:$0xff] %v13736_v53  ;;  %v13763_v53 = vld [vmem:[#allocation3 + $0x92] sm:$0xff] }
 0x406   : > { %16457 = vst [vmem:[#allocation100_spill] sm:$0xff] %v13741_v59  ;;  %v13743_v60 = vpop.f32.mrf.mxu0 }
 0x407   : > { %16458 = vst [vmem:[#allocation101_spill] sm:$0xff] %v13743_v60 }
 0x408   : > { %10712 = vmatmul.msk.f32.gmra.mxu0 %vm697_vm3, %v4404_v57  ;;  %10802 = vmatmul.msk.f32.gmra.mxu3 %vm697_vm3, %v4400_v14  ;;  %v13745_v21 = vpop.f32.mrf.mxu1  ;;  %16465 = vst [vmem:[#allocation108_spill] sm:$0xff] %v13763_v53 }
 0x409   : > { %10744 = vmatmul.msk.f32.gmra.mxu1 %vm697_vm3, %v13733_v58  ;;  %16459 = vst [vmem:[#allocation102_spill] sm:$0xff] %v13745_v21  ;;  %v4406_v21 = vld [vmem:[#allocation3 + $0x91] sm:$0xff]  ;;  %v4967_v58 = vld [vmem:[#allocation3 + $0x108] sm:$0xff] }
 0x40a   : > { %10775 = vmatmul.msk.f32.gmra.mxu2 %vm697_vm3, %v4956_v52 }
 0x40c   : > { %v13751_v14 = vpop.f32.mrf.mxu3  ;;  %v13760_v59 = vpop.f32.mrf.mxu2 }
 0x40d   : > { %16461 = vst [vmem:[#allocation104_spill] sm:$0xff] %v13751_v14  ;;  %v13778_v14 = vld [vmem:[#allocation3 + $0x9a] sm:$0xff] }
 0x40e   : > { %v13756_v52 = vpop.f32.mrf.mxu0  ;;  %16464 = vst [vmem:[#allocation107_spill] sm:$0xff] %v13760_v59 }
 0x40f   : > { %16462 = vst [vmem:[#allocation105_spill] sm:$0xff] %v13756_v52 }
 0x410   : > { %10713 = vmatmul.msk.f32.gmra.mxu0 %vm697_vm3, %v4405_v13  ;;  %10803 = vmatmul.msk.f32.gmra.mxu3 %vm697_vm3, %v4401_v45  ;;  %v13758_v60 = vpop.f32.mrf.mxu1  ;;  %16470 = vst [vmem:[#allocation113_spill] sm:$0xff] %v13778_v14 }
 0x411   : > { %10745 = vmatmul.msk.f32.gmra.mxu1 %vm697_vm3, %v13748_v34  ;;  %16463 = vst [vmem:[#allocation106_spill] sm:$0xff] %v13758_v60  ;;  %v4407_v60 = vld [vmem:[#allocation3 + $0x99] sm:$0xff] }
 0x412   : > { %10776 = vmatmul.msk.f32.gmra.mxu2 %vm697_vm3, %v4957_v30  ;;  %v13891_v34 = vld [vmem:[#allocation3 + $0xfa] sm:$0xff] }
 0x413   : > { %16499 = vst [vmem:[#allocation142_spill] sm:$0xff] %v13891_v34 }
 0x414   : > { %v13766_v45 = vpop.f32.mrf.mxu3  ;;  %v13775_v59 = vpop.f32.mrf.mxu2 }
 0x415   : > { %16466 = vst [vmem:[#allocation109_spill] sm:$0xff] %v13766_v45  ;;  %v4960_v45 = vld [vmem:[#allocation3 + $0xb0] sm:$0xff] }
 0x416   : > { %v13771_v30 = vpop.f32.mrf.mxu0  ;;  %16469 = vst [vmem:[#allocation112_spill] sm:$0xff] %v13775_v59  ;;  %v4408_v59 = vld [vmem:[#allocation3 + $0xa9] sm:$0xff] }
 0x417   : > { %16467 = vst [vmem:[#allocation110_spill] sm:$0xff] %v13771_v30 }
 0x418   : > { %10714 = vmatmul.msk.f32.gmra.mxu0 %vm697_vm3, %v4406_v21  ;;  %10804 = vmatmul.msk.f32.gmra.mxu3 %vm697_vm3, %v4402_v26  ;;  %v13773_v52 = vpop.f32.mrf.mxu1 }
 0x419   : > { %10746 = vmatmul.msk.f32.gmra.mxu1 %vm697_vm3, %v13763_v53  ;;  %16468 = vst [vmem:[#allocation111_spill] sm:$0xff] %v13773_v52  ;;  %v13791_v52 = vld [vmem:[#allocation3 + $0xaa] sm:$0xff]  ;;  %v13887_v53 = vld [vmem:[#allocation3 + $0xf9] sm:$0xff] }
 0x41a   : > { %10777 = vmatmul.msk.f32.gmra.mxu2 %vm697_vm3, %v4958_v10  ;;  %16474 = vst [vmem:[#allocation117_spill] sm:$0xff] %v13791_v52 }
 0x41c   : > { %v13781_v26 = vpop.f32.mrf.mxu3 }
 0x41d   : > { %16471 = vst [vmem:[#allocation114_spill] sm:$0xff] %v13781_v26  ;;  %v13796_v26 = vpop.f32.mrf.mxu2 }
 0x41e   : > { %v13786_v10 = vpop.f32.mrf.mxu0  ;;  %16476 = vst [vmem:[#allocation119_spill] sm:$0xff] %v13796_v26 }
 0x41f   : > { %16472 = vst [vmem:[#allocation115_spill] sm:$0xff] %v13786_v10 }
 0x420   : > { %10715 = vmatmul.msk.f32.gmra.mxu0 %vm697_vm3, %v4407_v60  ;;  %10805 = vmatmul.msk.f32.gmra.mxu3 %vm697_vm3, %v4403_v5  ;;  %v13788_v30 = vpop.f32.mrf.mxu1 }
 0x421   : > { %10747 = vmatmul.msk.f32.gmra.mxu1 %vm697_vm3, %v13778_v14  ;;  %16473 = vst [vmem:[#allocation116_spill] sm:$0xff] %v13788_v30  ;;  %v4409_v30 = vld [vmem:[#allocation3 + $0xb1] sm:$0xff] }
 0x422   : > { %10778 = vmatmul.msk.f32.gmra.mxu2 %vm697_vm3, %v4959_v4  ;;  %v4966_v14 = vld [vmem:[#allocation3 + $0xf8] sm:$0xff] }
 0x424   : > { %v13794_v5 = vpop.f32.mrf.mxu3 }
 0x425   : > { %16475 = vst [vmem:[#allocation118_spill] sm:$0xff] %v13794_v5  ;;  %v13811_v26 = vpop.f32.mrf.mxu2  ;;  %v4410_v5 = vld [vmem:[#allocation3 + $0xc1] sm:$0xff] }
 0x426   : > { %v13801_v4 = vpop.f32.mrf.mxu0  ;;  %16481 = vst [vmem:[#allocation124_spill] sm:$0xff] %v13811_v26  ;;  %v5534_v26 = vld [vmem:[#allocation13 + $0x80] sm:$0xff] }
 0x427   : > { %16477 = vst [vmem:[#allocation120_spill] sm:$0xff] %v13801_v4  ;;  %v5986_v4 = vld [vmem:[#allocation16 + $0x38] sm:$0xff]  ;;  %5647 = vmatpush.msra.mxu0 %v5534_v26 }
 0x428   : > { %10716 = vmatmul.msk.f32.gmra.mxu0 %vm697_vm3, %v4408_v59  ;;  %10806 = vmatmul.msk.f32.gmra.mxu3 %vm697_vm3, %v4404_v57  ;;  %v13803_v10 = vpop.f32.mrf.mxu1 }
 0x429   : > { %10748 = vmatmul.msk.f32.gmra.mxu1 %vm697_vm3, %v13791_v52  ;;  %16478 = vst [vmem:[#allocation121_spill] sm:$0xff] %v13803_v10  ;;  %v4965_v52 = vld [vmem:[#allocation3 + $0xf0] sm:$0xff] }
 0x42a   : > { %10779 = vmatmul.msk.f32.gmra.mxu2 %vm697_vm3, %v4960_v45  ;;  %6095 = vmatpush.msra.mxu1 %v5986_v4 }
 0x42c   : > { %v13809_v57 = vpop.f32.mrf.mxu3 }
 0x42d   : > { %16480 = vst [vmem:[#allocation123_spill] sm:$0xff] %v13809_v57 }
 0x430   : > { %10717 = vmatmul.msk.f32.gmra.mxu0 %vm697_vm3, %v4409_v30  ;;  %10807 = vmatmul.msk.f32.gmra.mxu3 %vm697_vm3, %v4405_v13  ;;  %v13818_v10 = vpop.f32.mrf.mxu1  ;;  %v4962_v13 = vld [vmem:[#allocation3 + $0xc8] sm:$0xff] }
 0x431   : > { %10749 = vmatmul.msk.f32.gmra.mxu1 %vm697_vm3, %v13806_v42  ;;  %16482 = vst [vmem:[#allocation125_spill] sm:$0xff] %v13818_v10  ;;  %v4964_v42 = vld [vmem:[#allocation3 + $0xe0] sm:$0xff] }
 0x432   : > { %10780 = vmatmul.msk.f32.gmra.mxu2 %vm697_vm3, %v4961_v43  ;;  %v13829_v43 = vpop.f32.mrf.mxu2 }
 0x433   : > { %v13816_v45 = vpop.f32.mrf.mxu0  ;;  %16485 = vst [vmem:[#allocation128_spill] sm:$0xff] %v13829_v43 }
 0x434   : > { %v13824_v57 = vpop.f32.mrf.mxu3 }
 0x435   : > { %16484 = vst [vmem:[#allocation127_spill] sm:$0xff] %v13824_v57 }
 0x438   : > { %10718 = vmatmul.msk.f32.gmra.mxu0 %vm697_vm3, %v4410_v5  ;;  %10808 = vmatmul.msk.f32.gmra.mxu3 %vm697_vm3, %v4406_v21  ;;  %v13833_v10 = vpop.f32.mrf.mxu1  ;;  %v4963_v21 = vld [vmem:[#allocation3 + $0xd8] sm:$0xff] }
 0x439   : > { %10750 = vmatmul.msk.f32.gmra.mxu1 %vm697_vm3, %v13821_v16  ;;  %16486 = vst [vmem:[#allocation129_spill] sm:$0xff] %v13833_v10  ;;  %v4412_v10 = vld [vmem:[#allocation3 + $0xd9] sm:$0xff] }
 0x43a   : > { %10781 = vmatmul.msk.f32.gmra.mxu2 %vm697_vm3, %v4962_v13  ;;  %v13844_v26 = vpop.f32.mrf.mxu2  ;;  %v13851_v16 = vld [vmem:[#allocation3 + $0xda] sm:$0xff] }
 0x43b   : > { %16489 = vst [vmem:[#allocation132_spill] sm:$0xff] %v13844_v26 }
 0x43c   : > { %v13839_v57 = vpop.f32.mrf.mxu3  ;;  %16491 = vst [vmem:[#allocation134_spill] sm:$0xff] %v13851_v16 }
 0x43d   : > { %v13831_v4 = vpop.f32.mrf.mxu0  ;;  %16488 = vst [vmem:[#allocation131_spill] sm:$0xff] %v13839_v57  ;;  %v4413_v57 = vld [vmem:[#allocation3 + $0xe1] sm:$0xff] }
 0x440   : > { %10719 = vmatmul.msk.f32.gmra.mxu0 %vm697_vm3, %v4411_v9  ;;  %10809 = vmatmul.msk.f32.gmra.mxu3 %vm697_vm3, %v4407_v60  ;;  %v13848_v43 = vpop.f32.mrf.mxu1 }
 0x441   : > { %10751 = vmatmul.msk.f32.gmra.mxu1 %vm697_vm3, %v13836_v6  ;;  %16490 = vst [vmem:[#allocation133_spill] sm:$0xff] %v13848_v43  ;;  %v13866_v6 = vld [vmem:[#allocation3 + $0xe2] sm:$0xff] }
 0x442   : > { %10782 = vmatmul.msk.f32.gmra.mxu2 %vm697_vm3, %v4963_v21  ;;  %v13859_v21 = vpop.f32.mrf.mxu2  ;;  %16495 = vst [vmem:[#allocation138_spill] sm:$0xff] %v13866_v6 }
 0x443   : > { %16493 = vst [vmem:[#allocation136_spill] sm:$0xff] %v13859_v21 }
 0x444   : > { %v13854_v60 = vpop.f32.mrf.mxu3 }
 0x445   : > { %v13846_v13 = vpop.f32.mrf.mxu0  ;;  %16492 = vst [vmem:[#allocation135_spill] sm:$0xff] %v13854_v60 }
 0x448   : > { %10720 = vmatmul.msk.f32.gmra.mxu0 %vm697_vm3, %v4412_v10  ;;  %10810 = vmatmul.msk.f32.gmra.mxu3 %vm697_vm3, %v4408_v59  ;;  %v13863_v43 = vpop.f32.mrf.mxu1 }
 0x449   : > { %10752 = vmatmul.msk.f32.gmra.mxu1 %vm697_vm3, %v13851_v16  ;;  %16494 = vst [vmem:[#allocation137_spill] sm:$0xff] %v13863_v43  ;;  %v4414_v43 = vld [vmem:[#allocation3 + $0xf1] sm:$0xff] }
 0x44a   : > { %10783 = vmatmul.msk.f32.gmra.mxu2 %vm697_vm3, %v4964_v42  ;;  %v4082_v42 = vpop.f32.mrf.mxu2  ;;  %v13877_v16 = vld [vmem:[#allocation3 + $0xf2] sm:$0xff] }
 0x44b   : > { %16497 = vst [vmem:[#allocation140_spill] sm:$0xff] %v13877_v16 }
 0x44c   : > { %v13869_v59 = vpop.f32.mrf.mxu3 }
 0x44d   : > { %v13861_v26 = vpop.f32.mrf.mxu0  ;;  %16496 = vst [vmem:[#allocation139_spill] sm:$0xff] %v13869_v59 }
 0x450   : > { %10721 = vmatmul.msk.f32.gmra.mxu0 %vm697_vm3, %v4413_v57  ;;  %10811 = vmatmul.msk.f32.gmra.mxu3 %vm697_vm3, %v4409_v30  ;;  %v3838_v60 = vpop.f32.mrf.mxu1 }
 0x451   : > { %10753 = vmatmul.msk.f32.gmra.mxu1 %vm697_vm3, %v13866_v6 }
 0x452   : > { %10784 = vmatmul.msk.f32.gmra.mxu2 %vm697_vm3, %v4965_v52  ;;  %v4085_v6 = vpop.f32.mrf.mxu2 }
 0x454   : > { %v13880_v30 = vpop.f32.mrf.mxu3 }
 0x455   : > { %v13874_v21 = vpop.f32.mrf.mxu0  ;;  %16498 = vst [vmem:[#allocation141_spill] sm:$0xff] %v13880_v30  ;;  %v3839_v30 = vadd.f32 %v3838_v60, %v13816_v45 }
 0x457   : > { %v4118_v33 = vadd.f32 %v4082_v42, %v3839_v30  ;;  %v13919_v30 = vld [vmem:[#allocation3 + $0x111] sm:$0xff] }
 0x458   : > { %10722 = vmatmul.msk.f32.gmra.mxu0 %vm697_vm3, %v4414_v43  ;;  %10812 = vmatmul.msk.f32.gmra.mxu3 %vm697_vm3, %v4410_v5  ;;  %v3841_v59 = vpop.f32.mrf.mxu1 }
 0x459   : > { %10754 = vmatmul.msk.f32.gmra.mxu1 %vm697_vm3, %v13877_v16  ;;  %v13902_v16 = vld [vmem:[#allocation3 + $0x109] sm:$0xff] }
 0x45a   : > { %10785 = vmatmul.msk.f32.gmra.mxu2 %vm697_vm3, %v4966_v14 }
 0x45c   : > { %v13894_v5 = vpop.f32.mrf.mxu3 }
 0x45d   : > { %v13885_v52 = vpop.f32.mrf.mxu0  ;;  %16500 = vst [vmem:[#allocation143_spill] sm:$0xff] %v13894_v5  ;;  %v5097_v5 = vpop.f32.mrf.mxu2 }
 0x460   : > { %10723 = vmatmul.msk.f32.gmra.mxu0 %vm697_vm3, %v13887_v53  ;;  %10813 = vmatmul.msk.f32.gmra.mxu3 %vm697_vm3, %v4411_v9  ;;  %v4820_v2 = vpop.f32.mrf.mxu1  ;;  %v4968_v9 = vld [vmem:[#allocation3 + $0x110] sm:$0xff] }
 0x461   : > { %10755 = vmatmul.msk.f32.gmra.mxu1 %vm697_vm3, %v13891_v34 }
 0x462   : > { %10786 = vmatmul.msk.f32.gmra.mxu2 %vm697_vm3, %v4967_v58  ;;  %v3749_v58 = vadd.f32 %v13295_v56, %v13293_v50  ;;  %v3752_v50 = vadd.f32 %v13340_v61, %v13338_v0  ;;  %v13943_v0 = vld [vmem:[#allocation3 + $0x122] sm:$0xff] }
 0x463   : > { %v4970_v61 = vld [vmem:[#allocation3 + $0x128] sm:$0xff] }
 0x464   : > { %v4088_v42 = vadd.f32 %v13344_v47, %v3749_v58 }
 0x465   : > { %v13899_v14 = vpop.f32.mrf.mxu0 }
 0x466   : > { %v4364_v56 = vadd.f32 %v13383_v55, %v4088_v42 }
 0x468   : > { %10724 = vmatmul.msk.f32.gmra.mxu0 %vm697_vm3, %v13902_v16  ;;  %10814 = vmatmul.msk.f32.gmra.mxu3 %vm697_vm3, %v4412_v10  ;;  %v3842_v10 = vadd.f32 %v3841_v59, %v13831_v4  ;;  %v4640_v59 = vadd.f32 %v13846_v13, %v4364_v56  ;;  %v13957_v56 = vld [vmem:[#allocation3 + $0x129] sm:$0xff] }
 0x469   : > { %v4358_v34 = vpop.f32.mrf.mxu3  ;;  %10756 = vmatmul.msk.f32.gmra.mxu1 %vm697_vm3, %v13906_v32  ;;  %v4969_v32 = vld [vmem:[#allocation3 + $0x120] sm:$0xff] }
 0x46a   : > { %10787 = vmatmul.msk.f32.gmra.mxu2 %vm697_vm3, %v4968_v9  ;;  %v13914_v45 = vadd.f32 %v4358_v34, %v4118_v33  ;;  %v4119_v47 = vadd.f32 %v4085_v6, %v3842_v10  ;;  %v4823_v33 = vpop.f32.mrf.mxu1  ;;  %v5100_v34 = vpop.f32.mrf.mxu2 }
 0x46c   : > { %16502 = vst [vmem:[#allocation145_spill] sm:$0xff] %v13914_v45  ;;  %v4089_v45 = vadd.f32 %v13356_v46, %v3752_v50 }
 0x46d   : > { %v13916_v60 = vpop.f32.mrf.mxu0 }
 0x46e   : > { %v4365_v55 = vadd.f32 %v13424_v17, %v4089_v45  ;;  %v13962_v17 = vld [vmem:[#allocation3 + $0x12a] sm:$0xff] }
 0x470   : > { %10725 = vmatmul.msk.f32.gmra.mxu0 %vm697_vm3, %v13919_v30  ;;  %10815 = vmatmul.msk.f32.gmra.mxu3 %vm697_vm3, %v4413_v57  ;;  %v5985_v57 = vld [vmem:[#allocation16 + $0x30] sm:$0xff]  ;;  %v4641_v13 = vadd.f32 %v13861_v26, %v4365_v55 }
 0x471   : > { %10757 = vmatmul.msk.f32.gmra.mxu1 %vm697_vm3, %v13924_v38  ;;  %v4916_v38 = vadd.f32 %v4820_v2, %v4640_v59 }
 0x472   : > { %10788 = vmatmul.msk.f32.gmra.mxu2 %vm697_vm3, %v4969_v32  ;;  %6096 = vmatpush.msra.mxu1 %v5985_v57  ;;  %v13939_v32 = vld [vmem:[#allocation3 + $0x121] sm:$0xff]  ;;  %v4826_v2 = vpop.f32.mrf.mxu1  ;;  %v5103_v10 = vpop.f32.mrf.mxu2  ;;  %v13977_v57 = vld [vmem:[#allocation3 + $0x139] sm:$0xff] }
 0x473   : > { %v4361_v4 = vpop.f32.mrf.mxu3  ;;  %v5193_v46 = vadd.f32 %v5097_v5, %v4916_v38  ;;  %v4971_v38 = vld [vmem:[#allocation3 + $0x138] sm:$0xff] }
 0x474   : > { %v13934_v9 = vadd.f32 %v4361_v4, %v4119_v47  ;;  %v4917_v4 = vadd.f32 %v4823_v33, %v4641_v13  ;;  %v3758_v33 = vadd.f32 %v13420_v41, %v13395_v15  ;;  %v3761_v13 = vadd.f32 %v13458_v12, %v13406_v49 }
 0x475   : > { %v13936_v58 = vpop.f32.mrf.mxu0 }
 0x476   : > { %16504 = vst [vmem:[#allocation147_spill] sm:$0xff] %v13934_v9 }
 0x478   : > { %10726 = vmatmul.msk.f32.gmra.mxu0 %vm697_vm3, %v13939_v32  ;;  %10816 = vmatmul.msk.f32.gmra.mxu3 %vm697_vm3, %v4414_v43  ;;  %v3755_v43 = vadd.f32 %v13379_v11, %v13376_v19  ;;  %v5194_v11 = vadd.f32 %v5100_v34, %v4917_v4 }
 0x479   : > { %10758 = vmatmul.msk.f32.gmra.mxu1 %vm697_vm3, %v13943_v0 }
 0x47a   : > { %10789 = vmatmul.msk.f32.gmra.mxu2 %vm697_vm3, %v4970_v61  ;;  %v4090_v47 = vadd.f32 %v13386_v63, %v3755_v43  ;;  %v4829_v59 = vpop.f32.mrf.mxu1  ;;  %v4091_v61 = vadd.f32 %v13400_v27, %v3758_v33 }
 0x47b   : > { %v5373_v6 = vpop.f32.mrf.mxu3 }
 0x47c   : > { %v13951_v42 = vadd.f32 %v5373_v6, %v5193_v46  ;;  %v4366_v19 = vadd.f32 %v13465_v44, %v4090_v47  ;;  %v11396_v44 = vld [vmem:[#allocation3 + $0x13a] sm:$0xff]  ;;  %v4367_v15 = vadd.f32 %v13479_v36, %v4091_v61 }
 0x47d   : > { %v13953_v50 = vpop.f32.mrf.mxu0 }
 0x47e   : > { %v4642_v63 = vadd.f32 %v13874_v21, %v4366_v19  ;;  %v11397_v21 = vld [vmem:[#allocation3 + $0x140] sm:$0xff]  ;;  %v4643_v46 = vadd.f32 %v13885_v52, %v4367_v15 }
 0x47f   : > { %v11398_v52 = vld [vmem:[#allocation3 + $0x142] sm:$0xff] }
 0x480   : > { %10727 = vmatmul.msk.f32.gmra.mxu0 %vm697_vm3, %v13957_v56  ;;  %10817 = vmatmul.msk.f32.gmra.mxu3 %vm697_vm3, %v13887_v53  ;;  %v5106_v53 = vpop.f32.mrf.mxu2  ;;  %v4918_v55 = vadd.f32 %v4826_v2, %v4642_v63  ;;  %v4092_v2 = vadd.f32 %v13414_v7, %v3761_v13  ;;  %v4919_v43 = vadd.f32 %v4829_v59, %v4643_v46 }
 0x481   : > { %10759 = vmatmul.msk.f32.gmra.mxu1 %vm697_vm3, %v13962_v17 }
 0x482   : > { %10790 = vmatmul.msk.f32.gmra.mxu2 %vm697_vm3, %v4971_v38  ;;  %v5195_v41 = vadd.f32 %v5103_v10, %v4918_v55  ;;  %v4832_v47 = vpop.f32.mrf.mxu1  ;;  %v4368_v49 = vadd.f32 %v13496_v18, %v4092_v2  ;;  %v5196_v12 = vadd.f32 %v5106_v53, %v4919_v43  ;;  %v16506_v55 = vld [vmem:[#allocation33_spill] sm:$0xff] }
 0x483   : > { %v5376_v26 = vpop.f32.mrf.mxu3 }
 0x484   : > { %v13971_v5 = vadd.f32 %v5376_v26, %v5194_v11  ;;  %v4644_v7 = vadd.f32 %v13899_v14, %v4368_v49  ;;  %v11399_v26 = vld [vmem:[#allocation3 + $0x151] sm:$0xff] }
 0x485   : > { %v13973_v45 = vpop.f32.mrf.mxu0 }
 0x486   : > { %v4920_v11 = vadd.f32 %v4832_v47, %v4644_v7  ;;  %v4426_v7 = vld [vmem:[#allocation3 + $0x181] sm:$0xff] }
 0x488   : > { %10728 = vmatmul.msk.f32.gmra.mxu0 %vm697_vm3, %v13977_v57  ;;  %10818 = vmatmul.msk.f32.gmra.mxu3 %vm697_vm3, %v13902_v16  ;;  %v13994_v16 = vld [vmem:[#allocation3 + $0x141] sm:$0xff]  ;;  %v5109_v36 = vpop.f32.mrf.mxu2 }
 0x489   : > { %10760 = vmatmul.msk.f32.gmra.mxu1 %vm697_vm3, %v11396_v44  ;;  %v5197_v14 = vadd.f32 %v5109_v36, %v4920_v11  ;;  %v16512_v36 = vld [vmem:[#allocation62_spill] sm:$0xff] }
 0x48a   : > { %10791 = vmatmul.msk.f32.gmra.mxu2 %vm697_vm3, %v11397_v21  ;;  %v4835_v18 = vpop.f32.mrf.mxu1  ;;  %v16507_v21 = vld [vmem:[#allocation49_spill] sm:$0xff] }
 0x48b   : > { %v5379_v34 = vpop.f32.mrf.mxu3  ;;  %v4427_v11 = vld [vmem:[#allocation3 + $0x189] sm:$0xff] }
 0x48c   : > { %v13988_v27 = vadd.f32 %v5379_v34, %v5195_v41 }
 0x48d   : > { %v13990_v6 = vpop.f32.mrf.mxu0 }
 0x490   : > { %10729 = vmatmul.msk.f32.gmra.mxu0 %vm697_vm3, %v13994_v16  ;;  %10819 = vmatmul.msk.f32.gmra.mxu3 %vm697_vm3, %v13919_v30  ;;  %v3764_v30 = vadd.f32 %v13473_v8, %v13417_v39  ;;  %v5112_v39 = vpop.f32.mrf.mxu2 }
 0x491   : > { %10761 = vmatmul.msk.f32.gmra.mxu1 %vm697_vm3, %v11398_v52 }
 0x492   : > { %10792 = vmatmul.msk.f32.gmra.mxu2 %vm697_vm3, %v13456_v48  ;;  %v4093_v19 = vadd.f32 %v13430_v62, %v3764_v30  ;;  %v5249_v30 = vld [vmem:[#allocation3 + $0x151] sm:$0xff] }
 0x493   : > { %v5382_v10 = vpop.f32.mrf.mxu3 }
 0x494   : > { %v14006_v4 = vadd.f32 %v5382_v10, %v5196_v12  ;;  %v4369_v48 = vadd.f32 %v13525_v37, %v4093_v19  ;;  %v5984_v10 = vld [vmem:[#allocation16 + $0x28] sm:$0xff] }
 0x495   : > { %v14008_v38 = vpop.f32.mrf.mxu0  ;;  %6097 = vmatpush.msra.mxu1 %v5984_v10  ;;  %v14073_v19 = vld [vmem:[#allocation3 + $0x182] sm:$0xff] }
 0x496   : > { %v4645_v62 = vadd.f32 %v13916_v60, %v4369_v48  ;;  %v14083_v48 = vld [vmem:[#allocation3 + $0x18a] sm:$0xff] }
 0x498   : > { %10730 = vmatmul.msk.f32.gmra.mxu0 %vm697_vm3, %v11399_v26  ;;  %10820 = vmatmul.msk.f32.gmra.mxu3 %vm697_vm3, %v13939_v32  ;;  %v3767_v32 = vadd.f32 %v13486_v1, %v13432_v3  ;;  %v4921_v59 = vadd.f32 %v4835_v18, %v4645_v62  ;;  %v4838_v3 = vpop.f32.mrf.mxu1  ;;  %v5115_v53 = vpop.f32.mrf.mxu2  ;;  %v5250_v26 = vld [vmem:[#allocation3 + $0x159] sm:$0xff]  ;;  %v16514_v62 = vld [vmem:[#allocation78_spill] sm:$0xff] }
 0x499   : > { %10762 = vmatmul.msk.f32.gmra.mxu1 %vm697_vm3, %v13508_v25 }
 0x49a   : > { %10793 = vmatmul.msk.f32.gmra.mxu2 %vm697_vm3, %v13506_v20  ;;  %v4094_v25 = vadd.f32 %v13444_v35, %v3767_v32  ;;  %v5198_v37 = vadd.f32 %v5112_v39, %v4921_v59  ;;  %v16516_v59 = vld [vmem:[#allocation83_spill] sm:$0xff] }
 0x49b   : > { %v5385_v8 = vpop.f32.mrf.mxu3 }
 0x49c   : > { %v14022_v63 = vadd.f32 %v5385_v8, %v5197_v14  ;;  %v4370_v20 = vadd.f32 %v13540_v29, %v4094_v25  ;;  %v16508_v29 = vld [vmem:[#allocation57_spill] sm:$0xff] }
 0x49d   : > { %v14024_v33 = vpop.f32.mrf.mxu0  ;;  %v4980_v14 = vld [vmem:[#allocation3 + $0x1a0] sm:$0xff] }
 0x49e   : > { %v4646_v1 = vadd.f32 %v13936_v58, %v4370_v20  ;;  %v16510_v58 = vld [vmem:[#allocation46_spill] sm:$0xff] }
 0x4a0   : > { %10731 = vmatmul.msk.f32.gmra.mxu0 %vm697_vm3, %v13504_v40  ;;  %10821 = vmatmul.msk.f32.gmra.mxu3 %vm697_vm3, %v13957_v56  ;;  %v16505_v56 = vld [vmem:[#allocation39_spill] sm:$0xff]  ;;  %v4922_v44 = vadd.f32 %v4838_v3, %v4646_v1  ;;  %v4841_v2 = vpop.f32.mrf.mxu1  ;;  %v5118_v43 = vpop.f32.mrf.mxu2  ;;  %v16518_v3 = vld [vmem:[#allocation88_spill] sm:$0xff] }
 0x4a1   : > { %10763 = vmatmul.msk.f32.gmra.mxu1 %vm697_vm3, %v13534_v22  ;;  %v3770_v61 = vadd.f32 %v16505_v56, %v13442_v23  ;;  %v5255_v1 = vld [vmem:[#allocation3 + $0x199] sm:$0xff] }
 0x4a2   : > { %10794 = vmatmul.msk.f32.gmra.mxu2 %vm697_vm3, %v13563_v28  ;;  %v16509_v28 = vld [vmem:[#allocation56_spill] sm:$0xff]  ;;  %v5199_v41 = vadd.f32 %v5115_v53, %v4922_v44  ;;  %v16520_v44 = vld [vmem:[#allocation93_spill] sm:$0xff] }
 0x4a3   : > { %v5388_v60 = vpop.f32.mrf.mxu3  ;;  %v4095_v22 = vadd.f32 %v16506_v55, %v3770_v61  ;;  %v5256_v55 = vld [vmem:[#allocation3 + $0x1a1] sm:$0xff] }
 0x4a4   : > { %v14039_v35 = vadd.f32 %v5388_v60, %v5198_v37 }
 0x4a5   : > { %v14041_v40 = vpop.f32.mrf.mxu0  ;;  %v4371_v15 = vadd.f32 %v16510_v58, %v4095_v22 }
 0x4a7   : > { %v4647_v23 = vadd.f32 %v13953_v50, %v4371_v15  ;;  %v16522_v15 = vld [vmem:[#allocation98_spill] sm:$0xff] }
 0x4a8   : > { %10732 = vmatmul.msk.f32.gmra.mxu0 %vm697_vm3, %v16507_v21  ;;  %10822 = vmatmul.msk.f32.gmra.mxu3 %vm697_vm3, %v13977_v57  ;;  %v16511_v57 = vld [vmem:[#allocation55_spill] sm:$0xff]  ;;  %v14102_v39 = vpop.f32.mrf.mxu1 }
 0x4a9   : > { %10764 = vmatmul.msk.f32.gmra.mxu1 %vm697_vm3, %v16508_v29  ;;  %v4923_v47 = vadd.f32 %v4841_v2, %v4647_v23  ;;  %v5983_v29 = vld [vmem:[#allocation16 + $0x20] sm:$0xff] }
 0x4aa   : > { %10795 = vmatmul.msk.f32.gmra.mxu2 %vm697_vm3, %v16509_v28  ;;  %6098 = vmatpush.msra.mxu1 %v5983_v29  ;;  %v16524_v2 = vld [vmem:[#allocation103_spill] sm:$0xff] }
 0x4ab   : > { %v5391_v34 = vpop.f32.mrf.mxu3  ;;  %v5200_v50 = vadd.f32 %v5118_v43, %v4923_v47 }
 0x4ac   : > { %v14056_v46 = vadd.f32 %v5391_v34, %v5199_v41 }
 0x4ad   : > { %v14058_v13 = vpop.f32.mrf.mxu0 }
 0x4b0   : > { %10733 = vmatmul.msk.f32.gmra.mxu0 %vm697_vm3, %v16511_v57  ;;  %10823 = vmatmul.msk.f32.gmra.mxu3 %vm697_vm3, %v13994_v16  ;;  %v4979_v16 = vld [vmem:[#allocation3 + $0x198] sm:$0xff]  ;;  %v14111_v32 = vpop.f32.mrf.mxu1 }
 0x4b1   : > { %10765 = vmatmul.msk.f32.gmra.mxu1 %vm697_vm3, %v16512_v36  ;;  %v16526_v36 = vld [vmem:[#allocation108_spill] sm:$0xff] }
 0x4b2   : > { %10796 = vmatmul.msk.f32.gmra.mxu2 %vm697_vm3, %v13662_v51 }
 0x4b3   : > { %v5394_v52 = vpop.f32.mrf.mxu3 }
 0x4b4   : > { %v14068_v49 = vadd.f32 %v5394_v52, %v5200_v50 }
 0x4b5   : > { %v14070_v12 = vpop.f32.mrf.mxu0 }
 0x4b8   : > { %10734 = vmatmul.msk.f32.gmra.mxu0 %vm697_vm3, %v4426_v7  ;;  %10824 = vmatmul.msk.f32.gmra.mxu3 %vm697_vm3, %v5249_v30  ;;  %v14122_v37 = vpop.f32.mrf.mxu1  ;;  %v16528_v30 = vld [vmem:[#allocation113_spill] sm:$0xff] }
 0x4b9   : > { %10766 = vmatmul.msk.f32.gmra.mxu1 %vm697_vm3, %v14073_v19 }
 0x4ba   : > { %10797 = vmatmul.msk.f32.gmra.mxu2 %vm697_vm3, %v13683_v24 }
 0x4bd   : > { %v14080_v51 = vpop.f32.mrf.mxu0 }
 0x4c0   : > { %10735 = vmatmul.msk.f32.gmra.mxu0 %vm697_vm3, %v4427_v11  ;;  %10825 = vmatmul.msk.f32.gmra.mxu3 %vm697_vm3, %v5250_v26  ;;  %v14135_v22 = vpop.f32.mrf.mxu1 }
 0x4c1   : > { %10767 = vmatmul.msk.f32.gmra.mxu1 %vm697_vm3, %v14083_v48 }
 0x4c2   : > { %10798 = vmatmul.msk.f32.gmra.mxu2 %vm697_vm3, %v4979_v16 }
 0x4c5   : > { %v14089_v18 = vpop.f32.mrf.mxu0 }
 0x4c8   : > { %10826 = vmatmul.msk.f32.gmra.mxu3 %vm697_vm3, %v16507_v21  ;;  %10832 = vmatmul.msk.f32.vlgmr.msra.gmra.mxu0 %vm697_vm3, %v13633_v54  ;;  %v14109_v54 = vpop.f32.mrf.mxu2  ;;  %v14148_v41 = vpop.f32.mrf.mxu1 }
 0x4ca   : > { %10799 = vmatmul.msk.f32.gmra.mxu2 %vm697_vm3, %v4980_v14 }
 0x4cd   : > { %v14096_v24 = vpop.f32.mrf.mxu0 }
 0x4d0   : > { %10827 = vmatmul.msk.f32.gmra.mxu3 %vm697_vm3, %v16511_v57  ;;  %10833 = vmatmul.msk.f32.gmra.mxu0 %vm697_vm3, %v13650_v31  ;;  %v14118_v31 = vpop.f32.mrf.mxu3  ;;  %v14120_v20 = vpop.f32.mrf.mxu2 }
 0x4d1   : > { %v14158_v47 = vpop.f32.mrf.mxu1 }
 0x4d5   : > { %v14104_v8 = vpop.f32.mrf.mxu0 }
 0x4d6   : > { %16513 = vst [vmem:[#allocation39_spill] sm:$0xff] %v14104_v8 }
 0x4d8   : > { %10828 = vmatmul.msk.f32.gmra.mxu3 %vm697_vm3, %v4426_v7  ;;  %10834 = vmatmul.msk.f32.gmra.mxu0 %vm697_vm3, %v16514_v62  ;;  %v14129_v53 = vpop.f32.mrf.mxu3  ;;  %v14131_v56 = vpop.f32.mrf.mxu2  ;;  %v16530_v62 = vld [vmem:[#allocation117_spill] sm:$0xff] }
 0x4d9   : > { %v14168_v10 = vpop.f32.mrf.mxu1 }
 0x4dd   : > { %v14113_v25 = vpop.f32.mrf.mxu0 }
 0x4de   : > { %16515 = vst [vmem:[#allocation33_spill] sm:$0xff] %v14113_v25  ;;  %v16549_v25 = vld [vmem:[#allocation140_spill] sm:$0xff] }
 0x4e0   : > { %10829 = vmatmul.msk.f32.gmra.mxu3 %vm697_vm3, %v4427_v11  ;;  %10835 = vmatmul.msk.f32.gmra.mxu0 %vm697_vm3, %v16516_v59  ;;  %v14142_v28 = vpop.f32.mrf.mxu3  ;;  %v14144_v58 = vpop.f32.mrf.mxu2  ;;  %v5949_v59 = vld [vmem:[#allocation16 + $0x18] sm:$0xff] }
 0x4e1   : > { %v14180_v14 = vpop.f32.mrf.mxu1  ;;  %6304 = vmatpush.msra.mxu2 %v5949_v59 }
 0x4e5   : > { %v14124_v60 = vpop.f32.mrf.mxu0 }
 0x4e6   : > { %16517 = vst [vmem:[#allocation49_spill] sm:$0xff] %v14124_v60 }
 0x4e8   : > { %10830 = vmatmul.msk.f32.gmra.mxu3 %vm697_vm3, %v5255_v1  ;;  %10836 = vmatmul.msk.f32.gmra.mxu0 %vm697_vm3, %v16518_v3  ;;  %v14152_v23 = vpop.f32.mrf.mxu3  ;;  %v14156_v43 = vpop.f32.mrf.mxu2  ;;  %v16531_v1 = vmov 0.0  }
 0x4e9   : > { %744 = vst.msk [vmem:[#allocation4] sm:$0xff] %vm743_vm6, %v16531_v1  ;;  %v14204_v59 = vpop.f32.mrf.mxu1 }
 0x4ea   : > { %753 = vst.msk [vmem:[#allocation4] sm:$0x1] %vm752_vm7, %v16531_v1 }
 0x4eb   : > { %745 = vst.msk [vmem:[#allocation4 + $0x8] sm:$0xff] %vm743_vm6, %v16531_v1 }
 0x4ec   : > { %749 = vst.msk [vmem:[#allocation4 + $0x198] sm:$0xff] %vm743_vm6, %v16531_v1 }
 0x4ed   : > { %v14133_v61 = vpop.f32.mrf.mxu0  ;;  %750 = vst.msk [vmem:[#allocation4 + $0x1a0] sm:$0xff] %vm743_vm6, %v16531_v1 }
 0x4ee   : > { %16519 = vst [vmem:[#allocation57_spill] sm:$0xff] %v14133_v61 }
 0x4ef   : > { %754 = vst.msk [vmem:[#allocation4 + $0x18] sm:$0x1] %vm752_vm7, %v16531_v1 }
 0x4f0   : > { %10831 = vmatmul.msk.f32.gmra.mxu3 %vm697_vm3, %v5256_v55  ;;  %10837 = vmatmul.msk.f32.gmra.mxu0 %vm697_vm3, %v16520_v44  ;;  %v14164_v50 = vpop.f32.mrf.mxu3  ;;  %v14166_v52 = vpop.f32.mrf.mxu2  ;;  %v5948_v55 = vld [vmem:[#allocation16 + $0x10] sm:$0xff]  ;;  %v6441_v44 = vld [vmem:[#allocation16 + $0x58] sm:$0xff]  ;;  %755 = vst.msk [vmem:[#allocation4 + $0x30] sm:$0x1] %vm752_vm7, %v16531_v1 }
 0x4f1   : > { %6305 = vmatpush.msra.mxu2 %v5948_v55  ;;  %6550 = vmatpush.msra.mxu3 %v6441_v44  ;;  %v6439_v55 = vld [vmem:[#allocation16 + $0x48] sm:$0xff]  ;;  %756 = vst.msk [vmem:[#allocation4 + $0x48] sm:$0x1] %vm752_vm7, %v16531_v1  ;;  %v6438_v44 = vld [vmem:[#allocation16 + $0x40] sm:$0xff] }
 0x4f2   : > { %757 = vst.msk [vmem:[#allocation4 + $0x60] sm:$0x1] %vm752_vm7, %v16531_v1 }
 0x4f3   : > { %758 = vst.msk [vmem:[#allocation4 + $0x78] sm:$0x1] %vm752_vm7, %v16531_v1 }
 0x4f4   : > { %759 = vst.msk [vmem:[#allocation4 + $0x90] sm:$0x1] %vm752_vm7, %v16531_v1 }
 0x4f5   : > { %v14140_v21 = vpop.f32.mrf.mxu0  ;;  %760 = vst.msk [vmem:[#allocation4 + $0xa8] sm:$0x1] %vm752_vm7, %v16531_v1 }
 0x4f6   : > { %16521 = vst [vmem:[#allocation56_spill] sm:$0xff] %v14140_v21 }
 0x4f7   : > { %761 = vst.msk [vmem:[#allocation4 + $0xc0] sm:$0x1] %vm752_vm7, %v16531_v1 }
 0x4f8   : > { %10838 = vmatmul.msk.f32.gmra.mxu0 %vm697_vm3, %v16522_v15  ;;  %v14174_v16 = vpop.f32.mrf.mxu3  ;;  %v14176_v11 = vpop.f32.mrf.mxu2  ;;  %762 = vst.msk [vmem:[#allocation4 + $0xd8] sm:$0x1] %vm752_vm7, %v16531_v1 }
 0x4f9   : > { %763 = vst.msk [vmem:[#allocation4 + $0xf0] sm:$0x1] %vm752_vm7, %v16531_v1 }
 0x4fa   : > { %764 = vst.msk [vmem:[#allocation4 + $0x108] sm:$0x1] %vm752_vm7, %v16531_v1 }
 0x4fb   : > { %765 = vst.msk [vmem:[#allocation4 + $0x120] sm:$0x1] %vm752_vm7, %v16531_v1 }
 0x4fc   : > { %766 = vst.msk [vmem:[#allocation4 + $0x138] sm:$0x1] %vm752_vm7, %v16531_v1 }
 0x4fd   : > { %v14150_v34 = vpop.f32.mrf.mxu0  ;;  %767 = vst.msk [vmem:[#allocation4 + $0x150] sm:$0x1] %vm752_vm7, %v16531_v1 }
 0x4fe   : > { %16523 = vst [vmem:[#allocation46_spill] sm:$0xff] %v14150_v34 }
 0x4ff   : > { %768 = vst.msk [vmem:[#allocation4 + $0x168] sm:$0x1] %vm752_vm7, %v16531_v1 }
 0x500   : > { %10839 = vmatmul.msk.f32.gmra.mxu0 %vm697_vm3, %v16524_v2  ;;  %v14192_v29 = vpop.f32.mrf.mxu3  ;;  %v14196_v15 = vpop.f32.mrf.mxu2  ;;  %v16533_v2 = vld [vmem:[#allocation122_spill] sm:$0xff]  ;;  %769 = vst.msk [vmem:[#allocation4 + $0x180] sm:$0x1] %vm752_vm7, %v16531_v1 }
 0x501   : > { %772 = vst.msk [vmem:[#allocation4 + $0x29] sm:$0x1] %vm752_vm7, %v16531_v1 }
 0x502   : > { %773 = vst.msk [vmem:[#allocation4 + $0x41] sm:$0x1] %vm752_vm7, %v16531_v1 }
 0x503   : > { %774 = vst.msk [vmem:[#allocation4 + $0x59] sm:$0x1] %vm752_vm7, %v16531_v1 }
 0x504   : > { %775 = vst.msk [vmem:[#allocation4 + $0x71] sm:$0x1] %vm752_vm7, %v16531_v1 }
 0x505   : > { %v14160_v57 = vpop.f32.mrf.mxu0  ;;  %776 = vst.msk [vmem:[#allocation4 + $0x89] sm:$0x1] %vm752_vm7, %v16531_v1 }
 0x506   : > { %16525 = vst [vmem:[#allocation55_spill] sm:$0xff] %v14160_v57  ;;  %v16546_v57 = vld [vmem:[#allocation138_spill] sm:$0xff] }
 0x507   : > { %777 = vst.msk [vmem:[#allocation4 + $0xa1] sm:$0x1] %vm752_vm7, %v16531_v1 }
 0x508   : > { %10840 = vmatmul.msk.f32.gmra.mxu0 %vm697_vm3, %v16526_v36  ;;  %v5947_v36 = vld [vmem:[#allocation16 + $0x8] sm:$0xff]  ;;  %778 = vst.msk [vmem:[#allocation4 + $0xb9] sm:$0x1] %vm752_vm7, %v16531_v1 }
 0x509   : > { %6306 = vmatpush.msra.mxu2 %v5947_v36  ;;  %v6405_v36 = vld [vmem:[#allocation4 + $0x2] sm:$0xff]  ;;  %779 = vst.msk [vmem:[#allocation4 + $0xd1] sm:$0x1] %vm752_vm7, %v16531_v1 }
 0x50a   : > { %780 = vst.msk [vmem:[#allocation4 + $0xe9] sm:$0x1] %vm752_vm7, %v16531_v1 }
 0x50b   : > { %781 = vst.msk [vmem:[#allocation4 + $0x101] sm:$0x1] %vm752_vm7, %v16531_v1 }
 0x50c   : > { %782 = vst.msk [vmem:[#allocation4 + $0x119] sm:$0x1] %vm752_vm7, %v16531_v1 }
 0x50d   : > { %v14170_v7 = vpop.f32.mrf.mxu0  ;;  %783 = vst.msk [vmem:[#allocation4 + $0x131] sm:$0x1] %vm752_vm7, %v16531_v1 }
 0x50e   : > { %16527 = vst [vmem:[#allocation62_spill] sm:$0xff] %v14170_v7  ;;  %v16541_v7 = vld [vmem:[#allocation134_spill] sm:$0xff] }
 0x50f   : > { %784 = vst.msk [vmem:[#allocation4 + $0x149] sm:$0x1] %vm752_vm7, %v16531_v1 }
 0x510   : > { %10841 = vmatmul.msk.f32.gmra.mxu0 %vm697_vm3, %v16528_v30  ;;  %v6440_v30 = vld [vmem:[#allocation16 + $0x50] sm:$0xff]  ;;  %785 = vst.msk [vmem:[#allocation4 + $0x161] sm:$0x1] %vm752_vm7, %v16531_v1 }
 0x511   : > { %6551 = vmatpush.msra.mxu3 %v6440_v30  ;;  %786 = vst.msk [vmem:[#allocation4 + $0x179] sm:$0x1] %vm752_vm7, %v16531_v1 }
 0x512   : > { %787 = vst.msk [vmem:[#allocation4 + $0x191] sm:$0x1] %vm752_vm7, %v16531_v1 }
 0x513   : > { %6552 = vmatpush.msra.mxu3 %v6439_v55  ;;  %v16535_v55 = vld [vmem:[#allocation126_spill] sm:$0xff]  ;;  %770 = vst.msk [vmem:[#allocation4 + $0x198] sm:$0x1] %vm752_vm7, %v16531_v1 }
 0x514   : > { %747 = vst.msk [vmem:[#allocation4 + $0x10] sm:$0x3] %vm746_vm8, %v16531_v1 }
 0x515   : > { %v14178_v26 = vpop.f32.mrf.mxu0  ;;  %6553 = vmatpush.msra.mxu3 %v6438_v44  ;;  %v5950_v44 = vld [vmem:[#allocation4 + $0x1] sm:$0xff]  ;;  %771 = vst.msk [vmem:[#allocation4 + $0x11] sm:$0x1] %vm752_vm7, %v16531_v1 }
 0x516   : > { %16529 = vst [vmem:[#allocation78_spill] sm:$0xff] %v14178_v26  ;;  %10928 = vmatmul.msk.f32.vlgmr.msra.gmra.mxu3 %vm743_vm6, %v6405_v36  ;;  %10864 = vmatmul.msk.f32.vlgmr.msra.gmra.mxu1 %vm743_vm6, %v5950_v44  ;;  %v14237_v36 = vpop.f32.mrf.mxu1  ;;  %v16537_v44 = vld [vmem:[#allocation130_spill] sm:$0xff] }
 0x517   : > { %v6997_v26 = vld [vmem:[#allocation16 + $0x98] sm:$0xff]  ;;  %751 = vst.msk [vmem:[#allocation4 + $0x1a8] sm:$0x3] %vm746_vm8, %v16531_v1 }
 0x518   : > { %10842 = vmatmul.msk.f32.gmra.mxu0 %vm697_vm3, %v16530_v62  ;;  %v5946_v62 = vld [vmem:[#allocation16] sm:$0xff]  ;;  %7106 = vmatpush.msrb.mxu1 %v6997_v26  ;;  %788 = vst.msk [vmem:[#allocation4 + $0x1a9] sm:$0x1] %vm752_vm7, %v16531_v1 }
 0x519   : > { %6307 = vmatpush.msra.mxu2 %v5946_v62  ;;  %v14224_v62 = vpop.f32.mrf.mxu3 }
 0x51c   : > { %v6406_v1 = vld [vmem:[#allocation4 + $0xa] sm:$0xff] }
 0x51d   : > { %v14188_v3 = vpop.f32.mrf.mxu0 }
 0x51e   : > { %16532 = vst [vmem:[#allocation83_spill] sm:$0xff] %v14188_v3  ;;  %v6719_v3 = vld [vmem:[#allocation16 + $0x78] sm:$0xff]  ;;  %10929 = vmatmul.msk.f32.gmra.mxu3 %vm743_vm6, %v6406_v1 }
 0x51f   : > { %6828 = vmatpush.msrb.mxu0 %v6719_v3 }
 0x520   : > { %10843 = vmatmul.msk.f32.gmra.mxu0 %vm697_vm3, %v16533_v2  ;;  %v5914_v2 = vld [vmem:[#allocation4] sm:$0xff] }
 0x521   : > { %10896 = vmatmul.msk.f32.vlgmr.msra.gmra.mxu2 %vm743_vm6, %v5914_v2  ;;  %v14230_v2 = vpop.f32.mrf.mxu2 }
 0x525   : > { %v14215_v30 = vpop.f32.mrf.mxu0 }
 0x526   : > { %16534 = vst [vmem:[#allocation88_spill] sm:$0xff] %v14215_v30 }
 0x528   : > { %10844 = vmatmul.msk.f32.gmra.mxu0 %vm697_vm3, %v16535_v55  ;;  %v5915_v55 = vld [vmem:[#allocation4 + $0x8] sm:$0xff] }
 0x529   : > { %10897 = vmatmul.msk.f32.gmra.mxu2 %vm743_vm6, %v5915_v55  ;;  %v14258_v55 = vpop.f32.mrf.mxu3 }
 0x52d   : > { %v14244_v9 = vpop.f32.mrf.mxu0 }
 0x52e   : > { %16536 = vst [vmem:[#allocation93_spill] sm:$0xff] %v14244_v9  ;;  %v14262_v9 = vpop.f32.mrf.mxu2 }
 0x52f   : > { %16538 = vst [vmem:[#allocation98_spill] sm:$0xff] %v14262_v9 }
 0x530   : > { %10845 = vmatmul.msk.f32.gmra.mxu0 %vm697_vm3, %v16537_v44  ;;  %v14268_v44 = vpop.f32.mrf.mxu1 }
 0x531   : > { %16539 = vst [vmem:[#allocation103_spill] sm:$0xff] %v14268_v44 }
 0x535   : > { %v14270_v30 = vpop.f32.mrf.mxu0 }
 0x536   : > { %16540 = vst [vmem:[#allocation108_spill] sm:$0xff] %v14270_v30  ;;  %v14288_v30 = vpop.f32.mrf.mxu3  ;;  %v14292_v26 = vpop.f32.mrf.mxu2 }
 0x537   : > { %16542 = vst [vmem:[#allocation113_spill] sm:$0xff] %v14288_v30  ;;  %v16551_v30 = vld [vmem:[#allocation142_spill] sm:$0xff] }
 0x538   : > { %10846 = vmatmul.msk.f32.gmra.mxu0 %vm697_vm3, %v16541_v7  ;;  %16543 = vst [vmem:[#allocation117_spill] sm:$0xff] %v14292_v26  ;;  %v14300_v3 = vpop.f32.mrf.mxu1  ;;  %v5951_v26 = vld [vmem:[#allocation4 + $0x9] sm:$0xff] }
 0x539   : > { %16545 = vst [vmem:[#allocation126_spill] sm:$0xff] %v14300_v3  ;;  %v14325_v3 = vld [vmem:[%s16319_s6] ss:$0 sm:$0xff]  ;;  %10865 = vmatmul.msk.f32.gmra.mxu1 %vm743_vm6, %v5951_v26 }
 0x53d   : > { %v14294_v7 = vpop.f32.mrf.mxu0 }
 0x53e   : > { %16544 = vst [vmem:[#allocation122_spill] sm:$0xff] %v14294_v7  ;;  %v14312_v7 = vld [vmem:[#allocation14] ss:$0 sm:$0xff]  ;;  %v14316_v21 = vpop.f32.mrf.mxu3  ;;  %v14319_v61 = vpop.f32.mrf.mxu2 }
 0x53f   : > { %16547 = vst [vmem:[#allocation130_spill] sm:$0xff] %v14316_v21 }
 0x540   : > { %10847 = vmatmul.msk.f32.gmra.mxu0 %vm697_vm3, %v16546_v57  ;;  %16548 = vst [vmem:[#allocation134_spill] sm:$0xff] %v14319_v61  ;;  %v14329_v44 = vpop.f32.mrf.mxu1 }
 0x541   : > { %16550 = vst [vmem:[#allocation138_spill] sm:$0xff] %v14329_v44 }
 0x545   : > { %v5649_v34 = vpop.f32.mrf.mxu0 }
 0x546   : > { %v5745_v57 = vadd.f32 %v5649_v34, %v13951_v42  ;;  %v14336_v61 = vpop.f32.mrf.mxu3  ;;  %v14341_v44 = vpop.f32.mrf.mxu2 }
 0x547   : > { %16552 = vst [vmem:[#allocation140_spill] sm:$0xff] %v14341_v44 }
 0x548   : > { %v5781_v60 = vadd.f32 %v14312_v7, %v5745_v57  ;;  %10848 = vmatmul.msk.f32.gmra.mxu0 %vm697_vm3, %v16549_v25 }
 0x54a   : > { %v5813_v21 = vmax.f32 %v5781_v60, 0.0  ;;  %v14343_v60 = vpop.f32.mrf.mxu1 }
 0x54b   : > { %16553 = vst [vmem:[#allocation142_spill] sm:$0xff] %v14343_v60 }
 0x54c   : > { %v5849_v42 = vadd.f32 %v14325_v3, %v5813_v21 }
 0x54d   : > { %v5652_v34 = vpop.f32.mrf.mxu0 }
 0x54e   : > { %5882 = vst.msk [vmem:[#allocation4 + $0x19] sm:$0xff] %vm743_vm6, %v5849_v42  ;;  %v5746_v57 = vadd.f32 %v5652_v34, %v13971_v5  ;;  %v16554_v42 = vld [vmem:[#allocation144_spill] sm:$0xff]  ;;  %v14356_v34 = vpop.f32.mrf.mxu3 }
 0x54f   : > { %16555 = vst [vmem:[#allocation144_spill] sm:$0xff] %v14356_v34 }
 0x550   : > { %v5782_v25 = vadd.f32 %v14312_v7, %v5746_v57  ;;  %10849 = vmatmul.msk.f32.gmra.mxu0 %vm697_vm3, %v16551_v30 }
 0x552   : > { %v5814_v26 = vmax.f32 %v5782_v25, 0.0  ;;  %v14358_v25 = vpop.f32.mrf.mxu2 }
 0x553   : > { %16556 = vst [vmem:[#allocation148_spill] sm:$0xff] %v14358_v25 }
 0x554   : > { %v5850_v1 = vadd.f32 %v14325_v3, %v5814_v26 }
 0x555   : > { %v5655_v21 = vpop.f32.mrf.mxu0  ;;  %v5952_v8 = vld [vmem:[#allocation4 + $0x19] sm:$0xff] }
 0x556   : > { %v14346_v9 = vld [vmem:[#allocation4 + $0x18] sm:$0xff]  ;;  %5883 = vst.msk [vmem:[#allocation4 + $0x21] sm:$0xff] %vm743_vm6, %v5850_v1  ;;  %v5747_v5 = vadd.f32 %v5655_v21, %v13988_v27  ;;  %10866 = vmatmul.msk.f32.gmra.mxu1 %vm743_vm6, %v5952_v8  ;;  %v14361_v1 = vpop.f32.mrf.mxu1 }
 0x557   : > { %10898 = vmatmul.msk.f32.gmra.mxu2 %vm743_vm6, %v14346_v9  ;;  %16557 = vst [vmem:[#allocation149_spill] sm:$0xff] %v14361_v1  ;;  %v14374_v1 = vpop.f32.mrf.mxu3 }
 0x558   : > { %v5783_v30 = vadd.f32 %v14312_v7, %v5747_v5  ;;  %10850 = vmatmul.msk.f32.gmra.mxu0 %vm697_vm3, %v16554_v42  ;;  %v16558_v42 = vld [vmem:[#allocation146_spill] sm:$0xff] }
 0x559   : > { %16559 = vst [vmem:[#allocation146_spill] sm:$0xff] %v14374_v1 }
 0x55a   : > { %v5815_v57 = vmax.f32 %v5783_v30, 0.0 }
 0x55c   : > { %v5851_v26 = vadd.f32 %v14325_v3, %v5815_v57 }
 0x55d   : > { %v5658_v27 = vpop.f32.mrf.mxu0  ;;  %v5953_v21 = vld [vmem:[#allocation4 + $0x21] sm:$0xff] }
 0x55e   : > { %v14363_v8 = vld [vmem:[#allocation4 + $0x20] sm:$0xff]  ;;  %5884 = vst.msk [vmem:[#allocation4 + $0x31] sm:$0xff] %vm743_vm6, %v5851_v26  ;;  %v5748_v5 = vadd.f32 %v5658_v27, %v14006_v4  ;;  %10867 = vmatmul.msk.f32.gmra.mxu1 %vm743_vm6, %v5953_v21  ;;  %v14377_v26 = vpop.f32.mrf.mxu2 }
 0x55f   : > { %v6407_v60 = vld [vmem:[#allocation4 + $0x1a] sm:$0xff]  ;;  %10899 = vmatmul.msk.f32.gmra.mxu2 %vm743_vm6, %v14363_v8  ;;  %16560 = vst [vmem:[#allocation150_spill] sm:$0xff] %v14377_v26  ;;  %v14395_v1 = vpop.f32.mrf.mxu3 }
 0x560   : > { %10930 = vmatmul.msk.f32.gmra.mxu3 %vm743_vm6, %v6407_v60  ;;  %v5784_v30 = vadd.f32 %v14312_v7, %v5748_v5  ;;  %10851 = vmatmul.msk.f32.gmra.mxu0 %vm697_vm3, %v16558_v42  ;;  %v6408_v5 = vld [vmem:[#allocation4 + $0x22] sm:$0xff]  ;;  %16563 = vst [vmem:[#allocation153_spill] sm:$0xff] %v14395_v1  ;;  %v16568_v1 = vld [vmem:[#allocation42_spill] sm:$0xff] }
 0x562   : > { %v5816_v57 = vmax.f32 %v5784_v30, 0.0  ;;  %v14386_v30 = vpop.f32.mrf.mxu1 }
 0x563   : > { %16561 = vst [vmem:[#allocation151_spill] sm:$0xff] %v14386_v30 }
 0x564   : > { %v5852_v25 = vadd.f32 %v14325_v3, %v5816_v57 }
 0x565   : > { %v5661_v4 = vpop.f32.mrf.mxu0  ;;  %v5954_v27 = vld [vmem:[#allocation4 + $0x31] sm:$0xff] }
 0x566   : > { %v14379_v21 = vld [vmem:[#allocation4 + $0x30] sm:$0xff]  ;;  %5885 = vst.msk [vmem:[#allocation4 + $0x39] sm:$0xff] %vm743_vm6, %v5852_v25  ;;  %v5749_v60 = vadd.f32 %v5661_v4, %v14022_v63  ;;  %10868 = vmatmul.msk.f32.gmra.mxu1 %vm743_vm6, %v5954_v27 }
 0x567   : > { %10900 = vmatmul.msk.f32.gmra.mxu2 %vm743_vm6, %v14379_v21  ;;  %v14422_v44 = vpop.f32.mrf.mxu3 }
 0x568   : > { %10931 = vmatmul.msk.f32.gmra.mxu3 %vm743_vm6, %v6408_v5  ;;  %v5785_v42 = vadd.f32 %v14312_v7, %v5749_v60  ;;  %10852 = vmatmul.msk.f32.gmra.mxu0 %vm697_vm3, %v13943_v0  ;;  %v14402_v0 = vpop.f32.mrf.mxu2 }
 0x569   : > { %16564 = vst [vmem:[#allocation154_spill] sm:$0xff] %v14402_v0 }
 0x56a   : > { %v5817_v57 = vmax.f32 %v5785_v42, 0.0  ;;  %v14408_v5 = vpop.f32.mrf.mxu1 }
 0x56b   : > { %16565 = vst [vmem:[#allocation155_spill] sm:$0xff] %v14408_v5  ;;  %v16569_v5 = vld [vmem:[#allocation35_spill] sm:$0xff] }
 0x56c   : > { %v5853_v25 = vadd.f32 %v14325_v3, %v5817_v57 }
 0x56d   : > { %v5664_v26 = vpop.f32.mrf.mxu0  ;;  %v5955_v63 = vld [vmem:[#allocation4 + $0x39] sm:$0xff] }
 0x56e   : > { %v14393_v4 = vld [vmem:[#allocation4 + $0x38] sm:$0xff]  ;;  %5886 = vst.msk [vmem:[#allocation4 + $0x49] sm:$0xff] %vm743_vm6, %v5853_v25  ;;  %v5750_v30 = vadd.f32 %v5664_v26, %v14039_v35  ;;  %10869 = vmatmul.msk.f32.gmra.mxu1 %vm743_vm6, %v5955_v63  ;;  %v16567_v63 = vld [vmem:[#allocation32_spill] sm:$0xff] }
 0x56f   : > { %16562 = vst [vmem:[#allocation152_spill] sm:$0xff] %v14393_v4  ;;  %v6409_v27 = vld [vmem:[#allocation4 + $0x32] sm:$0xff]  ;;  %10901 = vmatmul.msk.f32.gmra.mxu2 %vm743_vm6, %v14393_v4  ;;  %v3773_v34 = vadd.f32 %v16568_v1, %v16567_v63 }
 0x570   : > { %10932 = vmatmul.msk.f32.gmra.mxu3 %vm743_vm6, %v6409_v27  ;;  %v5786_v60 = vadd.f32 %v14312_v7, %v5750_v30  ;;  %10853 = vmatmul.msk.f32.gmra.mxu0 %vm697_vm3, %v13962_v17  ;;  %v6410_v17 = vld [vmem:[#allocation4 + $0x3a] sm:$0xff]  ;;  %16570 = vst [vmem:[#allocation32_spill] sm:$0xff] %v14422_v44  ;;  %v16573_v4 = vld [vmem:[#allocation45_spill] sm:$0xff] }
 0x571   : > { %v6718_v30 = vld [vmem:[#allocation16 + $0x70] sm:$0xff]  ;;  %v4096_v0 = vadd.f32 %v16569_v5, %v3773_v34 }
 0x572   : > { %v5818_v42 = vmax.f32 %v5786_v60, 0.0  ;;  %v6996_v60 = vld [vmem:[#allocation16 + $0x90] sm:$0xff]  ;;  %6829 = vmatpush.msrb.mxu0 %v6718_v30  ;;  %v14429_v63 = vpop.f32.mrf.mxu1 }
 0x573   : > { %7107 = vmatpush.msrb.mxu1 %v6996_v60 }
 0x574   : > { %v5854_v57 = vadd.f32 %v14325_v3, %v5818_v42  ;;  %v5523_v42 = vld [vmem:[#allocation3 + $0x13a] sm:$0xff] }
 0x575   : > { %v5667_v35 = vpop.f32.mrf.mxu0  ;;  %v5956_v26 = vld [vmem:[#allocation4 + $0x49] sm:$0xff] }
 0x576   : > { %v14411_v25 = vld [vmem:[#allocation4 + $0x48] sm:$0xff]  ;;  %5887 = vst.msk [vmem:[#allocation4 + $0x51] sm:$0xff] %vm743_vm6, %v5854_v57  ;;  %v5751_v27 = vadd.f32 %v5667_v35, %v14056_v46  ;;  %10870 = vmatmul.msk.f32.gmra.mxu1 %vm743_vm6, %v5956_v26  ;;  %v14426_v46 = vpop.f32.mrf.mxu2 }
 0x577   : > { %16566 = vst [vmem:[#allocation156_spill] sm:$0xff] %v14411_v25  ;;  %10902 = vmatmul.msk.f32.gmra.mxu2 %vm743_vm6, %v14411_v25  ;;  %v16571_v57 = vld [vmem:[#allocation51_spill] sm:$0xff] }
 0x578   : > { %10933 = vmatmul.msk.f32.gmra.mxu3 %vm743_vm6, %v6410_v17  ;;  %v5787_v1 = vadd.f32 %v14312_v7, %v5751_v27  ;;  %10854 = vmatmul.msk.f32.gmra.mxu0 %vm697_vm3, %v5523_v42  ;;  %v4372_v35 = vadd.f32 %v16571_v57, %v4096_v0  ;;  %v16572_v27 = vld [vmem:[#allocation34_spill] sm:$0xff]  ;;  %v16574_v0 = vld [vmem:[#allocation37_spill] sm:$0xff] }
 0x579   : > { %v3776_v42 = vadd.f32 %v16573_v4, %v16572_v27  ;;  %v16575_v4 = vld [vmem:[#allocation58_spill] sm:$0xff] }
 0x57a   : > { %v5819_v26 = vmax.f32 %v5787_v1, 0.0  ;;  %v4648_v17 = vadd.f32 %v13973_v45, %v4372_v35  ;;  %v5524_v45 = vld [vmem:[#allocation3 + $0x142] sm:$0xff] }
 0x57b   : > { %v4097_v1 = vadd.f32 %v16574_v0, %v3776_v42  ;;  %v16576_v0 = vld [vmem:[#allocation36_spill] sm:$0xff] }
 0x57c   : > { %v5855_v30 = vadd.f32 %v14325_v3, %v5819_v26  ;;  %v4924_v57 = vadd.f32 %v14102_v39, %v4648_v17  ;;  %v14456_v39 = vpop.f32.mrf.mxu1 }
 0x57d   : > { %v5670_v25 = vpop.f32.mrf.mxu0  ;;  %v5957_v34 = vld [vmem:[#allocation4 + $0x51] sm:$0xff]  ;;  %v4373_v26 = vadd.f32 %v16575_v4, %v4097_v1  ;;  %v16577_v1 = vld [vmem:[#allocation50_spill] sm:$0xff] }
 0x57e   : > { %v14433_v5 = vld [vmem:[#allocation4 + $0x50] sm:$0xff]  ;;  %5888 = vst.msk [vmem:[#allocation4 + $0x61] sm:$0xff] %vm743_vm6, %v5855_v30  ;;  %v5752_v60 = vadd.f32 %v5670_v25, %v14068_v49  ;;  %10871 = vmatmul.msk.f32.gmra.mxu1 %vm743_vm6, %v5957_v34  ;;  %v5201_v49 = vadd.f32 %v14109_v54, %v4924_v57  ;;  %v14449_v25 = vpop.f32.mrf.mxu3  ;;  %v14451_v34 = vpop.f32.mrf.mxu2  ;;  %v3779_v54 = vadd.f32 %v16577_v1, %v16576_v0 }
 0x57f   : > { %v6411_v44 = vld [vmem:[#allocation4 + $0x4a] sm:$0xff]  ;;  %10903 = vmatmul.msk.f32.gmra.mxu2 %vm743_vm6, %v14433_v5 }
 0x580   : > { %10934 = vmatmul.msk.f32.gmra.mxu3 %vm743_vm6, %v6411_v44  ;;  %v5788_v35 = vadd.f32 %v14312_v7, %v5752_v60  ;;  %10855 = vmatmul.msk.f32.gmra.mxu0 %vm697_vm3, %v5524_v45  ;;  %v4649_v44 = vadd.f32 %v13990_v6, %v4373_v26  ;;  %v5477_v27 = vadd.f32 %v14118_v31, %v5201_v49  ;;  %v6412_v6 = vld [vmem:[#allocation4 + $0x52] sm:$0xff]  ;;  %v5525_v31 = vld [vmem:[#allocation3 + $0x152] sm:$0xff] }
 0x582   : > { %v5820_v30 = vmax.f32 %v5788_v35, 0.0  ;;  %v16578_v35 = vld [vmem:[#allocation40_spill] sm:$0xff]  ;;  %v4925_v26 = vadd.f32 %v14111_v32, %v4649_v44 }
 0x583   : > { %v4098_v4 = vadd.f32 %v16578_v35, %v3779_v54  ;;  %v16580_v35 = vld [vmem:[#allocation38_spill] sm:$0xff] }
 0x584   : > { %v5856_v42 = vadd.f32 %v14325_v3, %v5820_v30  ;;  %v16579_v30 = vld [vmem:[#allocation63_spill] sm:$0xff] }
 0x585   : > { %v5673_v17 = vpop.f32.mrf.mxu0  ;;  %v5958_v60 = vld [vmem:[#allocation4 + $0x61] sm:$0xff] }
 0x586   : > { %v14458_v45 = vld [vmem:[#allocation4 + $0x60] sm:$0xff]  ;;  %5889 = vst.msk [vmem:[#allocation4 + $0x69] sm:$0xff] %vm743_vm6, %v5856_v42  ;;  %v5753_v57 = vadd.f32 %v5673_v17, %v5477_v27  ;;  %10872 = vmatmul.msk.f32.gmra.mxu1 %vm743_vm6, %v5958_v60  ;;  %v4374_v42 = vadd.f32 %v16579_v30, %v4098_v4  ;;  %v5202_v27 = vadd.f32 %v14120_v20, %v4925_v26  ;;  %v14475_v1 = vpop.f32.mrf.mxu3  ;;  %v14478_v54 = vpop.f32.mrf.mxu2 }
 0x587   : > { %10904 = vmatmul.msk.f32.gmra.mxu2 %vm743_vm6, %v14458_v45  ;;  %v16581_v4 = vld [vmem:[#allocation54_spill] sm:$0xff]  ;;  %v16583_v26 = vld [vmem:[#allocation43_spill] sm:$0xff] }
 0x588   : > { %10935 = vmatmul.msk.f32.gmra.mxu3 %vm743_vm6, %v6412_v6  ;;  %v5789_v49 = vadd.f32 %v14312_v7, %v5753_v57  ;;  %10856 = vmatmul.msk.f32.gmra.mxu0 %vm697_vm3, %v5525_v31  ;;  %v4650_v60 = vadd.f32 %v14008_v38, %v4374_v42  ;;  %v5478_v0 = vadd.f32 %v14129_v53, %v5202_v27  ;;  %v14488_v38 = vpop.f32.mrf.mxu1  ;;  %v5526_v53 = vld [vmem:[#allocation3 + $0x15a] sm:$0xff] }
 0x589   : > { %v3782_v30 = vadd.f32 %v16581_v4, %v16580_v35  ;;  %16582 = vst [vmem:[#allocation42_spill] sm:$0xff] %v14488_v38 }
 0x58a   : > { %v5821_v17 = vmax.f32 %v5789_v49, 0.0  ;;  %v4926_v42 = vadd.f32 %v14122_v37, %v4650_v60  ;;  %v16585_v37 = vld [vmem:[#allocation41_spill] sm:$0xff] }
 0x58b   : > { %v4099_v49 = vadd.f32 %v16583_v26, %v3782_v30  ;;  %v16586_v60 = vld [vmem:[#allocation61_spill] sm:$0xff] }
 0x58c   : > { %v5857_v6 = vadd.f32 %v14325_v3, %v5821_v17  ;;  %v16584_v17 = vld [vmem:[#allocation67_spill] sm:$0xff] }
 0x58d   : > { %v5676_v32 = vpop.f32.mrf.mxu0  ;;  %v5959_v44 = vld [vmem:[#allocation4 + $0x69] sm:$0xff] }
 0x58e   : > { %v14480_v57 = vld [vmem:[#allocation4 + $0x68] sm:$0xff]  ;;  %5890 = vst.msk [vmem:[#allocation4 + $0x79] sm:$0xff] %vm743_vm6, %v5857_v6  ;;  %v5754_v20 = vadd.f32 %v5676_v32, %v5478_v0  ;;  %10873 = vmatmul.msk.f32.gmra.mxu1 %vm743_vm6, %v5959_v44  ;;  %v4375_v0 = vadd.f32 %v16584_v17, %v4099_v49  ;;  %v5203_v6 = vadd.f32 %v14131_v56, %v4926_v42  ;;  %v14504_v26 = vpop.f32.mrf.mxu3  ;;  %v14510_v56 = vpop.f32.mrf.mxu2 }
 0x58f   : > { %v6413_v31 = vld [vmem:[#allocation4 + $0x62] sm:$0xff]  ;;  %10905 = vmatmul.msk.f32.gmra.mxu2 %vm743_vm6, %v14480_v57 }
 0x590   : > { %10936 = vmatmul.msk.f32.gmra.mxu3 %vm743_vm6, %v6413_v31  ;;  %v5790_v27 = vadd.f32 %v14312_v7, %v5754_v20  ;;  %10857 = vmatmul.msk.f32.gmra.mxu0 %vm697_vm3, %v5526_v53  ;;  %v4651_v44 = vadd.f32 %v14024_v33, %v4375_v0  ;;  %v5479_v35 = vadd.f32 %v14142_v28, %v5203_v6  ;;  %v6414_v33 = vld [vmem:[#allocation4 + $0x6a] sm:$0xff]  ;;  %v5527_v28 = vld [vmem:[#allocation3 + $0x16a] sm:$0xff]  ;;  %v16587_v49 = vld [vmem:[#allocation47_spill] sm:$0xff]  ;;  %v14517_v0 = vpop.f32.mrf.mxu1 }
 0x591   : > { %v3785_v20 = vadd.f32 %v16586_v60, %v16585_v37 }
 0x592   : > { %v5822_v32 = vmax.f32 %v5790_v27, 0.0  ;;  %v4927_v27 = vadd.f32 %v14135_v22, %v4651_v44 }
 0x593   : > { %v4100_v42 = vadd.f32 %v16587_v49, %v3785_v20 }
 0x594   : > { %v5858_v31 = vadd.f32 %v14325_v3, %v5822_v32  ;;  %v5204_v32 = vadd.f32 %v14144_v58, %v4927_v27  ;;  %v16591_v58 = vld [vmem:[#allocation52_spill] sm:$0xff] }
 0x595   : > { %v5679_v4 = vpop.f32.mrf.mxu0  ;;  %v5960_v38 = vld [vmem:[#allocation4 + $0x79] sm:$0xff] }
 0x596   : > { %v14500_v30 = vld [vmem:[#allocation4 + $0x78] sm:$0xff]  ;;  %5891 = vst.msk [vmem:[#allocation4 + $0x81] sm:$0xff] %vm743_vm6, %v5858_v31  ;;  %v5755_v53 = vadd.f32 %v5679_v4, %v5479_v35  ;;  %10874 = vmatmul.msk.f32.gmra.mxu1 %vm743_vm6, %v5960_v38  ;;  %v16588_v38 = vld [vmem:[#allocation71_spill] sm:$0xff]  ;;  %v5480_v4 = vadd.f32 %v14152_v23, %v5204_v32  ;;  %v14535_v27 = vpop.f32.mrf.mxu3 }
 0x597   : > { %10906 = vmatmul.msk.f32.gmra.mxu2 %vm743_vm6, %v14500_v30  ;;  %v4376_v6 = vadd.f32 %v16588_v38, %v4100_v42  ;;  %v14539_v38 = vpop.f32.mrf.mxu2 }
 0x598   : > { %10937 = vmatmul.msk.f32.gmra.mxu3 %vm743_vm6, %v6414_v33  ;;  %v5791_v17 = vadd.f32 %v14312_v7, %v5755_v53  ;;  %10858 = vmatmul.msk.f32.gmra.mxu0 %vm697_vm3, %v5527_v28  ;;  %v16589_v53 = vld [vmem:[#allocation44_spill] sm:$0xff]  ;;  %v16590_v33 = vld [vmem:[#allocation65_spill] sm:$0xff] }
 0x599   : > { %v4652_v31 = vadd.f32 %v14041_v40, %v4376_v6  ;;  %v3788_v28 = vadd.f32 %v16590_v33, %v16589_v53  ;;  %v5528_v40 = vld [vmem:[#allocation3 + $0x172] sm:$0xff]  ;;  %v16592_v6 = vld [vmem:[#allocation74_spill] sm:$0xff]  ;;  %v16593_v33 = vld [vmem:[#allocation48_spill] sm:$0xff] }
 0x59a   : > { %v5823_v35 = vmax.f32 %v5791_v17, 0.0 }
 0x59b   : > { %v4101_v23 = vadd.f32 %v16591_v58, %v3788_v28  ;;  %v4928_v42 = vadd.f32 %v14148_v41, %v4652_v31  ;;  %v16594_v28 = vld [vmem:[#allocation69_spill] sm:$0xff] }
 0x59c   : > { %v5859_v37 = vadd.f32 %v14325_v3, %v5823_v35 }
 0x59d   : > { %v5682_v60 = vpop.f32.mrf.mxu0  ;;  %v5961_v20 = vld [vmem:[#allocation4 + $0x81] sm:$0xff]  ;;  %v4377_v32 = vadd.f32 %v16592_v6, %v4101_v23  ;;  %v5205_v35 = vadd.f32 %v14156_v43, %v4928_v42  ;;  %v6717_v42 = vld [vmem:[#allocation16 + $0x68] sm:$0xff] }
 0x59e   : > { %v14524_v22 = vld [vmem:[#allocation4 + $0x80] sm:$0xff]  ;;  %5892 = vst.msk [vmem:[#allocation4 + $0x91] sm:$0xff] %vm743_vm6, %v5859_v37  ;;  %v5756_v49 = vadd.f32 %v5682_v60, %v5480_v4  ;;  %10875 = vmatmul.msk.f32.gmra.mxu1 %vm743_vm6, %v5961_v20  ;;  %v14543_v37 = vpop.f32.mrf.mxu1  ;;  %6830 = vmatpush.msrb.mxu0 %v6717_v42 }
 0x59f   : > { %v6415_v44 = vld [vmem:[#allocation4 + $0x7a] sm:$0xff]  ;;  %10907 = vmatmul.msk.f32.gmra.mxu2 %vm743_vm6, %v14524_v22  ;;  %v4653_v60 = vadd.f32 %v14058_v13, %v4377_v32  ;;  %v5481_v20 = vadd.f32 %v14164_v50, %v5205_v35  ;;  %v6416_v13 = vld [vmem:[#allocation4 + $0x82] sm:$0xff]  ;;  %v14564_v35 = vpop.f32.mrf.mxu3 }
 0x5a0   : > { %10938 = vmatmul.msk.f32.gmra.mxu3 %vm743_vm6, %v6415_v44  ;;  %v5792_v17 = vadd.f32 %v14312_v7, %v5756_v49  ;;  %10859 = vmatmul.msk.f32.gmra.mxu0 %vm697_vm3, %v5528_v40  ;;  %v3791_v49 = vadd.f32 %v16594_v28, %v16593_v33  ;;  %v16595_v43 = vld [vmem:[#allocation59_spill] sm:$0xff] }
 0x5a1   : > { %v4929_v58 = vadd.f32 %v14158_v47, %v4653_v60 }
 0x5a2   : > { %v5824_v4 = vmax.f32 %v5792_v17, 0.0  ;;  %v4102_v50 = vadd.f32 %v16595_v43, %v3791_v49  ;;  %v16596_v17 = vld [vmem:[#allocation79_spill] sm:$0xff]  ;;  %v16597_v49 = vld [vmem:[#allocation53_spill] sm:$0xff] }
 0x5a3   : > { %v5206_v32 = vadd.f32 %v14166_v52, %v4929_v58 }
 0x5a4   : > { %v5860_v41 = vadd.f32 %v14325_v3, %v5824_v4  ;;  %v4378_v6 = vadd.f32 %v16596_v17, %v4102_v50 }
 0x5a5   : > { %v5685_v31 = vpop.f32.mrf.mxu0  ;;  %v5962_v44 = vld [vmem:[#allocation4 + $0x91] sm:$0xff]  ;;  %v5482_v60 = vadd.f32 %v14174_v16, %v5206_v32 }
 0x5a6   : > { %v14548_v53 = vld [vmem:[#allocation4 + $0x90] sm:$0xff]  ;;  %5893 = vst.msk [vmem:[#allocation4 + $0x99] sm:$0xff] %vm743_vm6, %v5860_v41  ;;  %v5757_v40 = vadd.f32 %v5685_v31, %v5481_v20  ;;  %10876 = vmatmul.msk.f32.gmra.mxu1 %vm743_vm6, %v5962_v44  ;;  %v6716_v20 = vld [vmem:[#allocation16 + $0x60] sm:$0xff]  ;;  %v14566_v41 = vpop.f32.mrf.mxu2  ;;  %v4654_v47 = vadd.f32 %v14070_v12, %v4378_v6  ;;  %v16599_v12 = vld [vmem:[#allocation66_spill] sm:$0xff] }
 0x5a7   : > { %10908 = vmatmul.msk.f32.gmra.mxu2 %vm743_vm6, %v14548_v53  ;;  %6831 = vmatpush.msrb.mxu0 %v6716_v20  ;;  %v14591_v20 = vpop.f32.mrf.mxu3 }
 0x5a8   : > { %10939 = vmatmul.msk.f32.gmra.mxu3 %vm743_vm6, %v6416_v13  ;;  %v5793_v23 = vadd.f32 %v14312_v7, %v5757_v40  ;;  %10860 = vmatmul.msk.f32.gmra.mxu0 %vm697_vm3, %v14073_v19  ;;  %v14571_v19 = vpop.f32.mrf.mxu1  ;;  %v16598_v40 = vld [vmem:[#allocation73_spill] sm:$0xff]  ;;  %v4930_v50 = vadd.f32 %v14168_v10, %v4654_v47 }
 0x5a9   : > { %v3794_v13 = vadd.f32 %v16598_v40, %v16597_v49 }
 0x5aa   : > { %v5825_v4 = vmax.f32 %v5793_v23, 0.0  ;;  %v16600_v23 = vld [vmem:[#allocation84_spill] sm:$0xff]  ;;  %v5207_v17 = vadd.f32 %v14176_v11, %v4930_v50  ;;  %v16604_v50 = vld [vmem:[#allocation89_spill] sm:$0xff] }
 0x5ab   : > { %v4103_v16 = vadd.f32 %v16599_v12, %v3794_v13  ;;  %v16603_v13 = vld [vmem:[#allocation70_spill] sm:$0xff] }
 0x5ac   : > { %v5861_v31 = vadd.f32 %v14325_v3, %v5825_v4  ;;  %v5483_v4 = vadd.f32 %v14192_v29, %v5207_v17  ;;  %v6995_v29 = vld [vmem:[#allocation16 + $0x88] sm:$0xff] }
 0x5ad   : > { %v5688_v44 = vpop.f32.mrf.mxu0  ;;  %v5963_v33 = vld [vmem:[#allocation4 + $0x99] sm:$0xff]  ;;  %v4379_v42 = vadd.f32 %v16600_v23, %v4103_v16  ;;  %7108 = vmatpush.msrb.mxu1 %v6995_v29 }
 0x5ae   : > { %v14573_v28 = vld [vmem:[#allocation4 + $0x98] sm:$0xff]  ;;  %5894 = vst.msk [vmem:[#allocation4 + $0xa9] sm:$0xff] %vm743_vm6, %v5861_v31  ;;  %v5758_v43 = vadd.f32 %v5688_v44, %v5482_v60  ;;  %10877 = vmatmul.msk.f32.gmra.mxu1 %vm743_vm6, %v5963_v33  ;;  %v14594_v31 = vpop.f32.mrf.mxu2  ;;  %v16601_v33 = vld [vmem:[#allocation60_spill] sm:$0xff] }
 0x5af   : > { %v6417_v52 = vld [vmem:[#allocation4 + $0x92] sm:$0xff]  ;;  %10909 = vmatmul.msk.f32.gmra.mxu2 %vm743_vm6, %v14573_v28  ;;  %v4655_v32 = vadd.f32 %v14080_v51, %v4379_v42  ;;  %v6418_v51 = vld [vmem:[#allocation4 + $0x9a] sm:$0xff] }
 0x5b0   : > { %10940 = vmatmul.msk.f32.gmra.mxu3 %vm743_vm6, %v6417_v52  ;;  %v5794_v58 = vadd.f32 %v14312_v7, %v5758_v43  ;;  %10861 = vmatmul.msk.f32.gmra.mxu0 %vm697_vm3, %v14083_v48  ;;  %v5531_v48 = vld [vmem:[#allocation3 + $0x19a] sm:$0xff]  ;;  %v16602_v52 = vld [vmem:[#allocation77_spill] sm:$0xff]  ;;  %v14604_v40 = vpop.f32.mrf.mxu1 }
 0x5b1   : > { %v3797_v49 = vadd.f32 %v16602_v52, %v16601_v33  ;;  %v4931_v12 = vadd.f32 %v14180_v14, %v4655_v32  ;;  %v16605_v32 = vld [vmem:[#allocation64_spill] sm:$0xff]  ;;  %v16606_v52 = vld [vmem:[#allocation82_spill] sm:$0xff] }
 0x5b2   : > { %v5826_v6 = vmax.f32 %v5794_v58, 0.0 }
 0x5b3   : > { %v4104_v43 = vadd.f32 %v16603_v13, %v3797_v49  ;;  %v5208_v23 = vadd.f32 %v14196_v15, %v4931_v12  ;;  %v14620_v49 = vpop.f32.mrf.mxu3 }
 0x5b4   : > { %v5862_v60 = vadd.f32 %v14325_v3, %v5826_v6 }
 0x5b5   : > { %v5691_v10 = vpop.f32.mrf.mxu0  ;;  %v5964_v47 = vld [vmem:[#allocation4 + $0xa9] sm:$0xff]  ;;  %v4380_v58 = vadd.f32 %v16604_v50, %v4104_v43  ;;  %v5484_v6 = vadd.f32 %v14224_v62, %v5208_v23  ;;  %v16608_v43 = vld [vmem:[#allocation94_spill] sm:$0xff] }
 0x5b6   : > { %v14596_v44 = vld [vmem:[#allocation4 + $0xa8] sm:$0xff]  ;;  %5895 = vst.msk [vmem:[#allocation4 + $0xb1] sm:$0xff] %vm743_vm6, %v5862_v60  ;;  %v5759_v11 = vadd.f32 %v5691_v10, %v5483_v4  ;;  %10878 = vmatmul.msk.f32.gmra.mxu1 %vm743_vm6, %v5964_v47  ;;  %v5532_v60 = vld [vmem:[#allocation3 + $0x1a2] sm:$0xff] }
 0x5b7   : > { %10910 = vmatmul.msk.f32.gmra.mxu2 %vm743_vm6, %v14596_v44  ;;  %v4656_v17 = vadd.f32 %v14089_v18, %v4380_v58  ;;  %v14626_v18 = vpop.f32.mrf.mxu2 }
 0x5b8   : > { %10941 = vmatmul.msk.f32.gmra.mxu3 %vm743_vm6, %v6418_v51  ;;  %v5795_v16 = vadd.f32 %v14312_v7, %v5759_v11  ;;  %10862 = vmatmul.msk.f32.gmra.mxu0 %vm697_vm3, %v5531_v48  ;;  %v3800_v48 = vadd.f32 %v16606_v52, %v16605_v32  ;;  %v14629_v62 = vpop.f32.mrf.mxu1  ;;  %v16607_v11 = vld [vmem:[#allocation75_spill] sm:$0xff] }
 0x5b9   : > { %v4932_v29 = vadd.f32 %v14204_v59, %v4656_v17  ;;  %v16609_v59 = vld [vmem:[#allocation68_spill] sm:$0xff]  ;;  %v16610_v17 = vld [vmem:[#allocation87_spill] sm:$0xff] }
 0x5ba   : > { %v5827_v42 = vmax.f32 %v5795_v16, 0.0  ;;  %v4105_v51 = vadd.f32 %v16607_v11, %v3800_v48  ;;  %v16613_v11 = vld [vmem:[#allocation99_spill] sm:$0xff] }
 0x5bb   : > { %v5209_v16 = vadd.f32 %v14230_v2, %v4932_v29  ;;  %v14653_v52 = vpop.f32.mrf.mxu3  ;;  %v16614_v29 = vld [vmem:[#allocation98_spill] sm:$0xff] }
 0x5bc   : > { %v5863_v4 = vadd.f32 %v14325_v3, %v5827_v42  ;;  %v4381_v12 = vadd.f32 %v16608_v43, %v4105_v51 }
 0x5bd   : > { %v5694_v10 = vpop.f32.mrf.mxu0  ;;  %v5965_v47 = vld [vmem:[#allocation4 + $0xb1] sm:$0xff]  ;;  %v5485_v23 = vadd.f32 %v14258_v55, %v5209_v16 }
 0x5be   : > { %v14616_v33 = vld [vmem:[#allocation4 + $0xb0] sm:$0xff]  ;;  %5896 = vst.msk [vmem:[#allocation4 + $0xc1] sm:$0xff] %vm743_vm6, %v5863_v4  ;;  %v5760_v15 = vadd.f32 %v5694_v10, %v5484_v6  ;;  %10879 = vmatmul.msk.f32.gmra.mxu1 %vm743_vm6, %v5965_v47  ;;  %v4657_v58 = vadd.f32 %v14096_v24, %v4381_v12  ;;  %v3803_v47 = vadd.f32 %v16610_v17, %v16609_v59  ;;  %v16615_v12 = vld [vmem:[#allocation39_spill] sm:$0xff] }
 0x5bf   : > { %v6419_v14 = vld [vmem:[#allocation4 + $0xaa] sm:$0xff]  ;;  %10911 = vmatmul.msk.f32.gmra.mxu2 %vm743_vm6, %v14616_v33  ;;  %v6420_v24 = vld [vmem:[#allocation4 + $0xb2] sm:$0xff]  ;;  %v14648_v2 = vpop.f32.mrf.mxu2 }
 0x5c0   : > { %10942 = vmatmul.msk.f32.gmra.mxu3 %vm743_vm6, %v6419_v14  ;;  %v5796_v13 = vadd.f32 %v14312_v7, %v5760_v15  ;;  %10863 = vmatmul.msk.f32.gmra.mxu0 %vm697_vm3, %v5532_v60  ;;  %v16611_v55 = vld [vmem:[#allocation80_spill] sm:$0xff]  ;;  %v4933_v32 = vadd.f32 %v14237_v36, %v4657_v58  ;;  %v14658_v15 = vpop.f32.mrf.mxu1 }
 0x5c1   : > { %v4106_v14 = vadd.f32 %v16611_v55, %v3803_v47  ;;  %16612 = vst [vmem:[#allocation35_spill] sm:$0xff] %v14658_v15  ;;  %v16617_v59 = vld [vmem:[#allocation72_spill] sm:$0xff]  ;;  %v16620_v55 = vld [vmem:[#allocation103_spill] sm:$0xff]  ;;  %v16645_v15 = vld [vmem:[#allocation86_spill] sm:$0xff] }
 0x5c2   : > { %v5828_v50 = vmax.f32 %v5796_v13, 0.0  ;;  %v5210_v13 = vadd.f32 %v16614_v29, %v4933_v32 }
 0x5c3   : > { %v4382_v51 = vadd.f32 %v16613_v11, %v4106_v14  ;;  %v14676_v32 = vpop.f32.mrf.mxu3 }
 0x5c4   : > { %v5864_v42 = vadd.f32 %v14325_v3, %v5828_v50  ;;  %v16616_v50 = vld [vmem:[#allocation113_spill] sm:$0xff]  ;;  %16621 = vst [vmem:[#allocation51_spill] sm:$0xff] %v14676_v32 }
 0x5c5   : > { %v5697_v6 = vpop.f32.mrf.mxu0  ;;  %v5966_v4 = vld [vmem:[#allocation4 + $0xc1] sm:$0xff]  ;;  %v4658_v16 = vadd.f32 %v16615_v12, %v4382_v51  ;;  %v16623_v51 = vld [vmem:[#allocation104_spill] sm:$0xff] }
 0x5c6   : > { %v14640_v10 = vld [vmem:[#allocation4 + $0xc0] sm:$0xff]  ;;  %5897 = vst.msk [vmem:[#allocation4 + $0xc9] sm:$0xff] %vm743_vm6, %v5864_v42  ;;  %v5761_v60 = vadd.f32 %v5697_v6, %v5485_v23  ;;  %10880 = vmatmul.msk.f32.gmra.mxu1 %vm743_vm6, %v5966_v4  ;;  %v5486_v23 = vadd.f32 %v16616_v50, %v5210_v13  ;;  %v16624_v13 = vld [vmem:[#allocation117_spill] sm:$0xff] }
 0x5c7   : > { %10912 = vmatmul.msk.f32.gmra.mxu2 %vm743_vm6, %v14640_v10  ;;  %v4934_v14 = vadd.f32 %v16620_v55, %v4658_v16  ;;  %v14681_v11 = vpop.f32.mrf.mxu2  ;;  %v16629_v55 = vld [vmem:[#allocation90_spill] sm:$0xff] }
 0x5c8   : > { %10943 = vmatmul.msk.f32.gmra.mxu3 %vm743_vm6, %v6420_v24  ;;  %v5797_v48 = vadd.f32 %v14312_v7, %v5761_v60  ;;  %10960 = vmatmul.msk.f32.vlgmr.msrb.gmra.mxu0 %vm743_vm6, %v14346_v9  ;;  %v16618_v9 = vld [vmem:[#allocation92_spill] sm:$0xff]  ;;  %v16619_v60 = vld [vmem:[#allocation85_spill] sm:$0xff]  ;;  %16622 = vst [vmem:[#allocation34_spill] sm:$0xff] %v14681_v11 }
 0x5c9   : > { %v3806_v17 = vadd.f32 %v16618_v9, %v16617_v59 }
 0x5ca   : > { %v5829_v43 = vmax.f32 %v5797_v48, 0.0 }
 0x5cb   : > { %v4107_v24 = vadd.f32 %v16619_v60, %v3806_v17  ;;  %v16627_v17 = vld [vmem:[#allocation76_spill] sm:$0xff] }
 0x5cc   : > { %v5865_v36 = vadd.f32 %v14325_v3, %v5829_v43  ;;  %v5211_v43 = vadd.f32 %v16624_v13, %v4934_v14 }
 0x5cd   : > { %v5700_v58 = vpop.f32.mrf.mxu0  ;;  %v5967_v42 = vld [vmem:[#allocation4 + $0xc9] sm:$0xff]  ;;  %v4383_v29 = vadd.f32 %v16623_v51, %v4107_v24 }
 0x5ce   : > { %v14665_v6 = vld [vmem:[#allocation4 + $0xc8] sm:$0xff]  ;;  %5898 = vst.msk [vmem:[#allocation4 + $0xd9] sm:$0xff] %vm743_vm6, %v5865_v36  ;;  %v5762_v47 = vadd.f32 %v5700_v58, %v5486_v23  ;;  %10881 = vmatmul.msk.f32.gmra.mxu1 %vm743_vm6, %v5967_v42  ;;  %v16625_v23 = vld [vmem:[#allocation33_spill] sm:$0xff]  ;;  %v16626_v58 = vld [vmem:[#allocation130_spill] sm:$0xff] }
 0x5cf   : > { %v6421_v4 = vld [vmem:[#allocation4 + $0xc2] sm:$0xff]  ;;  %10913 = vmatmul.msk.f32.gmra.mxu2 %vm743_vm6, %v14665_v6  ;;  %v4659_v36 = vadd.f32 %v16625_v23, %v4383_v29  ;;  %v5487_v42 = vadd.f32 %v16626_v58, %v5211_v43  ;;  %v6422_v24 = vld [vmem:[#allocation4 + $0xca] sm:$0xff]  ;;  %v16631_v43 = vld [vmem:[#allocation109_spill] sm:$0xff] }
 0x5d0   : > { %10944 = vmatmul.msk.f32.gmra.mxu3 %vm743_vm6, %v6421_v4  ;;  %v5798_v48 = vadd.f32 %v14312_v7, %v5762_v47  ;;  %10961 = vmatmul.msk.f32.gmra.mxu0 %vm743_vm6, %v14363_v8  ;;  %v16628_v8 = vld [vmem:[#allocation97_spill] sm:$0xff]  ;;  %v16632_v23 = vld [vmem:[#allocation134_spill] sm:$0xff] }
 0x5d1   : > { %v3809_v47 = vadd.f32 %v16628_v8, %v16627_v17  ;;  %v16634_v17 = vld [vmem:[#allocation49_spill] sm:$0xff] }
 0x5d2   : > { %v5830_v12 = vmax.f32 %v5798_v48, 0.0  ;;  %v16630_v48 = vld [vmem:[#allocation126_spill] sm:$0xff] }
 0x5d3   : > { %v6106_v50 = vpop.f32.mrf.mxu1  ;;  %v4108_v14 = vadd.f32 %v16629_v55, %v3809_v47  ;;  %v4935_v51 = vadd.f32 %v16630_v48, %v4659_v36  ;;  %v16635_v48 = vld [vmem:[#allocation81_spill] sm:$0xff] }
 0x5d4   : > { %v5866_v16 = vadd.f32 %v14325_v3, %v5830_v12 }
 0x5d5   : > { %v5703_v4 = vpop.f32.mrf.mxu0  ;;  %v5968_v59 = vld [vmem:[#allocation4 + $0xd9] sm:$0xff]  ;;  %v4384_v12 = vadd.f32 %v16631_v43, %v4108_v14  ;;  %v5212_v58 = vadd.f32 %v16632_v23, %v4935_v51  ;;  %v16639_v23 = vld [vmem:[#allocation152_spill] sm:$0xff] }
 0x5d6   : > { %v14688_v9 = vld [vmem:[#allocation4 + $0xd8] sm:$0xff]  ;;  %5899 = vst.msk [vmem:[#allocation4 + $0xe1] sm:$0xff] %vm743_vm6, %v5866_v16  ;;  %v5763_v60 = vadd.f32 %v5703_v4, %v5487_v42  ;;  %10882 = vmatmul.msk.f32.gmra.mxu1 %vm743_vm6, %v5968_v59  ;;  %v14704_v42 = vpop.f32.mrf.mxu3 }
 0x5d7   : > { %10914 = vmatmul.msk.f32.gmra.mxu2 %vm743_vm6, %v14688_v9  ;;  %16633 = vst [vmem:[#allocation45_spill] sm:$0xff] %v14704_v42  ;;  %v4660_v8 = vadd.f32 %v16634_v17, %v4384_v12  ;;  %v5488_v47 = vadd.f32 %v14336_v61, %v5212_v58  ;;  %v16636_v14 = vld [vmem:[#allocation102_spill] sm:$0xff]  ;;  %v16637_v61 = vld [vmem:[#allocation95_spill] sm:$0xff]  ;;  %v16643_v42 = vld [vmem:[#allocation57_spill] sm:$0xff] }
 0x5d8   : > { %10945 = vmatmul.msk.f32.gmra.mxu3 %vm743_vm6, %v6422_v24  ;;  %v5799_v29 = vadd.f32 %v14312_v7, %v5763_v60  ;;  %10962 = vmatmul.msk.f32.gmra.mxu0 %vm743_vm6, %v14379_v21  ;;  %v3812_v43 = vadd.f32 %v16636_v14, %v16635_v48 }
 0x5da   : > { %v6315_v13 = vpop.f32.mrf.mxu2  ;;  %v5831_v16 = vmax.f32 %v5799_v29, 0.0  ;;  %v16638_v29 = vld [vmem:[#allocation138_spill] sm:$0xff] }
 0x5db   : > { %v6316_v4 = vadd.f32 %v6315_v13, %v6106_v50  ;;  %v6109_v59 = vpop.f32.mrf.mxu1  ;;  %v4109_v50 = vadd.f32 %v16637_v61, %v3812_v43  ;;  %v4936_v13 = vadd.f32 %v16638_v29, %v4660_v8  ;;  %v16644_v61 = vld [vmem:[#allocation144_spill] sm:$0xff] }
 0x5dc   : > { %v5867_v36 = vadd.f32 %v14325_v3, %v5831_v16  ;;  %v16640_v16 = vld [vmem:[#allocation114_spill] sm:$0xff] }
 0x5dd   : > { %v5706_v60 = vpop.f32.mrf.mxu0  ;;  %v5969_v24 = vld [vmem:[#allocation4 + $0xe1] sm:$0xff]  ;;  %v4385_v17 = vadd.f32 %v16640_v16, %v4109_v50 }
 0x5de   : > { %v14709_v55 = vld [vmem:[#allocation4 + $0xe0] sm:$0xff]  ;;  %5900 = vst.msk [vmem:[#allocation4 + $0xf1] sm:$0xff] %vm743_vm6, %v5867_v36  ;;  %v5764_v51 = vadd.f32 %v5706_v60, %v5488_v47  ;;  %10883 = vmatmul.msk.f32.gmra.mxu1 %vm743_vm6, %v5969_v24  ;;  %v16641_v47 = vld [vmem:[#allocation140_spill] sm:$0xff] }
 0x5df   : > { %v6423_v21 = vld [vmem:[#allocation4 + $0xda] sm:$0xff]  ;;  %10915 = vmatmul.msk.f32.gmra.mxu2 %vm743_vm6, %v14709_v55  ;;  %v5213_v36 = vadd.f32 %v16641_v47, %v4936_v13  ;;  %v4661_v43 = vadd.f32 %v16643_v42, %v4385_v17  ;;  %v6424_v42 = vld [vmem:[#allocation4 + $0xe2] sm:$0xff]  ;;  %v16649_v47 = vld [vmem:[#allocation156_spill] sm:$0xff] }
 0x5e0   : > { %10946 = vmatmul.msk.f32.gmra.mxu3 %vm743_vm6, %v6423_v21  ;;  %v5800_v12 = vadd.f32 %v14312_v7, %v5764_v51  ;;  %10963 = vmatmul.msk.f32.gmra.mxu0 %vm743_vm6, %v16639_v23  ;;  %v16646_v50 = vld [vmem:[#allocation106_spill] sm:$0xff] }
 0x5e1   : > { %v5489_v8 = vadd.f32 %v16644_v61, %v5213_v36  ;;  %v3815_v16 = vadd.f32 %v16646_v50, %v16645_v15  ;;  %v16650_v36 = vld [vmem:[#allocation118_spill] sm:$0xff] }
 0x5e2   : > { %v6318_v58 = vpop.f32.mrf.mxu2  ;;  %v5832_v60 = vmax.f32 %v5800_v12, 0.0  ;;  %v16648_v12 = vld [vmem:[#allocation142_spill] sm:$0xff] }
 0x5e3   : > { %v6319_v24 = vadd.f32 %v6318_v58, %v6109_v59  ;;  %v6561_v48 = vpop.f32.mrf.mxu3  ;;  %v6112_v21 = vpop.f32.mrf.mxu1  ;;  %v4937_v58 = vadd.f32 %v16648_v12, %v4661_v43 }
 0x5e4   : > { %v14725_v14 = vadd.f32 %v6561_v48, %v6316_v4  ;;  %v5868_v51 = vadd.f32 %v14325_v3, %v5832_v60  ;;  %v16647_v4 = vld [vmem:[#allocation100_spill] sm:$0xff] }
 0x5e5   : > { %v5709_v29 = vpop.f32.mrf.mxu0  ;;  %v5970_v11 = vld [vmem:[#allocation4 + $0xf1] sm:$0xff]  ;;  %v4110_v13 = vadd.f32 %v16647_v4, %v3815_v16  ;;  %v16654_v4 = vld [vmem:[#allocation146_spill] sm:$0xff] }
 0x5e6   : > { %16642 = vst [vmem:[#allocation37_spill] sm:$0xff] %v14725_v14  ;;  %v14730_v23 = vld [vmem:[#allocation4 + $0xf0] sm:$0xff]  ;;  %v5765_v59 = vadd.f32 %v5709_v29, %v5489_v8  ;;  %10884 = vmatmul.msk.f32.gmra.mxu1 %vm743_vm6, %v5970_v11 }
 0x5e7   : > { %5901 = vst.msk [vmem:[#allocation4 + $0xf9] sm:$0xff] %vm743_vm6, %v5868_v51  ;;  %10916 = vmatmul.msk.f32.gmra.mxu2 %vm743_vm6, %v14730_v23  ;;  %v4386_v60 = vadd.f32 %v16650_v36, %v4110_v13  ;;  %v16651_v48 = vld [vmem:[#allocation148_spill] sm:$0xff]  ;;  %v16655_v13 = vld [vmem:[#allocation91_spill] sm:$0xff] }
 0x5e8   : > { %10947 = vmatmul.msk.f32.gmra.mxu3 %vm743_vm6, %v6424_v42  ;;  %v5801_v17 = vadd.f32 %v14312_v7, %v5765_v59  ;;  %10964 = vmatmul.msk.f32.gmra.mxu0 %vm743_vm6, %v16649_v47  ;;  %v5214_v11 = vadd.f32 %v16651_v48, %v4937_v58  ;;  %v16653_v42 = vld [vmem:[#allocation56_spill] sm:$0xff]  ;;  %v16656_v36 = vld [vmem:[#allocation111_spill] sm:$0xff] }
 0x5e9   : > { %v4662_v16 = vadd.f32 %v16653_v42, %v4386_v60  ;;  %v3818_v58 = vadd.f32 %v16656_v36, %v16655_v13  ;;  %v16660_v42 = vld [vmem:[#allocation150_spill] sm:$0xff] }
 0x5ea   : > { %v6321_v15 = vpop.f32.mrf.mxu2  ;;  %v5833_v61 = vmax.f32 %v5801_v17, 0.0  ;;  %v5490_v43 = vadd.f32 %v16654_v4, %v5214_v11  ;;  %v16662_v13 = vld [vmem:[#allocation46_spill] sm:$0xff] }
 0x5eb   : > { %v6322_v8 = vadd.f32 %v6321_v15, %v6112_v21  ;;  %v6564_v51 = vpop.f32.mrf.mxu3  ;;  %v6115_v50 = vpop.f32.mrf.mxu1  ;;  %v16658_v15 = vld [vmem:[#allocation149_spill] sm:$0xff] }
 0x5ec   : > { %v14746_v29 = vadd.f32 %v6564_v51, %v6319_v24  ;;  %v5869_v59 = vadd.f32 %v14325_v3, %v5833_v61  ;;  %v16657_v24 = vld [vmem:[#allocation107_spill] sm:$0xff]  ;;  %v4938_v60 = vadd.f32 %v16658_v15, %v4662_v16 }
 0x5ed   : > { %v5712_v12 = vpop.f32.mrf.mxu0  ;;  %v4111_v17 = vadd.f32 %v16657_v24, %v3818_v58  ;;  %v16659_v61 = vld [vmem:[#allocation123_spill] sm:$0xff]  ;;  %v16663_v58 = vld [vmem:[#allocation153_spill] sm:$0xff] }
 0x5ee   : > { %16652 = vst [vmem:[#allocation58_spill] sm:$0xff] %v14746_v29  ;;  %v5971_v14 = vld [vmem:[#allocation4 + $0xf9] sm:$0xff]  ;;  %v5766_v21 = vadd.f32 %v5712_v12, %v5490_v43  ;;  %v5215_v4 = vadd.f32 %v16660_v42, %v4938_v60  ;;  %v16664_v29 = vld [vmem:[#allocation96_spill] sm:$0xff] }
 0x5ef   : > { %v14751_v47 = vld [vmem:[#allocation4 + $0xf8] sm:$0xff]  ;;  %5902 = vst.msk [vmem:[#allocation4 + $0x109] sm:$0xff] %vm743_vm6, %v5869_v59  ;;  %10885 = vmatmul.msk.f32.gmra.mxu1 %vm743_vm6, %v5971_v14  ;;  %v4387_v51 = vadd.f32 %v16659_v61, %v4111_v17  ;;  %v16665_v17 = vld [vmem:[#allocation116_spill] sm:$0xff] }
 0x5f0   : > { %v6425_v32 = vld [vmem:[#allocation4 + $0xf2] sm:$0xff]  ;;  %10917 = vmatmul.msk.f32.gmra.mxu2 %vm743_vm6, %v14751_v47  ;;  %v5802_v48 = vadd.f32 %v14312_v7, %v5766_v21  ;;  %10965 = vmatmul.msk.f32.gmra.mxu0 %vm743_vm6, %v14433_v5  ;;  %v5491_v16 = vadd.f32 %v16663_v58, %v5215_v4  ;;  %v3821_v61 = vadd.f32 %v16665_v17, %v16664_v29  ;;  %v6994_v60 = vld [vmem:[#allocation16 + $0x80] sm:$0xff] }
 0x5f1   : > { %10948 = vmatmul.msk.f32.gmra.mxu3 %vm743_vm6, %v6425_v32  ;;  %v4663_v36 = vadd.f32 %v16662_v13, %v4387_v51  ;;  %7109 = vmatpush.msrb.mxu1 %v6994_v60  ;;  %v16668_v51 = vld [vmem:[#allocation151_spill] sm:$0xff]  ;;  %v16670_v13 = vld [vmem:[#allocation154_spill] sm:$0xff] }
 0x5f2   : > { %v6324_v11 = vpop.f32.mrf.mxu2  ;;  %v5834_v14 = vmax.f32 %v5802_v48, 0.0  ;;  %v16667_v48 = vld [vmem:[#allocation112_spill] sm:$0xff]  ;;  %v16671_v60 = vld [vmem:[#allocation55_spill] sm:$0xff] }
 0x5f3   : > { %v6325_v43 = vadd.f32 %v6324_v11, %v6115_v50  ;;  %v6567_v59 = vpop.f32.mrf.mxu3  ;;  %v6118_v32 = vpop.f32.mrf.mxu1  ;;  %v4112_v11 = vadd.f32 %v16667_v48, %v3821_v61  ;;  %v4939_v42 = vadd.f32 %v16668_v51, %v4663_v36  ;;  %v16672_v48 = vld [vmem:[#allocation32_spill] sm:$0xff] }
 0x5f4   : > { %v14767_v12 = vadd.f32 %v6567_v59, %v6322_v8  ;;  %v5870_v21 = vadd.f32 %v14325_v3, %v5834_v14  ;;  %v14780_v8 = vld [vmem:[#allocation4 + $0xfa] sm:$0xff]  ;;  %v16669_v14 = vld [vmem:[#allocation127_spill] sm:$0xff] }
 0x5f5   : > { %v5715_v24 = vpop.f32.mrf.mxu0  ;;  %16666 = vst [vmem:[#allocation50_spill] sm:$0xff] %v14780_v8  ;;  %v4388_v59 = vadd.f32 %v16669_v14, %v4112_v11  ;;  %v5216_v58 = vadd.f32 %v16670_v13, %v4939_v42  ;;  %v16673_v11 = vld [vmem:[#allocation101_spill] sm:$0xff] }
 0x5f6   : > { %16661 = vst [vmem:[#allocation36_spill] sm:$0xff] %v14767_v12  ;;  %v5972_v15 = vld [vmem:[#allocation4 + $0x109] sm:$0xff]  ;;  %v5767_v50 = vadd.f32 %v5715_v24, %v5491_v16  ;;  %v16674_v42 = vld [vmem:[#allocation121_spill] sm:$0xff] }
 0x5f7   : > { %v14772_v5 = vld [vmem:[#allocation4 + $0x108] sm:$0xff]  ;;  %5903 = vst.msk [vmem:[#allocation4 + $0x111] sm:$0xff] %vm743_vm6, %v5870_v21  ;;  %10886 = vmatmul.msk.f32.gmra.mxu1 %vm743_vm6, %v5972_v15  ;;  %v4664_v61 = vadd.f32 %v16671_v60, %v4388_v59  ;;  %v5492_v36 = vadd.f32 %v16672_v48, %v5216_v58 }
 0x5f8   : > { %10918 = vmatmul.msk.f32.gmra.mxu2 %vm743_vm6, %v14772_v5  ;;  %v5803_v29 = vadd.f32 %v14312_v7, %v5767_v50  ;;  %10966 = vmatmul.msk.f32.gmra.mxu0 %vm743_vm6, %v14458_v45  ;;  %v16677_v58 = vld [vmem:[#allocation131_spill] sm:$0xff] }
 0x5f9   : > { %10949 = vmatmul.msk.f32.gmra.mxu3 %vm743_vm6, %v14780_v8 }
 0x5fa   : > { %v6327_v4 = vpop.f32.mrf.mxu2  ;;  %v5835_v16 = vmax.f32 %v5803_v29, 0.0  ;;  %v3824_v29 = vadd.f32 %v16674_v42, %v16673_v11 }
 0x5fb   : > { %v6328_v21 = vadd.f32 %v6327_v4, %v6118_v32  ;;  %v6570_v24 = vpop.f32.mrf.mxu3  ;;  %v6121_v17 = vpop.f32.mrf.mxu1  ;;  %v16676_v4 = vld [vmem:[#allocation155_spill] sm:$0xff] }
 0x5fc   : > { %v14791_v15 = vadd.f32 %v6570_v24, %v6325_v43  ;;  %v5871_v50 = vadd.f32 %v14325_v3, %v5835_v16  ;;  %v16675_v3 = vld [vmem:[#allocation119_spill] sm:$0xff]  ;;  %v4940_v14 = vadd.f32 %v16676_v4, %v4664_v61 }
 0x5fd   : > { %v5718_v51 = vpop.f32.mrf.mxu0  ;;  %v4113_v32 = vadd.f32 %v16675_v3, %v3824_v29 }
 0x5fe   : > { %v5973_v12 = vld [vmem:[#allocation4 + $0x111] sm:$0xff]  ;;  %5904 = vst.msk [vmem:[#allocation4 + $0x121] sm:$0xff] %vm743_vm6, %v5871_v50  ;;  %v5768_v43 = vadd.f32 %v5718_v51, %v5492_v36  ;;  %v16678_v51 = vld [vmem:[#allocation62_spill] sm:$0xff] }
 0x5ff   : > { %v14796_v45 = vld [vmem:[#allocation4 + $0x110] sm:$0xff]  ;;  %10887 = vmatmul.msk.f32.gmra.mxu1 %vm743_vm6, %v5973_v12  ;;  %v4389_v16 = vadd.f32 %v16677_v58, %v4113_v32  ;;  %v5217_v12 = vadd.f32 %v14426_v46, %v4940_v14 }
 0x600   : > { %v14798_v8 = vld [vmem:[#allocation4 + $0x10a] sm:$0xff]  ;;  %10919 = vmatmul.msk.f32.gmra.mxu2 %vm743_vm6, %v14796_v45  ;;  %v5804_v59 = vadd.f32 %v14312_v7, %v5768_v43  ;;  %10967 = vmatmul.msk.f32.gmra.mxu0 %vm743_vm6, %v14480_v57  ;;  %v14822_v7 = vld [vmem:[%s16319_s6] ss:$0 sm:$0xff] }
 0x601   : > { %10950 = vmatmul.msk.f32.gmra.mxu3 %vm743_vm6, %v14798_v8  ;;  %v4665_v11 = vadd.f32 %v16678_v51, %v4389_v16  ;;  %v5493_v61 = vadd.f32 %v14449_v25, %v5217_v12  ;;  %v16680_v43 = vld [vmem:[#allocation125_spill] sm:$0xff]  ;;  %v16681_v32 = vld [vmem:[#allocation124_spill] sm:$0xff]  ;;  %v16682_v16 = vld [vmem:[#allocation135_spill] sm:$0xff] }
 0x602   : > { %v6330_v13 = vpop.f32.mrf.mxu2  ;;  %v5836_v24 = vmax.f32 %v5804_v59, 0.0  ;;  %v14833_v25 = vld [vmem:[#allocation4 + $0x112] sm:$0xff]  ;;  %v14839_v59 = vld [vmem:[#allocation14] ss:$0 sm:$0xff] }
 0x603   : > { %v6331_v60 = vadd.f32 %v6330_v13, %v6121_v17  ;;  %v6573_v48 = vpop.f32.mrf.mxu3  ;;  %v6124_v50 = vpop.f32.mrf.mxu1  ;;  %v16679_v17 = vld [vmem:[#allocation105_spill] sm:$0xff]  ;;  %v4941_v14 = vadd.f32 %v14429_v63, %v4665_v11 }
 0x604   : > { %v14815_v36 = vadd.f32 %v6573_v48, %v6328_v21  ;;  %v5872_v57 = vadd.f32 %v14822_v7, %v5836_v24  ;;  %v3827_v21 = vadd.f32 %v16680_v43, %v16679_v17 }
 0x605   : > { %v5721_v42 = vpop.f32.mrf.mxu0  ;;  %v5974_v29 = vld [vmem:[#allocation4 + $0x121] sm:$0xff]  ;;  %v5218_v24 = vadd.f32 %v14451_v34, %v4941_v14  ;;  %v16685_v34 = vld [vmem:[#allocation129_spill] sm:$0xff] }
 0x606   : > { %v14825_v46 = vld [vmem:[#allocation4 + $0x120] sm:$0xff]  ;;  %5905 = vst.msk [vmem:[#allocation4 + $0x129] sm:$0xff] %vm743_vm6, %v5872_v57  ;;  %v5769_v3 = vadd.f32 %v5721_v42, %v5493_v61  ;;  %v4114_v4 = vadd.f32 %v16681_v32, %v3827_v21 }
 0x607   : > { %10888 = vmatmul.msk.f32.gmra.mxu1 %vm743_vm6, %v5974_v29  ;;  %v16683_v29 = vld [vmem:[#allocation78_spill] sm:$0xff]  ;;  %v5494_v11 = vadd.f32 %v14475_v1, %v5218_v24  ;;  %v16686_v1 = vld [vmem:[#allocation128_spill] sm:$0xff] }
 0x608   : > { %10920 = vmatmul.msk.f32.gmra.mxu2 %vm743_vm6, %v14825_v46  ;;  %v5805_v13 = vadd.f32 %v14839_v59, %v5769_v3  ;;  %10968 = vmatmul.msk.f32.gmra.mxu0 %vm743_vm6, %v14500_v30  ;;  %v4390_v12 = vadd.f32 %v16682_v16, %v4114_v4  ;;  %v16684_v32 = vld [vmem:[#allocation110_spill] sm:$0xff]  ;;  %v16687_v16 = vld [vmem:[#allocation139_spill] sm:$0xff] }
 0x609   : > { %10951 = vmatmul.msk.f32.gmra.mxu3 %vm743_vm6, %v14833_v25  ;;  %v3830_v4 = vadd.f32 %v16685_v34, %v16684_v32 }
 0x60a   : > { %v6333_v58 = vpop.f32.mrf.mxu2  ;;  %v5837_v48 = vmax.f32 %v5805_v13, 0.0  ;;  %v4666_v63 = vadd.f32 %v16683_v29, %v4390_v12 }
 0x60b   : > { %v6334_v51 = vadd.f32 %v6333_v58, %v6124_v50  ;;  %v6576_v61 = vpop.f32.mrf.mxu3  ;;  %v6127_v42 = vpop.f32.mrf.mxu1  ;;  %v4115_v50 = vadd.f32 %v16686_v1, %v3830_v4  ;;  %v16690_v4 = vld [vmem:[#allocation115_spill] sm:$0xff] }
 0x60c   : > { %v14846_v57 = vadd.f32 %v6576_v61, %v6331_v60  ;;  %v5873_v17 = vadd.f32 %v14822_v7, %v5837_v48  ;;  %v4942_v14 = vadd.f32 %v14456_v39, %v4666_v63 }
 0x60d   : > { %v5724_v43 = vpop.f32.mrf.mxu0  ;;  %v5975_v21 = vld [vmem:[#allocation4 + $0x129] sm:$0xff]  ;;  %v4391_v12 = vadd.f32 %v16687_v16, %v4115_v50  ;;  %v16693_v50 = vld [vmem:[#allocation42_spill] sm:$0xff]  ;;  %v16694_v16 = vld [vmem:[#allocation141_spill] sm:$0xff] }
 0x60e   : > { %v14851_v30 = vld [vmem:[#allocation4 + $0x128] sm:$0xff]  ;;  %5906 = vst.msk [vmem:[#allocation4 + $0x139] sm:$0xff] %vm743_vm6, %v5873_v17  ;;  %v5770_v60 = vadd.f32 %v5724_v43, %v5494_v11  ;;  %v5219_v24 = vadd.f32 %v14478_v54, %v4942_v14 }
 0x60f   : > { %v14853_v3 = vld [vmem:[#allocation4 + $0x122] sm:$0xff]  ;;  %10889 = vmatmul.msk.f32.gmra.mxu1 %vm743_vm6, %v5975_v21 }
 0x610   : > { %10921 = vmatmul.msk.f32.gmra.mxu2 %vm743_vm6, %v14851_v30  ;;  %v5806_v13 = vadd.f32 %v14839_v59, %v5770_v60  ;;  %10969 = vmatmul.msk.f32.gmra.mxu0 %vm743_vm6, %v14524_v22  ;;  %v16689_v43 = vld [vmem:[#allocation83_spill] sm:$0xff]  ;;  %v5495_v39 = vadd.f32 %v14504_v26, %v5219_v24  ;;  %v16691_v60 = vld [vmem:[#allocation133_spill] sm:$0xff]  ;;  %v14886_v26 = vld [vmem:[#allocation4 + $0x12a] sm:$0xff] }
 0x611   : > { %10952 = vmatmul.msk.f32.gmra.mxu3 %vm743_vm6, %v14853_v3  ;;  %v4667_v21 = vadd.f32 %v16689_v43, %v4391_v12  ;;  %v3833_v54 = vadd.f32 %v16691_v60, %v16690_v4 }
 0x612   : > { %v6336_v58 = vpop.f32.mrf.mxu2  ;;  %v5838_v48 = vmax.f32 %v5806_v13, 0.0 }
 0x613   : > { %v6337_v61 = vadd.f32 %v6336_v58, %v6127_v42  ;;  %v6579_v29 = vpop.f32.mrf.mxu3  ;;  %v6130_v17 = vpop.f32.mrf.mxu1  ;;  %v4943_v14 = vadd.f32 %v16693_v50, %v4667_v21 }
 0x614   : > { %v14870_v11 = vadd.f32 %v6579_v29, %v6334_v51  ;;  %v5874_v63 = vadd.f32 %v14822_v7, %v5838_v48  ;;  %v16692_v51 = vld [vmem:[#allocation132_spill] sm:$0xff] }
 0x615   : > { %v5727_v32 = vpop.f32.mrf.mxu0  ;;  %v14875_v34 = vld [vmem:[#allocation4 + $0x139] sm:$0xff]  ;;  %v4116_v1 = vadd.f32 %v16692_v51, %v3833_v54  ;;  %v5220_v24 = vadd.f32 %v14510_v56, %v4943_v14  ;;  %v16697_v56 = vld [vmem:[#allocation120_spill] sm:$0xff] }
 0x616   : > { %16688 = vst [vmem:[#allocation40_spill] sm:$0xff] %v14870_v11  ;;  %v14877_v22 = vld [vmem:[#allocation4 + $0x138] sm:$0xff]  ;;  %v5771_v42 = vadd.f32 %v5727_v32, %v5495_v39  ;;  %v16696_v32 = vld [vmem:[#allocation88_spill] sm:$0xff] }
 0x617   : > { %5907 = vst.msk [vmem:[#allocation4 + $0x141] sm:$0xff] %vm743_vm6, %v5874_v63  ;;  %10890 = vmatmul.msk.f32.gmra.mxu1 %vm743_vm6, %v14875_v34  ;;  %v4392_v12 = vadd.f32 %v16694_v16, %v4116_v1  ;;  %v5496_v21 = vadd.f32 %v14535_v27, %v5220_v24  ;;  %v16698_v1 = vld [vmem:[#allocation137_spill] sm:$0xff]  ;;  %v16699_v27 = vld [vmem:[#allocation136_spill] sm:$0xff]  ;;  %v16700_v16 = vld [vmem:[#allocation143_spill] sm:$0xff] }
 0x618   : > { %10922 = vmatmul.msk.f32.gmra.mxu2 %vm743_vm6, %v14877_v22  ;;  %v5807_v13 = vadd.f32 %v14839_v59, %v5771_v42  ;;  %10970 = vmatmul.msk.f32.gmra.mxu0 %vm743_vm6, %v14548_v53  ;;  %v15160_v11 = vld [vmem:[#allocation4 + $0x91] sm:$0xff] }
 0x619   : > { %10953 = vmatmul.msk.f32.gmra.mxu3 %vm743_vm6, %v14886_v26  ;;  %v4668_v4 = vadd.f32 %v16696_v32, %v4392_v12 }
 0x61a   : > { %v6339_v58 = vpop.f32.mrf.mxu2  ;;  %v5839_v48 = vmax.f32 %v5807_v13, 0.0 }
 0x61b   : > { %v6340_v29 = vadd.f32 %v6339_v58, %v6130_v17  ;;  %v6582_v43 = vpop.f32.mrf.mxu3  ;;  %v6133_v63 = vpop.f32.mrf.mxu1  ;;  %v3836_v17 = vadd.f32 %v16698_v1, %v16697_v56  ;;  %v4944_v14 = vadd.f32 %v14517_v0, %v4668_v4  ;;  %v16702_v56 = vld [vmem:[#allocation93_spill] sm:$0xff] }
 0x61c   : > { %v14897_v39 = vadd.f32 %v6582_v43, %v6337_v61  ;;  %v5875_v60 = vadd.f32 %v14822_v7, %v5839_v48 }
 0x61d   : > { %v5730_v54 = vpop.f32.mrf.mxu0  ;;  %v4117_v50 = vadd.f32 %v16699_v27, %v3836_v17  ;;  %v5221_v24 = vadd.f32 %v14539_v38, %v4944_v14 }
 0x61e   : > { %16695 = vst [vmem:[#allocation63_spill] sm:$0xff] %v14897_v39  ;;  %v14902_v42 = vld [vmem:[#allocation4 + $0x141] sm:$0xff]  ;;  %v5772_v61 = vadd.f32 %v5730_v54, %v5496_v21 }
 0x61f   : > { %v14904_v53 = vld [vmem:[#allocation4 + $0x140] sm:$0xff]  ;;  %5908 = vst.msk [vmem:[#allocation4 + $0x151] sm:$0xff] %vm743_vm6, %v5875_v60  ;;  %10891 = vmatmul.msk.f32.gmra.mxu1 %vm743_vm6, %v14902_v42  ;;  %v4393_v12 = vadd.f32 %v16700_v16, %v4117_v50  ;;  %v5497_v4 = vadd.f32 %v14564_v35, %v5221_v24  ;;  %v7273_v35 = vld [vmem:[#allocation16 + $0xa8] sm:$0xff] }
 0x620   : > { %v14906_v51 = vld [vmem:[#allocation4 + $0x13a] sm:$0xff]  ;;  %10923 = vmatmul.msk.f32.gmra.mxu2 %vm743_vm6, %v14904_v53  ;;  %v5808_v13 = vadd.f32 %v14839_v59, %v5772_v61  ;;  %10971 = vmatmul.msk.f32.gmra.mxu0 %vm743_vm6, %v14573_v28  ;;  %v15147_v39 = vld [vmem:[#allocation4 + $0x82] sm:$0xff] }
 0x621   : > { %10954 = vmatmul.msk.f32.gmra.mxu3 %vm743_vm6, %v14906_v51  ;;  %v7275_v21 = vld [vmem:[#allocation16 + $0xb8] sm:$0xff]  ;;  %v4669_v0 = vadd.f32 %v16702_v56, %v4393_v12  ;;  %v7274_v28 = vld [vmem:[#allocation16 + $0xb0] sm:$0xff]  ;;  %16730 = vst [vmem:[#allocation64_spill] sm:$0xff] %v15147_v39 }
 0x622   : > { %v6342_v58 = vpop.f32.mrf.mxu2  ;;  %v5840_v48 = vmax.f32 %v5808_v13, 0.0  ;;  %7384 = vmatpush.msrb.mxu2 %v7275_v21  ;;  %v7554_v50 = vld [vmem:[#allocation16 + $0xd8] sm:$0xff]  ;;  %v7553_v56 = vld [vmem:[#allocation16 + $0xd0] sm:$0xff] }
 0x623   : > { %v6343_v43 = vadd.f32 %v6342_v58, %v6133_v63  ;;  %v6585_v32 = vpop.f32.mrf.mxu3  ;;  %v6136_v54 = vpop.f32.mrf.mxu1  ;;  %v7272_v63 = vld [vmem:[#allocation16 + $0xa0] sm:$0xff]  ;;  %v4945_v14 = vadd.f32 %v14543_v37, %v4669_v0  ;;  %7663 = vmatpush.msrb.mxu3 %v7554_v50 }
 0x624   : > { %v14924_v60 = vadd.f32 %v6585_v32, %v6340_v29  ;;  %v5876_v1 = vadd.f32 %v14822_v7, %v5840_v48  ;;  %7385 = vmatpush.msrb.mxu2 %v7274_v28  ;;  %v14938_v29 = vld [vmem:[#allocation4 + $0x142] sm:$0xff] }
 0x625   : > { %v5733_v17 = vpop.f32.mrf.mxu0  ;;  %v5222_v16 = vadd.f32 %v14566_v41, %v4945_v14  ;;  %7664 = vmatpush.msrb.mxu3 %v7553_v56  ;;  %v7832_v56 = vld [vmem:[#allocation16 + $0xf8] sm:$0xff] }
 0x626   : > { %16701 = vst [vmem:[#allocation38_spill] sm:$0xff] %v14924_v60  ;;  %v14929_v61 = vld [vmem:[#allocation4 + $0x151] sm:$0xff]  ;;  %v5773_v38 = vadd.f32 %v5733_v17, %v5497_v4  ;;  %7386 = vmatpush.msrb.mxu2 %v7273_v35  ;;  %7941 = vmatpush.msra.mxu0 %v7832_v56  ;;  %v15145_v60 = vld [vmem:[#allocation4 + $0x81] sm:$0xff] }
 0x627   : > { %v14931_v27 = vld [vmem:[#allocation4 + $0x150] sm:$0xff]  ;;  %5909 = vst.msk [vmem:[#allocation4 + $0x159] sm:$0xff] %vm743_vm6, %v5876_v1  ;;  %10892 = vmatmul.msk.f32.gmra.mxu1 %vm743_vm6, %v14929_v61  ;;  %v5498_v0 = vadd.f32 %v14591_v20, %v5222_v16  ;;  %v7551_v20 = vld [vmem:[#allocation16 + $0xc0] sm:$0xff] }
 0x628   : > { %10924 = vmatmul.msk.f32.gmra.mxu2 %vm743_vm6, %v14931_v27  ;;  %v5809_v13 = vadd.f32 %v14839_v59, %v5773_v38  ;;  %10972 = vmatmul.msk.f32.gmra.mxu0 %vm743_vm6, %v14596_v44  ;;  %v16704_v4 = vld [vmem:[#allocation145_spill] sm:$0xff]  ;;  %v16705_v1 = vld [vmem:[#allocation108_spill] sm:$0xff] }
 0x629   : > { %10955 = vmatmul.msk.f32.gmra.mxu3 %vm743_vm6, %v14938_v29  ;;  %7387 = vmatpush.msrb.mxu2 %v7272_v63  ;;  %v4670_v37 = vadd.f32 %v16705_v1, %v16704_v4  ;;  %v7552_v44 = vld [vmem:[#allocation16 + $0xc8] sm:$0xff]  ;;  %v8110_v4 = vld [vmem:[#allocation16 + $0x118] sm:$0xff] }
 0x62a   : > { %v6345_v58 = vpop.f32.mrf.mxu2  ;;  %v5841_v12 = vmax.f32 %v5809_v13, 0.0  ;;  %7665 = vmatpush.msrb.mxu3 %v7552_v44  ;;  %v16707_v1 = vld [vmem:[#allocation147_spill] sm:$0xff]  ;;  %8219 = vmatpush.msra.mxu1 %v8110_v4 }
 0x62b   : > { %v6346_v24 = vadd.f32 %v6345_v58, %v6136_v54  ;;  %v6588_v48 = vpop.f32.mrf.mxu3  ;;  %v6139_v21 = vpop.f32.mrf.mxu1  ;;  %v4946_v35 = vadd.f32 %v14571_v19, %v4670_v37  ;;  %v16708_v19 = vld [vmem:[#allocation122_spill] sm:$0xff] }
 0x62c   : > { %v14947_v32 = vadd.f32 %v6588_v48, %v6343_v43  ;;  %v5877_v28 = vadd.f32 %v14822_v7, %v5841_v12  ;;  %7666 = vmatpush.msrb.mxu3 %v7551_v20  ;;  %v4671_v37 = vadd.f32 %v16708_v19, %v16707_v1 }
 0x62d   : > { %v5736_v17 = vpop.f32.mrf.mxu0  ;;  %v5223_v14 = vadd.f32 %v14594_v31, %v4946_v35 }
 0x62e   : > { %16703 = vst [vmem:[#allocation54_spill] sm:$0xff] %v14947_v32  ;;  %v14953_v38 = vld [vmem:[#allocation4 + $0x159] sm:$0xff]  ;;  %v5774_v43 = vadd.f32 %v5736_v17, %v5498_v0 }
 0x62f   : > { %v14955_v41 = vld [vmem:[#allocation4 + $0x158] sm:$0xff]  ;;  %5910 = vst.msk [vmem:[#allocation4 + $0x169] sm:$0xff] %vm743_vm6, %v5877_v28  ;;  %10893 = vmatmul.msk.f32.gmra.mxu1 %vm743_vm6, %v14953_v38  ;;  %v5499_v0 = vadd.f32 %v14620_v49, %v5223_v14  ;;  %v4947_v49 = vadd.f32 %v14604_v40, %v4671_v37 }
 0x630   : > { %v14957_v54 = vld [vmem:[#allocation4 + $0x152] sm:$0xff]  ;;  %10925 = vmatmul.msk.f32.gmra.mxu2 %vm743_vm6, %v14955_v41  ;;  %v5810_v63 = vadd.f32 %v14839_v59, %v5774_v43  ;;  %10973 = vmatmul.msk.f32.gmra.mxu0 %vm743_vm6, %v14616_v33  ;;  %v14986_v44 = vld [vmem:[#allocation4 + $0x15a] sm:$0xff] }
 0x631   : > { %10956 = vmatmul.msk.f32.gmra.mxu3 %vm743_vm6, %v14957_v54  ;;  %v5224_v20 = vadd.f32 %v14626_v18, %v4947_v49  ;;  %v6961_v49 = vld [vmem:[#allocation4 + $0x19] sm:$0xff] }
 0x632   : > { %v6348_v50 = vpop.f32.mrf.mxu2  ;;  %v5842_v13 = vmax.f32 %v5810_v63, 0.0 }
 0x633   : > { %v6349_v58 = vadd.f32 %v6348_v50, %v6139_v21  ;;  %v6591_v16 = vpop.f32.mrf.mxu3  ;;  %v6142_v48 = vpop.f32.mrf.mxu1 }
 0x634   : > { %v14971_v12 = vadd.f32 %v6591_v16, %v6346_v24  ;;  %v5878_v33 = vadd.f32 %v14822_v7, %v5842_v13  ;;  %v5500_v16 = vadd.f32 %v14653_v52, %v5224_v20 }
 0x635   : > { %v5739_v28 = vpop.f32.mrf.mxu0 }
 0x636   : > { %16706 = vst [vmem:[#allocation43_spill] sm:$0xff] %v14971_v12  ;;  %v14977_v31 = vld [vmem:[#allocation4 + $0x169] sm:$0xff]  ;;  %v5775_v24 = vadd.f32 %v5739_v28, %v5499_v0  ;;  %v15132_v12 = vld [vmem:[#allocation4 + $0x7a] sm:$0xff] }
 0x637   : > { %v14979_v21 = vld [vmem:[#allocation4 + $0x168] sm:$0xff]  ;;  %5911 = vst.msk [vmem:[#allocation4 + $0x171] sm:$0xff] %vm743_vm6, %v5878_v33  ;;  %10894 = vmatmul.msk.f32.gmra.mxu1 %vm743_vm6, %v14977_v31 }
 0x638   : > { %10926 = vmatmul.msk.f32.gmra.mxu2 %vm743_vm6, %v14979_v21  ;;  %v5811_v17 = vadd.f32 %v14839_v59, %v5775_v24  ;;  %10974 = vmatmul.msk.f32.gmra.mxu0 %vm743_vm6, %v14640_v10  ;;  %16727 = vst [vmem:[#allocation77_spill] sm:$0xff] %v15132_v12 }
 0x639   : > { %10957 = vmatmul.msk.f32.gmra.mxu3 %vm743_vm6, %v14986_v44 }
 0x63a   : > { %v6351_v43 = vpop.f32.mrf.mxu2  ;;  %v5843_v35 = vmax.f32 %v5811_v17, 0.0 }
 0x63b   : > { %v6352_v63 = vadd.f32 %v6351_v43, %v6142_v48  ;;  %v6594_v50 = vpop.f32.mrf.mxu3  ;;  %v6145_v13 = vpop.f32.mrf.mxu1 }
 0x63c   : > { %v14995_v14 = vadd.f32 %v6594_v50, %v6349_v58  ;;  %v5879_v56 = vadd.f32 %v14822_v7, %v5843_v35  ;;  %v6962_v50 = vld [vmem:[#allocation4 + $0x21] sm:$0xff] }
 0x63d   : > { %v5742_v4 = vpop.f32.mrf.mxu0 }
 0x63e   : > { %16709 = vst [vmem:[#allocation67_spill] sm:$0xff] %v14995_v14  ;;  %v14999_v40 = vld [vmem:[#allocation4 + $0x171] sm:$0xff]  ;;  %v5776_v18 = vadd.f32 %v5742_v4, %v5500_v16  ;;  %v15130_v14 = vld [vmem:[#allocation4 + $0x79] sm:$0xff] }
 0x63f   : > { %16710 = vst [vmem:[#allocation41_spill] sm:$0xff] %v14999_v40  ;;  %v15001_v1 = vld [vmem:[#allocation4 + $0x170] sm:$0xff]  ;;  %10895 = vmatmul.msk.f32.gmra.mxu1 %vm743_vm6, %v14999_v40 }
 0x640   : > { %v15003_v19 = vld [vmem:[#allocation4 + $0x16a] sm:$0xff]  ;;  %5912 = vst.msk [vmem:[#allocation4 + $0x181] sm:$0xff] %vm743_vm6, %v5879_v56  ;;  %10927 = vmatmul.msk.f32.gmra.mxu2 %vm743_vm6, %v15001_v1  ;;  %v5812_v10 = vadd.f32 %v14839_v59, %v5776_v18  ;;  %10975 = vmatmul.msk.f32.gmra.mxu0 %vm743_vm6, %v14665_v6  ;;  %v15021_v17 = vld [vmem:[#allocation4 + $0x172] sm:$0xff]  ;;  %v11402_v59 = vld [vmem:[#allocation4 + $0x1a] sm:$0xff] }
 0x641   : > { %10958 = vmatmul.msk.f32.gmra.mxu3 %vm743_vm6, %v15003_v19  ;;  %16712 = vst [vmem:[#allocation47_spill] sm:$0xff] %v15021_v17  ;;  %v7518_v16 = vld [vmem:[#allocation4 + $0x30] sm:$0xff] }
 0x642   : > { %v6354_v52 = vpop.f32.mrf.mxu2  ;;  %v5844_v58 = vmax.f32 %v5812_v10, 0.0  ;;  %v15276_v40 = vld [vmem:[#allocation4 + $0xf1] sm:$0xff] }
 0x643   : > { %v6355_v48 = vadd.f32 %v6354_v52, %v6145_v13  ;;  %v6597_v37 = vpop.f32.mrf.mxu3  ;;  %v6148_v33 = vpop.f32.mrf.mxu1  ;;  %v11403_v13 = vld [vmem:[#allocation4 + $0x22] sm:$0xff] }
 0x644   : > { %v15015_v0 = vadd.f32 %v6597_v37, %v6352_v63  ;;  %v5880_v28 = vadd.f32 %v14822_v7, %v5844_v58  ;;  %v15042_v58 = vld [vmem:[#allocation4 + $0x31] sm:$0xff] }
 0x645   : > { %v15018_v24 = vpop.f32.mrf.mxu0  ;;  %v7519_v37 = vld [vmem:[#allocation4 + $0x38] sm:$0xff] }
 0x646   : > { %16711 = vst [vmem:[#allocation61_spill] sm:$0xff] %v15015_v0 }
 0x647   : > { %5913 = vst.msk [vmem:[#allocation4 + $0x189] sm:$0xff] %vm743_vm6, %v5880_v28  ;;  %10992 = vmatmul.msk.f32.vlgmr.msrb.gmra.mxu1 %vm743_vm6, %v6961_v49 }
 0x648   : > { %11024 = vmatmul.msk.f32.vlgmr.msrb.gmra.mxu2 %vm743_vm6, %v11402_v59  ;;  %10976 = vmatmul.msk.f32.gmra.mxu0 %vm743_vm6, %v14688_v9 }
 0x649   : > { %10959 = vmatmul.msk.f32.gmra.mxu3 %vm743_vm6, %v15021_v17 }
 0x64a   : > { %v6357_v6 = vpop.f32.mrf.mxu2 }
 0x64b   : > { %v6358_v7 = vadd.f32 %v6357_v6, %v6148_v33  ;;  %v6600_v43 = vpop.f32.mrf.mxu3  ;;  %v6151_v35 = vpop.f32.mrf.mxu1 }
 0x64c   : > { %v15029_v20 = vadd.f32 %v6600_v43, %v6355_v48  ;;  %v15044_v48 = vld [vmem:[#allocation4 + $0x32] sm:$0xff]  ;;  %v15059_v43 = vld [vmem:[#allocation4 + $0x3a] sm:$0xff] }
 0x64d   : > { %v15031_v63 = vpop.f32.mrf.mxu0  ;;  %16715 = vst [vmem:[#allocation65_spill] sm:$0xff] %v15044_v48 }
 0x64e   : > { %16713 = vst [vmem:[#allocation71_spill] sm:$0xff] %v15029_v20 }
 0x64f   : > { %10993 = vmatmul.msk.f32.gmra.mxu1 %vm743_vm6, %v6962_v50  ;;  %16717 = vst [vmem:[#allocation74_spill] sm:$0xff] %v15059_v43 }
 0x650   : > { %11025 = vmatmul.msk.f32.gmra.mxu2 %vm743_vm6, %v11403_v13  ;;  %10977 = vmatmul.msk.f32.gmra.mxu0 %vm743_vm6, %v14709_v55 }
 0x651   : > { %11056 = vmatmul.msk.f32.vlgmr.msrb.gmra.mxu3 %vm743_vm6, %v7518_v16 }
 0x652   : > { %v6360_v9 = vpop.f32.mrf.mxu2 }
 0x653   : > { %v6361_v56 = vadd.f32 %v6360_v9, %v6151_v35  ;;  %v6603_v4 = vpop.f32.mrf.mxu3  ;;  %v6154_v10 = vpop.f32.mrf.mxu1  ;;  %v7520_v35 = vld [vmem:[#allocation4 + $0x48] sm:$0xff] }
 0x654   : > { %v15038_v18 = vadd.f32 %v6603_v4, %v6358_v7  ;;  %v15057_v7 = vld [vmem:[#allocation4 + $0x39] sm:$0xff]  ;;  %v15072_v4 = vld [vmem:[#allocation4 + $0x49] sm:$0xff] }
 0x655   : > { %v15040_v52 = vpop.f32.mrf.mxu0 }
 0x656   : > { %16714 = vst [vmem:[#allocation44_spill] sm:$0xff] %v15038_v18  ;;  %v15102_v18 = vld [vmem:[#allocation4 + $0x62] sm:$0xff] }
 0x657   : > { %10994 = vmatmul.msk.f32.gmra.mxu1 %vm743_vm6, %v15042_v58  ;;  %16723 = vst [vmem:[#allocation73_spill] sm:$0xff] %v15102_v18 }
 0x658   : > { %11026 = vmatmul.msk.f32.gmra.mxu2 %vm743_vm6, %v15044_v48  ;;  %10978 = vmatmul.msk.f32.gmra.mxu0 %vm743_vm6, %v14730_v23  ;;  %v15238_v48 = vld [vmem:[#allocation4 + $0x188] sm:$0xff] }
 0x659   : > { %11057 = vmatmul.msk.f32.gmra.mxu3 %vm743_vm6, %v7519_v37  ;;  %v7521_v37 = vld [vmem:[#allocation4 + $0x50] sm:$0xff]  ;;  %16748 = vst [vmem:[#allocation130_spill] sm:$0xff] %v15238_v48 }
 0x65a   : > { %v6363_v55 = vpop.f32.mrf.mxu2 }
 0x65b   : > { %v6364_v33 = vadd.f32 %v6363_v55, %v6154_v10  ;;  %v6606_v28 = vpop.f32.mrf.mxu3  ;;  %v6157_v59 = vpop.f32.mrf.mxu1  ;;  %v15074_v10 = vld [vmem:[#allocation4 + $0x4a] sm:$0xff] }
 0x65c   : > { %v15053_v49 = vadd.f32 %v6606_v28, %v6361_v56  ;;  %16719 = vst [vmem:[#allocation69_spill] sm:$0xff] %v15074_v10 }
 0x65d   : > { %v15055_v6 = vpop.f32.mrf.mxu0 }
 0x65e   : > { %16716 = vst [vmem:[#allocation52_spill] sm:$0xff] %v15053_v49  ;;  %v15100_v49 = vld [vmem:[#allocation4 + $0x61] sm:$0xff] }
 0x65f   : > { %10995 = vmatmul.msk.f32.gmra.mxu1 %vm743_vm6, %v15057_v7 }
 0x660   : > { %11027 = vmatmul.msk.f32.gmra.mxu2 %vm743_vm6, %v15059_v43  ;;  %10979 = vmatmul.msk.f32.gmra.mxu0 %vm743_vm6, %v14751_v47  ;;  %v15224_v43 = vld [vmem:[#allocation4 + $0x180] sm:$0xff] }
 0x661   : > { %11058 = vmatmul.msk.f32.gmra.mxu3 %vm743_vm6, %v7520_v35  ;;  %16744 = vst [vmem:[#allocation103_spill] sm:$0xff] %v15224_v43 }
 0x662   : > { %v6366_v23 = vpop.f32.mrf.mxu2 }
 0x663   : > { %v6367_v50 = vadd.f32 %v6366_v23, %v6157_v59  ;;  %v6609_v13 = vpop.f32.mrf.mxu3  ;;  %v6160_v9 = vpop.f32.mrf.mxu1  ;;  %v15087_v23 = vld [vmem:[#allocation4 + $0x51] sm:$0xff] }
 0x664   : > { %v15068_v16 = vadd.f32 %v6609_v13, %v6364_v33  ;;  %v15089_v13 = vld [vmem:[#allocation4 + $0x52] sm:$0xff] }
 0x665   : > { %v15070_v56 = vpop.f32.mrf.mxu0  ;;  %16721 = vst [vmem:[#allocation79_spill] sm:$0xff] %v15089_v13 }
 0x666   : > { %16718 = vst [vmem:[#allocation48_spill] sm:$0xff] %v15068_v16  ;;  %v8109_v16 = vld [vmem:[#allocation16 + $0x110] sm:$0xff] }
 0x667   : > { %10996 = vmatmul.msk.f32.gmra.mxu1 %vm743_vm6, %v15072_v4 }
 0x668   : > { %11028 = vmatmul.msk.f32.gmra.mxu2 %vm743_vm6, %v15074_v10  ;;  %10980 = vmatmul.msk.f32.gmra.mxu0 %vm743_vm6, %v14772_v5  ;;  %v15203_v10 = vld [vmem:[#allocation4 + $0xb1] sm:$0xff] }
 0x669   : > { %11059 = vmatmul.msk.f32.gmra.mxu3 %vm743_vm6, %v7521_v37  ;;  %v7522_v37 = vld [vmem:[#allocation4 + $0x60] sm:$0xff]  ;;  %8220 = vmatpush.msra.mxu1 %v8109_v16 }
 0x66a   : > { %v6369_v47 = vpop.f32.mrf.mxu2 }
 0x66b   : > { %v6370_v55 = vadd.f32 %v6369_v47, %v6160_v9  ;;  %v6612_v33 = vpop.f32.mrf.mxu3 }
 0x66c   : > { %v15083_v28 = vadd.f32 %v6612_v33, %v6367_v50  ;;  %v6163_v59 = vpop.f32.mrf.mxu1 }
 0x66d   : > { %v15085_v35 = vpop.f32.mrf.mxu0 }
 0x66e   : > { %16720 = vst [vmem:[#allocation59_spill] sm:$0xff] %v15083_v28  ;;  %v7831_v28 = vld [vmem:[#allocation16 + $0xf0] sm:$0xff] }
 0x66f   : > { %10997 = vmatmul.msk.f32.gmra.mxu1 %vm743_vm6, %v15087_v23  ;;  %7942 = vmatpush.msra.mxu0 %v7831_v28 }
 0x670   : > { %11029 = vmatmul.msk.f32.gmra.mxu2 %vm743_vm6, %v15089_v13  ;;  %10981 = vmatmul.msk.f32.gmra.mxu0 %vm743_vm6, %v14796_v45 }
 0x671   : > { %11060 = vmatmul.msk.f32.gmra.mxu3 %vm743_vm6, %v7522_v37 }
 0x673   : > { %v6372_v5 = vpop.f32.mrf.mxu2 }
 0x674   : > { %v6373_v50 = vadd.f32 %v6372_v5, %v6163_v59  ;;  %v6615_v9 = vpop.f32.mrf.mxu3  ;;  %v6166_v33 = vpop.f32.mrf.mxu1  ;;  %v7523_v59 = vld [vmem:[#allocation4 + $0x68] sm:$0xff] }
 0x675   : > { %v15098_v47 = vadd.f32 %v6615_v9, %v6370_v55  ;;  %v15104_v20 = vpop.f32.mrf.mxu0  ;;  %v15115_v9 = vld [vmem:[#allocation4 + $0x69] sm:$0xff] }
 0x677   : > { %16722 = vst [vmem:[#allocation53_spill] sm:$0xff] %v15098_v47  ;;  %10998 = vmatmul.msk.f32.gmra.mxu1 %vm743_vm6, %v15100_v49  ;;  %v15117_v47 = vld [vmem:[#allocation4 + $0x6a] sm:$0xff] }
 0x678   : > { %11030 = vmatmul.msk.f32.gmra.mxu2 %vm743_vm6, %v15102_v18  ;;  %10982 = vmatmul.msk.f32.gmra.mxu0 %vm743_vm6, %v14825_v46  ;;  %16725 = vst [vmem:[#allocation84_spill] sm:$0xff] %v15117_v47 }
 0x679   : > { %11061 = vmatmul.msk.f32.gmra.mxu3 %vm743_vm6, %v7523_v59  ;;  %v7524_v59 = vld [vmem:[#allocation4 + $0x78] sm:$0xff] }
 0x67b   : > { %v6375_v55 = vpop.f32.mrf.mxu2 }
 0x67c   : > { %v6376_v16 = vadd.f32 %v6375_v55, %v6166_v33  ;;  %v6618_v28 = vpop.f32.mrf.mxu3  ;;  %v6169_v5 = vpop.f32.mrf.mxu1 }
 0x67d   : > { %v15113_v37 = vadd.f32 %v6618_v28, %v6373_v50  ;;  %v15124_v0 = vpop.f32.mrf.mxu0 }
 0x67f   : > { %16724 = vst [vmem:[#allocation66_spill] sm:$0xff] %v15113_v37  ;;  %10999 = vmatmul.msk.f32.gmra.mxu1 %vm743_vm6, %v15115_v9 }
 0x680   : > { %11031 = vmatmul.msk.f32.gmra.mxu2 %vm743_vm6, %v15117_v47  ;;  %10983 = vmatmul.msk.f32.gmra.mxu0 %vm743_vm6, %v14851_v30 }
 0x681   : > { %11062 = vmatmul.msk.f32.gmra.mxu3 %vm743_vm6, %v7524_v59  ;;  %v7525_v59 = vld [vmem:[#allocation4 + $0x80] sm:$0xff] }
 0x683   : > { %v6378_v50 = vpop.f32.mrf.mxu2 }
 0x684   : > { %v6379_v33 = vadd.f32 %v6378_v50, %v6169_v5  ;;  %v6621_v55 = vpop.f32.mrf.mxu3  ;;  %v6172_v37 = vpop.f32.mrf.mxu1 }
 0x685   : > { %v15128_v28 = vadd.f32 %v6621_v55, %v6376_v16  ;;  %v15141_v16 = vpop.f32.mrf.mxu0 }
 0x686   : > { %16728 = vst [vmem:[#allocation70_spill] sm:$0xff] %v15141_v16 }
 0x687   : > { %16726 = vst [vmem:[#allocation60_spill] sm:$0xff] %v15128_v28  ;;  %11000 = vmatmul.msk.f32.gmra.mxu1 %vm743_vm6, %v15130_v14 }
 0x688   : > { %11032 = vmatmul.msk.f32.gmra.mxu2 %vm743_vm6, %v15132_v12  ;;  %10984 = vmatmul.msk.f32.gmra.mxu0 %vm743_vm6, %v14877_v22  ;;  %v15162_v12 = vld [vmem:[#allocation4 + $0x92] sm:$0xff] }
 0x689   : > { %11063 = vmatmul.msk.f32.gmra.mxu3 %vm743_vm6, %v7525_v59  ;;  %v7526_v59 = vld [vmem:[#allocation4 + $0x90] sm:$0xff]  ;;  %16733 = vst [vmem:[#allocation94_spill] sm:$0xff] %v15162_v12 }
 0x68b   : > { %v6381_v5 = vpop.f32.mrf.mxu2 }
 0x68c   : > { %v6382_v50 = vadd.f32 %v6381_v5, %v6172_v37  ;;  %v6624_v55 = vpop.f32.mrf.mxu3  ;;  %v6175_v32 = vpop.f32.mrf.mxu1 }
 0x68d   : > { %v15143_v28 = vadd.f32 %v6624_v55, %v6379_v33  ;;  %v15158_v16 = vpop.f32.mrf.mxu0 }
 0x68e   : > { %16732 = vst [vmem:[#allocation75_spill] sm:$0xff] %v15158_v16  ;;  %v15173_v16 = vld [vmem:[#allocation4 + $0x99] sm:$0xff] }
 0x68f   : > { %16729 = vst [vmem:[#allocation89_spill] sm:$0xff] %v15143_v28  ;;  %11001 = vmatmul.msk.f32.gmra.mxu1 %vm743_vm6, %v15145_v60 }
 0x690   : > { %11033 = vmatmul.msk.f32.gmra.mxu2 %vm743_vm6, %v15147_v39  ;;  %10985 = vmatmul.msk.f32.gmra.mxu0 %vm743_vm6, %v14904_v53  ;;  %v15175_v39 = vld [vmem:[#allocation4 + $0x9a] sm:$0xff] }
 0x691   : > { %11064 = vmatmul.msk.f32.gmra.mxu3 %vm743_vm6, %v7526_v59  ;;  %v7527_v59 = vld [vmem:[#allocation4 + $0x98] sm:$0xff]  ;;  %16735 = vst [vmem:[#allocation87_spill] sm:$0xff] %v15175_v39 }
 0x693   : > { %v6384_v37 = vpop.f32.mrf.mxu2 }
 0x694   : > { %v6385_v33 = vadd.f32 %v6384_v37, %v6175_v32  ;;  %v6627_v5 = vpop.f32.mrf.mxu3  ;;  %v6178_v28 = vpop.f32.mrf.mxu1 }
 0x695   : > { %v15156_v55 = vadd.f32 %v6627_v5, %v6382_v50  ;;  %v15177_v47 = vpop.f32.mrf.mxu0 }
 0x696   : > { %16736 = vst [vmem:[#allocation80_spill] sm:$0xff] %v15177_v47  ;;  %v15190_v47 = vld [vmem:[#allocation4 + $0xaa] sm:$0xff] }
 0x697   : > { %16731 = vst [vmem:[#allocation82_spill] sm:$0xff] %v15156_v55  ;;  %11002 = vmatmul.msk.f32.gmra.mxu1 %vm743_vm6, %v15160_v11 }
 0x698   : > { %11034 = vmatmul.msk.f32.gmra.mxu2 %vm743_vm6, %v15162_v12  ;;  %10986 = vmatmul.msk.f32.gmra.mxu0 %vm743_vm6, %v14931_v27  ;;  %v15188_v12 = vld [vmem:[#allocation4 + $0xa9] sm:$0xff]  ;;  %16738 = vst [vmem:[#allocation98_spill] sm:$0xff] %v15190_v47 }
 0x699   : > { %11065 = vmatmul.msk.f32.gmra.mxu3 %vm743_vm6, %v7527_v59  ;;  %v7528_v59 = vld [vmem:[#allocation4 + $0xa8] sm:$0xff] }
 0x69b   : > { %v6387_v32 = vpop.f32.mrf.mxu2 }
 0x69c   : > { %v6388_v50 = vadd.f32 %v6387_v32, %v6178_v28  ;;  %v6630_v37 = vpop.f32.mrf.mxu3  ;;  %v6181_v55 = vpop.f32.mrf.mxu1 }
 0x69d   : > { %v15171_v5 = vadd.f32 %v6630_v37, %v6385_v33 }
 0x69f   : > { %16734 = vst [vmem:[#allocation68_spill] sm:$0xff] %v15171_v5  ;;  %11003 = vmatmul.msk.f32.gmra.mxu1 %vm743_vm6, %v15173_v16 }
 0x6a0   : > { %11035 = vmatmul.msk.f32.gmra.mxu2 %vm743_vm6, %v15175_v39  ;;  %10987 = vmatmul.msk.f32.gmra.mxu0 %vm743_vm6, %v14955_v41  ;;  %v7830_v39 = vld [vmem:[#allocation16 + $0xe8] sm:$0xff] }
 0x6a1   : > { %11066 = vmatmul.msk.f32.gmra.mxu3 %vm743_vm6, %v7528_v59  ;;  %v7529_v59 = vld [vmem:[#allocation4 + $0xb0] sm:$0xff]  ;;  %7943 = vmatpush.msra.mxu0 %v7830_v39  ;;  %v7530_v39 = vld [vmem:[#allocation4 + $0xc0] sm:$0xff] }
 0x6a3   : > { %v6390_v28 = vpop.f32.mrf.mxu2 }
 0x6a4   : > { %v6391_v33 = vadd.f32 %v6390_v28, %v6181_v55  ;;  %v6633_v32 = vpop.f32.mrf.mxu3  ;;  %v6184_v5 = vpop.f32.mrf.mxu1  ;;  %v7829_v55 = vld [vmem:[#allocation16 + $0xe0] sm:$0xff] }
 0x6a5   : > { %v15186_v37 = vadd.f32 %v6633_v32, %v6388_v50  ;;  %v15197_v28 = vpop.f32.mrf.mxu0  ;;  %7944 = vmatpush.msra.mxu0 %v7829_v55 }
 0x6a6   : > { %16739 = vst [vmem:[#allocation39_spill] sm:$0xff] %v15197_v28  ;;  %v15218_v28 = vld [vmem:[#allocation4 + $0xc1] sm:$0xff] }
 0x6a7   : > { %16737 = vst [vmem:[#allocation99_spill] sm:$0xff] %v15186_v37  ;;  %11004 = vmatmul.msk.f32.gmra.mxu1 %vm743_vm6, %v15188_v12 }
 0x6a8   : > { %11036 = vmatmul.msk.f32.gmra.mxu2 %vm743_vm6, %v15190_v47  ;;  %10988 = vmatmul.msk.f32.gmra.mxu0 %vm743_vm6, %v14979_v21  ;;  %v15205_v47 = vld [vmem:[#allocation4 + $0xb2] sm:$0xff] }
 0x6a9   : > { %11067 = vmatmul.msk.f32.gmra.mxu3 %vm743_vm6, %v7529_v59  ;;  %16741 = vst [vmem:[#allocation72_spill] sm:$0xff] %v15205_v47 }
 0x6ab   : > { %v6393_v50 = vpop.f32.mrf.mxu2 }
 0x6ac   : > { %v6394_v32 = vadd.f32 %v6393_v50, %v6184_v5  ;;  %v6636_v37 = vpop.f32.mrf.mxu3  ;;  %v6187_v13 = vpop.f32.mrf.mxu1 }
 0x6ad   : > { %v15201_v18 = vadd.f32 %v6636_v37, %v6391_v33  ;;  %v15214_v33 = vpop.f32.mrf.mxu0 }
 0x6ae   : > { %16742 = vst [vmem:[#allocation92_spill] sm:$0xff] %v15214_v33  ;;  %v15232_v33 = vld [vmem:[#allocation4 + $0xc9] sm:$0xff] }
 0x6af   : > { %16740 = vst [vmem:[#allocation113_spill] sm:$0xff] %v15201_v18  ;;  %11005 = vmatmul.msk.f32.gmra.mxu1 %vm743_vm6, %v15203_v10  ;;  %v8108_v18 = vld [vmem:[#allocation16 + $0x108] sm:$0xff] }
 0x6b0   : > { %11037 = vmatmul.msk.f32.gmra.mxu2 %vm743_vm6, %v15205_v47  ;;  %10989 = vmatmul.msk.f32.gmra.mxu0 %vm743_vm6, %v15001_v1  ;;  %v11404_v47 = vld [vmem:[#allocation4 + $0xc2] sm:$0xff]  ;;  %16747 = vst [vmem:[#allocation33_spill] sm:$0xff] %v15232_v33 }
 0x6b1   : > { %11068 = vmatmul.msk.f32.gmra.mxu3 %vm743_vm6, %v7530_v39  ;;  %8221 = vmatpush.msra.mxu1 %v8108_v18  ;;  %v7531_v39 = vld [vmem:[#allocation4 + $0xc8] sm:$0xff] }
 0x6b3   : > { %v6396_v5 = vpop.f32.mrf.mxu2 }
 0x6b4   : > { %v6397_v37 = vadd.f32 %v6396_v5, %v6187_v13  ;;  %v6639_v59 = vpop.f32.mrf.mxu3  ;;  %v6190_v50 = vpop.f32.mrf.mxu1 }
 0x6b5   : > { %v15216_v55 = vadd.f32 %v6639_v59, %v6394_v32 }
 0x6b7   : > { %16743 = vst [vmem:[#allocation85_spill] sm:$0xff] %v15216_v55  ;;  %11006 = vmatmul.msk.f32.gmra.mxu1 %vm743_vm6, %v15218_v28  ;;  %v15230_v55 = vpop.f32.mrf.mxu0 }
 0x6b8   : > { %11038 = vmatmul.msk.f32.gmra.mxu2 %vm743_vm6, %v11404_v47  ;;  %10990 = vmatmul.msk.f32.gmra.mxu0 %vm743_vm6, %v15224_v43  ;;  %16746 = vst [vmem:[#allocation117_spill] sm:$0xff] %v15230_v55  ;;  %v11405_v47 = vld [vmem:[#allocation4 + $0xca] sm:$0xff]  ;;  %v15244_v55 = vld [vmem:[#allocation4 + $0xd9] sm:$0xff]  ;;  %v15260_v43 = vld [vmem:[#allocation4 + $0xe1] sm:$0xff] }
 0x6b9   : > { %11069 = vmatmul.msk.f32.gmra.mxu3 %vm743_vm6, %v7531_v39  ;;  %v7532_v39 = vld [vmem:[#allocation4 + $0xd8] sm:$0xff]  ;;  %16750 = vst [vmem:[#allocation97_spill] sm:$0xff] %v15244_v55 }
 0x6ba   : > { %16754 = vst [vmem:[#allocation109_spill] sm:$0xff] %v15260_v43 }
 0x6bb   : > { %v6399_v13 = vpop.f32.mrf.mxu2 }
 0x6bc   : > { %v6400_v32 = vadd.f32 %v6399_v13, %v6190_v50  ;;  %v6642_v5 = vpop.f32.mrf.mxu3  ;;  %v6193_v18 = vpop.f32.mrf.mxu1 }
 0x6bd   : > { %v15228_v59 = vadd.f32 %v6642_v5, %v6397_v37 }
 0x6bf   : > { %16745 = vst [vmem:[#allocation104_spill] sm:$0xff] %v15228_v59  ;;  %11007 = vmatmul.msk.f32.gmra.mxu1 %vm743_vm6, %v15232_v33  ;;  %v15246_v33 = vpop.f32.mrf.mxu0 }
 0x6c0   : > { %11039 = vmatmul.msk.f32.gmra.mxu2 %vm743_vm6, %v11405_v47  ;;  %10991 = vmatmul.msk.f32.gmra.mxu0 %vm743_vm6, %v15238_v48  ;;  %16751 = vst [vmem:[#allocation90_spill] sm:$0xff] %v15246_v33  ;;  %v11406_v47 = vld [vmem:[#allocation4 + $0xda] sm:$0xff]  ;;  %v6310_v48 = vadd.f32 %v14648_v2, %v14629_v62  ;;  %v11407_v62 = vld [vmem:[#allocation4 + $0xe2] sm:$0xff]  ;;  %v7534_v2 = vld [vmem:[#allocation4 + $0xf0] sm:$0xff] }
 0x6c1   : > { %11070 = vmatmul.msk.f32.gmra.mxu3 %vm743_vm6, %v7532_v39  ;;  %v7533_v39 = vld [vmem:[#allocation4 + $0xe0] sm:$0xff] }
 0x6c3   : > { %v6402_v37 = vpop.f32.mrf.mxu2 }
 0x6c4   : > { %v6403_v50 = vadd.f32 %v6402_v37, %v6193_v18  ;;  %v6645_v13 = vpop.f32.mrf.mxu3  ;;  %v7111_v59 = vpop.f32.mrf.mxu1  ;;  %v16752_v37 = vld [vmem:[#allocation51_spill] sm:$0xff] }
 0x6c5   : > { %v15242_v5 = vadd.f32 %v6645_v13, %v6400_v32  ;;  %v6651_v13 = vadd.f32 %v16752_v37, %v6310_v48  ;;  %v16757_v37 = vld [vmem:[#allocation45_spill] sm:$0xff] }
 0x6c7   : > { %16749 = vst [vmem:[#allocation76_spill] sm:$0xff] %v15242_v5  ;;  %11008 = vmatmul.msk.f32.gmra.mxu1 %vm743_vm6, %v15244_v55  ;;  %v6929_v55 = vadd.f32 %v15018_v24, %v6651_v13  ;;  %v15268_v48 = vpop.f32.mrf.mxu0 }
 0x6c8   : > { %11040 = vmatmul.msk.f32.gmra.mxu2 %vm743_vm6, %v11406_v47  ;;  %11088 = vmatmul.msk.f32.vlgmr.msra.gmra.mxu0 %vm743_vm6, %v15042_v58  ;;  %v16755_v47 = vld [vmem:[#allocation35_spill] sm:$0xff]  ;;  %v16756_v58 = vld [vmem:[#allocation34_spill] sm:$0xff] }
 0x6c9   : > { %11071 = vmatmul.msk.f32.gmra.mxu3 %vm743_vm6, %v7533_v39  ;;  %v6313_v39 = vadd.f32 %v16756_v58, %v16755_v47  ;;  %v7207_v17 = vadd.f32 %v7111_v59, %v6929_v55  ;;  %v16758_v55 = vld [vmem:[#allocation37_spill] sm:$0xff] }
 0x6ca   : > { %v6931_v59 = vadd.f32 %v15040_v52, %v16758_v55 }
 0x6cb   : > { %v7389_v32 = vpop.f32.mrf.mxu2  ;;  %v6652_v13 = vadd.f32 %v16757_v37, %v6313_v39  ;;  %v15290_v37 = vld [vmem:[#allocation4 + $0xf9] sm:$0xff] }
 0x6cc   : > { %v6648_v18 = vpop.f32.mrf.mxu3  ;;  %v7114_v33 = vpop.f32.mrf.mxu1  ;;  %v7485_v24 = vadd.f32 %v7389_v32, %v7207_v17 }
 0x6cd   : > { %v15257_v5 = vadd.f32 %v6648_v18, %v6403_v50 }
 0x6cf   : > { %16753 = vst [vmem:[#allocation126_spill] sm:$0xff] %v15257_v5  ;;  %11009 = vmatmul.msk.f32.gmra.mxu1 %vm743_vm6, %v15260_v43  ;;  %v6930_v43 = vadd.f32 %v15031_v63, %v6652_v13  ;;  %v15286_v58 = vpop.f32.mrf.mxu0  ;;  %v16759_v13 = vld [vmem:[#allocation58_spill] sm:$0xff] }
 0x6d0   : > { %11041 = vmatmul.msk.f32.gmra.mxu2 %vm743_vm6, %v11407_v62  ;;  %11089 = vmatmul.msk.f32.gmra.mxu0 %vm743_vm6, %v15057_v7  ;;  %v11409_v7 = vld [vmem:[#allocation4 + $0xf8] sm:$0xff] }
 0x6d1   : > { %11072 = vmatmul.msk.f32.gmra.mxu3 %vm743_vm6, %v7534_v2  ;;  %v11408_v2 = vld [vmem:[#allocation4 + $0xf2] sm:$0xff]  ;;  %v7208_v17 = vadd.f32 %v7114_v33, %v6930_v43  ;;  %v6932_v43 = vadd.f32 %v15055_v6, %v16759_v13  ;;  %v16760_v33 = vld [vmem:[#allocation50_spill] sm:$0xff] }
 0x6d3   : > { %v7392_v50 = vpop.f32.mrf.mxu2 }
 0x6d4   : > { %v7668_v18 = vpop.f32.mrf.mxu3  ;;  %v7117_v62 = vpop.f32.mrf.mxu1  ;;  %v7486_v63 = vadd.f32 %v7392_v50, %v7208_v17 }
 0x6d5   : > { %v15273_v5 = vadd.f32 %v7668_v18, %v7485_v24  ;;  %v7209_v32 = vadd.f32 %v7117_v62, %v6931_v59 }
 0x6d7   : > { %11010 = vmatmul.msk.f32.gmra.mxu1 %vm743_vm6, %v15276_v40  ;;  %v15303_v6 = vpop.f32.mrf.mxu0 }
 0x6d8   : > { %11042 = vmatmul.msk.f32.gmra.mxu2 %vm743_vm6, %v11408_v2  ;;  %11090 = vmatmul.msk.f32.gmra.mxu0 %vm743_vm6, %v15072_v4  ;;  %v11410_v4 = vld [vmem:[#allocation4 + $0x108] sm:$0xff] }
 0x6d9   : > { %11073 = vmatmul.msk.f32.gmra.mxu3 %vm743_vm6, %v11409_v7  ;;  %v15305_v7 = vld [vmem:[#allocation4 + $0x109] sm:$0xff] }
 0x6db   : > { %v7395_v47 = vpop.f32.mrf.mxu2 }
 0x6dc   : > { %v7487_v39 = vadd.f32 %v7395_v47, %v7209_v32  ;;  %v7671_v52 = vpop.f32.mrf.mxu3  ;;  %v7120_v18 = vpop.f32.mrf.mxu1  ;;  %v16761_v32 = vld [vmem:[#allocation36_spill] sm:$0xff] }
 0x6dd   : > { %v15288_v24 = vadd.f32 %v7671_v52, %v7486_v63  ;;  %v7210_v50 = vadd.f32 %v7120_v18, %v6932_v43  ;;  %v6933_v63 = vadd.f32 %v15070_v56, %v16761_v32  ;;  %v15319_v56 = vld [vmem:[#allocation4 + $0x111] sm:$0xff]  ;;  %v6934_v43 = vadd.f32 %v15085_v35, %v14791_v15  ;;  %v8107_v35 = vld [vmem:[#allocation16 + $0x100] sm:$0xff] }
 0x6de   : > { %8222 = vmatpush.msra.mxu1 %v8107_v35  ;;  %v16772_v35 = vld [vmem:[#allocation74_spill] sm:$0xff] }
 0x6df   : > { %11011 = vmatmul.msk.f32.gmra.mxu1 %vm743_vm6, %v15290_v37 }
 0x6e0   : > { %11043 = vmatmul.msk.f32.gmra.mxu2 %vm743_vm6, %v16760_v33  ;;  %11091 = vmatmul.msk.f32.gmra.mxu0 %vm743_vm6, %v15087_v23  ;;  %v15323_v33 = vpop.f32.mrf.mxu0 }
 0x6e1   : > { %11074 = vmatmul.msk.f32.gmra.mxu3 %vm743_vm6, %v11410_v4 }
 0x6e3   : > { %v7398_v62 = vpop.f32.mrf.mxu2 }
 0x6e4   : > { %v7488_v55 = vadd.f32 %v7398_v62, %v7210_v50  ;;  %v7674_v59 = vpop.f32.mrf.mxu3  ;;  %v7123_v17 = vpop.f32.mrf.mxu1  ;;  %v15335_v62 = vld [vmem:[#allocation4 + $0x121] sm:$0xff] }
 0x6e5   : > { %v15301_v2 = vadd.f32 %v7674_v59, %v7487_v39  ;;  %v7211_v23 = vadd.f32 %v7123_v17, %v6933_v63 }
 0x6e7   : > { %11012 = vmatmul.msk.f32.gmra.mxu1 %vm743_vm6, %v15305_v7 }
 0x6e8   : > { %11044 = vmatmul.msk.f32.gmra.mxu2 %vm743_vm6, %v14798_v8  ;;  %11092 = vmatmul.msk.f32.gmra.mxu0 %vm743_vm6, %v15100_v49 }
 0x6e9   : > { %11075 = vmatmul.msk.f32.gmra.mxu3 %vm743_vm6, %v14796_v45 }
 0x6eb   : > { %v7401_v47 = vpop.f32.mrf.mxu2 }
 0x6ec   : > { %v7489_v39 = vadd.f32 %v7401_v47, %v7211_v23  ;;  %v7677_v52 = vpop.f32.mrf.mxu3  ;;  %v7126_v13 = vpop.f32.mrf.mxu1 }
 0x6ed   : > { %v15317_v18 = vadd.f32 %v7677_v52, %v7488_v55  ;;  %v7212_v8 = vadd.f32 %v7126_v13, %v6934_v43  ;;  %v15457_v52 = vld [vmem:[#allocation4 + $0x18a] sm:$0xff]  ;;  %v16769_v43 = vld [vmem:[#allocation109_spill] sm:$0xff] }
 0x6ef   : > { %11013 = vmatmul.msk.f32.gmra.mxu1 %vm743_vm6, %v15319_v56 }
 0x6f0   : > { %11045 = vmatmul.msk.f32.gmra.mxu2 %vm743_vm6, %v14833_v25  ;;  %11093 = vmatmul.msk.f32.gmra.mxu0 %vm743_vm6, %v15115_v9  ;;  %v6935_v25 = vadd.f32 %v15104_v20, %v14815_v36  ;;  %v15351_v20 = vld [vmem:[#allocation4 + $0x129] sm:$0xff] }
 0x6f1   : > { %11076 = vmatmul.msk.f32.gmra.mxu3 %vm743_vm6, %v14825_v46  ;;  %v15345_v46 = vpop.f32.mrf.mxu0 }
 0x6f3   : > { %v7404_v45 = vpop.f32.mrf.mxu2 }
 0x6f4   : > { %v7490_v49 = vadd.f32 %v7404_v45, %v7212_v8  ;;  %v7680_v4 = vpop.f32.mrf.mxu3  ;;  %v7129_v15 = vpop.f32.mrf.mxu1  ;;  %v7549_v45 = vld [vmem:[#allocation4 + $0x1a0] sm:$0xff] }
 0x6f5   : > { %v15333_v50 = vadd.f32 %v7680_v4, %v7489_v39  ;;  %v7213_v9 = vadd.f32 %v7129_v15, %v6935_v25 }
 0x6f7   : > { %11014 = vmatmul.msk.f32.gmra.mxu1 %vm743_vm6, %v15335_v62 }
 0x6f8   : > { %11046 = vmatmul.msk.f32.gmra.mxu2 %vm743_vm6, %v14853_v3  ;;  %11094 = vmatmul.msk.f32.gmra.mxu0 %vm743_vm6, %v15130_v14  ;;  %v6936_v3 = vadd.f32 %v15124_v0, %v14846_v57 }
 0x6f9   : > { %11077 = vmatmul.msk.f32.gmra.mxu3 %vm743_vm6, %v14851_v30  ;;  %v15363_v63 = vpop.f32.mrf.mxu0 }
 0x6fb   : > { %v7407_v55 = vpop.f32.mrf.mxu2 }
 0x6fc   : > { %v7491_v59 = vadd.f32 %v7407_v55, %v7213_v9  ;;  %v7683_v17 = vpop.f32.mrf.mxu3  ;;  %v7132_v36 = vpop.f32.mrf.mxu1  ;;  %v16774_v55 = vld [vmem:[#allocation69_spill] sm:$0xff] }
 0x6fd   : > { %v15349_v32 = vadd.f32 %v7683_v17, %v7490_v49  ;;  %v7214_v30 = vadd.f32 %v7132_v36, %v6936_v3  ;;  %v16770_v49 = vld [vmem:[#allocation65_spill] sm:$0xff]  ;;  %v16776_v17 = vld [vmem:[#allocation79_spill] sm:$0xff] }
 0x6fe   : > { %v16778_v3 = vld [vmem:[#allocation73_spill] sm:$0xff] }
 0x6ff   : > { %11015 = vmatmul.msk.f32.gmra.mxu1 %vm743_vm6, %v15351_v20 }
 0x700   : > { %11047 = vmatmul.msk.f32.gmra.mxu2 %vm743_vm6, %v14886_v26  ;;  %11095 = vmatmul.msk.f32.gmra.mxu0 %vm743_vm6, %v15145_v60 }
 0x701   : > { %11078 = vmatmul.msk.f32.gmra.mxu3 %vm743_vm6, %v14877_v22  ;;  %v15381_v0 = vpop.f32.mrf.mxu0 }
 0x703   : > { %v7410_v14 = vpop.f32.mrf.mxu2 }
 0x704   : > { %v7492_v23 = vadd.f32 %v7410_v14, %v7214_v30  ;;  %v7686_v47 = vpop.f32.mrf.mxu3  ;;  %v15367_v57 = vpop.f32.mrf.mxu1  ;;  %v16779_v30 = vld [vmem:[#allocation84_spill] sm:$0xff]  ;;  %v8616_v14 = vld [vmem:[#allocation19 + $0x78] sm:$0xff] }
 0x705   : > { %v15365_v39 = vadd.f32 %v7686_v47, %v7491_v59  ;;  %8649 = vmatpush.msra.mxu2 %v8616_v14  ;;  %v7822_v14 = vld [vmem:[#allocation4 + $0x169] sm:$0xff] }
 0x707   : > { %11016 = vmatmul.msk.f32.gmra.mxu1 %vm743_vm6, %v14875_v34 }
 0x708   : > { %11048 = vmatmul.msk.f32.gmra.mxu2 %vm743_vm6, %v14906_v51  ;;  %11096 = vmatmul.msk.f32.gmra.mxu0 %vm743_vm6, %v15160_v11 }
 0x709   : > { %11079 = vmatmul.msk.f32.gmra.mxu3 %vm743_vm6, %v14904_v53  ;;  %v15393_v34 = vpop.f32.mrf.mxu0 }
 0x70c   : > { %v7689_v22 = vpop.f32.mrf.mxu3  ;;  %v15379_v60 = vpop.f32.mrf.mxu1 }
 0x70d   : > { %v15377_v26 = vadd.f32 %v7689_v22, %v7492_v23  ;;  %v16781_v22 = vld [vmem:[#allocation77_spill] sm:$0xff] }
 0x70f   : > { %11017 = vmatmul.msk.f32.gmra.mxu1 %vm743_vm6, %v14902_v42 }
 0x710   : > { %11049 = vmatmul.msk.f32.gmra.mxu2 %vm743_vm6, %v14938_v29  ;;  %11097 = vmatmul.msk.f32.gmra.mxu0 %vm743_vm6, %v15173_v16  ;;  %v16762_v29 = vld [vmem:[#allocation41_spill] sm:$0xff] }
 0x711   : > { %11080 = vmatmul.msk.f32.gmra.mxu3 %vm743_vm6, %v14931_v27  ;;  %v15411_v53 = vpop.f32.mrf.mxu0  ;;  %v7548_v16 = vld [vmem:[#allocation4 + $0x198] sm:$0xff] }
 0x714   : > { %v15391_v11 = vpop.f32.mrf.mxu1 }
 0x717   : > { %11018 = vmatmul.msk.f32.gmra.mxu1 %vm743_vm6, %v14929_v61 }
 0x718   : > { %11050 = vmatmul.msk.f32.gmra.mxu2 %vm743_vm6, %v14957_v54  ;;  %11098 = vmatmul.msk.f32.gmra.mxu0 %vm743_vm6, %v15188_v12  ;;  %v16765_v54 = vld [vmem:[#allocation33_spill] sm:$0xff] }
 0x719   : > { %11081 = vmatmul.msk.f32.gmra.mxu3 %vm743_vm6, %v14955_v41  ;;  %v15425_v61 = vpop.f32.mrf.mxu0  ;;  %v16764_v41 = vld [vmem:[#allocation103_spill] sm:$0xff] }
 0x71c   : > { %v15403_v42 = vpop.f32.mrf.mxu1 }
 0x71f   : > { %11019 = vmatmul.msk.f32.gmra.mxu1 %vm743_vm6, %v14953_v38  ;;  %v16763_v38 = vld [vmem:[#allocation47_spill] sm:$0xff] }
 0x720   : > { %11051 = vmatmul.msk.f32.gmra.mxu2 %vm743_vm6, %v14986_v44  ;;  %11099 = vmatmul.msk.f32.gmra.mxu0 %vm743_vm6, %v15203_v10  ;;  %v15443_v44 = vld [vmem:[#allocation4 + $0x182] sm:$0xff] }
 0x721   : > { %11082 = vmatmul.msk.f32.gmra.mxu3 %vm743_vm6, %v14979_v21  ;;  %v15441_v21 = vld [vmem:[#allocation4 + $0x181] sm:$0xff] }
 0x724   : > { %v15415_v51 = vpop.f32.mrf.mxu1 }
 0x727   : > { %11020 = vmatmul.msk.f32.gmra.mxu1 %vm743_vm6, %v14977_v31  ;;  %v15439_v31 = vpop.f32.mrf.mxu0 }
 0x728   : > { %11052 = vmatmul.msk.f32.gmra.mxu2 %vm743_vm6, %v15003_v19  ;;  %11100 = vmatmul.msk.f32.gmra.mxu0 %vm743_vm6, %v15218_v28  ;;  %v16767_v19 = vld [vmem:[#allocation97_spill] sm:$0xff]  ;;  %v15455_v28 = vld [vmem:[#allocation4 + $0x189] sm:$0xff] }
 0x729   : > { %11083 = vmatmul.msk.f32.gmra.mxu3 %vm743_vm6, %v15001_v1  ;;  %v16766_v1 = vld [vmem:[#allocation130_spill] sm:$0xff] }
 0x72c   : > { %v15427_v27 = vpop.f32.mrf.mxu1 }
 0x72f   : > { %11021 = vmatmul.msk.f32.gmra.mxu1 %vm743_vm6, %v16762_v29  ;;  %v15459_v13 = vpop.f32.mrf.mxu0 }
 0x730   : > { %11053 = vmatmul.msk.f32.gmra.mxu2 %vm743_vm6, %v16763_v38  ;;  %11101 = vmatmul.msk.f32.gmra.mxu0 %vm743_vm6, %v16765_v54  ;;  %16768 = vst [vmem:[#allocation134_spill] sm:$0xff] %v15459_v13  ;;  %v7819_v54 = vld [vmem:[#allocation4 + $0x141] sm:$0xff] }
 0x731   : > { %11084 = vmatmul.msk.f32.gmra.mxu3 %vm743_vm6, %v16764_v41  ;;  %v16782_v41 = vld [vmem:[#allocation64_spill] sm:$0xff] }
 0x734   : > { %v15437_v12 = vpop.f32.mrf.mxu1 }
 0x737   : > { %11022 = vmatmul.msk.f32.gmra.mxu1 %vm743_vm6, %v15441_v21  ;;  %v15473_v4 = vpop.f32.mrf.mxu0 }
 0x738   : > { %11054 = vmatmul.msk.f32.gmra.mxu2 %vm743_vm6, %v15443_v44  ;;  %11102 = vmatmul.msk.f32.gmra.mxu0 %vm743_vm6, %v16767_v19  ;;  %16771 = vst [vmem:[#allocation49_spill] sm:$0xff] %v15473_v4  ;;  %v16783_v19 = vld [vmem:[#allocation94_spill] sm:$0xff] }
 0x739   : > { %11085 = vmatmul.msk.f32.gmra.mxu3 %vm743_vm6, %v16766_v1 }
 0x73c   : > { %v15453_v10 = vpop.f32.mrf.mxu1 }
 0x73f   : > { %11023 = vmatmul.msk.f32.gmra.mxu1 %vm743_vm6, %v15455_v28  ;;  %v15483_v25 = vpop.f32.mrf.mxu0 }
 0x740   : > { %11055 = vmatmul.msk.f32.gmra.mxu2 %vm743_vm6, %v15457_v52  ;;  %11103 = vmatmul.msk.f32.gmra.mxu0 %vm743_vm6, %v16769_v43  ;;  %16773 = vst [vmem:[#allocation81_spill] sm:$0xff] %v15483_v25  ;;  %v15592_v25 = vpop.f32.mrf.mxu2 }
 0x741   : > { %11086 = vmatmul.msk.f32.gmra.mxu3 %vm743_vm6, %v7548_v16  ;;  %v7820_v16 = vld [vmem:[#allocation4 + $0x151] sm:$0xff] }
 0x744   : > { %v15468_v8 = vpop.f32.mrf.mxu1 }
 0x747   : > { %11120 = vmatmul.msk.f32.vlgmr.msra.gmra.mxu1 %vm743_vm6, %v16770_v49  ;;  %v16785_v49 = vld [vmem:[#allocation87_spill] sm:$0xff] }
 0x748   : > { %11104 = vmatmul.msk.f32.gmra.mxu0 %vm743_vm6, %v15276_v40  ;;  %v15493_v40 = vpop.f32.mrf.mxu0 }
 0x749   : > { %11087 = vmatmul.msk.f32.gmra.mxu3 %vm743_vm6, %v7549_v45  ;;  %16775 = vst [vmem:[#allocation102_spill] sm:$0xff] %v15493_v40  ;;  %v8090_v40 = vld [vmem:[#allocation4 + $0xf2] sm:$0xff] }
 0x74c   : > { %v15477_v15 = vpop.f32.mrf.mxu1 }
 0x74f   : > { %11121 = vmatmul.msk.f32.gmra.mxu1 %vm743_vm6, %v16772_v35  ;;  %v8615_v35 = vld [vmem:[#allocation19 + $0x70] sm:$0xff] }
 0x750   : > { %11105 = vmatmul.msk.f32.gmra.mxu0 %vm743_vm6, %v15290_v37  ;;  %v15501_v36 = vpop.f32.mrf.mxu0  ;;  %8650 = vmatpush.msra.mxu2 %v8615_v35 }
 0x751   : > { %16777 = vst [vmem:[#allocation95_spill] sm:$0xff] %v15501_v36  ;;  %v7827_v36 = vld [vmem:[#allocation4 + $0x1a1] sm:$0xff] }
 0x754   : > { %v15485_v9 = vpop.f32.mrf.mxu1 }
 0x757   : > { %11122 = vmatmul.msk.f32.gmra.mxu1 %vm743_vm6, %v16774_v55  ;;  %v7821_v55 = vld [vmem:[#allocation4 + $0x159] sm:$0xff] }
 0x758   : > { %11106 = vmatmul.msk.f32.gmra.mxu0 %vm743_vm6, %v15305_v7  ;;  %v15511_v23 = vpop.f32.mrf.mxu0 }
 0x759   : > { %16780 = vst [vmem:[#allocation138_spill] sm:$0xff] %v15511_v23  ;;  %v8597_v23 = vld [vmem:[#allocation19 + $0x28] sm:$0xff] }
 0x75c   : > { %v15491_v59 = vpop.f32.mrf.mxu1 }
 0x75f   : > { %11123 = vmatmul.msk.f32.gmra.mxu1 %vm743_vm6, %v16776_v17  ;;  %v8598_v17 = vld [vmem:[#allocation19 + $0x30] sm:$0xff] }
 0x760   : > { %11107 = vmatmul.msk.f32.gmra.mxu0 %vm743_vm6, %v15319_v56  ;;  %v8599_v56 = vld [vmem:[#allocation19 + $0x38] sm:$0xff]  ;;  %v7946_v29 = vpop.f32.mrf.mxu0 }
 0x761   : > { %8714 = vmatpush.msra.mxu3 %v8599_v56 }
 0x763   : > { %8715 = vmatpush.msra.mxu3 %v8598_v17  ;;  %v8087_v17 = vld [vmem:[#allocation4 + $0xca] sm:$0xff] }
 0x764   : > { %v15499_v37 = vpop.f32.mrf.mxu1 }
 0x765   : > { %8716 = vmatpush.msra.mxu3 %v8597_v23  ;;  %v15586_v23 = vld [vmem:[%s16322_s9] ss:$0 sm:$0xff] }
 0x767   : > { %11124 = vmatmul.msk.f32.gmra.mxu1 %vm743_vm6, %v16778_v3 }
 0x768   : > { %11108 = vmatmul.msk.f32.gmra.mxu0 %vm743_vm6, %v15335_v62  ;;  %v7818_v62 = vld [vmem:[#allocation4 + $0x139] sm:$0xff]  ;;  %v7949_v1 = vpop.f32.mrf.mxu0 }
 0x76c   : > { %v15507_v7 = vpop.f32.mrf.mxu1 }
 0x76f   : > { %11125 = vmatmul.msk.f32.gmra.mxu1 %vm743_vm6, %v16779_v30  ;;  %v16787_v30 = vld [vmem:[#allocation98_spill] sm:$0xff] }
 0x770   : > { %11109 = vmatmul.msk.f32.gmra.mxu0 %vm743_vm6, %v15351_v20  ;;  %v15532_v45 = vpop.f32.mrf.mxu0 }
 0x774   : > { %v15515_v47 = vpop.f32.mrf.mxu1 }
 0x777   : > { %11126 = vmatmul.msk.f32.gmra.mxu1 %vm743_vm6, %v16781_v22 }
 0x778   : > { %11110 = vmatmul.msk.f32.gmra.mxu0 %vm743_vm6, %v7818_v62  ;;  %v15541_v56 = vpop.f32.mrf.mxu0  ;;  %v16789_v62 = vld [vmem:[#allocation72_spill] sm:$0xff] }
 0x77c   : > { %v15520_v38 = vpop.f32.mrf.mxu1 }
 0x77f   : > { %11127 = vmatmul.msk.f32.gmra.mxu1 %vm743_vm6, %v16782_v41  ;;  %v7823_v41 = vld [vmem:[#allocation4 + $0x171] sm:$0xff] }
 0x780   : > { %11111 = vmatmul.msk.f32.gmra.mxu0 %vm743_vm6, %v7819_v54  ;;  %v15549_v54 = vpop.f32.mrf.mxu0 }
 0x784   : > { %v15525_v20 = vpop.f32.mrf.mxu1 }
 0x787   : > { %11128 = vmatmul.msk.f32.gmra.mxu1 %vm743_vm6, %v16783_v19 }
 0x788   : > { %11112 = vmatmul.msk.f32.gmra.mxu0 %vm743_vm6, %v7820_v16  ;;  %v16791_v16 = vmov 0.0  }
 0x789   : > { %790 = vst.msk [vmem:[#allocation6] sm:$0xff] %vm789_vm9, %v16791_v16 }
 0x78a   : > { %794 = vst.msk [vmem:[#allocation6 + $0x90] sm:$0xff] %vm789_vm9, %v16791_v16 }
 0x78b   : > { %792 = vst.msk [vmem:[#allocation6 + $0x8] sm:$0x3] %vm791_vm10, %v16791_v16 }
 0x78c   : > { %v15530_v43 = vpop.f32.mrf.mxu1  ;;  %795 = vst.msk [vmem:[#allocation6 + $0x98] sm:$0x3] %vm791_vm10, %v16791_v16 }
 0x78d   : > { %16784 = vst [vmem:[#allocation152_spill] sm:$0xff] %v15530_v43 }
 0x78e   : > { %797 = vst.msk [vmem:[#allocation6] sm:$0x1] %vm796_vm11, %v16791_v16 }
 0x78f   : > { %11129 = vmatmul.msk.f32.gmra.mxu1 %vm743_vm6, %v16785_v49  ;;  %v8086_v49 = vld [vmem:[#allocation4 + $0xc2] sm:$0xff]  ;;  %798 = vst.msk [vmem:[#allocation6 + $0x10] sm:$0x1] %vm796_vm11, %v16791_v16 }
 0x790   : > { %11113 = vmatmul.msk.f32.gmra.mxu0 %vm743_vm6, %v7821_v55  ;;  %v15562_v55 = vpop.f32.mrf.mxu0  ;;  %799 = vst.msk [vmem:[#allocation6 + $0x20] sm:$0x1] %vm796_vm11, %v16791_v16 }
 0x791   : > { %800 = vst.msk [vmem:[#allocation6 + $0x30] sm:$0x1] %vm796_vm11, %v16791_v16 }
 0x792   : > { %801 = vst.msk [vmem:[#allocation6 + $0x40] sm:$0x1] %vm796_vm11, %v16791_v16 }
 0x793   : > { %802 = vst.msk [vmem:[#allocation6 + $0x50] sm:$0x1] %vm796_vm11, %v16791_v16 }
 0x794   : > { %v15537_v3 = vpop.f32.mrf.mxu1  ;;  %803 = vst.msk [vmem:[#allocation6 + $0x60] sm:$0x1] %vm796_vm11, %v16791_v16 }
 0x795   : > { %16786 = vst [vmem:[#allocation114_spill] sm:$0xff] %v15537_v3  ;;  %v9304_v3 = vld [vmem:[#allocation19 + $0x238] sm:$0xff] }
 0x796   : > { %804 = vst.msk [vmem:[#allocation6 + $0x70] sm:$0x1] %vm796_vm11, %v16791_v16  ;;  %9337 = vmatpush.msrb.mxu0 %v9304_v3  ;;  %v9301_v3 = vld [vmem:[#allocation19 + $0x220] sm:$0xff] }
 0x797   : > { %11130 = vmatmul.msk.f32.gmra.mxu1 %vm743_vm6, %v16787_v30  ;;  %805 = vst.msk [vmem:[#allocation6 + $0x80] sm:$0x1] %vm796_vm11, %v16791_v16 }
 0x798   : > { %11114 = vmatmul.msk.f32.gmra.mxu0 %vm743_vm6, %v7822_v14  ;;  %v8088_v14 = vld [vmem:[#allocation4 + $0xda] sm:$0xff]  ;;  %806 = vst.msk [vmem:[#allocation6 + $0x90] sm:$0x1] %vm796_vm11, %v16791_v16 }
 0x799   : > { %807 = vst.msk [vmem:[#allocation6 + $0x9] sm:$0x1] %vm796_vm11, %v16791_v16 }
 0x79a   : > { %808 = vst.msk [vmem:[#allocation6 + $0x19] sm:$0x1] %vm796_vm11, %v16791_v16 }
 0x79b   : > { %809 = vst.msk [vmem:[#allocation6 + $0x29] sm:$0x1] %vm796_vm11, %v16791_v16 }
 0x79c   : > { %v15544_v22 = vpop.f32.mrf.mxu1  ;;  %810 = vst.msk [vmem:[#allocation6 + $0x39] sm:$0x1] %vm796_vm11, %v16791_v16 }
 0x79d   : > { %16788 = vst [vmem:[#allocation140_spill] sm:$0xff] %v15544_v22 }
 0x79e   : > { %811 = vst.msk [vmem:[#allocation6 + $0x49] sm:$0x1] %vm796_vm11, %v16791_v16 }
 0x79f   : > { %11131 = vmatmul.msk.f32.gmra.mxu1 %vm743_vm6, %v16789_v62  ;;  %v7826_v62 = vld [vmem:[#allocation4 + $0x199] sm:$0xff]  ;;  %812 = vst.msk [vmem:[#allocation6 + $0x59] sm:$0x1] %vm796_vm11, %v16791_v16 }
 0x7a0   : > { %11115 = vmatmul.msk.f32.gmra.mxu0 %vm743_vm6, %v7823_v41  ;;  %v15569_v41 = vpop.f32.mrf.mxu0  ;;  %813 = vst.msk [vmem:[#allocation6 + $0x69] sm:$0x1] %vm796_vm11, %v16791_v16 }
 0x7a1   : > { %814 = vst.msk [vmem:[#allocation6 + $0x79] sm:$0x1] %vm796_vm11, %v16791_v16 }
 0x7a2   : > { %815 = vst.msk [vmem:[#allocation6 + $0x89] sm:$0x1] %vm796_vm11, %v16791_v16 }
 0x7a3   : > { %816 = vst.msk [vmem:[#allocation6 + $0x99] sm:$0x1] %vm796_vm11, %v16791_v16 }
 0x7a4   : > { %v15551_v19 = vpop.f32.mrf.mxu1 }
 0x7a5   : > { %16790 = vst [vmem:[#allocation57_spill] sm:$0xff] %v15551_v19 }
 0x7a7   : > { %11132 = vmatmul.msk.f32.gmra.mxu1 %vm743_vm6, %v8086_v49  ;;  %v8614_v49 = vld [vmem:[#allocation19 + $0x68] sm:$0xff] }
 0x7a8   : > { %11116 = vmatmul.msk.f32.gmra.mxu0 %vm743_vm6, %v15441_v21  ;;  %8651 = vmatpush.msra.mxu2 %v8614_v49 }
 0x7ac   : > { %v15560_v35 = vpop.f32.mrf.mxu1 }
 0x7ad   : > { %16792 = vst [vmem:[#allocation144_spill] sm:$0xff] %v15560_v35  ;;  %v15580_v35 = vld [vmem:[#allocation17] ss:$0 sm:$0xff] }
 0x7af   : > { %11133 = vmatmul.msk.f32.gmra.mxu1 %vm743_vm6, %v8087_v17  ;;  %v8089_v17 = vld [vmem:[#allocation4 + $0xe2] sm:$0xff] }
 0x7b0   : > { %11117 = vmatmul.msk.f32.gmra.mxu0 %vm743_vm6, %v15455_v28  ;;  %v15576_v28 = vpop.f32.mrf.mxu0 }
 0x7b4   : > { %v15567_v30 = vpop.f32.mrf.mxu1 }
 0x7b5   : > { %16793 = vst [vmem:[#allocation86_spill] sm:$0xff] %v15567_v30  ;;  %v8042_v30 = vadd.f32 %v7946_v29, %v15273_v5  ;;  %v8613_v5 = vld [vmem:[#allocation19 + $0x60] sm:$0xff] }
 0x7b6   : > { %v8596_v29 = vld [vmem:[#allocation19 + $0x20] sm:$0xff]  ;;  %8652 = vmatpush.msra.mxu2 %v8613_v5 }
 0x7b7   : > { %11134 = vmatmul.msk.f32.gmra.mxu1 %vm743_vm6, %v8088_v14  ;;  %8717 = vmatpush.msra.mxu3 %v8596_v29  ;;  %v8044_v29 = vadd.f32 %v15532_v45, %v15301_v2  ;;  %v8584_v45 = vld [vmem:[#allocation6] sm:$0xff] }
 0x7b8   : > { %11118 = vmatmul.msk.f32.gmra.mxu0 %vm743_vm6, %v7826_v62  ;;  %v15604_v5 = vpop.f32.mrf.mxu0 }
 0x7bc   : > { %v15573_v21 = vpop.f32.mrf.mxu1 }
 0x7bd   : > { %16794 = vst [vmem:[#allocation106_spill] sm:$0xff] %v15573_v21 }
 0x7bf   : > { %11135 = vmatmul.msk.f32.gmra.mxu1 %vm743_vm6, %v8089_v17  ;;  %v8043_v17 = vadd.f32 %v7949_v1, %v15288_v24  ;;  %v8611_v1 = vld [vmem:[#allocation19 + $0x50] sm:$0xff] }
 0x7c0   : > { %11119 = vmatmul.msk.f32.gmra.mxu0 %vm743_vm6, %v7827_v36 }
 0x7c4   : > { %v8224_v14 = vpop.f32.mrf.mxu1 }
 0x7c5   : > { %v8320_v62 = vadd.f32 %v8224_v14, %v8042_v30  ;;  %v8612_v14 = vld [vmem:[#allocation19 + $0x58] sm:$0xff] }
 0x7c6   : > { %8653 = vmatpush.msra.mxu2 %v8612_v14  ;;  %v8609_v14 = vld [vmem:[#allocation19 + $0x40] sm:$0xff] }
 0x7c7   : > { %v8356_v21 = vadd.f32 %v15580_v35, %v8320_v62  ;;  %11136 = vmatmul.msk.f32.gmra.mxu1 %vm743_vm6, %v8090_v40  ;;  %v8595_v62 = vld [vmem:[#allocation19 + $0x18] sm:$0xff] }
 0x7c8   : > { %v8091_v40 = vld [vmem:[#allocation4 + $0xfa] sm:$0xff]  ;;  %8718 = vmatpush.msra.mxu3 %v8595_v62  ;;  %8654 = vmatpush.msra.mxu2 %v8611_v1  ;;  %v8592_v62 = vld [vmem:[#allocation19] sm:$0xff]  ;;  %v8600_v1 = vld [vmem:[#allocation6 + $0x1] sm:$0xff] }
 0x7c9   : > { %v8388_v49 = vmax.f32 %v8356_v21, 0.0  ;;  %v8594_v21 = vld [vmem:[#allocation19 + $0x10] sm:$0xff] }
 0x7ca   : > { %8719 = vmatpush.msra.mxu3 %v8594_v21  ;;  %v8092_v21 = vld [vmem:[#allocation4 + $0x10a] sm:$0xff] }
 0x7cb   : > { %v8424_v36 = vadd.f32 %v15586_v23, %v8388_v49  ;;  %v15598_v49 = vpop.f32.mrf.mxu3 }
 0x7cc   : > { %v8227_v19 = vpop.f32.mrf.mxu1 }
 0x7cd   : > { %8456 = vst.msk [vmem:[#allocation5] sm:$0xff] %vm789_vm9, %v8424_v36  ;;  %v8321_v30 = vadd.f32 %v8227_v19, %v8043_v17  ;;  %v8610_v17 = vld [vmem:[#allocation19 + $0x48] sm:$0xff] }
 0x7ce   : > { %v8593_v36 = vld [vmem:[#allocation19 + $0x8] sm:$0xff]  ;;  %8655 = vmatpush.msra.mxu2 %v8610_v17 }
 0x7cf   : > { %v8357_v24 = vadd.f32 %v15580_v35, %v8321_v30  ;;  %11137 = vmatmul.msk.f32.gmra.mxu1 %vm743_vm6, %v8091_v40  ;;  %8720 = vmatpush.msra.mxu3 %v8593_v36 }
 0x7d0   : > { %8656 = vmatpush.msra.mxu2 %v8609_v14  ;;  %v15639_v14 = vpop.f32.mrf.mxu0 }
 0x7d1   : > { %v8389_v19 = vmax.f32 %v8357_v24, 0.0  ;;  %8721 = vmatpush.msra.mxu3 %v8592_v62  ;;  %11152 = vmatmul.msk.f32.vlgmr.msra.gmra.mxu2 %vm789_vm9, %v8600_v1 }
 0x7d2   : > { %11160 = vmatmul.msk.f32.vlgmr.msra.gmra.mxu3 %vm789_vm9, %v8584_v45 }
 0x7d3   : > { %v8425_v30 = vadd.f32 %v15586_v23, %v8389_v19  ;;  %v15623_v19 = vpop.f32.mrf.mxu2  ;;  %v15630_v36 = vpop.f32.mrf.mxu3 }
 0x7d4   : > { %v8230_v40 = vpop.f32.mrf.mxu1 }
 0x7d5   : > { %8457 = vst.msk [vmem:[#allocation5 + $0x8] sm:$0xff] %vm789_vm9, %v8425_v30  ;;  %v8322_v24 = vadd.f32 %v8230_v40, %v8044_v29  ;;  %v8045_v29 = vadd.f32 %v15541_v56, %v15317_v18 }
 0x7d7   : > { %v8358_v2 = vadd.f32 %v15580_v35, %v8322_v24  ;;  %11138 = vmatmul.msk.f32.gmra.mxu1 %vm743_vm6, %v8092_v21  ;;  %v8093_v24 = vld [vmem:[#allocation4 + $0x112] sm:$0xff]  ;;  %v8046_v21 = vadd.f32 %v15549_v54, %v15333_v50 }
 0x7d9   : > { %v8390_v17 = vmax.f32 %v8358_v2, 0.0 }
 0x7db   : > { %v8426_v30 = vadd.f32 %v15586_v23, %v8390_v17  ;;  %v15654_v1 = vpop.f32.mrf.mxu2  ;;  %v15663_v45 = vpop.f32.mrf.mxu3 }
 0x7dc   : > { %v8233_v62 = vpop.f32.mrf.mxu1 }
 0x7dd   : > { %8458 = vst.msk [vmem:[#allocation5 + $0x10] sm:$0xff] %vm789_vm9, %v8426_v30  ;;  %v8323_v40 = vadd.f32 %v8233_v62, %v8045_v29  ;;  %v15668_v30 = vpop.f32.mrf.mxu0  ;;  %v8094_v62 = vld [vmem:[#allocation4 + $0x122] sm:$0xff] }
 0x7df   : > { %v8359_v18 = vadd.f32 %v15580_v35, %v8323_v40  ;;  %11139 = vmatmul.msk.f32.gmra.mxu1 %vm743_vm6, %v8093_v24  ;;  %v8488_v40 = vld [vmem:[#allocation5] ss:$2 sm:$0xff]  ;;  %v8520_v24 = vld [vmem:[#allocation5 + $0x1] ss:$2 sm:$0xff] }
 0x7e0   : > { %v8551_v4 = vmax.f32 %v8488_v40, %v8520_v24  ;;  %v8048_v40 = vadd.f32 %v15569_v41, %v15365_v39 }
 0x7e1   : > { %v8391_v56 = vmax.f32 %v8359_v18, 0.0  ;;  %v8047_v18 = vadd.f32 %v15562_v55, %v15349_v32  ;;  %v9303_v55 = vld [vmem:[#allocation19 + $0x230] sm:$0xff] }
 0x7e2   : > { %9338 = vmatpush.msrb.mxu0 %v9303_v55  ;;  %v16795_v55 = vld [vmem:[#allocation40_spill] sm:$0xff] }
 0x7e3   : > { %v8427_v2 = vadd.f32 %v15586_v23, %v8391_v56 }
 0x7e4   : > { %v8236_v17 = vpop.f32.mrf.mxu1 }
 0x7e5   : > { %8459 = vst.msk [vmem:[#allocation5 + $0x18] sm:$0xff] %vm789_vm9, %v8427_v2  ;;  %v8324_v29 = vadd.f32 %v8236_v17, %v8046_v21  ;;  %v15677_v2 = vpop.f32.mrf.mxu2 }
 0x7e7   : > { %v8360_v50 = vadd.f32 %v15580_v35, %v8324_v29  ;;  %11140 = vmatmul.msk.f32.gmra.mxu1 %vm743_vm6, %v8094_v62  ;;  %v15680_v62 = vpop.f32.mrf.mxu3 }
 0x7e9   : > { %v8392_v54 = vmax.f32 %v8360_v50, 0.0  ;;  %v8095_v50 = vld [vmem:[#allocation4 + $0x12a] sm:$0xff] }
 0x7eb   : > { %v8428_v56 = vadd.f32 %v15586_v23, %v8392_v54  ;;  %v15684_v54 = vpop.f32.mrf.mxu0 }
 0x7ec   : > { %v8490_v21 = vld [vmem:[#allocation5 + $0x10] ss:$2 sm:$0xff]  ;;  %v8522_v17 = vld [vmem:[#allocation5 + $0x11] ss:$2 sm:$0xff]  ;;  %v8239_v22 = vpop.f32.mrf.mxu1 }
 0x7ed   : > { %8460 = vst.msk [vmem:[#allocation5 + $0x20] sm:$0xff] %vm789_vm9, %v8428_v56  ;;  %v8325_v16 = vadd.f32 %v8239_v22, %v8047_v18  ;;  %v8552_v29 = vmax.f32 %v8490_v21, %v8522_v17  ;;  %v9302_v22 = vld [vmem:[#allocation19 + $0x228] sm:$0xff]  ;;  %v9300_v56 = vld [vmem:[#allocation19 + $0x218] sm:$0xff]  ;;  %v15691_v21 = vpop.f32.mrf.mxu2 }
 0x7ee   : > { %9339 = vmatpush.msrb.mxu0 %v9302_v22  ;;  %v8096_v17 = vld [vmem:[#allocation4 + $0x13a] sm:$0xff] }
 0x7ef   : > { %v8361_v13 = vadd.f32 %v15580_v35, %v8325_v16  ;;  %11141 = vmatmul.msk.f32.gmra.mxu1 %vm743_vm6, %v8095_v50  ;;  %v8567_v32 = vmax.f32 %v8551_v4, %v8552_v29  ;;  %v9299_v16 = vld [vmem:[#allocation19 + $0x210] sm:$0xff]  ;;  %v15695_v29 = vpop.f32.mrf.mxu3  ;;  %v9298_v50 = vld [vmem:[#allocation19 + $0x208] sm:$0xff] }
 0x7f0   : > { %9340 = vmatpush.msrb.mxu0 %v9301_v3  ;;  %v16796_v22 = vld [vmem:[#allocation70_spill] sm:$0xff] }
 0x7f1   : > { %v8393_v43 = vmax.f32 %v8361_v13, 0.0  ;;  %8576 = vst.msk [vmem:[#allocation6 + $0x11] sm:$0xff] %vm789_vm9, %v8567_v32 }
 0x7f2   : > { %9341 = vmatpush.msrb.mxu0 %v9300_v56 }
 0x7f3   : > { %v8429_v24 = vadd.f32 %v15586_v23, %v8393_v43  ;;  %v15702_v32 = vpop.f32.mrf.mxu0 }
 0x7f4   : > { %v8242_v18 = vpop.f32.mrf.mxu1  ;;  %9342 = vmatpush.msrb.mxu0 %v9299_v16 }
 0x7f5   : > { %8461 = vst.msk [vmem:[#allocation5 + $0x28] sm:$0xff] %vm789_vm9, %v8429_v24  ;;  %v8326_v4 = vadd.f32 %v8242_v18, %v8048_v40  ;;  %v6937_v40 = vadd.f32 %v16796_v22, %v16795_v55  ;;  %v8049_v24 = vadd.f32 %v15576_v28, %v15377_v26  ;;  %v9297_v18 = vld [vmem:[#allocation19 + $0x200] sm:$0xff] }
 0x7f6   : > { %9343 = vmatpush.msrb.mxu0 %v9298_v50  ;;  %v15714_v50 = vpop.f32.mrf.mxu2  ;;  %v16797_v55 = vld [vmem:[#allocation63_spill] sm:$0xff] }
 0x7f7   : > { %v8362_v13 = vadd.f32 %v15580_v35, %v8326_v4  ;;  %11142 = vmatmul.msk.f32.gmra.mxu1 %vm743_vm6, %v8096_v17  ;;  %v7215_v56 = vadd.f32 %v15367_v57, %v6937_v40  ;;  %v16798_v22 = vld [vmem:[#allocation75_spill] sm:$0xff] }
 0x7f8   : > { %v8601_v39 = vld [vmem:[#allocation6 + $0x11] sm:$0xff]  ;;  %9344 = vmatpush.msrb.mxu0 %v9297_v18  ;;  %v6938_v57 = vadd.f32 %v16798_v22, %v16797_v55  ;;  %v16800_v55 = vld [vmem:[#allocation80_spill] sm:$0xff] }
 0x7f9   : > { %v15697_v43 = vld [vmem:[#allocation6 + $0x10] sm:$0xff]  ;;  %v8394_v41 = vmax.f32 %v8362_v13, 0.0  ;;  %11153 = vmatmul.msk.f32.gmra.mxu2 %vm789_vm9, %v8601_v39  ;;  %v7493_v16 = vadd.f32 %v15592_v25, %v7215_v56  ;;  %v8098_v56 = vld [vmem:[#allocation4 + $0x152] sm:$0xff] }
 0x7fa   : > { %11161 = vmatmul.msk.f32.gmra.mxu3 %vm789_vm9, %v15697_v43  ;;  %v8097_v13 = vld [vmem:[#allocation4 + $0x142] sm:$0xff]  ;;  %v7216_v18 = vadd.f32 %v15379_v60, %v6938_v57 }
 0x7fb   : > { %v8430_v3 = vadd.f32 %v15586_v23, %v8394_v41  ;;  %v7772_v26 = vadd.f32 %v15598_v49, %v7493_v16  ;;  %v15717_v41 = vpop.f32.mrf.mxu3 }
 0x7fc   : > { %v8245_v4 = vpop.f32.mrf.mxu1  ;;  %v7494_v49 = vadd.f32 %v15623_v19, %v7216_v18 }
 0x7fd   : > { %8462 = vst.msk [vmem:[#allocation5 + $0x30] sm:$0xff] %vm789_vm9, %v8430_v3  ;;  %v8327_v17 = vadd.f32 %v8245_v4, %v8049_v24  ;;  %v8050_v40 = vadd.f32 %v15604_v5, %v7772_v26  ;;  %v15723_v3 = vpop.f32.mrf.mxu0  ;;  %v8524_v26 = vld [vmem:[#allocation5 + $0x21] ss:$2 sm:$0xff] }
 0x7fe   : > { %v15731_v16 = vpop.f32.mrf.mxu2 }
 0x7ff   : > { %v8363_v39 = vadd.f32 %v15580_v35, %v8327_v17  ;;  %11143 = vmatmul.msk.f32.gmra.mxu1 %vm743_vm6, %v8097_v13  ;;  %v7773_v13 = vadd.f32 %v15630_v36, %v7494_v49 }
 0x801   : > { %v8395_v28 = vmax.f32 %v8363_v39, 0.0  ;;  %v8492_v39 = vld [vmem:[#allocation5 + $0x20] ss:$2 sm:$0xff]  ;;  %v8051_v22 = vadd.f32 %v15639_v14, %v7773_v13 }
 0x803   : > { %v8431_v24 = vadd.f32 %v15586_v23, %v8395_v28  ;;  %v16799_v28 = vld [vmem:[#allocation38_spill] sm:$0xff] }
 0x804   : > { %v8248_v25 = vpop.f32.mrf.mxu1  ;;  %v6939_v60 = vadd.f32 %v16800_v55, %v16799_v28 }
 0x805   : > { %8463 = vst.msk [vmem:[#allocation5 + $0x38] sm:$0xff] %vm789_vm9, %v8431_v24  ;;  %v8328_v4 = vadd.f32 %v8248_v25, %v8050_v40  ;;  %v15737_v40 = vpop.f32.mrf.mxu3  ;;  %v15741_v49 = vpop.f32.mrf.mxu0 }
 0x806   : > { %v7217_v18 = vadd.f32 %v15391_v11, %v6939_v60  ;;  %v16801_v11 = vld [vmem:[#allocation54_spill] sm:$0xff]  ;;  %v16802_v60 = vld [vmem:[#allocation39_spill] sm:$0xff] }
 0x807   : > { %v8364_v17 = vadd.f32 %v15580_v35, %v8328_v4  ;;  %11144 = vmatmul.msk.f32.gmra.mxu1 %vm743_vm6, %v8098_v56  ;;  %v8553_v4 = vmax.f32 %v8492_v39, %v8524_v26 }
 0x808   : > { %v7495_v28 = vadd.f32 %v15654_v1, %v7217_v18 }
 0x809   : > { %v8396_v5 = vmax.f32 %v8364_v17, 0.0  ;;  %v8099_v17 = vld [vmem:[#allocation4 + $0x15a] sm:$0xff] }
 0x80b   : > { %v8432_v57 = vadd.f32 %v15586_v23, %v8396_v5  ;;  %v7774_v5 = vadd.f32 %v15663_v45, %v7495_v28  ;;  %v8100_v45 = vld [vmem:[#allocation4 + $0x16a] sm:$0xff] }
 0x80c   : > { %v8494_v19 = vld [vmem:[#allocation5 + $0x30] ss:$2 sm:$0xff]  ;;  %v8526_v24 = vld [vmem:[#allocation5 + $0x31] ss:$2 sm:$0xff]  ;;  %v8251_v25 = vpop.f32.mrf.mxu1 }
 0x80d   : > { %8464 = vst.msk [vmem:[#allocation5 + $0x40] sm:$0xff] %vm789_vm9, %v8432_v57  ;;  %v8329_v36 = vadd.f32 %v8251_v25, %v8051_v22  ;;  %v8554_v56 = vmax.f32 %v8494_v19, %v8526_v24  ;;  %v6940_v22 = vadd.f32 %v16802_v60, %v16801_v11  ;;  %v8052_v39 = vadd.f32 %v15668_v30, %v7774_v5  ;;  %v15752_v57 = vpop.f32.mrf.mxu2  ;;  %v15756_v25 = vpop.f32.mrf.mxu3 }
 0x80e   : > { %v15761_v30 = vpop.f32.mrf.mxu0 }
 0x80f   : > { %v8365_v14 = vadd.f32 %v15580_v35, %v8329_v36  ;;  %11145 = vmatmul.msk.f32.gmra.mxu1 %vm743_vm6, %v8099_v17  ;;  %v8568_v13 = vmax.f32 %v8553_v4, %v8554_v56  ;;  %v7218_v19 = vadd.f32 %v15403_v42, %v6940_v22 }
 0x811   : > { %v8397_v55 = vmax.f32 %v8365_v14, 0.0  ;;  %8577 = vst.msk [vmem:[#allocation6 + $0x21] sm:$0xff] %vm789_vm9, %v8568_v13  ;;  %v7496_v18 = vadd.f32 %v15677_v2, %v7218_v19  ;;  %v16803_v2 = vld [vmem:[#allocation43_spill] sm:$0xff]  ;;  %v16804_v14 = vld [vmem:[#allocation92_spill] sm:$0xff] }
 0x812   : > { %v6941_v13 = vadd.f32 %v16804_v14, %v16803_v2 }
 0x813   : > { %v8433_v26 = vadd.f32 %v15586_v23, %v8397_v55  ;;  %v7775_v42 = vadd.f32 %v15680_v62, %v7496_v18  ;;  %v16806_v18 = vld [vmem:[#allocation117_spill] sm:$0xff] }
 0x814   : > { %v8254_v1 = vpop.f32.mrf.mxu1  ;;  %v7219_v62 = vadd.f32 %v15415_v51, %v6941_v13  ;;  %v16805_v51 = vld [vmem:[#allocation67_spill] sm:$0xff] }
 0x815   : > { %8465 = vst.msk [vmem:[#allocation5 + $0x48] sm:$0xff] %vm789_vm9, %v8433_v26  ;;  %v8330_v24 = vadd.f32 %v8254_v1, %v8052_v39  ;;  %v8053_v5 = vadd.f32 %v15684_v54, %v7775_v42  ;;  %v15782_v22 = vpop.f32.mrf.mxu2  ;;  %v8101_v39 = vld [vmem:[#allocation4 + $0x172] sm:$0xff]  ;;  %v15787_v19 = vpop.f32.mrf.mxu3 }
 0x816   : > { %v7497_v26 = vadd.f32 %v15691_v21, %v7219_v62 }
 0x817   : > { %v8366_v36 = vadd.f32 %v15580_v35, %v8330_v24  ;;  %11146 = vmatmul.msk.f32.gmra.mxu1 %vm743_vm6, %v8100_v45  ;;  %v15790_v45 = vpop.f32.mrf.mxu0 }
 0x818   : > { %v15763_v4 = vld [vmem:[#allocation6 + $0x21] sm:$0xff]  ;;  %v7776_v54 = vadd.f32 %v15695_v29, %v7497_v26 }
 0x819   : > { %v15765_v56 = vld [vmem:[#allocation6 + $0x20] sm:$0xff]  ;;  %v8398_v28 = vmax.f32 %v8366_v36, 0.0  ;;  %11154 = vmatmul.msk.f32.gmra.mxu2 %vm789_vm9, %v15763_v4  ;;  %v6942_v36 = vadd.f32 %v16806_v18, %v16805_v51 }
 0x81a   : > { %v15767_v17 = vld [vmem:[#allocation6 + $0x22] sm:$0xff]  ;;  %11162 = vmatmul.msk.f32.gmra.mxu3 %vm789_vm9, %v15765_v56  ;;  %v8054_v42 = vadd.f32 %v15702_v32, %v7776_v54 }
 0x81b   : > { %11216 = vmatmul.msk.f32.vlgmr.msrb.gmra.mxu0 %vm789_vm9, %v15767_v17  ;;  %v8434_v55 = vadd.f32 %v15586_v23, %v8398_v28  ;;  %v7220_v21 = vadd.f32 %v15427_v27, %v6942_v36  ;;  %v16807_v27 = vld [vmem:[#allocation61_spill] sm:$0xff] }
 0x81c   : > { %v8257_v11 = vpop.f32.mrf.mxu1  ;;  %v8496_v62 = vld [vmem:[#allocation5 + $0x40] ss:$2 sm:$0xff] }
 0x81d   : > { %8466 = vst.msk [vmem:[#allocation5 + $0x50] sm:$0xff] %vm789_vm9, %v8434_v55  ;;  %v8331_v60 = vadd.f32 %v8257_v11, %v8053_v5  ;;  %v7498_v13 = vadd.f32 %v15714_v50, %v7220_v21  ;;  %v15802_v5 = vpop.f32.mrf.mxu2  ;;  %v15805_v11 = vpop.f32.mrf.mxu3 }
 0x81f   : > { %v8367_v1 = vadd.f32 %v15580_v35, %v8331_v60  ;;  %11147 = vmatmul.msk.f32.gmra.mxu1 %vm743_vm6, %v8101_v39  ;;  %v7777_v55 = vadd.f32 %v15717_v41, %v7498_v13  ;;  %v8528_v60 = vld [vmem:[#allocation5 + $0x41] ss:$2 sm:$0xff]  ;;  %v15811_v54 = vpop.f32.mrf.mxu0 }
 0x820   : > { %v16808_v39 = vld [vmem:[#allocation90_spill] sm:$0xff]  ;;  %v8555_v36 = vmax.f32 %v8496_v62, %v8528_v60 }
 0x821   : > { %v8399_v24 = vmax.f32 %v8367_v1, 0.0  ;;  %v6943_v26 = vadd.f32 %v16808_v39, %v16807_v27  ;;  %v8055_v1 = vadd.f32 %v15723_v3, %v7777_v55  ;;  %v8104_v60 = vld [vmem:[#allocation4 + $0x19a] sm:$0xff] }
 0x823   : > { %v8435_v28 = vadd.f32 %v15586_v23, %v8399_v24  ;;  %v7221_v18 = vadd.f32 %v15437_v12, %v6943_v26  ;;  %v16809_v12 = vld [vmem:[#allocation71_spill] sm:$0xff] }
 0x824   : > { %v8260_v2 = vpop.f32.mrf.mxu1 }
 0x825   : > { %8467 = vst.msk [vmem:[#allocation5 + $0x58] sm:$0xff] %vm789_vm9, %v8435_v28  ;;  %v8332_v14 = vadd.f32 %v8260_v2, %v8054_v42  ;;  %v7499_v28 = vadd.f32 %v15731_v16, %v7221_v18  ;;  %v15821_v13 = vpop.f32.mrf.mxu2 }
 0x827   : > { %v8368_v29 = vadd.f32 %v15580_v35, %v8332_v14  ;;  %11148 = vmatmul.msk.f32.gmra.mxu1 %vm743_vm6, %v15443_v44  ;;  %v7778_v21 = vadd.f32 %v15737_v40, %v7499_v28  ;;  %v15831_v27 = vpop.f32.mrf.mxu0 }
 0x829   : > { %v8400_v32 = vmax.f32 %v8368_v29, 0.0  ;;  %v6944_v29 = vadd.f32 %v15268_v48, %v16809_v12  ;;  %v8056_v55 = vadd.f32 %v15741_v49, %v7778_v21 }
 0x82b   : > { %v8436_v50 = vadd.f32 %v15586_v23, %v8400_v32  ;;  %v15827_v32 = vpop.f32.mrf.mxu3 }
 0x82c   : > { %v8498_v24 = vld [vmem:[#allocation5 + $0x50] ss:$2 sm:$0xff]  ;;  %v8530_v44 = vld [vmem:[#allocation5 + $0x51] ss:$2 sm:$0xff]  ;;  %v8263_v51 = vpop.f32.mrf.mxu1 }
 0x82d   : > { %8468 = vst.msk [vmem:[#allocation5 + $0x60] sm:$0xff] %vm789_vm9, %v8436_v50  ;;  %v8333_v41 = vadd.f32 %v8263_v51, %v8055_v1  ;;  %v8556_v42 = vmax.f32 %v8498_v24, %v8530_v44  ;;  %v7446_v18 = vpop.f32.mrf.mxu2 }
 0x82f   : > { %v8369_v2 = vadd.f32 %v15580_v35, %v8333_v41  ;;  %11149 = vmatmul.msk.f32.gmra.mxu1 %vm743_vm6, %v15457_v52  ;;  %v8569_v3 = vmax.f32 %v8555_v36, %v8556_v42  ;;  %v7222_v52 = vadd.f32 %v15453_v10, %v6944_v29 }
 0x831   : > { %v8401_v14 = vmax.f32 %v8369_v2, 0.0  ;;  %8578 = vst.msk [vmem:[#allocation6 + $0x31] sm:$0xff] %vm789_vm9, %v8569_v3  ;;  %v7500_v39 = vadd.f32 %v15752_v57, %v7222_v52  ;;  %v16810_v57 = vld [vmem:[#allocation44_spill] sm:$0xff] }
 0x832   : > { %v6945_v24 = vadd.f32 %v15286_v58, %v16810_v57  ;;  %v8003_v58 = vpop.f32.mrf.mxu0 }
 0x833   : > { %v8437_v16 = vadd.f32 %v15586_v23, %v8401_v14  ;;  %v7779_v50 = vadd.f32 %v15756_v25, %v7500_v39  ;;  %v8105_v25 = vld [vmem:[#allocation4 + $0x1a2] sm:$0xff]  ;;  %v7725_v28 = vpop.f32.mrf.mxu3  ;;  %v16811_v14 = vld [vmem:[#allocation52_spill] sm:$0xff] }
 0x834   : > { %v8266_v62 = vpop.f32.mrf.mxu1  ;;  %v7223_v36 = vadd.f32 %v15468_v8, %v6945_v24  ;;  %v6946_v12 = vadd.f32 %v15303_v6, %v16811_v14 }
 0x835   : > { %8469 = vst.msk [vmem:[#allocation5 + $0x68] sm:$0xff] %vm789_vm9, %v8437_v16  ;;  %v8334_v40 = vadd.f32 %v8266_v62, %v8056_v55  ;;  %v8057_v44 = vadd.f32 %v15761_v30, %v7779_v50  ;;  %v7449_v62 = vpop.f32.mrf.mxu2  ;;  %v16812_v50 = vld [vmem:[#allocation48_spill] sm:$0xff] }
 0x836   : > { %v7501_v2 = vadd.f32 %v15782_v22, %v7223_v36  ;;  %v7224_v16 = vadd.f32 %v15477_v15, %v6946_v12 }
 0x837   : > { %v8370_v26 = vadd.f32 %v15580_v35, %v8334_v40  ;;  %11150 = vmatmul.msk.f32.gmra.mxu1 %vm743_vm6, %v8104_v60 }
 0x838   : > { %v15836_v48 = vld [vmem:[#allocation6 + $0x31] sm:$0xff]  ;;  %v7780_v30 = vadd.f32 %v15787_v19, %v7501_v2  ;;  %v7502_v60 = vadd.f32 %v15802_v5, %v7224_v16 }
 0x839   : > { %v15838_v49 = vld [vmem:[#allocation6 + $0x30] sm:$0xff]  ;;  %v8402_v10 = vmax.f32 %v8370_v26, 0.0  ;;  %11155 = vmatmul.msk.f32.gmra.mxu2 %vm789_vm9, %v15836_v48 }
 0x83a   : > { %v15840_v1 = vld [vmem:[#allocation6 + $0x32] sm:$0xff]  ;;  %11163 = vmatmul.msk.f32.gmra.mxu3 %vm789_vm9, %v15838_v49  ;;  %v8058_v29 = vadd.f32 %v15790_v45, %v7780_v30  ;;  %v7781_v40 = vadd.f32 %v15805_v11, %v7502_v60  ;;  %v8006_v6 = vpop.f32.mrf.mxu0 }
 0x83b   : > { %11217 = vmatmul.msk.f32.gmra.mxu0 %vm789_vm9, %v15840_v1  ;;  %v8438_v51 = vadd.f32 %v15586_v23, %v8402_v10  ;;  %v7728_v19 = vpop.f32.mrf.mxu3  ;;  %v6947_v10 = vadd.f32 %v15323_v33, %v16812_v50 }
 0x83c   : > { %v8269_v41 = vpop.f32.mrf.mxu1  ;;  %v8500_v26 = vld [vmem:[#allocation5 + $0x60] ss:$2 sm:$0xff]  ;;  %v8532_v45 = vld [vmem:[#allocation5 + $0x61] ss:$2 sm:$0xff]  ;;  %v8059_v15 = vadd.f32 %v15811_v54, %v7781_v40 }
 0x83d   : > { %8470 = vst.msk [vmem:[#allocation5 + $0x70] sm:$0xff] %vm789_vm9, %v8438_v51  ;;  %v8335_v42 = vadd.f32 %v8269_v41, %v8057_v44  ;;  %v7225_v5 = vadd.f32 %v15485_v9, %v6947_v10  ;;  %v8557_v11 = vmax.f32 %v8500_v26, %v8532_v45  ;;  %v7452_v33 = vpop.f32.mrf.mxu2 }
 0x83f   : > { %v8371_v3 = vadd.f32 %v15580_v35, %v8335_v42  ;;  %11151 = vmatmul.msk.f32.gmra.mxu1 %vm743_vm6, %v8105_v25  ;;  %v7503_v36 = vadd.f32 %v15821_v13, %v7225_v5  ;;  %v16815_v5 = vld [vmem:[#allocation66_spill] sm:$0xff] }
 0x841   : > { %v8403_v21 = vmax.f32 %v8371_v3, 0.0  ;;  %v7782_v54 = vadd.f32 %v15827_v32, %v7503_v36 }
 0x843   : > { %v8439_v8 = vadd.f32 %v15586_v23, %v8403_v21  ;;  %v7731_v30 = vpop.f32.mrf.mxu3  ;;  %v16813_v21 = vld [vmem:[#allocation59_spill] sm:$0xff]  ;;  %v8060_v14 = vadd.f32 %v15831_v27, %v7782_v54 }
 0x844   : > { %v8272_v55 = vpop.f32.mrf.mxu1  ;;  %v6948_v9 = vadd.f32 %v15345_v46, %v16813_v21 }
 0x845   : > { %8471 = vst.msk [vmem:[#allocation5 + $0x78] sm:$0xff] %vm789_vm9, %v8439_v8  ;;  %v8336_v22 = vadd.f32 %v8272_v55, %v8058_v29  ;;  %v8009_v29 = vpop.f32.mrf.mxu0 }
 0x846   : > { %v7226_v13 = vadd.f32 %v15491_v59, %v6948_v9  ;;  %v7455_v59 = vpop.f32.mrf.mxu2 }
 0x847   : > { %v8372_v52 = vadd.f32 %v15580_v35, %v8336_v22 }
 0x848   : > { %v7504_v16 = vadd.f32 %v7446_v18, %v7226_v13  ;;  %v16814_v18 = vld [vmem:[#allocation53_spill] sm:$0xff] }
 0x849   : > { %v8404_v39 = vmax.f32 %v8372_v52, 0.0  ;;  %v6949_v40 = vadd.f32 %v15363_v63, %v16814_v18 }
 0x84a   : > { %v7783_v46 = vadd.f32 %v7725_v28, %v7504_v16 }
 0x84b   : > { %v8440_v57 = vadd.f32 %v15586_v23, %v8404_v39  ;;  %v7734_v45 = vpop.f32.mrf.mxu3  ;;  %v7227_v28 = vadd.f32 %v15499_v37, %v6949_v40 }
 0x84c   : > { %v8502_v24 = vld [vmem:[#allocation5 + $0x70] ss:$2 sm:$0xff]  ;;  %v8534_v44 = vld [vmem:[#allocation5 + $0x71] ss:$2 sm:$0xff]  ;;  %v8275_v51 = vpop.f32.mrf.mxu1  ;;  %v8061_v39 = vadd.f32 %v8003_v58, %v7783_v46 }
 0x84d   : > { %8472 = vst.msk [vmem:[#allocation5 + $0x80] sm:$0xff] %vm789_vm9, %v8440_v57  ;;  %v8337_v41 = vadd.f32 %v8275_v51, %v8059_v15  ;;  %v8558_v25 = vmax.f32 %v8502_v24, %v8534_v44  ;;  %v8012_v15 = vpop.f32.mrf.mxu0  ;;  %v7505_v57 = vadd.f32 %v7449_v62, %v7227_v28 }
 0x84f   : > { %v8373_v42 = vadd.f32 %v15580_v35, %v8337_v41  ;;  %v8570_v2 = vmax.f32 %v8557_v11, %v8558_v25  ;;  %v7784_v44 = vadd.f32 %v7728_v19, %v7505_v57  ;;  %v6950_v41 = vadd.f32 %v15381_v0, %v16815_v5  ;;  %v7458_v11 = vpop.f32.mrf.mxu2  ;;  %v16816_v0 = vld [vmem:[#allocation60_spill] sm:$0xff] }
 0x851   : > { %v8405_v3 = vmax.f32 %v8373_v42, 0.0  ;;  %8579 = vst.msk [vmem:[#allocation6 + $0x41] sm:$0xff] %vm789_vm9, %v8570_v2  ;;  %v8062_v63 = vadd.f32 %v8006_v6, %v7784_v44  ;;  %v7228_v36 = vadd.f32 %v15507_v7, %v6950_v41  ;;  %v6951_v6 = vadd.f32 %v15393_v34, %v16816_v0 }
 0x853   : > { %v8441_v12 = vadd.f32 %v15586_v23, %v8405_v3  ;;  %v7737_v42 = vpop.f32.mrf.mxu3  ;;  %v7506_v2 = vadd.f32 %v7452_v33, %v7228_v36 }
 0x854   : > { %v8278_v8 = vpop.f32.mrf.mxu1 }
 0x855   : > { %8473 = vst.msk [vmem:[#allocation5 + $0x88] sm:$0xff] %vm789_vm9, %v8441_v12  ;;  %v8338_v55 = vadd.f32 %v8278_v8, %v8060_v14  ;;  %v8015_v54 = vpop.f32.mrf.mxu0  ;;  %v7785_v19 = vadd.f32 %v7731_v30, %v7506_v2 }
 0x857   : > { %v8374_v32 = vadd.f32 %v15580_v35, %v8338_v55  ;;  %v8063_v14 = vadd.f32 %v8009_v29, %v7785_v19  ;;  %v7229_v55 = vadd.f32 %v15515_v47, %v6951_v6  ;;  %v7461_v30 = vpop.f32.mrf.mxu2  ;;  %v8853_v19 = vld [vmem:[#allocation19 + $0xf8] sm:$0xff] }
 0x858   : > { %v15885_v22 = vld [vmem:[#allocation6 + $0x41] sm:$0xff]  ;;  %8886 = vmatpush.msrb.mxu3 %v8853_v19 }
 0x859   : > { %v15887_v60 = vld [vmem:[#allocation6 + $0x40] sm:$0xff]  ;;  %v8406_v27 = vmax.f32 %v8374_v32, 0.0  ;;  %11156 = vmatmul.msk.f32.gmra.mxu2 %vm789_vm9, %v15885_v22  ;;  %v7507_v46 = vadd.f32 %v7455_v59, %v7229_v55 }
 0x85a   : > { %v15889_v52 = vld [vmem:[#allocation6 + $0x42] sm:$0xff]  ;;  %11164 = vmatmul.msk.f32.gmra.mxu3 %vm789_vm9, %v15887_v60  ;;  %v16820_v55 = vld [vmem:[#allocation152_spill] sm:$0xff] }
 0x85b   : > { %11218 = vmatmul.msk.f32.gmra.mxu0 %vm789_vm9, %v15889_v52  ;;  %v8442_v26 = vadd.f32 %v15586_v23, %v8406_v27  ;;  %v7740_v40 = vpop.f32.mrf.mxu3  ;;  %v7786_v34 = vadd.f32 %v7734_v45, %v7507_v46  ;;  %v16824_v19 = vld [vmem:[#allocation113_spill] sm:$0xff] }
 0x85c   : > { %v8281_v50 = vpop.f32.mrf.mxu1  ;;  %v8504_v21 = vld [vmem:[#allocation5 + $0x80] ss:$2 sm:$0xff]  ;;  %v8536_v9 = vld [vmem:[#allocation5 + $0x81] ss:$2 sm:$0xff] }
 0x85d   : > { %8474 = vst.msk [vmem:[#allocation5 + $0x90] sm:$0xff] %vm789_vm9, %v8442_v26  ;;  %v8339_v10 = vadd.f32 %v8281_v50, %v8061_v39  ;;  %v8559_v16 = vmax.f32 %v8504_v21, %v8536_v9  ;;  %v8018_v39 = vpop.f32.mrf.mxu0  ;;  %v16817_v26 = vld [vmem:[#allocation89_spill] sm:$0xff]  ;;  %v8064_v47 = vadd.f32 %v8012_v15, %v7786_v34  ;;  %v16822_v34 = vld [vmem:[#allocation134_spill] sm:$0xff] }
 0x85e   : > { %v6952_v50 = vadd.f32 %v15411_v53, %v16817_v26  ;;  %v8852_v21 = vld [vmem:[#allocation19 + $0xf0] sm:$0xff] }
 0x85f   : > { %v8375_v24 = vadd.f32 %v15580_v35, %v8339_v10  ;;  %v7464_v45 = vpop.f32.mrf.mxu2  ;;  %8887 = vmatpush.msrb.mxu3 %v8852_v21 }
 0x860   : > { %v7230_v57 = vadd.f32 %v15520_v38, %v6952_v50 }
 0x861   : > { %v8407_v51 = vmax.f32 %v8375_v24, 0.0 }
 0x862   : > { %v7508_v24 = vadd.f32 %v7458_v11, %v7230_v57 }
 0x863   : > { %v8443_v58 = vadd.f32 %v15586_v23, %v8407_v51  ;;  %v7743_v38 = vpop.f32.mrf.mxu3 }
 0x864   : > { %v8284_v25 = vpop.f32.mrf.mxu1  ;;  %v7787_v53 = vadd.f32 %v7737_v42, %v7508_v24  ;;  %v8763_v42 = vld [vmem:[#allocation19 + $0xb8] sm:$0xff] }
 0x865   : > { %8475 = vst.msk [vmem:[#allocation5 + $0x98] sm:$0xff] %vm789_vm9, %v8443_v58  ;;  %v8340_v37 = vadd.f32 %v8284_v25, %v8062_v63  ;;  %v16818_v63 = vld [vmem:[#allocation82_spill] sm:$0xff]  ;;  %v8021_v36 = vpop.f32.mrf.mxu0  ;;  %8796 = vmatpush.msrb.mxu2 %v8763_v42 }
 0x866   : > { %v6953_v58 = vadd.f32 %v15425_v61, %v16818_v63  ;;  %v8065_v11 = vadd.f32 %v8015_v54, %v7787_v53  ;;  %v8760_v63 = vld [vmem:[#allocation19 + $0xa0] sm:$0xff] }
 0x867   : > { %v8376_v62 = vadd.f32 %v15580_v35, %v8340_v37  ;;  %v7467_v6 = vpop.f32.mrf.mxu2 }
 0x868   : > { %v7231_v2 = vadd.f32 %v15525_v20, %v6953_v58  ;;  %v8850_v58 = vld [vmem:[#allocation19 + $0xe0] sm:$0xff] }
 0x869   : > { %v8408_v3 = vmax.f32 %v8376_v62, 0.0 }
 0x86a   : > { %v7509_v9 = vadd.f32 %v7461_v30, %v7231_v2 }
 0x86b   : > { %v8444_v12 = vadd.f32 %v15586_v23, %v8408_v3  ;;  %v8762_v3 = vld [vmem:[#allocation19 + $0xb0] sm:$0xff] }
 0x86c   : > { %v8506_v8 = vld [vmem:[#allocation5 + $0x90] ss:$2 sm:$0xff]  ;;  %v8538_v7 = vld [vmem:[#allocation5 + $0x91] ss:$2 sm:$0xff]  ;;  %v8287_v13 = vpop.f32.mrf.mxu1  ;;  %8797 = vmatpush.msrb.mxu2 %v8762_v3  ;;  %v7788_v61 = vadd.f32 %v7740_v40, %v7509_v9  ;;  %v16825_v3 = vld [vmem:[#allocation49_spill] sm:$0xff] }
 0x86d   : > { %8476 = vst.msk [vmem:[#allocation5 + $0xa0] sm:$0xff] %vm789_vm9, %v8444_v12  ;;  %v8341_v33 = vadd.f32 %v8287_v13, %v8063_v14  ;;  %v8560_v32 = vmax.f32 %v8506_v8, %v8538_v7  ;;  %v16819_v14 = vld [vmem:[#allocation68_spill] sm:$0xff]  ;;  %v7746_v7 = vpop.f32.mrf.mxu3  ;;  %v16821_v40 = vld [vmem:[#allocation99_spill] sm:$0xff]  ;;  %v6956_v21 = vadd.f32 %v16825_v3, %v16824_v19 }
 0x86e   : > { %v6954_v12 = vadd.f32 %v15439_v31, %v16819_v14  ;;  %v8066_v20 = vadd.f32 %v8018_v39, %v7788_v61  ;;  %v16832_v19 = vld [vmem:[#allocation144_spill] sm:$0xff] }
 0x86f   : > { %v8377_v27 = vadd.f32 %v15580_v35, %v8341_v33  ;;  %v8571_v18 = vmax.f32 %v8559_v16, %v8560_v32  ;;  %v8024_v32 = vpop.f32.mrf.mxu0 }
 0x870   : > { %v7232_v33 = vadd.f32 %v16820_v55, %v6954_v12 }
 0x871   : > { %v8409_v29 = vmax.f32 %v8377_v27, 0.0  ;;  %8580 = vst.msk [vmem:[#allocation6 + $0x51] sm:$0xff] %vm789_vm9, %v8571_v18 }
 0x872   : > { %v7510_v30 = vadd.f32 %v7464_v45, %v7232_v33 }
 0x873   : > { %v8445_v28 = vadd.f32 %v15586_v23, %v8409_v29  ;;  %v6955_v29 = vadd.f32 %v16822_v34, %v16821_v40  ;;  %v15978_v40 = vld [vmem:[%s16322_s9] ss:$0 sm:$0xff] }
 0x874   : > { %v8290_v10 = vpop.f32.mrf.mxu1  ;;  %v7789_v27 = vadd.f32 %v7743_v38, %v7510_v30  ;;  %v8851_v38 = vld [vmem:[#allocation19 + $0xe8] sm:$0xff] }
 0x875   : > { %8477 = vst.msk [vmem:[#allocation5 + $0xa8] sm:$0xff] %vm789_vm9, %v8445_v28  ;;  %v8342_v59 = vadd.f32 %v8290_v10, %v8064_v47  ;;  %v16823_v47 = vld [vmem:[#allocation114_spill] sm:$0xff]  ;;  %v7470_v10 = vpop.f32.mrf.mxu2  ;;  %8888 = vmatpush.msrb.mxu3 %v8851_v38  ;;  %v16827_v30 = vld [vmem:[#allocation85_spill] sm:$0xff] }
 0x876   : > { %v8067_v26 = vadd.f32 %v8021_v36, %v7789_v27  ;;  %v7233_v28 = vadd.f32 %v16823_v47, %v6955_v29  ;;  %v8849_v47 = vld [vmem:[#allocation19 + $0xd8] sm:$0xff] }
 0x877   : > { %v8378_v44 = vadd.f32 %v15580_v35, %v8342_v59  ;;  %v8027_v42 = vpop.f32.mrf.mxu0  ;;  %8889 = vmatpush.msrb.mxu3 %v8850_v58  ;;  %v16831_v58 = vld [vmem:[#allocation102_spill] sm:$0xff] }
 0x878   : > { %v15922_v51 = vld [vmem:[#allocation6 + $0x51] sm:$0xff] }
 0x879   : > { %v15924_v5 = vld [vmem:[#allocation6 + $0x50] sm:$0xff]  ;;  %v8410_v15 = vmax.f32 %v8378_v44, 0.0  ;;  %11157 = vmatmul.msk.f32.gmra.mxu2 %vm789_vm9, %v15922_v51  ;;  %v8761_v44 = vld [vmem:[#allocation19 + $0xa8] sm:$0xff]  ;;  %8890 = vmatpush.msrb.mxu3 %v8849_v47 }
 0x87a   : > { %v15926_v41 = vld [vmem:[#allocation6 + $0x52] sm:$0xff]  ;;  %11165 = vmatmul.msk.f32.gmra.mxu3 %vm789_vm9, %v15924_v5  ;;  %8798 = vmatpush.msrb.mxu2 %v8761_v44 }
 0x87b   : > { %11219 = vmatmul.msk.f32.gmra.mxu0 %vm789_vm9, %v15926_v41  ;;  %v8446_v25 = vadd.f32 %v15586_v23, %v8410_v15 }
 0x87c   : > { %v8293_v37 = vpop.f32.mrf.mxu1  ;;  %v8508_v31 = vld [vmem:[#allocation5 + $0xa0] ss:$2 sm:$0xff]  ;;  %v8540_v39 = vld [vmem:[#allocation5 + $0xa1] ss:$2 sm:$0xff]  ;;  %8799 = vmatpush.msrb.mxu2 %v8760_v63 }
 0x87d   : > { %8478 = vst.msk [vmem:[#allocation5 + $0xb0] sm:$0xff] %vm789_vm9, %v8446_v25  ;;  %v8343_v62 = vadd.f32 %v8293_v37, %v8065_v11  ;;  %v8561_v53 = vmax.f32 %v8508_v31, %v8540_v39  ;;  %v7749_v11 = vpop.f32.mrf.mxu3  ;;  %v7511_v25 = vadd.f32 %v7467_v6, %v7233_v28  ;;  %v7473_v6 = vpop.f32.mrf.mxu2  ;;  %v8759_v31 = vld [vmem:[#allocation19 + $0x98] sm:$0xff]  ;;  %v16829_v39 = vld [vmem:[#allocation57_spill] sm:$0xff]  ;;  %v16830_v63 = vld [vmem:[#allocation104_spill] sm:$0xff] }
 0x87e   : > { %8800 = vmatpush.msrb.mxu2 %v8759_v31  ;;  %v8758_v28 = vld [vmem:[#allocation19 + $0x90] sm:$0xff] }
 0x87f   : > { %v8379_v0 = vadd.f32 %v15580_v35, %v8343_v62  ;;  %v7790_v2 = vadd.f32 %v7746_v7, %v7511_v25 }
 0x880   : > { %8801 = vmatpush.msrb.mxu2 %v8758_v28 }
 0x881   : > { %v8411_v54 = vmax.f32 %v8379_v0, 0.0  ;;  %v8068_v9 = vadd.f32 %v8024_v32, %v7790_v2  ;;  %v8030_v32 = vpop.f32.mrf.mxu0 }
 0x883   : > { %v8447_v8 = vadd.f32 %v15586_v23, %v8411_v54  ;;  %v16826_v54 = vld [vmem:[#allocation140_spill] sm:$0xff] }
 0x884   : > { %v8296_v13 = vpop.f32.mrf.mxu1  ;;  %v7234_v14 = vadd.f32 %v16826_v54, %v6956_v21 }
 0x885   : > { %8479 = vst.msk [vmem:[#allocation5 + $0xb8] sm:$0xff] %vm789_vm9, %v8447_v8  ;;  %v8344_v16 = vadd.f32 %v8296_v13, %v8066_v20  ;;  %v15958_v20 = vld [vmem:[#allocation17] ss:$0 sm:$0xff]  ;;  %v7752_v7 = vpop.f32.mrf.mxu3 }
 0x886   : > { %v7512_v12 = vadd.f32 %v7470_v10, %v7234_v14  ;;  %v8848_v10 = vld [vmem:[#allocation19 + $0xd0] sm:$0xff]  ;;  %v16833_v14 = vld [vmem:[#allocation76_spill] sm:$0xff] }
 0x887   : > { %v8380_v46 = vadd.f32 %v15580_v35, %v8344_v16  ;;  %8891 = vmatpush.msrb.mxu3 %v8848_v10 }
 0x889   : > { %v8412_v18 = vmax.f32 %v8380_v46, 0.0  ;;  %v16828_v46 = vld [vmem:[#allocation81_spill] sm:$0xff]  ;;  %v8033_v2 = vpop.f32.mrf.mxu0 }
 0x88a   : > { %v6957_v27 = vadd.f32 %v16828_v46, %v16827_v30 }
 0x88b   : > { %v8448_v50 = vadd.f32 %v15586_v23, %v8412_v18 }
 0x88c   : > { %v8510_v57 = vld [vmem:[#allocation5 + $0xb0] ss:$2 sm:$0xff]  ;;  %v8542_v59 = vld [vmem:[#allocation5 + $0xb1] ss:$2 sm:$0xff]  ;;  %v8299_v24 = vpop.f32.mrf.mxu1 }
 0x88d   : > { %8480 = vst.msk [vmem:[#allocation5 + $0xc0] sm:$0xff] %vm789_vm9, %v8448_v50  ;;  %v8345_v45 = vadd.f32 %v8299_v24, %v8067_v26  ;;  %v8562_v15 = vmax.f32 %v8510_v57, %v8542_v59  ;;  %v7235_v26 = vadd.f32 %v16829_v39, %v6957_v27  ;;  %v7476_v24 = vpop.f32.mrf.mxu2  ;;  %v7755_v38 = vpop.f32.mrf.mxu3 }
 0x88f   : > { %v8381_v36 = vadd.f32 %v15580_v35, %v8345_v45  ;;  %v8572_v37 = vmax.f32 %v8561_v53, %v8562_v15  ;;  %v7513_v57 = vadd.f32 %v7473_v6, %v7235_v26  ;;  %v8757_v53 = vld [vmem:[#allocation19 + $0x88] sm:$0xff] }
 0x890   : > { %v8847_v15 = vld [vmem:[#allocation19 + $0xc8] sm:$0xff]  ;;  %8802 = vmatpush.msrb.mxu2 %v8757_v53 }
 0x891   : > { %v8413_v62 = vmax.f32 %v8381_v36, 0.0  ;;  %8581 = vst.msk [vmem:[#allocation6 + $0x61] sm:$0xff] %vm789_vm9, %v8572_v37  ;;  %v7792_v44 = vadd.f32 %v7752_v7, %v7513_v57  ;;  %8892 = vmatpush.msrb.mxu3 %v8847_v15  ;;  %v8756_v37 = vld [vmem:[#allocation19 + $0x80] sm:$0xff] }
 0x892   : > { %8803 = vmatpush.msrb.mxu2 %v8756_v37 }
 0x893   : > { %v8449_v0 = vadd.f32 %v15586_v23, %v8413_v62  ;;  %v7791_v23 = vadd.f32 %v7749_v11, %v7512_v12  ;;  %v6958_v11 = vadd.f32 %v16831_v58, %v16830_v63  ;;  %v8070_v25 = vadd.f32 %v8030_v32, %v7792_v44  ;;  %v16835_v32 = vld [vmem:[#allocation86_spill] sm:$0xff] }
 0x894   : > { %v8302_v61 = vpop.f32.mrf.mxu1  ;;  %v16836_v44 = vld [vmem:[#allocation126_spill] sm:$0xff] }
 0x895   : > { %8481 = vst.msk [vmem:[#allocation5 + $0xc8] sm:$0xff] %vm789_vm9, %v8449_v0  ;;  %v8346_v35 = vadd.f32 %v8302_v61, %v8068_v9  ;;  %v8069_v18 = vadd.f32 %v8027_v42, %v7791_v23  ;;  %v8846_v42 = vld [vmem:[#allocation19 + $0xc0] sm:$0xff]  ;;  %v7236_v3 = vadd.f32 %v16832_v19, %v6958_v11  ;;  %v7479_v12 = vpop.f32.mrf.mxu2  ;;  %v7758_v46 = vpop.f32.mrf.mxu3  ;;  %v16838_v11 = vld [vmem:[#allocation106_spill] sm:$0xff] }
 0x896   : > { %8893 = vmatpush.msrb.mxu3 %v8846_v42 }
 0x897   : > { %v8382_v8 = vadd.f32 %v15958_v20, %v8346_v35  ;;  %v7514_v9 = vadd.f32 %v7476_v24, %v7236_v3  ;;  %v16834_v35 = vld [vmem:[#allocation95_spill] sm:$0xff] }
 0x898   : > { %v15961_v13 = vld [vmem:[#allocation6 + $0x61] sm:$0xff]  ;;  %v6959_v6 = vadd.f32 %v16834_v35, %v16833_v14  ;;  %v9033_v24 = vld [vmem:[#allocation19 + $0x178] sm:$0xff] }
 0x899   : > { %v15963_v55 = vld [vmem:[#allocation6 + $0x60] sm:$0xff]  ;;  %v8414_v16 = vmax.f32 %v8382_v8, 0.0  ;;  %11158 = vmatmul.msk.f32.gmra.mxu2 %vm789_vm9, %v15961_v13  ;;  %v7793_v61 = vadd.f32 %v7755_v38, %v7514_v9  ;;  %9066 = vmatpush.msra.mxu3 %v9033_v24  ;;  %v9026_v24 = vld [vmem:[#allocation19 + $0x140] sm:$0xff] }
 0x89a   : > { %v15965_v33 = vld [vmem:[#allocation6 + $0x62] sm:$0xff]  ;;  %11166 = vmatmul.msk.f32.gmra.mxu3 %vm789_vm9, %v15963_v55  ;;  %v7237_v30 = vadd.f32 %v16835_v32, %v6959_v6 }
 0x89b   : > { %11220 = vmatmul.msk.f32.gmra.mxu0 %vm789_vm9, %v15965_v33  ;;  %v8450_v34 = vadd.f32 %v15978_v40, %v8414_v16  ;;  %v8071_v23 = vadd.f32 %v8033_v2, %v7793_v61  ;;  %v9031_v32 = vld [vmem:[#allocation19 + $0x168] sm:$0xff] }
 0x89c   : > { %v8305_v29 = vpop.f32.mrf.mxu1  ;;  %v8512_v8 = vld [vmem:[#allocation5 + $0xc0] ss:$2 sm:$0xff]  ;;  %v8544_v7 = vld [vmem:[#allocation5 + $0xc1] ss:$2 sm:$0xff]  ;;  %v7515_v47 = vadd.f32 %v7479_v12, %v7237_v30  ;;  %v8940_v30 = vld [vmem:[#allocation19 + $0x120] sm:$0xff] }
 0x89d   : > { %8482 = vst.msk [vmem:[#allocation5 + $0xd0] sm:$0xff] %vm789_vm9, %v8450_v34  ;;  %v8347_v50 = vadd.f32 %v8305_v29, %v8069_v18  ;;  %v8943_v29 = vld [vmem:[#allocation19 + $0x138] sm:$0xff]  ;;  %v8563_v39 = vmax.f32 %v8512_v8, %v8544_v7  ;;  %v7482_v63 = vpop.f32.mrf.mxu2  ;;  %v7761_v37 = vpop.f32.mrf.mxu3  ;;  %v8941_v8 = vld [vmem:[#allocation19 + $0x128] sm:$0xff] }
 0x89e   : > { %8976 = vmatpush.msra.mxu2 %v8943_v29  ;;  %v7794_v57 = vadd.f32 %v7758_v46, %v7515_v47  ;;  %v8747_v7 = vld [vmem:[#allocation6 + $0x2] sm:$0xff] }
 0x89f   : > { %v8383_v59 = vadd.f32 %v15958_v20, %v8347_v50  ;;  %v8036_v50 = vpop.f32.mrf.mxu0 }
 0x8a0   : > { %v8072_v15 = vadd.f32 %v8036_v50, %v7794_v57  ;;  %v9027_v57 = vld [vmem:[#allocation19 + $0x148] sm:$0xff] }
 0x8a1   : > { %v8415_v45 = vmax.f32 %v8383_v59, 0.0 }
 0x8a3   : > { %v8451_v36 = vadd.f32 %v15978_v40, %v8415_v45  ;;  %v16837_v45 = vld [vmem:[#allocation138_spill] sm:$0xff] }
 0x8a4   : > { %v8308_v62 = vpop.f32.mrf.mxu1  ;;  %v6960_v53 = vadd.f32 %v16837_v45, %v16836_v44  ;;  %v9124_v44 = vld [vmem:[#allocation19 + $0x1b8] sm:$0xff] }
 0x8a5   : > { %8483 = vst.msk [vmem:[#allocation5 + $0xd8] sm:$0xff] %vm789_vm9, %v8451_v36  ;;  %v8348_v21 = vadd.f32 %v8308_v62, %v8070_v25  ;;  %v8942_v62 = vld [vmem:[#allocation19 + $0x130] sm:$0xff]  ;;  %v9214_v45 = vld [vmem:[#allocation19 + $0x1f8] sm:$0xff] }
 0x8a6   : > { %v7238_v25 = vadd.f32 %v16838_v11, %v6960_v53  ;;  %8977 = vmatpush.msra.mxu2 %v8942_v62  ;;  %v9123_v53 = vld [vmem:[#allocation19 + $0x1b0] sm:$0xff]  ;;  %v9212_v11 = vld [vmem:[#allocation19 + $0x1e8] sm:$0xff]  ;;  %v9120_v62 = vld [vmem:[#allocation19 + $0x198] sm:$0xff] }
 0x8a7   : > { %v8384_v0 = vadd.f32 %v15958_v20, %v8348_v21  ;;  %v8039_v19 = vpop.f32.mrf.mxu0 }
 0x8a8   : > { %v7516_v42 = vadd.f32 %v7482_v63, %v7238_v25  ;;  %8978 = vmatpush.msra.mxu2 %v8941_v8  ;;  %v9122_v63 = vld [vmem:[#allocation19 + $0x1a8] sm:$0xff]  ;;  %v9121_v25 = vld [vmem:[#allocation19 + $0x1a0] sm:$0xff] }
 0x8a9   : > { %v8416_v54 = vmax.f32 %v8384_v0, 0.0  ;;  %v9208_v8 = vld [vmem:[#allocation19 + $0x1c8] sm:$0xff] }
 0x8aa   : > { %v7795_v0 = vadd.f32 %v7761_v37, %v7516_v42  ;;  %8979 = vmatpush.msra.mxu2 %v8940_v30  ;;  %v16059_v37 = vpop.f32.mrf.mxu2  ;;  %v16061_v42 = vpop.f32.mrf.mxu3 }
 0x8ab   : > { %v8452_v16 = vadd.f32 %v15978_v40, %v8416_v54  ;;  %v9032_v54 = vld [vmem:[#allocation19 + $0x170] sm:$0xff] }
 0x8ac   : > { %v8514_v27 = vld [vmem:[#allocation5 + $0xd0] ss:$2 sm:$0xff]  ;;  %v8546_v18 = vld [vmem:[#allocation5 + $0xd1] ss:$2 sm:$0xff]  ;;  %v8311_v34 = vpop.f32.mrf.mxu1  ;;  %9067 = vmatpush.msra.mxu3 %v9032_v54  ;;  %v8073_v14 = vadd.f32 %v8039_v19, %v7795_v0 }
 0x8ad   : > { %8484 = vst.msk [vmem:[#allocation5 + $0xe0] sm:$0xff] %vm789_vm9, %v8452_v16  ;;  %v8349_v31 = vadd.f32 %v8311_v34, %v8071_v23  ;;  %v8564_v26 = vmax.f32 %v8514_v27, %v8546_v18  ;;  %v8748_v27 = vld [vmem:[#allocation6 + $0x12] sm:$0xff] }
 0x8ae   : > { %9068 = vmatpush.msra.mxu3 %v9031_v32  ;;  %v8939_v18 = vld [vmem:[#allocation19 + $0x118] sm:$0xff] }
 0x8af   : > { %v8385_v28 = vadd.f32 %v15958_v20, %v8349_v31  ;;  %v8573_v10 = vmax.f32 %v8563_v39, %v8564_v26  ;;  %8980 = vmatpush.msra.mxu2 %v8939_v18  ;;  %v9533_v32 = vld [vmem:[#allocation22 + $0x1d0] sm:$0xff] }
 0x8b1   : > { %v8417_v59 = vmax.f32 %v8385_v28, 0.0  ;;  %8582 = vst.msk [vmem:[#allocation6 + $0x71] sm:$0xff] %vm789_vm9, %v8573_v10  ;;  %v9028_v28 = vld [vmem:[#allocation19 + $0x150] sm:$0xff]  ;;  %v8937_v10 = vld [vmem:[#allocation19 + $0x108] sm:$0xff] }
 0x8b2   : > { %v16067_v19 = vpop.f32.mrf.mxu2  ;;  %v16069_v0 = vpop.f32.mrf.mxu3 }
 0x8b3   : > { %v8453_v38 = vadd.f32 %v15978_v40, %v8417_v59  ;;  %v8936_v59 = vld [vmem:[#allocation19 + $0x100] sm:$0xff] }
 0x8b4   : > { %v8314_v58 = vpop.f32.mrf.mxu1 }
 0x8b5   : > { %8485 = vst.msk [vmem:[#allocation5 + $0xe8] sm:$0xff] %vm789_vm9, %v8453_v38  ;;  %v8350_v36 = vadd.f32 %v8314_v58, %v8072_v15  ;;  %v9213_v38 = vld [vmem:[#allocation19 + $0x1f0] sm:$0xff]  ;;  %v11413_v58 = vld [vmem:[#allocation6 + $0x11] sm:$0xff] }
 0x8b7   : > { %v8386_v2 = vadd.f32 %v15958_v20, %v8350_v36  ;;  %v9537_v36 = vld [vmem:[#allocation22 + $0x1f0] sm:$0xff] }
 0x8b8   : > { %v16003_v3 = vld [vmem:[#allocation6 + $0x71] sm:$0xff]  ;;  %9554 = vmatpush.msrb.mxu1 %v9537_v36 }
 0x8b9   : > { %v16005_v21 = vld [vmem:[#allocation6 + $0x70] sm:$0xff]  ;;  %v8418_v61 = vmax.f32 %v8386_v2, 0.0  ;;  %11159 = vmatmul.msk.f32.gmra.mxu2 %vm789_vm9, %v16003_v3 }
 0x8ba   : > { %v16007_v9 = vld [vmem:[#allocation6 + $0x72] sm:$0xff]  ;;  %11167 = vmatmul.msk.f32.gmra.mxu3 %vm789_vm9, %v16005_v21  ;;  %v16077_v54 = vpop.f32.mrf.mxu3 }
 0x8bb   : > { %11221 = vmatmul.msk.f32.gmra.mxu0 %vm789_vm9, %v16007_v9  ;;  %v8454_v35 = vadd.f32 %v15978_v40, %v8418_v61  ;;  %v9211_v2 = vld [vmem:[#allocation19 + $0x1e0] sm:$0xff]  ;;  %v9210_v61 = vld [vmem:[#allocation19 + $0x1d8] sm:$0xff] }
 0x8bc   : > { %v8317_v6 = vpop.f32.mrf.mxu1  ;;  %v8516_v34 = vld [vmem:[#allocation5 + $0xe0] ss:$2 sm:$0xff]  ;;  %v8548_v29 = vld [vmem:[#allocation5 + $0xe1] ss:$2 sm:$0xff] }
 0x8bd   : > { %8486 = vst.msk [vmem:[#allocation5 + $0xf0] sm:$0xff] %vm789_vm9, %v8454_v35  ;;  %v8351_v12 = vadd.f32 %v8317_v6, %v8073_v14  ;;  %v8565_v39 = vmax.f32 %v8516_v34, %v8548_v29  ;;  %v9535_v14 = vld [vmem:[#allocation22 + $0x1e0] sm:$0xff]  ;;  %v9209_v35 = vld [vmem:[#allocation19 + $0x1d0] sm:$0xff] }
 0x8be   : > { %9555 = vmatpush.msrb.mxu1 %v9535_v14 }
 0x8bf   : > { %v8387_v23 = vadd.f32 %v15958_v20, %v8351_v12  ;;  %v9030_v20 = vld [vmem:[#allocation19 + $0x160] sm:$0xff]  ;;  %v9118_v12 = vld [vmem:[#allocation19 + $0x188] sm:$0xff] }
 0x8c0   : > { %9069 = vmatpush.msra.mxu3 %v9030_v20  ;;  %9556 = vmatpush.msrb.mxu1 %v9533_v32  ;;  %v9531_v20 = vld [vmem:[#allocation22 + $0x1c0] sm:$0xff] }
 0x8c1   : > { %v8419_v16 = vmax.f32 %v8387_v23, 0.0  ;;  %11168 = vmatmul.msk.f32.vlgmr.msrb.gmra.mxu2 %vm789_vm9, %v8747_v7  ;;  %v9117_v7 = vld [vmem:[#allocation19 + $0x180] sm:$0xff] }
 0x8c2   : > { %11176 = vmatmul.msk.f32.vlgmr.msrb.gmra.mxu3 %vm789_vm9, %v15697_v43  ;;  %v9207_v23 = vld [vmem:[#allocation19 + $0x1c0] sm:$0xff]  ;;  %9557 = vmatpush.msrb.mxu1 %v9531_v20  ;;  %v9528_v20 = vld [vmem:[#allocation22 + $0x1a8] sm:$0xff] }
 0x8c3   : > { %v8455_v46 = vadd.f32 %v15978_v40, %v8419_v16  ;;  %v8938_v40 = vld [vmem:[#allocation19 + $0x110] sm:$0xff] }
 0x8c4   : > { %8981 = vmatpush.msra.mxu2 %v8938_v40 }
 0x8c5   : > { %8487 = vst.msk [vmem:[#allocation5 + $0xf8] sm:$0xff] %vm789_vm9, %v8455_v46 }
 0x8c6   : > { %8982 = vmatpush.msra.mxu2 %v8937_v10 }
 0x8c8   : > { %8983 = vmatpush.msra.mxu2 %v8936_v59  ;;  %v9115_v59 = vld [vmem:[#allocation6 + $0x90] sm:$0xff] }
 0x8c9   : > { %11169 = vmatmul.msk.f32.gmra.mxu2 %vm789_vm9, %v8748_v27 }
 0x8ca   : > { %11177 = vmatmul.msk.f32.gmra.mxu3 %vm789_vm9, %v15765_v56  ;;  %v9029_v56 = vld [vmem:[#allocation19 + $0x158] sm:$0xff]  ;;  %9157 = vmatpush.msrb.mxu2 %v9124_v44  ;;  %v9523_v44 = vld [vmem:[#allocation22 + $0x180] sm:$0xff] }
 0x8cb   : > { %9070 = vmatpush.msra.mxu3 %v9029_v56 }
 0x8cc   : > { %v8518_v43 = vld [vmem:[#allocation5 + $0xf0] ss:$2 sm:$0xff]  ;;  %v8550_v31 = vld [vmem:[#allocation5 + $0xf1] ss:$2 sm:$0xff]  ;;  %9158 = vmatpush.msrb.mxu2 %v9123_v53 }
 0x8cd   : > { %v8566_v26 = vmax.f32 %v8518_v43, %v8550_v31  ;;  %9071 = vmatpush.msra.mxu3 %v9028_v28  ;;  %v11414_v43 = vld [vmem:[#allocation6 + $0x20] sm:$0xff]  ;;  %v9527_v28 = vld [vmem:[#allocation22 + $0x1a0] sm:$0xff] }
 0x8ce   : > { %9159 = vmatpush.msrb.mxu2 %v9122_v63 }
 0x8cf   : > { %v8574_v50 = vmax.f32 %v8565_v39, %v8566_v26  ;;  %9072 = vmatpush.msra.mxu3 %v9027_v57  ;;  %v9529_v26 = vld [vmem:[#allocation22 + $0x1b0] sm:$0xff] }
 0x8d0   : > { %9160 = vmatpush.msrb.mxu2 %v9121_v25  ;;  %9558 = vmatpush.msrb.mxu1 %v9529_v26  ;;  %v9519_v25 = vld [vmem:[#allocation22 + $0x160] sm:$0xff]  ;;  %v9522_v26 = vld [vmem:[#allocation22 + $0x178] sm:$0xff] }
 0x8d1   : > { %11170 = vmatmul.msk.f32.gmra.mxu2 %vm789_vm9, %v15767_v17  ;;  %8583 = vst.msk [vmem:[#allocation6 + $0x81] sm:$0xff] %vm789_vm9, %v8574_v50  ;;  %9073 = vmatpush.msra.mxu3 %v9026_v24  ;;  %v9205_v24 = vld [vmem:[#allocation6 + $0x91] sm:$0xff] }
 0x8d2   : > { %11178 = vmatmul.msk.f32.gmra.mxu3 %vm789_vm9, %v15838_v49  ;;  %9161 = vmatpush.msrb.mxu2 %v9120_v62  ;;  %v9538_v62 = vld [vmem:[#allocation22 + $0x1f8] sm:$0xff] }
 0x8d3   : > { %9247 = vmatpush.msrb.mxu3 %v9214_v45  ;;  %9559 = vmatpush.msrb.mxu1 %v9527_v28  ;;  %v9492_v28 = vld [vmem:[#allocation22 + $0xb0] sm:$0xff] }
 0x8d5   : > { %9248 = vmatpush.msrb.mxu3 %v9213_v38 }
 0x8d7   : > { %9249 = vmatpush.msrb.mxu3 %v9212_v11 }
 0x8d8   : > { %v16031_v47 = vld [vmem:[#allocation6 + $0x82] sm:$0xff] }
 0x8d9   : > { %11171 = vmatmul.msk.f32.gmra.mxu2 %vm789_vm9, %v15840_v1  ;;  %11222 = vmatmul.msk.f32.gmra.mxu0 %vm789_vm9, %v16031_v47  ;;  %v16051_v15 = vld [vmem:[#allocation6 + $0x80] sm:$0xff] }
 0x8da   : > { %11179 = vmatmul.msk.f32.gmra.mxu3 %vm789_vm9, %v15887_v60  ;;  %v8934_v18 = vld [vmem:[#allocation6 + $0x81] sm:$0xff] }
 0x8db   : > { %9250 = vmatpush.msrb.mxu3 %v9211_v2 }
 0x8dd   : > { %9251 = vmatpush.msrb.mxu3 %v9210_v61  ;;  %v9536_v61 = vld [vmem:[#allocation22 + $0x1e8] sm:$0xff] }
 0x8df   : > { %9252 = vmatpush.msrb.mxu3 %v9209_v35  ;;  %v9534_v35 = vld [vmem:[#allocation22 + $0x1d8] sm:$0xff] }
 0x8e1   : > { %11172 = vmatmul.msk.f32.gmra.mxu2 %vm789_vm9, %v15889_v52  ;;  %9253 = vmatpush.msrb.mxu3 %v9208_v8  ;;  %v9530_v8 = vld [vmem:[#allocation22 + $0x1b8] sm:$0xff] }
 0x8e2   : > { %11180 = vmatmul.msk.f32.gmra.mxu3 %vm789_vm9, %v15924_v5 }
 0x8e3   : > { %9254 = vmatpush.msrb.mxu3 %v9207_v23 }
 0x8e9   : > { %11173 = vmatmul.msk.f32.gmra.mxu2 %vm789_vm9, %v15926_v41 }
 0x8ea   : > { %11181 = vmatmul.msk.f32.gmra.mxu3 %vm789_vm9, %v15963_v55 }
 0x8f1   : > { %11174 = vmatmul.msk.f32.gmra.mxu2 %vm789_vm9, %v15965_v33 }
 0x8f2   : > { %11182 = vmatmul.msk.f32.gmra.mxu3 %vm789_vm9, %v16005_v21 }
 0x8f9   : > { %11175 = vmatmul.msk.f32.gmra.mxu2 %vm789_vm9, %v16007_v9 }
 0x8fa   : > { %11183 = vmatmul.msk.f32.gmra.mxu3 %vm789_vm9, %v16051_v15 }
 0x901   : > { %11184 = vmatmul.msk.f32.vlgmr.msra.gmra.mxu2 %vm789_vm9, %v11413_v58 }
 0x902   : > { %11192 = vmatmul.msk.f32.vlgmr.msra.gmra.mxu3 %vm789_vm9, %v8748_v27 }
 0x909   : > { %11185 = vmatmul.msk.f32.gmra.mxu2 %vm789_vm9, %v15763_v4  ;;  %v16075_v4 = vpop.f32.mrf.mxu2 }
 0x90a   : > { %11193 = vmatmul.msk.f32.gmra.mxu3 %vm789_vm9, %v15767_v17  ;;  %v9119_v17 = vld [vmem:[#allocation19 + $0x190] sm:$0xff] }
 0x90b   : > { %9162 = vmatpush.msrb.mxu2 %v9119_v17 }
 0x90d   : > { %9163 = vmatpush.msrb.mxu2 %v9118_v12  ;;  %v9532_v12 = vld [vmem:[#allocation22 + $0x1c8] sm:$0xff] }
 0x90f   : > { %9164 = vmatpush.msrb.mxu2 %v9117_v7  ;;  %v9500_v7 = vld [vmem:[#allocation22 + $0xf0] sm:$0xff] }
 0x910   : > { %9615 = vmatpush.msra.mxu3 %v9500_v7  ;;  %v9513_v7 = vld [vmem:[#allocation22 + $0x130] sm:$0xff] }
 0x911   : > { %11186 = vmatmul.msk.f32.gmra.mxu2 %vm789_vm9, %v15836_v48  ;;  %v16083_v6 = vpop.f32.mrf.mxu2 }
 0x912   : > { %11194 = vmatmul.msk.f32.gmra.mxu3 %vm789_vm9, %v15840_v1  ;;  %v16085_v1 = vpop.f32.mrf.mxu3  ;;  %9577 = vmatpush.msra.mxu2 %v9538_v62  ;;  %v9488_v62 = vld [vmem:[#allocation22 + $0x90] sm:$0xff] }
 0x914   : > { %9578 = vmatpush.msra.mxu2 %v9536_v61 }
 0x916   : > { %9579 = vmatpush.msra.mxu2 %v9534_v35  ;;  %v9515_v35 = vld [vmem:[#allocation22 + $0x140] sm:$0xff] }
 0x918   : > { %9580 = vmatpush.msra.mxu2 %v9532_v12  ;;  %v9516_v12 = vld [vmem:[#allocation22 + $0x148] sm:$0xff] }
 0x919   : > { %11187 = vmatmul.msk.f32.gmra.mxu2 %vm789_vm9, %v15885_v22 }
 0x91a   : > { %11195 = vmatmul.msk.f32.gmra.mxu3 %vm789_vm9, %v15889_v52  ;;  %v16091_v52 = vpop.f32.mrf.mxu2  ;;  %v16093_v16 = vpop.f32.mrf.mxu3  ;;  %9581 = vmatpush.msra.mxu2 %v9530_v8  ;;  %v9486_v8 = vld [vmem:[#allocation22 + $0x80] sm:$0xff] }
 0x91c   : > { %9582 = vmatpush.msra.mxu2 %v9528_v20  ;;  %v9514_v20 = vld [vmem:[#allocation22 + $0x138] sm:$0xff] }
 0x921   : > { %11188 = vmatmul.msk.f32.gmra.mxu2 %vm789_vm9, %v15922_v51 }
 0x922   : > { %11196 = vmatmul.msk.f32.gmra.mxu3 %vm789_vm9, %v15926_v41  ;;  %v16099_v30 = vpop.f32.mrf.mxu2  ;;  %v16101_v46 = vpop.f32.mrf.mxu3 }
 0x929   : > { %11189 = vmatmul.msk.f32.gmra.mxu2 %vm789_vm9, %v15961_v13 }
 0x92a   : > { %11197 = vmatmul.msk.f32.gmra.mxu3 %vm789_vm9, %v15965_v33  ;;  %v16107_v41 = vpop.f32.mrf.mxu2  ;;  %v16109_v27 = vpop.f32.mrf.mxu3 }
 0x931   : > { %11190 = vmatmul.msk.f32.gmra.mxu2 %vm789_vm9, %v16003_v3 }
 0x932   : > { %11198 = vmatmul.msk.f32.gmra.mxu3 %vm789_vm9, %v16007_v9  ;;  %v11415_v9 = vld [vmem:[#allocation6 + $0x21] sm:$0xff] }
 0x939   : > { %11191 = vmatmul.msk.f32.gmra.mxu2 %vm789_vm9, %v8934_v18 }
 0x93a   : > { %11199 = vmatmul.msk.f32.gmra.mxu3 %vm789_vm9, %v16031_v47 }
 0x93c   : > { %v8679_v33 = vpop.f32.mrf.mxu2 }
 0x93d   : > { %v8744_v34 = vpop.f32.mrf.mxu3 }
 0x93e   : > { %v16114_v29 = vadd.f32 %v8744_v34, %v8679_v33  ;;  %v9526_v33 = vld [vmem:[#allocation22 + $0x198] sm:$0xff]  ;;  %v9496_v34 = vld [vmem:[#allocation22 + $0xd0] sm:$0xff] }
 0x93f   : > { %9583 = vmatpush.msra.mxu2 %v9526_v33 }
 0x941   : > { %11200 = vmatmul.msk.f32.vlgmr.msrb.gmra.mxu2 %vm789_vm9, %v11414_v43  ;;  %v9524_v43 = vld [vmem:[#allocation22 + $0x188] sm:$0xff] }
 0x942   : > { %11208 = vmatmul.msk.f32.vlgmr.msrb.gmra.mxu3 %vm789_vm9, %v11415_v9  ;;  %v9494_v9 = vld [vmem:[#allocation22 + $0xc0] sm:$0xff]  ;;  %9584 = vmatpush.msra.mxu2 %v9524_v43 }
 0x943   : > { %v9482_v43 = vld [vmem:[#allocation22 + $0x60] sm:$0xff] }
 0x944   : > { %v16118_v31 = vpop.f32.mrf.mxu2  ;;  %9585 = vmatpush.msra.mxu2 %v9522_v26 }
 0x945   : > { %v16120_v39 = vpop.f32.mrf.mxu3 }
 0x949   : > { %11201 = vmatmul.msk.f32.gmra.mxu2 %vm789_vm9, %v15838_v49 }
 0x94a   : > { %11209 = vmatmul.msk.f32.gmra.mxu3 %vm789_vm9, %v15836_v48 }
 0x94c   : > { %v16126_v50 = vpop.f32.mrf.mxu2 }
 0x94d   : > { %v16128_v56 = vpop.f32.mrf.mxu3 }
 0x951   : > { %11202 = vmatmul.msk.f32.gmra.mxu2 %vm789_vm9, %v15887_v60  ;;  %v9295_v60 = vld [vmem:[#allocation6 + $0x92] sm:$0xff] }
 0x952   : > { %11210 = vmatmul.msk.f32.gmra.mxu3 %vm789_vm9, %v15885_v22  ;;  %11223 = vmatmul.msk.f32.gmra.mxu0 %vm789_vm9, %v9295_v60 }
 0x954   : > { %v16134_v40 = vpop.f32.mrf.mxu2 }
 0x955   : > { %v16136_v47 = vpop.f32.mrf.mxu3 }
 0x959   : > { %11203 = vmatmul.msk.f32.gmra.mxu2 %vm789_vm9, %v15924_v5  ;;  %v9525_v5 = vld [vmem:[#allocation22 + $0x190] sm:$0xff] }
 0x95a   : > { %11211 = vmatmul.msk.f32.gmra.mxu3 %vm789_vm9, %v15922_v51  ;;  %9560 = vmatpush.msrb.mxu1 %v9525_v5 }
 0x95c   : > { %v16142_v48 = vpop.f32.mrf.mxu2  ;;  %9561 = vmatpush.msrb.mxu1 %v9523_v44  ;;  %v8724_v44 = vadd.f32 %v16061_v42, %v16059_v37 }
 0x95d   : > { %v16144_v49 = vpop.f32.mrf.mxu3 }
 0x95e   : > { %v8829_v61 = vadd.f32 %v16118_v31, %v8724_v44  ;;  %v9511_v31 = vld [vmem:[#allocation22 + $0x120] sm:$0xff] }
 0x960   : > { %v8919_v42 = vadd.f32 %v16120_v39, %v8829_v61  ;;  %v9507_v39 = vld [vmem:[#allocation22 + $0x100] sm:$0xff]  ;;  %v9696_v61 = vld [vmem:[#allocation22 + $0x2f0] sm:$0xff] }
 0x961   : > { %11204 = vmatmul.msk.f32.gmra.mxu2 %vm789_vm9, %v15963_v55 }
 0x962   : > { %11212 = vmatmul.msk.f32.gmra.mxu3 %vm789_vm9, %v15961_v13 }
 0x964   : > { %v16151_v22 = vpop.f32.mrf.mxu2 }
 0x965   : > { %v16153_v10 = vpop.f32.mrf.mxu3 }
 0x969   : > { %11205 = vmatmul.msk.f32.gmra.mxu2 %vm789_vm9, %v16005_v21 }
 0x96a   : > { %11213 = vmatmul.msk.f32.gmra.mxu3 %vm789_vm9, %v16003_v3 }
 0x96c   : > { %v16159_v51 = vpop.f32.mrf.mxu2 }
 0x96d   : > { %v16161_v57 = vpop.f32.mrf.mxu3 }
 0x971   : > { %11206 = vmatmul.msk.f32.gmra.mxu2 %vm789_vm9, %v16051_v15  ;;  %v9521_v15 = vld [vmem:[#allocation22 + $0x170] sm:$0xff] }
 0x972   : > { %11214 = vmatmul.msk.f32.gmra.mxu3 %vm789_vm9, %v8934_v18  ;;  %9562 = vmatpush.msrb.mxu1 %v9521_v15  ;;  %v9498_v18 = vld [vmem:[#allocation22 + $0xe0] sm:$0xff]  ;;  %v9517_v15 = vld [vmem:[#allocation22 + $0x150] sm:$0xff] }
 0x973   : > { %9616 = vmatpush.msra.mxu3 %v9498_v18  ;;  %v9484_v18 = vld [vmem:[#allocation22 + $0x70] sm:$0xff] }
 0x974   : > { %v16166_v13 = vpop.f32.mrf.mxu2  ;;  %9563 = vmatpush.msrb.mxu1 %v9519_v25  ;;  %v9518_v25 = vld [vmem:[#allocation22 + $0x158] sm:$0xff] }
 0x975   : > { %v16168_v55 = vpop.f32.mrf.mxu3  ;;  %9617 = vmatpush.msra.mxu3 %v9496_v34  ;;  %v9512_v34 = vld [vmem:[#allocation22 + $0x128] sm:$0xff] }
 0x976   : > { %9564 = vmatpush.msrb.mxu1 %v9517_v15  ;;  %v9508_v15 = vld [vmem:[#allocation22 + $0x108] sm:$0xff] }
 0x977   : > { %9618 = vmatpush.msra.mxu3 %v9494_v9  ;;  %v8727_v9 = vadd.f32 %v16069_v0, %v16067_v19  ;;  %v9476_v0 = vld [vmem:[#allocation22 + $0x30] sm:$0xff] }
 0x978   : > { %9565 = vmatpush.msrb.mxu1 %v9515_v35 }
 0x979   : > { %11207 = vmatmul.msk.f32.gmra.mxu2 %vm789_vm9, %v9115_v59  ;;  %9619 = vmatpush.msra.mxu3 %v9492_v28  ;;  %v9520_v59 = vld [vmem:[#allocation22 + $0x168] sm:$0xff]  ;;  %v9509_v28 = vld [vmem:[#allocation22 + $0x110] sm:$0xff]  ;;  %v8830_v44 = vadd.f32 %v16126_v50, %v8727_v9  ;;  %v16221_v9 = vld [vmem:[#allocation20] ss:$0 sm:$0xff] }
 0x97a   : > { %11215 = vmatmul.msk.f32.gmra.mxu3 %vm789_vm9, %v9205_v24  ;;  %v9490_v24 = vld [vmem:[#allocation22 + $0xa0] sm:$0xff]  ;;  %9586 = vmatpush.msra.mxu2 %v9520_v59  ;;  %v9510_v59 = vld [vmem:[#allocation22 + $0x118] sm:$0xff] }
 0x97b   : > { %9620 = vmatpush.msra.mxu3 %v9490_v24  ;;  %9566 = vmatpush.msrb.mxu1 %v9513_v7  ;;  %v9480_v24 = vld [vmem:[#allocation22 + $0x50] sm:$0xff]  ;;  %v8920_v50 = vadd.f32 %v16128_v56, %v8830_v44  ;;  %v9495_v56 = vld [vmem:[#allocation22 + $0xc8] sm:$0xff]  ;;  %v9470_v44 = vld [vmem:[#allocation22] sm:$0xff] }
 0x97c   : > { %v16172_v3 = vpop.f32.mrf.mxu2  ;;  %9587 = vmatpush.msra.mxu2 %v9518_v25  ;;  %v9478_v25 = vld [vmem:[#allocation22 + $0x40] sm:$0xff] }
 0x97d   : > { %v16174_v21 = vpop.f32.mrf.mxu3  ;;  %9621 = vmatpush.msra.mxu3 %v9488_v62  ;;  %9567 = vmatpush.msrb.mxu1 %v9511_v31  ;;  %v9501_v62 = vld [vmem:[#allocation22 + $0xf8] sm:$0xff]  ;;  %v9692_v31 = vld [vmem:[#allocation22 + $0x2d0] sm:$0xff] }
 0x97e   : > { %9588 = vmatpush.msra.mxu2 %v9516_v12  ;;  %v9499_v12 = vld [vmem:[#allocation22 + $0xe8] sm:$0xff] }
 0x97f   : > { %9622 = vmatpush.msra.mxu3 %v9486_v8  ;;  %9568 = vmatpush.msrb.mxu1 %v9509_v28  ;;  %v9694_v8 = vld [vmem:[#allocation22 + $0x2e0] sm:$0xff] }
 0x980   : > { %9589 = vmatpush.msra.mxu2 %v9514_v20  ;;  %v9474_v20 = vld [vmem:[#allocation22 + $0x20] sm:$0xff] }
 0x981   : > { %9623 = vmatpush.msra.mxu3 %v9484_v18  ;;  %9569 = vmatpush.msrb.mxu1 %v9507_v39  ;;  %v9346_v18 = vpop.f32.mrf.mxu0  ;;  %v9690_v28 = vld [vmem:[#allocation22 + $0x2c0] sm:$0xff]  ;;  %v9493_v39 = vld [vmem:[#allocation22 + $0xb8] sm:$0xff] }
 0x982   : > { %9590 = vmatpush.msra.mxu2 %v9512_v34 }
 0x983   : > { %9624 = vmatpush.msra.mxu3 %v9482_v43  ;;  %9638 = vmatpush.msra.mxu1 %v9501_v62 }
 0x984   : > { %v16176_v45 = vpop.f32.mrf.mxu2  ;;  %9591 = vmatpush.msra.mxu2 %v9510_v59 }
 0x985   : > { %v16178_v53 = vpop.f32.mrf.mxu3  ;;  %v9009_v26 = vadd.f32 %v16176_v45, %v8919_v42  ;;  %9625 = vmatpush.msra.mxu3 %v9480_v24  ;;  %9639 = vmatpush.msra.mxu1 %v9499_v12  ;;  %v9497_v42 = vld [vmem:[#allocation22 + $0xd8] sm:$0xff] }
 0x986   : > { %9592 = vmatpush.msra.mxu2 %v9508_v15 }
 0x987   : > { %v9099_v19 = vadd.f32 %v16178_v53, %v9009_v26  ;;  %9626 = vmatpush.msra.mxu3 %v9478_v25  ;;  %v8730_v53 = vadd.f32 %v16077_v54, %v16075_v4  ;;  %9640 = vmatpush.msra.mxu1 %v9497_v42  ;;  %v9472_v26 = vld [vmem:[#allocation22 + $0x10] sm:$0xff]  ;;  %v9697_v54 = vld [vmem:[#allocation22 + $0x2f8] sm:$0xff] }
 0x988   : > { %9713 = vmatpush.msrb.mxu2 %v9696_v61  ;;  %v9688_v4 = vld [vmem:[#allocation22 + $0x2b0] sm:$0xff]  ;;  %v9693_v42 = vld [vmem:[#allocation22 + $0x2d8] sm:$0xff] }
 0x989   : > { %9627 = vmatpush.msra.mxu3 %v9476_v0  ;;  %v8831_v59 = vadd.f32 %v16134_v40, %v8730_v53  ;;  %9641 = vmatpush.msra.mxu1 %v9495_v56  ;;  %v16229_v25 = vld [vmem:[%s16325_s12] ss:$0 sm:$0xff]  ;;  %v9686_v0 = vld [vmem:[#allocation22 + $0x2a0] sm:$0xff]  ;;  %v9691_v56 = vld [vmem:[#allocation22 + $0x2c8] sm:$0xff] }
 0x98a   : > { %9714 = vmatpush.msrb.mxu2 %v9694_v8  ;;  %v9798_v40 = vld [vmem:[#allocation22 + $0x3f0] sm:$0xff]  ;;  %v9796_v8 = vld [vmem:[#allocation22 + $0x3e0] sm:$0xff] }
 0x98b   : > { %9628 = vmatpush.msra.mxu3 %v9474_v20  ;;  %9642 = vmatpush.msra.mxu1 %v9493_v39  ;;  %v9489_v20 = vld [vmem:[#allocation22 + $0x98] sm:$0xff] }
 0x98c   : > { %v16180_v38 = vpop.f32.mrf.mxu2  ;;  %9715 = vmatpush.msrb.mxu2 %v9692_v31  ;;  %9815 = vmatpush.msra.mxu0 %v9798_v40  ;;  %v9678_v40 = vld [vmem:[#allocation22 + $0x260] sm:$0xff] }
 0x98d   : > { %v16182_v63 = vpop.f32.mrf.mxu3  ;;  %v9010_v34 = vadd.f32 %v16180_v38, %v8920_v50  ;;  %9629 = vmatpush.msra.mxu3 %v9472_v26  ;;  %v9349_v50 = vpop.f32.mrf.mxu0  ;;  %v9682_v26 = vld [vmem:[#allocation22 + $0x280] sm:$0xff] }
 0x98e   : > { %9716 = vmatpush.msrb.mxu2 %v9690_v28  ;;  %9816 = vmatpush.msra.mxu0 %v9796_v8  ;;  %v9792_v28 = vld [vmem:[#allocation22 + $0x3c0] sm:$0xff]  ;;  %v9685_v8 = vld [vmem:[#allocation22 + $0x298] sm:$0xff] }
 0x98f   : > { %v9100_v38 = vadd.f32 %v16182_v63, %v9010_v34  ;;  %9630 = vmatpush.msra.mxu3 %v9470_v44  ;;  %v9689_v44 = vld [vmem:[#allocation22 + $0x2b8] sm:$0xff] }
 0x990   : > { %9717 = vmatpush.msrb.mxu2 %v9688_v4 }
 0x991   : > { %9736 = vmatpush.msrb.mxu3 %v9697_v54  ;;  %v9790_v54 = vld [vmem:[#allocation22 + $0x3b0] sm:$0xff] }
 0x992   : > { %9718 = vmatpush.msrb.mxu2 %v9686_v0 }
 0x994   : > { %v16184_v58 = vpop.f32.mrf.mxu2 }
 0x995   : > { %v16186_v11 = vpop.f32.mrf.mxu3 }
 0x99c   : > { %v16188_v36 = vpop.f32.mrf.mxu2 }
 0x99d   : > { %v16190_v2 = vpop.f32.mrf.mxu3 }
 0x9a4   : > { %v16192_v17 = vpop.f32.mrf.mxu2 }
 0x9a5   : > { %v16194_v14 = vpop.f32.mrf.mxu3 }
 0x9ac   : > { %v16196_v23 = vpop.f32.mrf.mxu2 }
 0x9ad   : > { %v16198_v32 = vpop.f32.mrf.mxu3 }
 0x9b4   : > { %v16200_v60 = vpop.f32.mrf.mxu2 }
 0x9b5   : > { %v16202_v5 = vpop.f32.mrf.mxu3 }
 0x9bc   : > { %v16207_v33 = vpop.f32.mrf.mxu2 }
 0x9bd   : > { %v16209_v37 = vpop.f32.mrf.mxu3 }
 0x9c4   : > { %v9166_v45 = vpop.f32.mrf.mxu2 }
 0x9c5   : > { %v9256_v35 = vpop.f32.mrf.mxu3  ;;  %v9190_v7 = vadd.f32 %v9166_v45, %v9099_v19  ;;  %v9491_v19 = vld [vmem:[#allocation22 + $0xa8] sm:$0xff] }
 0x9c6   : > { %v9695_v45 = vld [vmem:[#allocation22 + $0x2e8] sm:$0xff]  ;;  %9643 = vmatpush.msra.mxu1 %v9491_v19 }
 0x9c7   : > { %v9280_v43 = vadd.f32 %v9256_v35, %v9190_v7  ;;  %v8921_v35 = vadd.f32 %v16136_v47, %v8831_v59  ;;  %v8733_v7 = vadd.f32 %v16085_v1, %v16083_v6  ;;  %9737 = vmatpush.msrb.mxu3 %v9695_v45  ;;  %v9794_v47 = vld [vmem:[#allocation22 + $0x3d0] sm:$0xff]  ;;  %v9502_v59 = vld [vmem:[#allocation8 + $0x1] sm:$0xf]  ;;  %v9788_v45 = vld [vmem:[#allocation22 + $0x3a0] sm:$0xff] }
 0x9c8   : > { %9644 = vmatpush.msra.mxu1 %v9489_v20  ;;  %9817 = vmatpush.msra.mxu0 %v9794_v47  ;;  %9543 = vst [vmem:[#allocation1] ss:$2 sm:$0xff] %v9502_v59  ;;  %v9670_v59 = vld [vmem:[#allocation22 + $0x220] sm:$0xff] }
 0x9c9   : > { %v9370_v24 = vadd.f32 %v9346_v18, %v9280_v43  ;;  %v9684_v18 = vld [vmem:[#allocation22 + $0x290] sm:$0xff]  ;;  %v9011_v31 = vadd.f32 %v16184_v58, %v8921_v35  ;;  %9738 = vmatpush.msrb.mxu3 %v9693_v42  ;;  %v9487_v43 = vld [vmem:[#allocation22 + $0x88] sm:$0xff]  ;;  %v8832_v6 = vadd.f32 %v16142_v48, %v8733_v7  ;;  %v9485_v58 = vld [vmem:[#allocation22 + $0x78] sm:$0xff]  ;;  %v8736_v35 = vadd.f32 %v16093_v16, %v16091_v52 }
 0x9ca   : > { %9719 = vmatpush.msrb.mxu2 %v9684_v18  ;;  %9645 = vmatpush.msra.mxu1 %v9487_v43  ;;  %v9479_v52 = vld [vmem:[#allocation22 + $0x48] sm:$0xff]  ;;  %v9674_v16 = vld [vmem:[#allocation22 + $0x240] sm:$0xff] }
 0x9cb   : > { %v9382_v15 = vadd.f32 %v16221_v9, %v9370_v24  ;;  %9739 = vmatpush.msrb.mxu3 %v9691_v56  ;;  %v9680_v24 = vld [vmem:[#allocation22 + $0x270] sm:$0xff]  ;;  %v9101_v39 = vadd.f32 %v16186_v11, %v9011_v31  ;;  %9818 = vmatpush.msra.mxu0 %v9792_v28  ;;  %v9352_v11 = vpop.f32.mrf.mxu0  ;;  %v8833_v18 = vadd.f32 %v16151_v22, %v8736_v35  ;;  %v9683_v31 = vld [vmem:[#allocation22 + $0x288] sm:$0xff] }
 0x9cc   : > { %v9169_v62 = vpop.f32.mrf.mxu2  ;;  %9720 = vmatpush.msrb.mxu2 %v9682_v26  ;;  %9646 = vmatpush.msra.mxu1 %v9485_v58  ;;  %v9681_v26 = vld [vmem:[#allocation22 + $0x278] sm:$0xff]  ;;  %v9782_v56 = vld [vmem:[#allocation22 + $0x370] sm:$0xff]  ;;  %v9475_v28 = vld [vmem:[#allocation22 + $0x28] sm:$0xff] }
 0x9cd   : > { %v9259_v61 = vpop.f32.mrf.mxu3  ;;  %v9390_v63 = vmax.f32 %v9382_v15, 0.0  ;;  %v9191_v12 = vadd.f32 %v9169_v62, %v9100_v38  ;;  %9740 = vmatpush.msrb.mxu3 %v9689_v44  ;;  %v9483_v15 = vld [vmem:[#allocation22 + $0x68] sm:$0xff]  ;;  %9819 = vmatpush.msra.mxu0 %v9790_v54 }
 0x9ce   : > { %9721 = vmatpush.msrb.mxu2 %v9680_v24  ;;  %v9687_v62 = vld [vmem:[#allocation22 + $0x2a8] sm:$0xff]  ;;  %9647 = vmatpush.msra.mxu1 %v9483_v15  ;;  %v8923_v24 = vadd.f32 %v16153_v10, %v8833_v18  ;;  %v9668_v15 = vld [vmem:[#allocation22 + $0x210] sm:$0xff] }
 0x9cf   : > { %v9402_v53 = vadd.f32 %v16229_v25, %v9390_v63  ;;  %v9281_v34 = vadd.f32 %v9259_v61, %v9191_v12  ;;  %v8922_v61 = vadd.f32 %v16144_v49, %v8832_v6  ;;  %9741 = vmatpush.msrb.mxu3 %v9687_v62  ;;  %v9481_v63 = vld [vmem:[#allocation22 + $0x58] sm:$0xff]  ;;  %v9676_v12 = vld [vmem:[#allocation22 + $0x250] sm:$0xff]  ;;  %9820 = vmatpush.msra.mxu0 %v9788_v45  ;;  %v9679_v58 = vld [vmem:[#allocation22 + $0x268] sm:$0xff] }
 0x9d0   : > { %9722 = vmatpush.msrb.mxu2 %v9678_v40  ;;  %9648 = vmatpush.msra.mxu1 %v9481_v63  ;;  %v9786_v49 = vld [vmem:[#allocation22 + $0x390] sm:$0xff]  ;;  %v9677_v40 = vld [vmem:[#allocation22 + $0x258] sm:$0xff]  ;;  %v9013_v62 = vadd.f32 %v16192_v17, %v8923_v24  ;;  %v9471_v63 = vld [vmem:[#allocation22 + $0x8] sm:$0xff] }
 0x9d1   : > { %9410 = vst [vmem:[#allocation7] sm:$0xff] %v9402_v53  ;;  %v9371_v1 = vadd.f32 %v9349_v50, %v9281_v34  ;;  %v9012_v50 = vadd.f32 %v16188_v36, %v8922_v61  ;;  %9742 = vmatpush.msrb.mxu3 %v9685_v8  ;;  %9821 = vmatpush.msra.mxu0 %v9786_v49  ;;  %v9784_v53 = vld [vmem:[#allocation22 + $0x380] sm:$0xff]  ;;  %v9477_v36 = vld [vmem:[#allocation22 + $0x38] sm:$0xff]  ;;  %v9672_v34 = vld [vmem:[#allocation22 + $0x230] sm:$0xff] }
 0x9d2   : > { %9723 = vmatpush.msrb.mxu2 %v9676_v12  ;;  %9649 = vmatpush.msra.mxu1 %v9479_v52  ;;  %v9666_v17 = vld [vmem:[#allocation22 + $0x200] sm:$0xff]  ;;  %v9675_v12 = vld [vmem:[#allocation22 + $0x248] sm:$0xff]  ;;  %v9774_v49 = vld [vmem:[#allocation22 + $0x330] sm:$0xff] }
 0x9d3   : > { %v9383_v4 = vadd.f32 %v16221_v9, %v9371_v1  ;;  %v9102_v47 = vadd.f32 %v16190_v2, %v9012_v50  ;;  %9743 = vmatpush.msrb.mxu3 %v9683_v31  ;;  %9822 = vmatpush.msra.mxu0 %v9784_v53  ;;  %v9780_v2 = vld [vmem:[#allocation22 + $0x360] sm:$0xff]  ;;  %v9355_v54 = vpop.f32.mrf.mxu0  ;;  %v9103_v50 = vadd.f32 %v16194_v14, %v9013_v62  ;;  %v9671_v52 = vld [vmem:[#allocation22 + $0x228] sm:$0xff] }
 0x9d4   : > { %v9172_v48 = vpop.f32.mrf.mxu2  ;;  %9724 = vmatpush.msrb.mxu2 %v9674_v16  ;;  %9650 = vmatpush.msra.mxu1 %v9477_v36  ;;  %v9776_v8 = vld [vmem:[#allocation22 + $0x340] sm:$0xff]  ;;  %v8742_v14 = vadd.f32 %v16109_v27, %v16107_v41 }
 0x9d5   : > { %v9262_v38 = vpop.f32.mrf.mxu3  ;;  %v9391_v19 = vmax.f32 %v9383_v4, 0.0  ;;  %v9192_v0 = vadd.f32 %v9172_v48, %v9101_v39  ;;  %9744 = vmatpush.msrb.mxu3 %v9681_v26  ;;  %9823 = vmatpush.msra.mxu0 %v9782_v56  ;;  %v8739_v48 = vadd.f32 %v16101_v46, %v16099_v30  ;;  %v9772_v36 = vld [vmem:[#allocation22 + $0x320] sm:$0xff] }
 0x9d6   : > { %9725 = vmatpush.msrb.mxu2 %v9672_v34  ;;  %9651 = vmatpush.msra.mxu1 %v9475_v28  ;;  %v9768_v28 = vld [vmem:[#allocation22 + $0x300] sm:$0xff] }
 0x9d7   : > { %v9403_v7 = vadd.f32 %v16229_v25, %v9391_v19  ;;  %v9282_v20 = vadd.f32 %v9262_v38, %v9192_v0  ;;  %v9473_v38 = vld [vmem:[#allocation22 + $0x18] sm:$0xff]  ;;  %9745 = vmatpush.msrb.mxu3 %v9679_v58  ;;  %9824 = vmatpush.msra.mxu0 %v9780_v2  ;;  %v9778_v19 = vld [vmem:[#allocation22 + $0x350] sm:$0xff]  ;;  %v8834_v0 = vadd.f32 %v16159_v51, %v8739_v48  ;;  %v10000_v2 = vld [vmem:[#allocation22 + $0x5e0] sm:$0xff] }
 0x9d8   : > { %v9418_v22 = vld [vmem:[#allocation7] ss:$2 sm:$0xf]  ;;  %v9434_v44 = vld [vmem:[#allocation7 + $0x1] ss:$2 sm:$0xf]  ;;  %9726 = vmatpush.msrb.mxu2 %v9670_v59  ;;  %9652 = vmatpush.msra.mxu1 %v9473_v38 }
 0x9d9   : > { %9411 = vst [vmem:[#allocation7 + $0x8] sm:$0xff] %v9403_v7  ;;  %v9372_v42 = vadd.f32 %v9352_v11, %v9282_v20  ;;  %v9449_v30 = vmax.f32 %v9418_v22, %v9434_v44  ;;  %9746 = vmatpush.msrb.mxu3 %v9677_v40  ;;  %9825 = vmatpush.msra.mxu0 %v9778_v19  ;;  %v9673_v20 = vld [vmem:[#allocation22 + $0x238] sm:$0xff]  ;;  %v9770_v22 = vld [vmem:[#allocation22 + $0x310] sm:$0xff] }
 0x9da   : > { %9727 = vmatpush.msrb.mxu2 %v9668_v15  ;;  %9653 = vmatpush.msra.mxu1 %v9471_v63  ;;  %v8924_v16 = vadd.f32 %v16161_v57, %v8834_v0  ;;  %v8835_v57 = vadd.f32 %v16166_v13, %v8742_v14  ;;  %v10002_v59 = vld [vmem:[#allocation22 + $0x5f0] sm:$0xff] }
 0x9db   : > { %v9384_v43 = vadd.f32 %v16221_v9, %v9372_v42  ;;  %9747 = vmatpush.msrb.mxu3 %v9675_v12  ;;  %9826 = vmatpush.msra.mxu0 %v9776_v8  ;;  %v9358_v34 = vpop.f32.mrf.mxu0  ;;  %v9998_v38 = vld [vmem:[#allocation22 + $0x5d0] sm:$0xff] }
 0x9dc   : > { %v9175_v6 = vpop.f32.mrf.mxu2  ;;  %9728 = vmatpush.msrb.mxu2 %v9666_v17  ;;  %v8925_v13 = vadd.f32 %v16168_v55, %v8835_v57  ;;  %v9900_v63 = vld [vmem:[#allocation22 + $0x4f0] sm:$0xff]  ;;  %v9789_v57 = vld [vmem:[#allocation22 + $0x3a8] sm:$0xff] }
 0x9dd   : > { %v9265_v1 = vpop.f32.mrf.mxu3  ;;  %v9392_v39 = vmax.f32 %v9384_v43, 0.0  ;;  %v9193_v4 = vadd.f32 %v9175_v6, %v9102_v47  ;;  %9748 = vmatpush.msrb.mxu3 %v9673_v20  ;;  %9827 = vmatpush.msra.mxu0 %v9774_v49  ;;  %v9669_v47 = vld [vmem:[#allocation22 + $0x218] sm:$0xff]  ;;  %v9014_v43 = vadd.f32 %v16196_v23, %v8924_v16  ;;  %v9990_v14 = vld [vmem:[#allocation22 + $0x590] sm:$0xff] }
 0x9df   : > { %v9404_v61 = vadd.f32 %v16229_v25, %v9392_v39  ;;  %v9283_v10 = vadd.f32 %v9265_v1, %v9193_v4  ;;  %9749 = vmatpush.msrb.mxu3 %v9671_v52  ;;  %9828 = vmatpush.msra.mxu0 %v9772_v36  ;;  %v9667_v1 = vld [vmem:[#allocation22 + $0x208] sm:$0xff]  ;;  %v9104_v41 = vadd.f32 %v16198_v32, %v9014_v43  ;;  %v9988_v43 = vld [vmem:[#allocation22 + $0x580] sm:$0xff] }
 0x9e0   : > { %v9420_v45 = vld [vmem:[#allocation7 + $0x8] ss:$2 sm:$0xf]  ;;  %v9436_v11 = vld [vmem:[#allocation7 + $0x9] ss:$2 sm:$0xf]  ;;  %v9015_v32 = vadd.f32 %v16200_v60, %v8925_v13 }
 0x9e1   : > { %v9450_v46 = vmax.f32 %v9420_v45, %v9436_v11  ;;  %9412 = vst [vmem:[#allocation7 + $0x10] sm:$0xff] %v9404_v61  ;;  %v9373_v35 = vadd.f32 %v9355_v54, %v9283_v10  ;;  %9750 = vmatpush.msrb.mxu3 %v9669_v47  ;;  %9829 = vmatpush.msra.mxu0 %v9770_v22  ;;  %v9996_v45 = vld [vmem:[#allocation22 + $0x5c0] sm:$0xff]  ;;  %v9466_v60 = vld [vmem:[#allocation8] sm:$0xf]  ;;  %v9791_v47 = vld [vmem:[#allocation22 + $0x3b8] sm:$0xff] }
 0x9e2   : > { %v8836_v10 = vadd.f32 %v16172_v3, %v16114_v29  ;;  %v9105_v11 = vadd.f32 %v16202_v5, %v9015_v32  ;;  %v9898_v5 = vld [vmem:[#allocation22 + $0x4e0] sm:$0xff]  ;;  %v9793_v36 = vld [vmem:[#allocation22 + $0x3c8] sm:$0xff]  ;;  %v9901_v22 = vld [vmem:[#allocation22 + $0x4f8] sm:$0xff] }
 0x9e3   : > { %v9457_v7 = vmax.f32 %v9449_v30, %v9450_v46  ;;  %v9385_v51 = vadd.f32 %v16221_v9, %v9373_v35  ;;  %9751 = vmatpush.msrb.mxu3 %v9667_v1  ;;  %9830 = vmatpush.msra.mxu0 %v9768_v28  ;;  %v9361_v54 = vpop.f32.mrf.mxu0  ;;  %v9799_v35 = vld [vmem:[#allocation22 + $0x3f8] sm:$0xff]  ;;  %v9984_v32 = vld [vmem:[#allocation22 + $0x560] sm:$0xff] }
 0x9e4   : > { %v9178_v18 = vpop.f32.mrf.mxu2  ;;  %v8926_v29 = vadd.f32 %v16174_v21, %v8836_v10  ;;  %v9896_v21 = vld [vmem:[#allocation22 + $0x4d0] sm:$0xff] }
 0x9e5   : > { %v9268_v42 = vpop.f32.mrf.mxu3  ;;  %9462 = vst [vmem:[#allocation8 + $0x9] sm:$0xf] %v9457_v7  ;;  %v9393_v31 = vmax.f32 %v9385_v51, 0.0  ;;  %v9194_v53 = vadd.f32 %v9178_v18, %v9103_v50  ;;  %10019 = vmatpush.msrb.mxu0 %v10002_v59  ;;  %v9797_v50 = vld [vmem:[#allocation22 + $0x3e8] sm:$0xff]  ;;  %v9994_v7 = vld [vmem:[#allocation22 + $0x5b0] sm:$0xff]  ;;  %v9992_v18 = vld [vmem:[#allocation22 + $0x5a0] sm:$0xff] }
 0x9e7   : > { %v9405_v26 = vadd.f32 %v16229_v25, %v9393_v31  ;;  %v9284_v56 = vadd.f32 %v9268_v42, %v9194_v53  ;;  %10020 = vmatpush.msrb.mxu0 %v10000_v2  ;;  %v9016_v42 = vadd.f32 %v16207_v33, %v8926_v29  ;;  %v9795_v31 = vld [vmem:[#allocation22 + $0x3d8] sm:$0xff]  ;;  %v9976_v29 = vld [vmem:[#allocation22 + $0x520] sm:$0xff] }
 0x9e8   : > { %v9422_v58 = vld [vmem:[#allocation7 + $0x10] ss:$2 sm:$0xf]  ;;  %v9438_v48 = vld [vmem:[#allocation7 + $0x11] ss:$2 sm:$0xf] }
 0x9e9   : > { %9413 = vst [vmem:[#allocation7 + $0x18] sm:$0xff] %v9405_v26  ;;  %v9374_v6 = vadd.f32 %v9358_v34, %v9284_v56  ;;  %10021 = vmatpush.msrb.mxu0 %v9998_v38  ;;  %v9451_v55 = vmax.f32 %v9422_v58, %v9438_v48  ;;  %v9894_v34 = vld [vmem:[#allocation22 + $0x4c0] sm:$0xff]  ;;  %v9106_v33 = vadd.f32 %v16209_v37, %v9016_v42  ;;  %v9892_v56 = vld [vmem:[#allocation22 + $0x4b0] sm:$0xff]  ;;  %v9787_v48 = vld [vmem:[#allocation22 + $0x398] sm:$0xff] }
 0x9ea   : > { %v9986_v37 = vld [vmem:[#allocation22 + $0x570] sm:$0xff]  ;;  %v9889_v42 = vld [vmem:[#allocation22 + $0x498] sm:$0xff] }
 0x9eb   : > { %v9386_v27 = vadd.f32 %v16221_v9, %v9374_v6  ;;  %10022 = vmatpush.msrb.mxu0 %v9996_v45  ;;  %v9364_v49 = vpop.f32.mrf.mxu0  ;;  %v9888_v38 = vld [vmem:[#allocation22 + $0x490] sm:$0xff]  ;;  %v9886_v45 = vld [vmem:[#allocation22 + $0x480] sm:$0xff] }
 0x9ec   : > { %v9503_v23 = vld [vmem:[#allocation8 + $0x9] sm:$0xf]  ;;  %v9181_v24 = vpop.f32.mrf.mxu2 }
 0x9ed   : > { %v9271_v44 = vpop.f32.mrf.mxu3  ;;  %9545 = vst [vmem:[#allocation1 + $0x1] ss:$2 sm:$0xff] %v9503_v23  ;;  %v9394_v39 = vmax.f32 %v9386_v27, 0.0  ;;  %v9195_v4 = vadd.f32 %v9181_v24, %v9104_v41  ;;  %v9467_v3 = vld [vmem:[#allocation8 + $0x8] sm:$0xf]  ;;  %10023 = vmatpush.msrb.mxu0 %v9994_v7  ;;  %v9890_v41 = vld [vmem:[#allocation22 + $0x4a0] sm:$0xff] }
 0x9ee   : > { %v9662_v27 = vld [vmem:[#allocation8 + $0xa] sm:$0xf]  ;;  %v9899_v24 = vld [vmem:[#allocation22 + $0x4e8] sm:$0xff]  ;;  %v9882_v7 = vld [vmem:[#allocation22 + $0x460] sm:$0xff] }
 0x9ef   : > { %v9406_v15 = vadd.f32 %v16229_v25, %v9394_v39  ;;  %v9285_v40 = vadd.f32 %v9271_v44, %v9195_v4  ;;  %10024 = vmatpush.msrb.mxu0 %v9992_v18  ;;  %v9661_v44 = vld [vmem:[#allocation8 + $0x2] sm:$0xf] }
 0x9f0   : > { %v9424_v62 = vld [vmem:[#allocation7 + $0x18] ss:$2 sm:$0xf]  ;;  %v9440_v61 = vld [vmem:[#allocation7 + $0x19] ss:$2 sm:$0xf] }
 0x9f1   : > { %v9452_v19 = vmax.f32 %v9424_v62, %v9440_v61  ;;  %9414 = vst [vmem:[#allocation7 + $0x20] sm:$0xff] %v9406_v15  ;;  %v9375_v0 = vadd.f32 %v9361_v54, %v9285_v40  ;;  %10025 = vmatpush.msrb.mxu0 %v9990_v14  ;;  %v9885_v14 = vld [vmem:[#allocation22 + $0x478] sm:$0xff] }
 0x9f3   : > { %v9458_v30 = vmax.f32 %v9451_v55, %v9452_v19  ;;  %v9387_v46 = vadd.f32 %v16221_v9, %v9375_v0  ;;  %10026 = vmatpush.msrb.mxu0 %v9988_v43  ;;  %v9367_v4 = vpop.f32.mrf.mxu0  ;;  %v9897_v55 = vld [vmem:[#allocation22 + $0x4d8] sm:$0xff]  ;;  %v9785_v19 = vld [vmem:[#allocation22 + $0x388] sm:$0xff]  ;;  %v9982_v0 = vld [vmem:[#allocation22 + $0x550] sm:$0xff] }
 0x9f4   : > { %v9184_v17 = vpop.f32.mrf.mxu2  ;;  %v9550_v8 = vld.sshfl [vmem:[#allocation1] sm:$0xff pattern:$0x75316420]  ;;  %v9874_v43 = vld [vmem:[#allocation22 + $0x420] sm:$0xff] }
 0x9f5   : > { %v9274_v12 = vpop.f32.mrf.mxu3  ;;  %9463 = vst [vmem:[#allocation8 + $0x11] sm:$0xf] %v9458_v30  ;;  %v9395_v51 = vmax.f32 %v9387_v46, 0.0  ;;  %v9196_v20 = vadd.f32 %v9184_v17, %v9105_v11  ;;  %9570 = vmatmul.f32.vlgmr.msrb.gmra.mxu1 %v9550_v8  ;;  %9593 = vmatmul.f32.vlgmr.msra.gmra.mxu2 %v9550_v8  ;;  %v9895_v46 = vld [vmem:[#allocation22 + $0x4c8] sm:$0xff]  ;;  %v9978_v17 = vld [vmem:[#allocation22 + $0x530] sm:$0xff]  ;;  %v9893_v8 = vld [vmem:[#allocation22 + $0x4b8] sm:$0xff] }
 0x9f6   : > { %9606 = vst [vmem:[#allocation1 + $0x1] ss:$2 sm:$0xff] %v9467_v3  ;;  %9838 = vmatpush.msrb.mxu1 %v9799_v35  ;;  %9917 = vmatpush.msra.mxu2 %v9900_v63  ;;  %v9980_v35 = vld [vmem:[#allocation22 + $0x540] sm:$0xff]  ;;  %v9884_v63 = vld [vmem:[#allocation22 + $0x470] sm:$0xff]  ;;  %v9891_v3 = vld [vmem:[#allocation22 + $0x4a8] sm:$0xff] }
 0x9f7   : > { %v9407_v52 = vadd.f32 %v16229_v25, %v9395_v51  ;;  %v9286_v16 = vadd.f32 %v9274_v12, %v9196_v20  ;;  %9604 = vst [vmem:[#allocation1] ss:$2 sm:$0xff] %v9466_v60  ;;  %10027 = vmatpush.msrb.mxu0 %v9986_v37  ;;  %v9783_v60 = vld [vmem:[#allocation22 + $0x378] sm:$0xff]  ;;  %v9763_v20 = vld [vmem:[#allocation8 + $0x8] sm:$0xf]  ;;  %v9879_v37 = vld [vmem:[#allocation22 + $0x448] sm:$0xff] }
 0x9f8   : > { %9839 = vmatpush.msrb.mxu1 %v9797_v50  ;;  %9918 = vmatpush.msra.mxu2 %v9898_v5  ;;  %v9426_v1 = vld [vmem:[#allocation7 + $0x20] ss:$2 sm:$0xf]  ;;  %v9442_v13 = vld [vmem:[#allocation7 + $0x21] ss:$2 sm:$0xf] }
 0x9f9   : > { %9415 = vst [vmem:[#allocation7 + $0x28] sm:$0xff] %v9407_v52  ;;  %v9376_v53 = vadd.f32 %v9364_v49, %v9286_v16  ;;  %v9453_v62 = vmax.f32 %v9426_v1, %v9442_v13  ;;  %10028 = vmatpush.msrb.mxu0 %v9984_v32  ;;  %v9781_v50 = vld [vmem:[#allocation22 + $0x368] sm:$0xff]  ;;  %v9779_v51 = vld [vmem:[#allocation22 + $0x358] sm:$0xff]  ;;  %v9880_v5 = vld [vmem:[#allocation22 + $0x450] sm:$0xff] }
 0x9fa   : > { %9840 = vmatpush.msrb.mxu1 %v9795_v31  ;;  %9919 = vmatpush.msra.mxu2 %v9896_v21  ;;  %v9974_v49 = vld [vmem:[#allocation22 + $0x510] sm:$0xff]  ;;  %v9777_v52 = vld [vmem:[#allocation22 + $0x348] sm:$0xff]  ;;  %v9972_v31 = vld [vmem:[#allocation22 + $0x500] sm:$0xff] }
 0x9fb   : > { %v9388_v26 = vadd.f32 %v16221_v9, %v9376_v53  ;;  %10029 = vmatpush.msrb.mxu0 %v9982_v0  ;;  %v9887_v21 = vld [vmem:[#allocation22 + $0x488] sm:$0xff]  ;;  %v9775_v53 = vld [vmem:[#allocation22 + $0x338] sm:$0xff]  ;;  %v10205_v32 = vld [vmem:[#allocation22 + $0x7e0] sm:$0xff] }
 0x9fc   : > { %v9504_v6 = vld [vmem:[#allocation8 + $0x11] sm:$0xf]  ;;  %v9187_v28 = vpop.f32.mrf.mxu2  ;;  %9841 = vmatpush.msrb.mxu1 %v9793_v36  ;;  %9920 = vmatpush.msra.mxu2 %v9894_v34  ;;  %v9876_v34 = vld [vmem:[#allocation22 + $0x430] sm:$0xff]  ;;  %v10201_v0 = vld [vmem:[#allocation22 + $0x7c0] sm:$0xff] }
 0x9fd   : > { %v9277_v59 = vpop.f32.mrf.mxu3  ;;  %9547 = vst [vmem:[#allocation1 + $0x10] ss:$2 sm:$0xff] %v9504_v6  ;;  %v9396_v23 = vmax.f32 %v9388_v26, 0.0  ;;  %v9197_v58 = vadd.f32 %v9187_v28, %v9106_v33  ;;  %10030 = vmatpush.msrb.mxu0 %v9980_v35  ;;  %v9764_v16 = vld [vmem:[#allocation8 + $0x10] sm:$0xf]  ;;  %v9871_v35 = vld [vmem:[#allocation22 + $0x408] sm:$0xff] }
 0x9fe   : > { %v16275_v39 = vld.sshfl [vmem:[#allocation1] sm:$0xff pattern:$0x75316420]  ;;  %9842 = vmatpush.msrb.mxu1 %v9791_v47  ;;  %9921 = vmatpush.msra.mxu2 %v9892_v56  ;;  %v9773_v47 = vld [vmem:[#allocation22 + $0x328] sm:$0xff]  ;;  %v9866_v13 = vld [vmem:[#allocation8 + $0x11] sm:$0xf] }
 0x9ff   : > { %v9408_v2 = vadd.f32 %v16229_v25, %v9396_v23  ;;  %9631 = vmatmul.f32.vlgmr.msra.gmra.mxu3 %v16275_v39  ;;  %9704 = vst [vmem:[#allocation1 + $0x1] ss:$2 sm:$0xff] %v9662_v27  ;;  %v9287_v54 = vadd.f32 %v9277_v59, %v9197_v58  ;;  %10031 = vmatpush.msrb.mxu0 %v9978_v17  ;;  %v9883_v56 = vld [vmem:[#allocation22 + $0x468] sm:$0xff]  ;;  %v9865_v58 = vld [vmem:[#allocation8 + $0x9] sm:$0xf] }
 0xa00   : > { %v9428_v15 = vld [vmem:[#allocation7 + $0x28] ss:$2 sm:$0xf]  ;;  %v9444_v40 = vld [vmem:[#allocation7 + $0x29] ss:$2 sm:$0xf]  ;;  %9940 = vmatpush.msra.mxu3 %v9901_v22  ;;  %9843 = vmatpush.msrb.mxu1 %v9789_v57 }
 0xa01   : > { %v9454_v61 = vmax.f32 %v9428_v15, %v9444_v40  ;;  %9416 = vst [vmem:[#allocation7 + $0x30] sm:$0xff] %v9408_v2  ;;  %v9377_v10 = vadd.f32 %v9367_v4, %v9287_v54  ;;  %9922 = vmatpush.msra.mxu2 %v9890_v41  ;;  %10032 = vmatpush.msrb.mxu0 %v9976_v29  ;;  %v9771_v22 = vld [vmem:[#allocation22 + $0x318] sm:$0xff]  ;;  %v9872_v57 = vld [vmem:[#allocation22 + $0x410] sm:$0xff]  ;;  %v9769_v27 = vld [vmem:[#allocation22 + $0x308] sm:$0xff] }
 0xa02   : > { %9941 = vmatpush.msra.mxu3 %v9899_v24  ;;  %9844 = vmatpush.msrb.mxu1 %v9787_v48  ;;  %9702 = vst [vmem:[#allocation1] ss:$2 sm:$0xff] %v9661_v44  ;;  %v9881_v41 = vld [vmem:[#allocation22 + $0x458] sm:$0xff]  ;;  %v9870_v44 = vld [vmem:[#allocation22 + $0x400] sm:$0xff]  ;;  %v10207_v2 = vld [vmem:[#allocation22 + $0x7f0] sm:$0xff] }
 0xa03   : > { %v9459_v11 = vmax.f32 %v9453_v62, %v9454_v61  ;;  %v9389_v30 = vadd.f32 %v16221_v9, %v9377_v10  ;;  %9923 = vmatpush.msra.mxu2 %v9888_v38  ;;  %10033 = vmatpush.msrb.mxu0 %v9974_v49  ;;  %v9468_v54 = vld [vmem:[#allocation8 + $0x10] sm:$0xf]  ;;  %v9875_v15 = vld [vmem:[#allocation22 + $0x428] sm:$0xff]  ;;  %v10203_v40 = vld [vmem:[#allocation22 + $0x7d0] sm:$0xff] }
 0xa04   : > { %9942 = vmatpush.msra.mxu3 %v9897_v55  ;;  %9845 = vmatpush.msrb.mxu1 %v9785_v19  ;;  %v9877_v48 = vld [vmem:[#allocation22 + $0x438] sm:$0xff]  ;;  %v9967_v61 = vld [vmem:[#allocation8 + $0xa] sm:$0xf] }
 0xa05   : > { %9464 = vst [vmem:[#allocation8 + $0x19] sm:$0xf] %v9459_v11  ;;  %v9397_v12 = vmax.f32 %v9389_v30, 0.0  ;;  %9924 = vmatpush.msra.mxu2 %v9886_v45  ;;  %10034 = vmatpush.msrb.mxu0 %v9972_v31  ;;  %v9873_v62 = vld [vmem:[#allocation22 + $0x418] sm:$0xff]  ;;  %v10105_v55 = vld [vmem:[#allocation22 + $0x6f0] sm:$0xff]  ;;  %v10001_v30 = vld [vmem:[#allocation22 + $0x5e8] sm:$0xff] }
 0xa06   : > { %9943 = vmatpush.msra.mxu3 %v9895_v46  ;;  %9846 = vmatpush.msrb.mxu1 %v9783_v60  ;;  %v10003_v10 = vld [vmem:[#allocation22 + $0x5f8] sm:$0xff]  ;;  %v10103_v46 = vld [vmem:[#allocation22 + $0x6e0] sm:$0xff]  ;;  %v10195_v29 = vld [vmem:[#allocation22 + $0x790] sm:$0xff] }
 0xa07   : > { %v9409_v9 = vadd.f32 %v16229_v25, %v9397_v12  ;;  %9925 = vmatpush.msra.mxu2 %v9884_v63  ;;  %v9878_v25 = vld [vmem:[#allocation22 + $0x440] sm:$0xff]  ;;  %v9968_v45 = vld [vmem:[#allocation8 + $0x12] sm:$0xf]  ;;  %v10199_v63 = vld [vmem:[#allocation22 + $0x7b0] sm:$0xff] }
 0xa08   : > { %9944 = vmatpush.msra.mxu3 %v9893_v8  ;;  %9847 = vmatpush.msrb.mxu1 %v9781_v50  ;;  %v9430_v33 = vld [vmem:[#allocation7 + $0x30] ss:$2 sm:$0xf]  ;;  %v9446_v26 = vld [vmem:[#allocation7 + $0x31] ss:$2 sm:$0xf] }
 0xa09   : > { %9417 = vst [vmem:[#allocation7 + $0x38] sm:$0xff] %v9409_v9  ;;  %v16281_v18 = vld.sshfl [vmem:[#allocation1] sm:$0xff pattern:$0x75316420]  ;;  %9926 = vmatpush.msra.mxu2 %v9882_v7  ;;  %v9455_v28 = vmax.f32 %v9430_v33, %v9446_v26  ;;  %v9663_v11 = vld [vmem:[#allocation8 + $0x12] sm:$0xf] }
 0xa0a   : > { %9804 = vst [vmem:[#allocation1] ss:$2 sm:$0xff] %v9763_v20  ;;  %9945 = vmatpush.msra.mxu3 %v9891_v3  ;;  %9848 = vmatpush.msrb.mxu1 %v9779_v51  ;;  %v9999_v12 = vld [vmem:[#allocation22 + $0x5d8] sm:$0xff]  ;;  %v10101_v8 = vld [vmem:[#allocation22 + $0x6d0] sm:$0xff]  ;;  %v9997_v50 = vld [vmem:[#allocation22 + $0x5c8] sm:$0xff] }
 0xa0b   : > { %9806 = vst [vmem:[#allocation1 + $0x1] ss:$2 sm:$0xff] %v9764_v16  ;;  %9927 = vmatpush.msra.mxu2 %v9880_v5  ;;  %v10099_v7 = vld [vmem:[#allocation22 + $0x6c0] sm:$0xff]  ;;  %v9995_v9 = vld [vmem:[#allocation22 + $0x5b8] sm:$0xff]  ;;  %v10097_v3 = vld [vmem:[#allocation22 + $0x6b0] sm:$0xff] }
 0xa0c   : > { %v9505_v36 = vld [vmem:[#allocation8 + $0x19] sm:$0xf]  ;;  %9946 = vmatpush.msra.mxu3 %v9889_v42  ;;  %9849 = vmatpush.msrb.mxu1 %v9777_v52  ;;  %v10070_v5 = vld [vmem:[#allocation8 + $0x10] sm:$0xf]  ;;  %v9993_v52 = vld [vmem:[#allocation22 + $0x5a8] sm:$0xff] }
 0xa0d   : > { %9549 = vst [vmem:[#allocation1 + $0x11] ss:$2 sm:$0xff] %v9505_v36  ;;  %9928 = vmatpush.msra.mxu2 %v9878_v25  ;;  %v9469_v38 = vld [vmem:[#allocation8 + $0x18] sm:$0xf]  ;;  %v10106_v49 = vld [vmem:[#allocation22 + $0x6f8] sm:$0xff]  ;;  %v10104_v25 = vld [vmem:[#allocation22 + $0x6e8] sm:$0xff] }
 0xa0e   : > { %9947 = vmatpush.msra.mxu3 %v9887_v21  ;;  %9850 = vmatpush.msrb.mxu1 %v9775_v53  ;;  %v9664_v17 = vld [vmem:[#allocation8 + $0x1a] sm:$0xf]  ;;  %v10191_v53 = vld [vmem:[#allocation22 + $0x770] sm:$0xff]  ;;  %v9991_v36 = vld [vmem:[#allocation22 + $0x598] sm:$0xff] }
 0xa0f   : > { %9929 = vmatpush.msra.mxu2 %v9876_v34  ;;  %v10193_v51 = vld [vmem:[#allocation22 + $0x780] sm:$0xff]  ;;  %v10093_v34 = vld [vmem:[#allocation22 + $0x690] sm:$0xff]  ;;  %v9989_v33 = vld [vmem:[#allocation22 + $0x588] sm:$0xff] }
 0xa10   : > { %v9432_v6 = vld [vmem:[#allocation7 + $0x38] ss:$2 sm:$0xf]  ;;  %v9448_v1 = vld [vmem:[#allocation7 + $0x39] ss:$2 sm:$0xf]  ;;  %9948 = vmatpush.msra.mxu3 %v9885_v14  ;;  %9851 = vmatpush.msrb.mxu1 %v9773_v47 }
 0xa11   : > { %v9456_v59 = vmax.f32 %v9432_v6, %v9448_v1  ;;  %9930 = vmatpush.msra.mxu2 %v9874_v43  ;;  %v10071_v42 = vld [vmem:[#allocation8 + $0x18] sm:$0xf]  ;;  %v10102_v47 = vld [vmem:[#allocation22 + $0x6d8] sm:$0xff]  ;;  %v10089_v1 = vld [vmem:[#allocation22 + $0x670] sm:$0xff] }
 0xa12   : > { %v16283_v23 = vld.sshfl [vmem:[#allocation1] sm:$0xff pattern:$0x75316420]  ;;  %9949 = vmatpush.msra.mxu3 %v9883_v56  ;;  %9852 = vmatpush.msrb.mxu1 %v9771_v22  ;;  %v10095_v16 = vld [vmem:[#allocation22 + $0x6a0] sm:$0xff]  ;;  %v9987_v56 = vld [vmem:[#allocation22 + $0x578] sm:$0xff] }
 0xa13   : > { %v9460_v24 = vmax.f32 %v9455_v28, %v9456_v59  ;;  %9831 = vmatmul.f32.vlgmr.msra.gmra.mxu0 %v16283_v23  ;;  %9931 = vmatpush.msra.mxu2 %v9872_v57  ;;  %9906 = vst [vmem:[#allocation1] ss:$2 sm:$0xff] %v9865_v58  ;;  %v9765_v14 = vld [vmem:[#allocation8 + $0x18] sm:$0xf]  ;;  %v10098_v22 = vld [vmem:[#allocation22 + $0x6b8] sm:$0xff]  ;;  %v9985_v59 = vld [vmem:[#allocation22 + $0x568] sm:$0xff] }
 0xa14   : > { %v9551_v4 = vld.sshfl [vmem:[#allocation1 + $0x10] sm:$0xff pattern:$0x75316420]  ;;  %9950 = vmatpush.msra.mxu3 %v9881_v41  ;;  %9853 = vmatpush.msrb.mxu1 %v9769_v27  ;;  %9908 = vst [vmem:[#allocation1 + $0x1] ss:$2 sm:$0xff] %v9866_v13  ;;  %v10096_v27 = vld [vmem:[#allocation22 + $0x6a8] sm:$0xff] }
 0xa15   : > { %9465 = vst [vmem:[#allocation8 + $0x21] sm:$0xf] %v9460_v24  ;;  %9573 = vmatmul.f32.gmra.mxu1 %v9551_v4  ;;  %9596 = vmatmul.f32.gmra.mxu2 %v9551_v4  ;;  %v10189_v43 = vld [vmem:[#allocation22 + $0x760] sm:$0xff]  ;;  %v10172_v6 = vld [vmem:[#allocation8 + $0x11] sm:$0xf]  ;;  %v10085_v4 = vld [vmem:[#allocation22 + $0x650] sm:$0xff] }
 0xa16   : > { %9608 = vst [vmem:[#allocation1 + $0x10] ss:$2 sm:$0xff] %v9468_v54  ;;  %9932 = vmatpush.msra.mxu2 %v9870_v44  ;;  %9951 = vmatpush.msra.mxu3 %v9879_v37  ;;  %v10091_v26 = vld [vmem:[#allocation22 + $0x680] sm:$0xff]  ;;  %v10187_v44 = vld [vmem:[#allocation22 + $0x750] sm:$0xff]  ;;  %v9983_v37 = vld [vmem:[#allocation22 + $0x558] sm:$0xff] }
 0xa17   : > { %9610 = vst [vmem:[#allocation1 + $0x11] ss:$2 sm:$0xff] %v9469_v38  ;;  %10224 = vmatpush.msra.mxu0 %v10207_v2  ;;  %v10173_v28 = vld [vmem:[#allocation8 + $0x19] sm:$0xf]  ;;  %v10094_v13 = vld [vmem:[#allocation22 + $0x698] sm:$0xff]  ;;  %v9981_v54 = vld [vmem:[#allocation22 + $0x548] sm:$0xff] }
 0xa18   : > { %9952 = vmatpush.msra.mxu3 %v9877_v48  ;;  %v10087_v41 = vld [vmem:[#allocation22 + $0x660] sm:$0xff]  ;;  %v10092_v48 = vld [vmem:[#allocation22 + $0x688] sm:$0xff] }
 0xa19   : > { %10225 = vmatpush.msra.mxu0 %v10205_v32  ;;  %v9867_v24 = vld [vmem:[#allocation8 + $0x19] sm:$0xf]  ;;  %v9979_v32 = vld [vmem:[#allocation22 + $0x538] sm:$0xff] }
 0xa1a   : > { %9953 = vmatpush.msra.mxu3 %v9875_v15  ;;  %v10185_v2 = vld [vmem:[#allocation22 + $0x740] sm:$0xff]  ;;  %v10081_v15 = vld [vmem:[#allocation22 + $0x630] sm:$0xff] }
 0xa1b   : > { %10226 = vmatpush.msra.mxu0 %v10203_v40  ;;  %v16286_v19 = vld.sshfl [vmem:[#allocation1] sm:$0xff pattern:$0x75316420]  ;;  %v10083_v38 = vld [vmem:[#allocation22 + $0x640] sm:$0xff] }
 0xa1c   : > { %9954 = vmatpush.msra.mxu3 %v9873_v62  ;;  %10008 = vst [vmem:[#allocation1] ss:$2 sm:$0xff] %v9967_v61  ;;  %v9766_v31 = vld [vmem:[#allocation8 + $0x20] sm:$0xf]  ;;  %v10274_v62 = vld [vmem:[#allocation8 + $0x12] sm:$0xf] }
 0xa1d   : > { %9654 = vmatmul.f32.vlgmr.msra.gmra.mxu1 %v16275_v39  ;;  %9729 = vmatmul.f32.vlgmr.msrb.gmra.mxu2 %v16281_v18  ;;  %10010 = vst [vmem:[#allocation1 + $0x1] ss:$2 sm:$0xff] %v9968_v45  ;;  %v10197_v39 = vld [vmem:[#allocation22 + $0x7a0] sm:$0xff]  ;;  %v10090_v61 = vld [vmem:[#allocation22 + $0x678] sm:$0xff] }
 0xa1e   : > { %v9612_v60 = vld.sshfl [vmem:[#allocation1 + $0x10] sm:$0xff pattern:$0x75316420]  ;;  %10042 = vmatpush.msra.mxu1 %v10003_v10  ;;  %10122 = vmatpush.msrb.mxu2 %v10105_v55  ;;  %v9977_v55 = vld [vmem:[#allocation22 + $0x528] sm:$0xff] }
 0xa1f   : > { %9634 = vmatmul.f32.gmra.mxu3 %v9612_v60  ;;  %9706 = vst [vmem:[#allocation1 + $0x10] ss:$2 sm:$0xff] %v9663_v11  ;;  %10227 = vmatpush.msra.mxu0 %v10201_v0  ;;  %v10275_v10 = vld [vmem:[#allocation8 + $0x1a] sm:$0xf] }
 0xa20   : > { %9708 = vst [vmem:[#allocation1 + $0x11] ss:$2 sm:$0xff] %v9664_v17  ;;  %10043 = vmatpush.msra.mxu1 %v10001_v30  ;;  %10123 = vmatpush.msrb.mxu2 %v10103_v46  ;;  %v10079_v0 = vld [vmem:[#allocation22 + $0x620] sm:$0xff]  ;;  %v10088_v30 = vld [vmem:[#allocation22 + $0x668] sm:$0xff]  ;;  %v10183_v46 = vld [vmem:[#allocation22 + $0x730] sm:$0xff] }
 0xa21   : > { %9955 = vmatpush.msra.mxu3 %v9871_v35  ;;  %10228 = vmatpush.msra.mxu0 %v10199_v63  ;;  %v9969_v45 = vld [vmem:[#allocation8 + $0x1a] sm:$0xf]  ;;  %v10077_v35 = vld [vmem:[#allocation22 + $0x610] sm:$0xff]  ;;  %v9970_v63 = vld [vmem:[#allocation8 + $0x22] sm:$0xf] }
 0xa22   : > { %10044 = vmatpush.msra.mxu1 %v9999_v12  ;;  %10124 = vmatpush.msrb.mxu2 %v10101_v8  ;;  %v10181_v17 = vld [vmem:[#allocation22 + $0x720] sm:$0xff]  ;;  %v9973_v12 = vld [vmem:[#allocation22 + $0x508] sm:$0xff] }
 0xa23   : > { %10229 = vmatpush.msra.mxu0 %v10197_v39  ;;  %v10075_v8 = vld [vmem:[#allocation22 + $0x600] sm:$0xff]  ;;  %v10084_v39 = vld [vmem:[#allocation22 + $0x648] sm:$0xff] }
 0xa24   : > { %10045 = vmatpush.msra.mxu1 %v9997_v50  ;;  %10125 = vmatpush.msrb.mxu2 %v10099_v7  ;;  %v16290_v20 = vld.sshfl [vmem:[#allocation1] sm:$0xff pattern:$0x75316420]  ;;  %v10208_v50 = vld [vmem:[#allocation22 + $0x7f8] sm:$0xff] }
 0xa25   : > { %9657 = vmatmul.f32.gmra.mxu1 %v9612_v60  ;;  %10230 = vmatpush.msra.mxu0 %v10195_v29  ;;  %10111 = vst [vmem:[#allocation1] ss:$2 sm:$0xff] %v10070_v5  ;;  %v9975_v60 = vld [vmem:[#allocation22 + $0x518] sm:$0xff]  ;;  %v10309_v7 = vld [vmem:[#allocation22 + $0x8f0] sm:$0xff]  ;;  %v10072_v29 = vld [vmem:[#allocation8 + $0x20] sm:$0xf] }
 0xa26   : > { %10046 = vmatpush.msra.mxu1 %v9995_v9  ;;  %10126 = vmatpush.msrb.mxu2 %v10097_v3  ;;  %10113 = vst [vmem:[#allocation1 + $0x1] ss:$2 sm:$0xff] %v10071_v42  ;;  %v10082_v9 = vld [vmem:[#allocation22 + $0x638] sm:$0xff]  ;;  %v10073_v3 = vld [vmem:[#allocation8 + $0x28] sm:$0xf]  ;;  %v10307_v5 = vld [vmem:[#allocation22 + $0x8e0] sm:$0xff] }
 0xa27   : > { %v9710_v21 = vld.sshfl [vmem:[#allocation1 + $0x10] sm:$0xff pattern:$0x75316420]  ;;  %9752 = vmatmul.f32.vlgmr.msrb.gmra.mxu3 %v16281_v18  ;;  %10231 = vmatpush.msra.mxu0 %v10193_v51  ;;  %v10100_v18 = vld [vmem:[#allocation22 + $0x6c8] sm:$0xff] }
 0xa28   : > { %9732 = vmatmul.f32.gmra.mxu2 %v9710_v21  ;;  %9810 = vst [vmem:[#allocation1 + $0x11] ss:$2 sm:$0xff] %v9766_v31  ;;  %10145 = vmatpush.msrb.mxu3 %v10106_v49  ;;  %v10206_v51 = vld [vmem:[#allocation22 + $0x7e8] sm:$0xff]  ;;  %v10078_v31 = vld [vmem:[#allocation22 + $0x618] sm:$0xff] }
 0xa29   : > { %10047 = vmatpush.msra.mxu1 %v9993_v52  ;;  %10127 = vmatpush.msrb.mxu2 %v10095_v16  ;;  %9808 = vst [vmem:[#allocation1 + $0x10] ss:$2 sm:$0xff] %v9765_v14  ;;  %v10080_v42 = vld [vmem:[#allocation22 + $0x628] sm:$0xff]  ;;  %v10179_v52 = vld [vmem:[#allocation22 + $0x710] sm:$0xff]  ;;  %v10204_v16 = vld [vmem:[#allocation22 + $0x7d8] sm:$0xff] }
 0xa2a   : > { %10146 = vmatpush.msrb.mxu3 %v10104_v25  ;;  %10232 = vmatpush.msra.mxu0 %v10191_v53  ;;  %v10305_v25 = vld [vmem:[#allocation22 + $0x8d0] sm:$0xff]  ;;  %v10202_v53 = vld [vmem:[#allocation22 + $0x7c8] sm:$0xff] }
 0xa2b   : > { %10048 = vmatpush.msra.mxu1 %v9991_v36  ;;  %10128 = vmatpush.msrb.mxu2 %v10093_v34  ;;  %v10303_v36 = vld [vmem:[#allocation22 + $0x8c0] sm:$0xff]  ;;  %v10200_v34 = vld [vmem:[#allocation22 + $0x7b8] sm:$0xff]  ;;  %v10301_v14 = vld [vmem:[#allocation22 + $0x8b0] sm:$0xff] }
 0xa2c   : > { %10147 = vmatpush.msrb.mxu3 %v10102_v47  ;;  %10233 = vmatpush.msra.mxu0 %v10189_v43  ;;  %v10310_v47 = vld [vmem:[#allocation22 + $0x8f8] sm:$0xff]  ;;  %v10174_v43 = vld [vmem:[#allocation8 + $0x21] sm:$0xf] }
 0xa2d   : > { %10049 = vmatpush.msra.mxu1 %v9989_v33  ;;  %10129 = vmatpush.msrb.mxu2 %v10091_v26  ;;  %v16293_v57 = vld.sshfl [vmem:[#allocation1] sm:$0xff pattern:$0x75316420]  ;;  %v10198_v26 = vld [vmem:[#allocation22 + $0x7a8] sm:$0xff] }
 0xa2e   : > { %10148 = vmatpush.msrb.mxu3 %v10100_v18  ;;  %9854 = vmatmul.f32.vlgmr.msrb.gmra.mxu1 %v16283_v23  ;;  %10213 = vst [vmem:[#allocation1] ss:$2 sm:$0xff] %v10172_v6  ;;  %v9868_v23 = vld [vmem:[#allocation8 + $0x21] sm:$0xf]  ;;  %v10175_v33 = vld [vmem:[#allocation8 + $0x29] sm:$0xf] }
 0xa2f   : > { %9755 = vmatmul.f32.gmra.mxu3 %v9710_v21  ;;  %10050 = vmatpush.msra.mxu1 %v9987_v56  ;;  %10215 = vst [vmem:[#allocation1 + $0x1] ss:$2 sm:$0xff] %v10173_v28  ;;  %v10177_v21 = vld [vmem:[#allocation22 + $0x700] sm:$0xff]  ;;  %v10196_v6 = vld [vmem:[#allocation22 + $0x798] sm:$0xff] }
 0xa30   : > { %v9812_v58 = vld.sshfl [vmem:[#allocation1 + $0x10] sm:$0xff pattern:$0x75316420]  ;;  %9933 = vmatmul.f32.vlgmr.msra.gmra.mxu2 %v16286_v19  ;;  %10149 = vmatpush.msrb.mxu3 %v10098_v22  ;;  %v10308_v22 = vld [vmem:[#allocation22 + $0x8e8] sm:$0xff]  ;;  %v10306_v28 = vld [vmem:[#allocation22 + $0x8d8] sm:$0xff] }
 0xa31   : > { %9834 = vmatmul.f32.gmra.mxu0 %v9812_v58  ;;  %10130 = vmatpush.msrb.mxu2 %v10089_v1  ;;  %9910 = vst [vmem:[#allocation1 + $0x10] ss:$2 sm:$0xff] %v9867_v24  ;;  %v10299_v56 = vld [vmem:[#allocation22 + $0x8a0] sm:$0xff]  ;;  %v10297_v1 = vld [vmem:[#allocation22 + $0x890] sm:$0xff] }
 0xa32   : > { %10051 = vmatpush.msra.mxu1 %v9985_v59  ;;  %10150 = vmatpush.msrb.mxu3 %v10096_v27  ;;  %9912 = vst [vmem:[#allocation1 + $0x11] ss:$2 sm:$0xff] %v9868_v23  ;;  %v10194_v59 = vld [vmem:[#allocation22 + $0x788] sm:$0xff]  ;;  %v10293_v24 = vld [vmem:[#allocation22 + $0x870] sm:$0xff] }
 0xa33   : > { %10131 = vmatpush.msrb.mxu2 %v10087_v41  ;;  %10234 = vmatpush.msra.mxu0 %v10187_v44  ;;  %v10295_v41 = vld [vmem:[#allocation22 + $0x880] sm:$0xff]  ;;  %v10304_v27 = vld [vmem:[#allocation22 + $0x8c8] sm:$0xff]  ;;  %v10302_v44 = vld [vmem:[#allocation22 + $0x8b8] sm:$0xff] }
 0xa34   : > { %10052 = vmatpush.msra.mxu1 %v9983_v37  ;;  %10151 = vmatpush.msrb.mxu3 %v10094_v13  ;;  %v10291_v37 = vld [vmem:[#allocation22 + $0x860] sm:$0xff]  ;;  %v10277_v13 = vld [vmem:[#allocation8 + $0x2a] sm:$0xf] }
 0xa35   : > { %10132 = vmatpush.msrb.mxu2 %v10085_v4  ;;  %10235 = vmatpush.msra.mxu0 %v10185_v2  ;;  %v10300_v4 = vld [vmem:[#allocation22 + $0x8a8] sm:$0xff] }
 0xa36   : > { %10053 = vmatpush.msra.mxu1 %v9981_v54  ;;  %10152 = vmatpush.msrb.mxu3 %v10092_v48  ;;  %v16297_v40 = vld.sshfl [vmem:[#allocation1] sm:$0xff pattern:$0x75316420]  ;;  %v10276_v2 = vld [vmem:[#allocation8 + $0x22] sm:$0xf]  ;;  %v10188_v54 = vld [vmem:[#allocation22 + $0x758] sm:$0xff] }
 0xa37   : > { %10133 = vmatpush.msrb.mxu2 %v10083_v38  ;;  %9857 = vmatmul.f32.gmra.mxu1 %v9812_v58  ;;  %10315 = vst [vmem:[#allocation1] ss:$2 sm:$0xff] %v10274_v62  ;;  %v10192_v58 = vld [vmem:[#allocation22 + $0x778] sm:$0xff]  ;;  %v10289_v48 = vld [vmem:[#allocation22 + $0x850] sm:$0xff]  ;;  %v10296_v62 = vld [vmem:[#allocation22 + $0x888] sm:$0xff] }
 0xa38   : > { %9956 = vmatmul.f32.vlgmr.msra.gmra.mxu3 %v16286_v19  ;;  %10054 = vmatpush.msra.mxu1 %v9979_v32  ;;  %10317 = vst [vmem:[#allocation1 + $0x1] ss:$2 sm:$0xff] %v10275_v10  ;;  %v10086_v19 = vld [vmem:[#allocation22 + $0x658] sm:$0xff]  ;;  %v10186_v32 = vld [vmem:[#allocation22 + $0x748] sm:$0xff]  ;;  %v10285_v10 = vld [vmem:[#allocation22 + $0x830] sm:$0xff] }
 0xa39   : > { %v9914_v11 = vld.sshfl [vmem:[#allocation1 + $0x10] sm:$0xff pattern:$0x75316420]  ;;  %10035 = vmatmul.f32.vlgmr.msrb.gmra.mxu0 %v16290_v20  ;;  %10134 = vmatpush.msrb.mxu2 %v10081_v15  ;;  %v10298_v38 = vld [vmem:[#allocation22 + $0x898] sm:$0xff] }
 0xa3a   : > { %9936 = vmatmul.f32.gmra.mxu2 %v9914_v11  ;;  %10153 = vmatpush.msrb.mxu3 %v10090_v61  ;;  %10012 = vst [vmem:[#allocation1 + $0x10] ss:$2 sm:$0xff] %v9969_v45  ;;  %v10287_v15 = vld [vmem:[#allocation22 + $0x840] sm:$0xff]  ;;  %v10184_v61 = vld [vmem:[#allocation22 + $0x738] sm:$0xff] }
 0xa3b   : > { %10055 = vmatpush.msra.mxu1 %v9977_v55  ;;  %10135 = vmatpush.msrb.mxu2 %v10079_v0  ;;  %10014 = vst [vmem:[#allocation1 + $0x11] ss:$2 sm:$0xff] %v9970_v63  ;;  %v10294_v55 = vld [vmem:[#allocation22 + $0x878] sm:$0xff]  ;;  %v10182_v0 = vld [vmem:[#allocation22 + $0x728] sm:$0xff]  ;;  %v10283_v45 = vld [vmem:[#allocation22 + $0x820] sm:$0xff] }
 0xa3c   : > { %10154 = vmatpush.msrb.mxu3 %v10088_v30  ;;  %10236 = vmatpush.msra.mxu0 %v10183_v46  ;;  %v10180_v30 = vld [vmem:[#allocation22 + $0x718] sm:$0xff]  ;;  %v10281_v46 = vld [vmem:[#allocation22 + $0x810] sm:$0xff]  ;;  %v10279_v63 = vld [vmem:[#allocation22 + $0x800] sm:$0xff] }
 0xa3d   : > { %10056 = vmatpush.msra.mxu1 %v9975_v60  ;;  %10136 = vmatpush.msrb.mxu2 %v10077_v35  ;;  %v10290_v60 = vld [vmem:[#allocation22 + $0x858] sm:$0xff]  ;;  %v10178_v35 = vld [vmem:[#allocation22 + $0x708] sm:$0xff] }
 0xa3e   : > { %10155 = vmatpush.msrb.mxu3 %v10086_v19  ;;  %10237 = vmatpush.msra.mxu0 %v10181_v17  ;;  %v10288_v19 = vld [vmem:[#allocation22 + $0x848] sm:$0xff]  ;;  %v10286_v17 = vld [vmem:[#allocation22 + $0x838] sm:$0xff] }
 0xa3f   : > { %10057 = vmatpush.msra.mxu1 %v9973_v12  ;;  %10137 = vmatpush.msrb.mxu2 %v10075_v8  ;;  %v10322_v12 = vld.sshfl [vmem:[#allocation1] sm:$0xff pattern:$0x75316420]  ;;  %v10284_v8 = vld [vmem:[#allocation22 + $0x828] sm:$0xff] }
 0xa40   : > { %10156 = vmatpush.msrb.mxu3 %v10084_v39  ;;  %10058 = vmatmul.f32.vlgmr.msra.gmra.mxu1 %v16290_v20  ;;  %v10076_v20 = vld [vmem:[#allocation22 + $0x608] sm:$0xff]  ;;  %v10282_v39 = vld [vmem:[#allocation22 + $0x818] sm:$0xff] }
 0xa41   : > { %10247 = vmatpush.msrb.mxu1 %v10208_v50  ;;  %10326 = vmatpush.msra.mxu2 %v10309_v7  ;;  %v10280_v50 = vld [vmem:[#allocation22 + $0x808] sm:$0xff] }
 0xa42   : > { %9959 = vmatmul.f32.gmra.mxu3 %v9914_v11  ;;  %v10016_v49 = vld.sshfl [vmem:[#allocation1 + $0x10] sm:$0xff pattern:$0x75316420]  ;;  %10138 = vmatmul.f32.vlgmr.msrb.gmra.mxu2 %v16293_v57  ;;  %v10292_v11 = vld [vmem:[#allocation22 + $0x868] sm:$0xff] }
 0xa43   : > { %10038 = vmatmul.f32.gmra.mxu0 %v10016_v49  ;;  %10115 = vst [vmem:[#allocation1 + $0x10] ss:$2 sm:$0xff] %v10072_v29  ;;  %10157 = vmatpush.msrb.mxu3 %v10082_v9 }
 0xa44   : > { %10117 = vst [vmem:[#allocation1 + $0x11] ss:$2 sm:$0xff] %v10073_v3  ;;  %10248 = vmatpush.msrb.mxu1 %v10206_v51  ;;  %10327 = vmatpush.msra.mxu2 %v10307_v5 }
 0xa45   : > { %10158 = vmatpush.msrb.mxu3 %v10080_v42  ;;  %10238 = vmatpush.msra.mxu0 %v10179_v52 }
 0xa46   : > { %10249 = vmatpush.msrb.mxu1 %v10204_v16  ;;  %10328 = vmatpush.msra.mxu2 %v10305_v25 }
 0xa47   : > { %10159 = vmatpush.msrb.mxu3 %v10078_v31  ;;  %10239 = vmatpush.msra.mxu0 %v10177_v21 }
 0xa48   : > { %10250 = vmatpush.msrb.mxu1 %v10202_v53  ;;  %10329 = vmatpush.msra.mxu2 %v10303_v36 }
 0xa49   : > { %10160 = vmatpush.msrb.mxu3 %v10076_v20  ;;  %10061 = vmatmul.f32.gmra.mxu1 %v10016_v49 }
 0xa4a   : > { %10251 = vmatpush.msrb.mxu1 %v10200_v34  ;;  %10330 = vmatpush.msra.mxu2 %v10301_v14 }
 0xa4b   : > { %10349 = vmatpush.msra.mxu3 %v10310_v47  ;;  %v10119_v18 = vld.sshfl [vmem:[#allocation1 + $0x10] sm:$0xff pattern:$0x75316420]  ;;  %10240 = vmatmul.f32.vlgmr.msra.gmra.mxu0 %v16297_v40 }
 0xa4c   : > { %10141 = vmatmul.f32.gmra.mxu2 %v10119_v18  ;;  %10217 = vst [vmem:[#allocation1 + $0x10] ss:$2 sm:$0xff] %v10174_v43  ;;  %10161 = vmatmul.f32.vlgmr.msrb.gmra.mxu3 %v16293_v57  ;;  %v10190_v57 = vld [vmem:[#allocation22 + $0x768] sm:$0xff] }
 0xa4d   : > { %10219 = vst [vmem:[#allocation1 + $0x11] ss:$2 sm:$0xff] %v10175_v33  ;;  %10252 = vmatpush.msrb.mxu1 %v10198_v26  ;;  %10331 = vmatpush.msra.mxu2 %v10299_v56 }
 0xa4e   : > { %10350 = vmatpush.msra.mxu3 %v10308_v22 }
 0xa4f   : > { %10253 = vmatpush.msrb.mxu1 %v10196_v6  ;;  %10332 = vmatpush.msra.mxu2 %v10297_v1 }
 0xa50   : > { %10351 = vmatpush.msra.mxu3 %v10306_v28 }
 0xa51   : > { %10254 = vmatpush.msrb.mxu1 %v10194_v59  ;;  %10333 = vmatpush.msra.mxu2 %v10295_v41 }
 0xa52   : > { %10352 = vmatpush.msra.mxu3 %v10304_v27 }
 0xa53   : > { %10255 = vmatpush.msrb.mxu1 %v10192_v58  ;;  %10334 = vmatpush.msra.mxu2 %v10293_v24 }
 0xa54   : > { %10353 = vmatpush.msra.mxu3 %v10302_v44  ;;  %v10221_v23 = vld.sshfl [vmem:[#allocation1 + $0x10] sm:$0xff pattern:$0x75316420] }
 0xa55   : > { %10164 = vmatmul.f32.gmra.mxu3 %v10119_v18  ;;  %10243 = vmatmul.f32.gmra.mxu0 %v10221_v23  ;;  %10319 = vst [vmem:[#allocation1 + $0x10] ss:$2 sm:$0xff] %v10276_v2  ;;  %v10376_v2 = vld [vmem:[#allocation23] sm:$0x3] }
 0xa56   : > { %10256 = vmatpush.msrb.mxu1 %v10190_v57  ;;  %10335 = vmatpush.msra.mxu2 %v10291_v37  ;;  %10321 = vst [vmem:[#allocation1 + $0x11] ss:$2 sm:$0xff] %v10277_v13 }
 0xa57   : > { %10354 = vmatpush.msra.mxu3 %v10300_v4 }
 0xa58   : > { %10257 = vmatpush.msrb.mxu1 %v10188_v54  ;;  %10336 = vmatpush.msra.mxu2 %v10289_v48 }
 0xa59   : > { %10355 = vmatpush.msra.mxu3 %v10298_v38 }
 0xa5a   : > { %10258 = vmatpush.msrb.mxu1 %v10186_v32  ;;  %10337 = vmatpush.msra.mxu2 %v10287_v15 }
 0xa5b   : > { %10356 = vmatpush.msra.mxu3 %v10296_v62  ;;  %v10378_v62 = vperm.slane %v10376_v2, 0 }
 0xa5c   : > { %10259 = vmatpush.msrb.mxu1 %v10184_v61  ;;  %10338 = vmatpush.msra.mxu2 %v10285_v10 }
 0xa5d   : > { %10357 = vmatpush.msra.mxu3 %v10294_v55  ;;  %v10323_v7 = vld.sshfl [vmem:[#allocation1 + $0x10] sm:$0xff pattern:$0x75316420] }
 0xa5e   : > { %10260 = vmatpush.msrb.mxu1 %v10182_v0  ;;  %10339 = vmatpush.msra.mxu2 %v10283_v45 }
 0xa5f   : > { %10358 = vmatpush.msra.mxu3 %v10292_v11 }
 0xa60   : > { %10261 = vmatpush.msrb.mxu1 %v10180_v30  ;;  %10340 = vmatpush.msra.mxu2 %v10281_v46 }
 0xa61   : > { %10359 = vmatpush.msra.mxu3 %v10290_v60 }
 0xa62   : > { %10262 = vmatpush.msrb.mxu1 %v10178_v35  ;;  %10341 = vmatpush.msra.mxu2 %v10279_v63 }
 0xa63   : > { %10360 = vmatpush.msra.mxu3 %v10288_v19  ;;  %10263 = vmatmul.f32.vlgmr.msrb.gmra.mxu1 %v16297_v40 }
 0xa64   : > { %10342 = vmatmul.f32.vlgmr.msra.gmra.mxu2 %v10322_v12 }
 0xa65   : > { %10361 = vmatpush.msra.mxu3 %v10286_v17 }
 0xa67   : > { %10362 = vmatpush.msra.mxu3 %v10284_v8 }
 0xa69   : > { %10363 = vmatpush.msra.mxu3 %v10282_v39 }
 0xa6b   : > { %10364 = vmatpush.msra.mxu3 %v10280_v50  ;;  %10266 = vmatmul.f32.gmra.mxu1 %v10221_v23  ;;  %v10379_v50 = vperm.slane %v10376_v2, 1 }
 0xa6c   : > { %10345 = vmatmul.f32.gmra.mxu2 %v10323_v7  ;;  %10365 = vmatmul.f32.vlgmr.msra.gmra.mxu3 %v10322_v12 }
 0xa72   : > { %v9571_v9 = vpop.f32.mrf.mxu1 }
 0xa74   : > { %10368 = vmatmul.f32.gmra.mxu3 %v10323_v7 }
 0xa78   : > { %v9594_v29 = vpop.f32.mrf.mxu2 }
 0xa82   : > { %v9632_v3 = vpop.f32.mrf.mxu3 }
 0xa83   : > { %v9633_v26 = vadd.f32 %v9632_v3, %v9571_v9 }
 0xa90   : > { %v9832_v31 = vpop.f32.mrf.mxu0 }
 0xa92   : > { %v9574_v5 = vpop.f32.mrf.mxu1 }
 0xa98   : > { %v9597_v51 = vpop.f32.mrf.mxu2 }
 0xa9a   : > { %v9655_v42 = vpop.f32.mrf.mxu1 }
 0xa9b   : > { %v9656_v27 = vadd.f32 %v9655_v42, %v9594_v29 }
 0xaa0   : > { %v9730_v49 = vpop.f32.mrf.mxu2 }
 0xaa1   : > { %v9759_v56 = vadd.f32 %v9730_v49, %v9633_v26 }
 0xaa2   : > { %v9635_v40 = vpop.f32.mrf.mxu3  ;;  %v9658_v25 = vpop.f32.mrf.mxu1 }
 0xaa3   : > { %v9861_v1 = vadd.f32 %v9832_v31, %v9759_v56  ;;  %v9636_v28 = vadd.f32 %v9635_v40, %v9574_v5  ;;  %v9659_v38 = vadd.f32 %v9658_v25, %v9597_v51 }
 0xaaa   : > { %v9753_v52 = vpop.f32.mrf.mxu3 }
 0xaab   : > { %v9733_v16 = vpop.f32.mrf.mxu2  ;;  %v9855_v20 = vpop.f32.mrf.mxu1  ;;  %v9760_v44 = vadd.f32 %v9753_v52, %v9656_v27 }
 0xaac   : > { %v9761_v58 = vadd.f32 %v9733_v16, %v9636_v28 }
 0xaad   : > { %v9862_v54 = vadd.f32 %v9855_v20, %v9760_v44 }
 0xaae   : > { %v9835_v36 = vpop.f32.mrf.mxu0 }
 0xaaf   : > { %v9863_v23 = vadd.f32 %v9835_v36, %v9761_v58 }
 0xab2   : > { %v9756_v21 = vpop.f32.mrf.mxu3 }
 0xab3   : > { %v9934_v53 = vpop.f32.mrf.mxu2  ;;  %v9762_v55 = vadd.f32 %v9756_v21, %v9659_v38 }
 0xab4   : > { %v9858_v47 = vpop.f32.mrf.mxu1  ;;  %v9963_v59 = vadd.f32 %v9934_v53, %v9861_v1 }
 0xab5   : > { %v9864_v63 = vadd.f32 %v9858_v47, %v9762_v55 }
 0xab6   : > { %v10036_v43 = vpop.f32.mrf.mxu0 }
 0xab7   : > { %v10065_v57 = vadd.f32 %v10036_v43, %v9963_v59 }
 0xabb   : > { %v9957_v34 = vpop.f32.mrf.mxu3 }
 0xabc   : > { %v9964_v32 = vadd.f32 %v9957_v34, %v9862_v54 }
 0xabd   : > { %v9937_v14 = vpop.f32.mrf.mxu2  ;;  %v10059_v6 = vpop.f32.mrf.mxu1 }
 0xabe   : > { %v9965_v48 = vadd.f32 %v9937_v14, %v9863_v23  ;;  %v10066_v30 = vadd.f32 %v10059_v6, %v9964_v32 }
 0xac0   : > { %v10039_v22 = vpop.f32.mrf.mxu0 }
 0xac1   : > { %v10067_v0 = vadd.f32 %v10039_v22, %v9965_v48 }
 0xac5   : > { %v9960_v33 = vpop.f32.mrf.mxu3  ;;  %v10139_v18 = vpop.f32.mrf.mxu2 }
 0xac6   : > { %v10062_v37 = vpop.f32.mrf.mxu1  ;;  %v10168_v4 = vadd.f32 %v10139_v18, %v10065_v57  ;;  %v9966_v12 = vadd.f32 %v9960_v33, %v9864_v63 }
 0xac8   : > { %v10241_v13 = vpop.f32.mrf.mxu0  ;;  %v10068_v51 = vadd.f32 %v10062_v37, %v9966_v12 }
 0xac9   : > { %v10270_v15 = vadd.f32 %v10241_v13, %v10168_v4 }
 0xacf   : > { %v10162_v41 = vpop.f32.mrf.mxu3  ;;  %v10142_v24 = vpop.f32.mrf.mxu2 }
 0xad0   : > { %v10170_v46 = vadd.f32 %v10142_v24, %v10067_v0  ;;  %v10169_v19 = vadd.f32 %v10162_v41, %v10066_v30 }
 0xad2   : > { %v10244_v35 = vpop.f32.mrf.mxu0 }
 0xad3   : > { %v10272_v8 = vadd.f32 %v10244_v35, %v10170_v46 }
 0xad8   : > { %v10165_v61 = vpop.f32.mrf.mxu3 }
 0xad9   : > { %v10171_v42 = vadd.f32 %v10165_v61, %v10068_v51 }
 0xae0   : > { %v10264_v11 = vpop.f32.mrf.mxu1 }
 0xae1   : > { %v10271_v39 = vadd.f32 %v10264_v11, %v10169_v19 }
 0xae7   : > { %v10343_v10 = vpop.f32.mrf.mxu2 }
 0xae8   : > { %v10372_v45 = vadd.f32 %v10343_v10, %v10270_v15  ;;  %v10267_v49 = vpop.f32.mrf.mxu1 }
 0xae9   : > { %v10273_v25 = vadd.f32 %v10267_v49, %v10171_v42 }
 0xaea   : > { %v10382_v60 = vadd.f32 %v10378_v62, %v10372_v45 }
 0xaec   : > { %v10386_v17 = vmax.f32 %v10382_v60, 0.0 }
 0xaee   : > { %10390 = vst [vmem:[%s650_s2] sm:$0xff] %v10386_v17 }
 0xaef   : > { %v10346_v7 = vpop.f32.mrf.mxu2  ;;  %v10366_v29 = vpop.f32.mrf.mxu3 }
 0xaf0   : > { %v10374_v9 = vadd.f32 %v10346_v7, %v10272_v8  ;;  %v10373_v3 = vadd.f32 %v10366_v29, %v10271_v39 }
 0xaf2   : > { %v10384_v5 = vadd.f32 %v10378_v62, %v10374_v9  ;;  %v10383_v40 = vadd.f32 %v10379_v50, %v10373_v3 }
 0xaf4   : > { %v10388_v52 = vmax.f32 %v10384_v5, 0.0  ;;  %v10387_v16 = vmax.f32 %v10383_v40, 0.0 }
 0xaf6   : > { %10392 = vst [vmem:[%s650_s2 + $0x10] sm:$0xff] %v10388_v52 }
 0xaf7   : > { %10391 = vst [vmem:[%s650_s2 + $0x8] sm:$0xff] %v10387_v16  ;;  %v10369_v31 = vpop.f32.mrf.mxu3 }
 0xaf8   : > { %v10375_v21 = vadd.f32 %v10369_v31, %v10273_v25 }
 0xafa   : > { %v10385_v53 = vadd.f32 %v10379_v50, %v10375_v21 }
 0xafc   : > { %v10389_v36 = vmax.f32 %v10385_v53, 0.0 }
 0xafe   : > { %10393 = vst [vmem:[%s650_s2 + $0x18] sm:$0xff] %v10389_v36 }
 0xaff PF: > { %s16839_s22 = sld [smem:[#allocation31_spill]] }
 0xb05   : > { %s31_s18 = sadd.s32 1, %s16839_s22  }
 0xb06   : > { %p28_p7 = scmp.ge.s32.totalorder %s31_s18, 4  }
 0xb08   :  { %30 = sbr.rel (!%p28_p7) target bundleno = 10 (0xa), region = 271 }
 0xb0d   :  { %10415 = vsyncpa [#allocation10], 1 }
 0xb0e   :  { %10417 = vsyncpa [#allocation10 + $0x1], 1 }
 0xb0f   :  { %10418 = vsyncpa [#allocation12], 1 }
 0xb10   :  { %10419 = vsyncpa [#allocation15], 1 }
 0xb11   :  { %10420 = vsyncpa [#allocation18], 1 }
 0xb12   :  { %10421 = vsyncpa [#allocation21], 1 }
 0xb13   :  { %10422 = vsyncpa [#allocation24], 1 }

</bundles_post_ra>
